<compile_context>
chip_gen: v5e
topology: v5e:2x2
jax: 0.10.0
libtpu: 0.0.40
codegen_flags: <defaults>
</compile_context>

<pallas_src>
import functools
from typing import NamedTuple

import numpy as np

import jax
import jax.numpy as jnp
from jax import lax
from jax.experimental import pallas as pl
from jax.experimental.pallas import tpu as pltpu


# ---------------------------------------------------------------------------
# Flat padded-pixel geometry (pixels are flattened onto the LANE axis).
# ---------------------------------------------------------------------------
class Geom(NamedTuple):
    B: int
    H: int
    W: int
    Hp: int    # H + 2  (zero-padded height)
    Wp: int    # W + 2  (zero-padded width)
    Npad: int  # B * Hp * Wp  (flattened padded pixel count)
    G: int     # Wp + 1       (zero guard lanes on each side of the buffer)
    N: int     # Npad + 2 * G (total buffer width)


def _make_geom(B, H, W):
    Hp, Wp = H + 2, W + 2
    Npad = B * Hp * Wp
    G = Wp + 1
    return Geom(B, H, W, Hp, Wp, Npad, G, Npad + 2 * G)


def _build_mask(g: Geom):
    """(1, Npad) f32: 1 on real pixels, 0 on the zero-padding ring."""
    m = np.zeros((g.B, g.Hp, g.Wp), np.float32)
    m[:, 1:g.H + 1, 1:g.W + 1] = 1.0
    return m.reshape(1, g.Npad)


def _build_pool_matrix(gs: Geom, gd: Geom):
    """0/1 (Npad_src, Npad_dst): picks the 2x2-window anchor of every dst
    pixel and scatters it into the dst level's padded flat layout
    (ring / unused columns stay all-zero)."""
    S = np.zeros((gs.Npad, gd.Npad), np.float32)
    for b in range(gd.B):
        for y2 in range(gd.H):
            for x2 in range(gd.W):
                q_dst = b * gd.Hp * gd.Wp + (y2 + 1) * gd.Wp + (x2 + 1)
                q_src = b * gs.Hp * gs.Wp + (2 * y2 + 1) * gs.Wp + (2 * x2 + 1)
                S[q_src, q_dst] = 1.0
    return S


def _build_up_matrix(gs: Geom, gd: Geom):
    """0/1 (4*Npad_src, Npad_dst): scatters the 4 transposed-conv phase maps
    (rows are phase-major, then source padded-pixel index) into the next
    finer level's padded flat layout."""
    U = np.zeros((4 * gs.Npad, gd.Npad), np.float32)
    for b in range(gs.B):
        for yy in range(gs.H):
            for xx in range(gs.W):
                q_src = b * gs.Hp * gs.Wp + (yy + 1) * gs.Wp + (xx + 1)
                for ry in range(2):
                    for rx in range(2):
                        p = ry * 2 + rx
                        Y, X = 2 * yy + ry, 2 * xx + rx
                        j = b * gd.Hp * gd.Wp + (Y + 1) * gd.Wp + (X + 1)
                        U[p * gs.Npad + q_src, j] = 1.0
    return U


# ---------------------------------------------------------------------------
# The single fused UNet kernel.
# ---------------------------------------------------------------------------
def _unet_kernel(*refs, cfg):
    geoms, D, ct, o_nc = cfg['geoms'], cfg['D'], cfg['ct'], cfg['o_nc']
    out_ref = refs[-1]
    it = iter(refs[:-1])
    load = lambda: next(it)[...]

    x = load()
    masks = [load() for _ in range(D + 1)]
    pool_S = [load() for _ in range(D)]
    up_U = [load() for _ in range(D)]

    def pad_guards(core, g):
        z = jnp.zeros((core.shape[0], g.G), core.dtype)
        return jnp.concatenate([z, core, z], axis=1)

    def conv3x3(v, g, mask):
        # Fused 3x3 'same' conv + bias + ReLU as ONE MXU GEMM:
        #   (Cout, 9*Cin) @ (9*Cin, Npad), operand built from 9 statically
        #   shifted lane-slices of the zero-padded flat pixel buffer.
        w, b = load(), load()
        shifts = [(dy - 1) * g.Wp + (dx - 1)
                  for dy in range(3) for dx in range(3)]
        xcol = jnp.concatenate(
            [v[:, g.G + s:g.G + s + g.Npad] for s in shifts], axis=0)
        out = jnp.dot(w, xcol, preferred_element_type=jnp.float32)
        out = jnp.maximum(out + b, 0.0) * mask   # bias + ReLU + re-zero ring
        return pad_guards(out, g)

    def maxpool2x2(v, gs, gd, S):
        # Vectorized MaxPool2d(2,2): 4-way shifted max over the whole buffer
        # (VPU) then a selection GEMM that subsamples the anchors and lays
        # them out in the coarser level's padded flat buffer (MXU).
        p00 = v[:, gs.G:gs.G + gs.Npad]
        p01 = v[:, gs.G + 1:gs.G + 1 + gs.Npad]
        p10 = v[:, gs.G + gs.Wp:gs.G + gs.Wp + gs.Npad]
        p11 = v[:, gs.G + gs.Wp + 1:gs.G + gs.Wp + 1 + gs.Npad]
        vmax = jnp.maximum(jnp.maximum(p00, p01), jnp.maximum(p10, p11))
        core = jnp.dot(vmax, S, preferred_element_type=jnp.float32)
        return pad_guards(core, gd)

    def conv_transpose_up(v, gs, gd, U):
        # ConvTranspose2d(3, stride 2, pad 1, out_pad 1) + ReLU via the exact
        # 4-phase sub-pixel decomposition; phases are interleaved into the
        # finer level's padded flat buffer by a selection GEMM (in VMEM).
        ws = [load() for _ in range(4)]
        bt = load()
        shifts = (0, 1, gs.Wp, gs.Wp + 1)   # (ay, ax) = (0,0),(0,1),(1,0),(1,1)
        xt = jnp.concatenate(
            [v[:, gs.G + s:gs.G + s + gs.Npad] for s in shifts], axis=0)
        phases = [
            jnp.maximum(
                jnp.dot(ws[p], xt, preferred_element_type=jnp.float32) + bt,
                0.0)
            for p in range(4)]
        cat = jnp.concatenate(phases, axis=1)        # (Cout, 4*Npad_src)
        core = jnp.dot(cat, U, preferred_element_type=jnp.float32)
        return pad_guards(core, gd)

    # ---------------- encoder ----------------
    h = conv3x3(x, geoms[0], masks[0])               # conv_in (Cin = i_nc)
    skips = []
    for d in range(D):
        for _ in range(ct):
            h = conv3x3(h, geoms[d], masks[d])
        skips.append(h)                              # skip stays on-chip
        h = maxpool2x2(h, geoms[d], geoms[d + 1], pool_S[d])

    # ---------------- bottom ----------------
    for _ in range(ct):
        h = conv3x3(h, geoms[D], masks[D])

    # ---------------- decoder ----------------
    for i in range(D):
        lvl = D - 1 - i
        up = conv_transpose_up(h, geoms[lvl + 1], geoms[lvl], up_U[i])
        h = jnp.concatenate([up, skips[lvl]], axis=0)   # channel concat
        for _ in range(ct):
            h = conv3x3(h, geoms[lvl], masks[lvl])

    # ---------------- 1x1 head (no activation) ----------------
    w_out, b_out = load(), load()                    # (Cin, o_nc), (o_nc, 1)
    g0 = geoms[0]
    core = h[:, g0.G:g0.G + g0.Npad]
    cols = [jnp.sum(core * w_out[:, oc:oc + 1], axis=0, keepdims=True)
            for oc in range(o_nc)]
    y = cols[0] if o_nc == 1 else jnp.concatenate(cols, axis=0)
    out_ref[...] = y + b_out


# ---------------------------------------------------------------------------
# Thin wrapper-side layout packing (one-time, on the tiny input / output).
# ---------------------------------------------------------------------------
def _pack_input(x_nchw, g: Geom):
    """NCHW -> (C, N) flat zero-padded pixel buffer with zero guard lanes."""
    xp = jnp.pad(x_nchw, ((0, 0), (0, 0), (1, 1), (1, 1)))
    flat = jnp.transpose(xp, (1, 0, 2, 3)).reshape(xp.shape[1], g.Npad)
    return jnp.pad(flat, ((0, 0), (g.G, g.G)))


def _unpack_output(y_flat, g: Geom, o_nc):
    y = y_flat.reshape(o_nc, g.B, g.Hp, g.Wp)[:, :, 1:g.H + 1, 1:g.W + 1]
    return jnp.transpose(y, (1, 0, 2, 3))            # -> (B, o_nc, H, W)


# ---------------------------------------------------------------------------
# Parameters: torch-layout init + conversion to the kernel's GEMM layout.
# ---------------------------------------------------------------------------
def init_unet_params(key, i_nc=1, o_nc=1, f_root=8, conv_times=2,
                     up_down_times=2):
    """Torch-layout params: Conv2d (Cout,Cin,kh,kw), ConvTranspose2d
    (Cin,Cout,3,3), biases (Cout,)."""
    D, ct = up_down_times, conv_times
    keys = iter(jax.random.split(key, 256))

    def conv_p(cin, cout, ksz):
        kw, kb = jax.random.split(next(keys))
        s = 1.0 / np.sqrt(cin * ksz * ksz)
        return {'w': jax.random.uniform(kw, (cout, cin, ksz, ksz),
                                        jnp.float32, -s, s),
                'b': jax.random.uniform(kb, (cout,), jnp.float32, -s, s)}

    def convt_p(cin, cout):
        kw, kb = jax.random.split(next(keys))
        s = 1.0 / np.sqrt(cin * 9)
        return {'w': jax.random.uniform(kw, (cin, cout, 3, 3),
                                        jnp.float32, -s, s),
                'b': jax.random.uniform(kb, (cout,), jnp.float32, -s, s)}

    p = {'conv_in': conv_p(i_nc, f_root, 3), 'down': []}
    for i in range(D):
        cin = f_root if i == 0 else f_root * 2 ** (i - 1)
        cout = f_root if i == 0 else f_root * 2 ** i
        p['down'].append([conv_p(cin if t == 0 else cout, cout, 3)
                          for t in range(ct)])
    cb_in, cb_out = f_root * 2 ** (D - 1), f_root * 2 ** D
    p['bottom'] = [conv_p(cb_in if t == 0 else cb_out, cb_out, 3)
                   for t in range(ct)]
    p['tran'], p['up'] = [], []
    for i in range(D):
        cin = f_root * 2 ** (D - i)
        cout = f_root * 2 ** (D - i - 1)
        p['tran'].append(convt_p(cin, cout))
        p['up'].append([conv_p(cin if t == 0 else cout, cout, 3)
                        for t in range(ct)])
    p['conv_out'] = conv_p(f_root, o_nc, 1)
    return p


# [ry or rx] -> {input offset a in {0,1} : transposed-conv kernel index k}
_TAP_K = ({0: 1}, {0: 2, 1: 0})


def _prep_kernel_params(params):
    """Convert torch-layout params to the kernel's fused-GEMM layouts."""
    def conv3_k(p):
        w = p['w']
        cout, cin = w.shape[0], w.shape[1]
        wk = jnp.transpose(w, (0, 2, 3, 1)).reshape(cout, 9 * cin)
        return (wk.astype(jnp.float32),
                p['b'].reshape(cout, 1).astype(jnp.float32))

    def conv1_k(p):
        w = p['w'][:, :, 0, 0]                       # (o_nc, cin)
        return (jnp.transpose(w).astype(jnp.float32),
                p['b'].reshape(-1, 1).astype(jnp.float32))

    def tran_k(p):
        w = p['w']                                   # (cin, cout, 3, 3)
        cin, cout = w.shape[0], w.shape[1]
        ws = []
        for ry in range(2):
            for rx in range(2):
                blocks = []
                for ay in range(2):
                    for ax in range(2):
                        ky = _TAP_K[ry].get(ay)
                        kx = _TAP_K[rx].get(ax)
                        if ky is None or kx is None:
                            blocks.append(jnp.zeros((cout, cin), jnp.float32))
                        else:
                            blocks.append(jnp.transpose(w[:, :, ky, kx]))
                ws.append(jnp.concatenate(blocks, axis=1))   # (cout, 4*cin)
        return (ws, p['b'].reshape(cout, 1).astype(jnp.float32))

    return {
        'conv_in': conv3_k(params['conv_in']),
        'down': [[conv3_k(q) for q in blk] for blk in params['down']],
        'bottom': [conv3_k(q) for q in params['bottom']],
        'tran': [tran_k(q) for q in params['tran']],
        'up': [[conv3_k(q) for q in blk] for blk in params['up']],
        'conv_out': conv1_k(params['conv_out']),
    }


# ---------------------------------------------------------------------------
# UNet forward (single fused pallas_call).
# ---------------------------------------------------------------------------
def unet_forward(x_nchw, params, *, padding=(0, 0), is_residual=False):
    D = len(params['down'])
    ct = len(params['down'][0])
    o_nc = params['conv_out']['w'].shape[0]

    input_ = x_nchw
    x = x_nchw.astype(jnp.float32)
    # F.pad(x, [0, p0, 0, p1]): right-pad W by p0, bottom-pad H by p1.
    if padding[0] > 0 or padding[1] > 0:
        x = jnp.pad(x, ((0, 0), (0, 0), (0, padding[1]), (0, padding[0])))
    B, _, H, W = x.shape
    assert H % (2 ** D) == 0 and W % (2 ** D) == 0, \
        "spatial dims must be divisible by 2**up_down_times"

    geoms = tuple(_make_geom(B, H // 2 ** l, W // 2 ** l) for l in range(D + 1))

    # Compile-time constant helper tensors.
    masks = [jnp.asarray(_build_mask(g)) for g in geoms]
    pool_S = [jnp.asarray(_build_pool_matrix(geoms[l], geoms[l + 1]))
              for l in range(D)]
    up_U = [jnp.asarray(_build_up_matrix(geoms[D - i], geoms[D - i - 1]))
            for i in range(D)]

    kp = _prep_kernel_params(params)

    # Flat input list in the exact order the kernel consumes it.
    inputs = [_pack_input(x, geoms[0])]
    inputs += masks
    inputs += pool_S
    inputs += up_U
    inputs += list(kp['conv_in'])
    for d in range(D):
        for wb in kp['down'][d]:
            inputs += list(wb)
    for wb in kp['bottom']:
        inputs += list(wb)
    for i in range(D):
        ws, bt = kp['tran'][i]
        inputs += list(ws) + [bt]
        for wb in kp['up'][i]:
            inputs += list(wb)
    inputs += list(kp['conv_out'])

    cfg = dict(D=D, ct=ct, o_nc=o_nc, geoms=geoms)
    vmem = lambda: pl.BlockSpec(memory_space=pltpu.MemorySpace.VMEM)
    y_flat = pl.pallas_call(
        functools.partial(_unet_kernel, cfg=cfg),
        out_shape=jax.ShapeDtypeStruct((o_nc, geoms[0].Npad), jnp.float32),
        in_specs=[vmem() for _ in inputs],
        out_specs=vmem(),
    )(*inputs)

    y = _unpack_output(y_flat, geoms[0], o_nc)
    if padding[0] > 0:
        y = y[..., :-padding[0]]
    if padding[1] > 0:
        y = y[..., :-padding[1], :]
    return input_ - y if is_residual else y


# ---------------------------------------------------------------------------
# Pure-JAX reference (independent formulation, for the tolerance check).
# ---------------------------------------------------------------------------
def unet_reference(x, params, *, padding=(0, 0), is_residual=False):
    D = len(params['down'])
    dn = ('NCHW', 'OIHW', 'NCHW')
    prec = lax.Precision.HIGHEST

    def conv3(h, p):
        y = lax.conv_general_dilated(h, p['w'], (1, 1), ((1, 1), (1, 1)),
                                     dimension_numbers=dn, precision=prec)
        return jax.nn.relu(y + p['b'].reshape(1, -1, 1, 1))

    def conv1(h, p):
        y = lax.conv_general_dilated(h, p['w'], (1, 1), ((0, 0), (0, 0)),
                                     dimension_numbers=dn, precision=prec)
        return y + p['b'].reshape(1, -1, 1, 1)

    def convt(h, p):
        # ConvTranspose2d(3, s=2, p=1, out_pad=1) == dilated conv with the
        # spatially flipped, IO-transposed kernel and padding (1, 2).
        w = jnp.transpose(p['w'], (1, 0, 2, 3))[:, :, ::-1, ::-1]
        y = lax.conv_general_dilated(h, w, (1, 1), ((1, 2), (1, 2)),
                                     lhs_dilation=(2, 2),
                                     dimension_numbers=dn, precision=prec)
        return jax.nn.relu(y + p['b'].reshape(1, -1, 1, 1))

    def pool(h):
        return lax.reduce_window(h, -jnp.inf, lax.max,
                                 (1, 1, 2, 2), (1, 1, 2, 2), 'VALID')

    input_ = x
    h = x
    if padding[0] > 0 or padding[1] > 0:
        h = jnp.pad(h, ((0, 0), (0, 0), (0, padding[1]), (0, padding[0])))
    h = conv3(h, params['conv_in'])
    skips = []
    for i in range(D):
        for p in params['down'][i]:
            h = conv3(h, p)
        skips.append(h)
        h = pool(h)
    for p in params['bottom']:
        h = conv3(h, p)
    for i in range(D):
        h = convt(h, params['tran'][i])
        h = jnp.concatenate([h, skips[D - 1 - i]], axis=1)
        for p in params['up'][i]:
            h = conv3(h, p)
    h = conv1(h, params['conv_out'])
    if padding[0] > 0:
        h = h[..., :-padding[0]]
    if padding[1] > 0:
        h = h[..., :-padding[1], :]
    return input_ - h if is_residual else h


if __name__ == "__main__":
    key = jax.random.PRNGKey(0)
    pkey, xkey = jax.random.split(key)
    # Small UNet consistent with the module: i_nc=1, o_nc=1, f_root=8,
    # conv_times=2, up_down_times=2, NCHW input (2, 1, 16, 16).
    params = init_unet_params(pkey, i_nc=1, o_nc=1, f_root=8,
                              conv_times=2, up_down_times=2)
    x = jax.random.normal(xkey, (2, 1, 16, 16), jnp.float32)

    fwd = jax.jit(functools.partial(unet_forward, padding=(0, 0),
                                    is_residual=False))
    y = fwd(x, params)
    jax.block_until_ready(y)
    assert y.shape == (2, 1, 16, 16) and y.dtype == jnp.float32
    assert bool(jnp.isfinite(y).all())

    # Tolerance-asserted pure-JAX reference comparison (per review).
    ref = jax.jit(functools.partial(unet_reference, padding=(0, 0),
                                    is_residual=False))
    y_ref = ref(x, params)
    jax.block_until_ready(y_ref)
    err = float(jnp.max(jnp.abs(y - y_ref)))
    scale = float(jnp.max(jnp.abs(y_ref))) + 1e-6
    assert err / scale < 5e-2, f"mismatch vs reference: err={err} scale={scale}"
    print("KERNEL_OK")
</pallas_src>

<mosaic_0001>
module attributes {stable_mosaic.version = 11 : i64} {
  func.func @_unet_kernel(%arg0: memref<1x686xf32, #tpu.memory_space<vmem>>, %arg1: memref<1x648xf32, #tpu.memory_space<vmem>>, %arg2: memref<1x200xf32, #tpu.memory_space<vmem>>, %arg3: memref<1x72xf32, #tpu.memory_space<vmem>>, %arg4: memref<648x200xf32, #tpu.memory_space<vmem>>, %arg5: memref<200x72xf32, #tpu.memory_space<vmem>>, %arg6: memref<288x200xf32, #tpu.memory_space<vmem>>, %arg7: memref<800x648xf32, #tpu.memory_space<vmem>>, %arg8: memref<8x9xf32, #tpu.memory_space<vmem>>, %arg9: memref<8x1xf32, #tpu.memory_space<vmem>>, %arg10: memref<8x72xf32, #tpu.memory_space<vmem>>, %arg11: memref<8x1xf32, #tpu.memory_space<vmem>>, %arg12: memref<8x72xf32, #tpu.memory_space<vmem>>, %arg13: memref<8x1xf32, #tpu.memory_space<vmem>>, %arg14: memref<16x72xf32, #tpu.memory_space<vmem>>, %arg15: memref<16x1xf32, #tpu.memory_space<vmem>>, %arg16: memref<16x144xf32, #tpu.memory_space<vmem>>, %arg17: memref<16x1xf32, #tpu.memory_space<vmem>>, %arg18: memref<32x144xf32, #tpu.memory_space<vmem>>, %arg19: memref<32x1xf32, #tpu.memory_space<vmem>>, %arg20: memref<32x288xf32, #tpu.memory_space<vmem>>, %arg21: memref<32x1xf32, #tpu.memory_space<vmem>>, %arg22: memref<16x128xf32, #tpu.memory_space<vmem>>, %arg23: memref<16x128xf32, #tpu.memory_space<vmem>>, %arg24: memref<16x128xf32, #tpu.memory_space<vmem>>, %arg25: memref<16x128xf32, #tpu.memory_space<vmem>>, %arg26: memref<16x1xf32, #tpu.memory_space<vmem>>, %arg27: memref<16x288xf32, #tpu.memory_space<vmem>>, %arg28: memref<16x1xf32, #tpu.memory_space<vmem>>, %arg29: memref<16x144xf32, #tpu.memory_space<vmem>>, %arg30: memref<16x1xf32, #tpu.memory_space<vmem>>, %arg31: memref<8x64xf32, #tpu.memory_space<vmem>>, %arg32: memref<8x64xf32, #tpu.memory_space<vmem>>, %arg33: memref<8x64xf32, #tpu.memory_space<vmem>>, %arg34: memref<8x64xf32, #tpu.memory_space<vmem>>, %arg35: memref<8x1xf32, #tpu.memory_space<vmem>>, %arg36: memref<8x144xf32, #tpu.memory_space<vmem>>, %arg37: memref<8x1xf32, #tpu.memory_space<vmem>>, %arg38: memref<8x72xf32, #tpu.memory_space<vmem>>, %arg39: memref<8x1xf32, #tpu.memory_space<vmem>>, %arg40: memref<8x1xf32, #tpu.memory_space<vmem>>, %arg41: memref<1x1xf32, #tpu.memory_space<vmem>>, %arg42: memref<1x648xf32, #tpu.memory_space<vmem>>) attributes {dimension_semantics = [], scalar_prefetch = 0 : i64, scratch_operands = 0 : i64, tpu.core_type = #tpu.core_type<tc>} {
    %c0 = arith.constant 0 : index
    %c0_0 = arith.constant 0 : index
    %0 = vector.load %arg0[%c0, %c0_0] : memref<1x686xf32, #tpu.memory_space<vmem>>, vector<1x686xf32>
    %c0_1 = arith.constant 0 : index
    %c0_2 = arith.constant 0 : index
    %1 = vector.load %arg1[%c0_1, %c0_2] : memref<1x648xf32, #tpu.memory_space<vmem>>, vector<1x648xf32>
    %c0_3 = arith.constant 0 : index
    %c0_4 = arith.constant 0 : index
    %2 = vector.load %arg2[%c0_3, %c0_4] : memref<1x200xf32, #tpu.memory_space<vmem>>, vector<1x200xf32>
    %c0_5 = arith.constant 0 : index
    %c0_6 = arith.constant 0 : index
    %3 = vector.load %arg3[%c0_5, %c0_6] : memref<1x72xf32, #tpu.memory_space<vmem>>, vector<1x72xf32>
    %c0_7 = arith.constant 0 : index
    %c0_8 = arith.constant 0 : index
    %4 = vector.load %arg4[%c0_7, %c0_8] : memref<648x200xf32, #tpu.memory_space<vmem>>, vector<648x200xf32>
    %c0_9 = arith.constant 0 : index
    %c0_10 = arith.constant 0 : index
    %5 = vector.load %arg5[%c0_9, %c0_10] : memref<200x72xf32, #tpu.memory_space<vmem>>, vector<200x72xf32>
    %c0_11 = arith.constant 0 : index
    %c0_12 = arith.constant 0 : index
    %6 = vector.load %arg6[%c0_11, %c0_12] : memref<288x200xf32, #tpu.memory_space<vmem>>, vector<288x200xf32>
    %c0_13 = arith.constant 0 : index
    %c0_14 = arith.constant 0 : index
    %7 = vector.load %arg7[%c0_13, %c0_14] : memref<800x648xf32, #tpu.memory_space<vmem>>, vector<800x648xf32>
    %c0_15 = arith.constant 0 : index
    %c0_16 = arith.constant 0 : index
    %8 = vector.load %arg8[%c0_15, %c0_16] : memref<8x9xf32, #tpu.memory_space<vmem>>, vector<8x9xf32>
    %c0_17 = arith.constant 0 : index
    %c0_18 = arith.constant 0 : index
    %9 = vector.load %arg9[%c0_17, %c0_18] : memref<8x1xf32, #tpu.memory_space<vmem>>, vector<8x1xf32>
    %10 = vector.extract_strided_slice %0 {offsets = [0, 0], sizes = [1, 648], strides = [1, 1]} : vector<1x686xf32> to vector<1x648xf32>
    %11 = vector.extract_strided_slice %0 {offsets = [0, 1], sizes = [1, 648], strides = [1, 1]} : vector<1x686xf32> to vector<1x648xf32>
    %12 = vector.extract_strided_slice %0 {offsets = [0, 2], sizes = [1, 648], strides = [1, 1]} : vector<1x686xf32> to vector<1x648xf32>
    %13 = vector.extract_strided_slice %0 {offsets = [0, 18], sizes = [1, 648], strides = [1, 1]} : vector<1x686xf32> to vector<1x648xf32>
    %14 = vector.extract_strided_slice %0 {offsets = [0, 19], sizes = [1, 648], strides = [1, 1]} : vector<1x686xf32> to vector<1x648xf32>
    %15 = vector.extract_strided_slice %0 {offsets = [0, 20], sizes = [1, 648], strides = [1, 1]} : vector<1x686xf32> to vector<1x648xf32>
    %16 = vector.extract_strided_slice %0 {offsets = [0, 36], sizes = [1, 648], strides = [1, 1]} : vector<1x686xf32> to vector<1x648xf32>
    %17 = vector.extract_strided_slice %0 {offsets = [0, 37], sizes = [1, 648], strides = [1, 1]} : vector<1x686xf32> to vector<1x648xf32>
    %18 = vector.extract_strided_slice %0 {offsets = [0, 38], sizes = [1, 648], strides = [1, 1]} : vector<1x686xf32> to vector<1x648xf32>
    %19 = tpu.concatenate %10, %11, %12, %13, %14, %15, %16, %17, %18 in 0 : vector<1x648xf32>, vector<1x648xf32>, vector<1x648xf32>, vector<1x648xf32>, vector<1x648xf32>, vector<1x648xf32>, vector<1x648xf32>, vector<1x648xf32>, vector<1x648xf32> -> vector<9x648xf32>
    %cst = arith.constant dense<0.000000e+00> : vector<8x648xf32>
    %20 = tpu.matmul %8, %19, %cst {dimension_numbers = #tpu.dot_dimension_numbers<[1], [0], [0], [1], [0, 0, 1, 1], [], []>} : vector<8x9xf32>, vector<9x648xf32>, vector<8x648xf32> -> vector<8x648xf32>
    %21 = vector.broadcast %9 : vector<8x1xf32> to vector<8x648xf32>
    %22 = arith.addf %20, %21 : vector<8x648xf32>
    %cst_19 = arith.constant 0.000000e+00 : f32
    %23 = vector.broadcast %cst_19 : f32 to vector<8x648xf32>
    %24 = arith.maximumf %22, %23 : vector<8x648xf32>
    %25 = vector.broadcast %1 : vector<1x648xf32> to vector<8x648xf32>
    %26 = arith.mulf %24, %25 : vector<8x648xf32>
    %cst_20 = arith.constant 0.000000e+00 : f32
    %27 = vector.broadcast %cst_20 : f32 to vector<8x19xf32>
    %28 = tpu.concatenate %27, %26, %27 in 1 : vector<8x19xf32>, vector<8x648xf32>, vector<8x19xf32> -> vector<8x686xf32>
    %c0_21 = arith.constant 0 : index
    %c0_22 = arith.constant 0 : index
    %29 = vector.load %arg10[%c0_21, %c0_22] : memref<8x72xf32, #tpu.memory_space<vmem>>, vector<8x72xf32>
    %c0_23 = arith.constant 0 : index
    %c0_24 = arith.constant 0 : index
    %30 = vector.load %arg11[%c0_23, %c0_24] : memref<8x1xf32, #tpu.memory_space<vmem>>, vector<8x1xf32>
    %31 = vector.extract_strided_slice %28 {offsets = [0, 0], sizes = [8, 648], strides = [1, 1]} : vector<8x686xf32> to vector<8x648xf32>
    %32 = vector.extract_strided_slice %28 {offsets = [0, 1], sizes = [8, 648], strides = [1, 1]} : vector<8x686xf32> to vector<8x648xf32>
    %33 = vector.extract_strided_slice %28 {offsets = [0, 2], sizes = [8, 648], strides = [1, 1]} : vector<8x686xf32> to vector<8x648xf32>
    %34 = vector.extract_strided_slice %28 {offsets = [0, 18], sizes = [8, 648], strides = [1, 1]} : vector<8x686xf32> to vector<8x648xf32>
    %35 = vector.extract_strided_slice %28 {offsets = [0, 19], sizes = [8, 648], strides = [1, 1]} : vector<8x686xf32> to vector<8x648xf32>
    %36 = vector.extract_strided_slice %28 {offsets = [0, 20], sizes = [8, 648], strides = [1, 1]} : vector<8x686xf32> to vector<8x648xf32>
    %37 = vector.extract_strided_slice %28 {offsets = [0, 36], sizes = [8, 648], strides = [1, 1]} : vector<8x686xf32> to vector<8x648xf32>
    %38 = vector.extract_strided_slice %28 {offsets = [0, 37], sizes = [8, 648], strides = [1, 1]} : vector<8x686xf32> to vector<8x648xf32>
    %39 = vector.extract_strided_slice %28 {offsets = [0, 38], sizes = [8, 648], strides = [1, 1]} : vector<8x686xf32> to vector<8x648xf32>
    %40 = tpu.concatenate %31, %32, %33, %34, %35, %36, %37, %38, %39 in 0 : vector<8x648xf32>, vector<8x648xf32>, vector<8x648xf32>, vector<8x648xf32>, vector<8x648xf32>, vector<8x648xf32>, vector<8x648xf32>, vector<8x648xf32>, vector<8x648xf32> -> vector<72x648xf32>
    %cst_25 = arith.constant dense<0.000000e+00> : vector<8x648xf32>
    %41 = tpu.matmul %29, %40, %cst_25 {dimension_numbers = #tpu.dot_dimension_numbers<[1], [0], [0], [1], [0, 0, 1, 1], [], []>} : vector<8x72xf32>, vector<72x648xf32>, vector<8x648xf32> -> vector<8x648xf32>
    %42 = vector.broadcast %30 : vector<8x1xf32> to vector<8x648xf32>
    %43 = arith.addf %41, %42 : vector<8x648xf32>
    %cst_26 = arith.constant 0.000000e+00 : f32
    %44 = vector.broadcast %cst_26 : f32 to vector<8x648xf32>
    %45 = arith.maximumf %43, %44 : vector<8x648xf32>
    %46 = vector.broadcast %1 : vector<1x648xf32> to vector<8x648xf32>
    %47 = arith.mulf %45, %46 : vector<8x648xf32>
    %cst_27 = arith.constant 0.000000e+00 : f32
    %48 = vector.broadcast %cst_27 : f32 to vector<8x19xf32>
    %49 = tpu.concatenate %48, %47, %48 in 1 : vector<8x19xf32>, vector<8x648xf32>, vector<8x19xf32> -> vector<8x686xf32>
    %c0_28 = arith.constant 0 : index
    %c0_29 = arith.constant 0 : index
    %50 = vector.load %arg12[%c0_28, %c0_29] : memref<8x72xf32, #tpu.memory_space<vmem>>, vector<8x72xf32>
    %c0_30 = arith.constant 0 : index
    %c0_31 = arith.constant 0 : index
    %51 = vector.load %arg13[%c0_30, %c0_31] : memref<8x1xf32, #tpu.memory_space<vmem>>, vector<8x1xf32>
    %52 = vector.extract_strided_slice %49 {offsets = [0, 0], sizes = [8, 648], strides = [1, 1]} : vector<8x686xf32> to vector<8x648xf32>
    %53 = vector.extract_strided_slice %49 {offsets = [0, 1], sizes = [8, 648], strides = [1, 1]} : vector<8x686xf32> to vector<8x648xf32>
    %54 = vector.extract_strided_slice %49 {offsets = [0, 2], sizes = [8, 648], strides = [1, 1]} : vector<8x686xf32> to vector<8x648xf32>
    %55 = vector.extract_strided_slice %49 {offsets = [0, 18], sizes = [8, 648], strides = [1, 1]} : vector<8x686xf32> to vector<8x648xf32>
    %56 = vector.extract_strided_slice %49 {offsets = [0, 19], sizes = [8, 648], strides = [1, 1]} : vector<8x686xf32> to vector<8x648xf32>
    %57 = vector.extract_strided_slice %49 {offsets = [0, 20], sizes = [8, 648], strides = [1, 1]} : vector<8x686xf32> to vector<8x648xf32>
    %58 = vector.extract_strided_slice %49 {offsets = [0, 36], sizes = [8, 648], strides = [1, 1]} : vector<8x686xf32> to vector<8x648xf32>
    %59 = vector.extract_strided_slice %49 {offsets = [0, 37], sizes = [8, 648], strides = [1, 1]} : vector<8x686xf32> to vector<8x648xf32>
    %60 = vector.extract_strided_slice %49 {offsets = [0, 38], sizes = [8, 648], strides = [1, 1]} : vector<8x686xf32> to vector<8x648xf32>
    %61 = tpu.concatenate %52, %53, %54, %55, %56, %57, %58, %59, %60 in 0 : vector<8x648xf32>, vector<8x648xf32>, vector<8x648xf32>, vector<8x648xf32>, vector<8x648xf32>, vector<8x648xf32>, vector<8x648xf32>, vector<8x648xf32>, vector<8x648xf32> -> vector<72x648xf32>
    %cst_32 = arith.constant dense<0.000000e+00> : vector<8x648xf32>
    %62 = tpu.matmul %50, %61, %cst_32 {dimension_numbers = #tpu.dot_dimension_numbers<[1], [0], [0], [1], [0, 0, 1, 1], [], []>} : vector<8x72xf32>, vector<72x648xf32>, vector<8x648xf32> -> vector<8x648xf32>
    %63 = vector.broadcast %51 : vector<8x1xf32> to vector<8x648xf32>
    %64 = arith.addf %62, %63 : vector<8x648xf32>
    %cst_33 = arith.constant 0.000000e+00 : f32
    %65 = vector.broadcast %cst_33 : f32 to vector<8x648xf32>
    %66 = arith.maximumf %64, %65 : vector<8x648xf32>
    %67 = vector.broadcast %1 : vector<1x648xf32> to vector<8x648xf32>
    %68 = arith.mulf %66, %67 : vector<8x648xf32>
    %cst_34 = arith.constant 0.000000e+00 : f32
    %69 = vector.broadcast %cst_34 : f32 to vector<8x19xf32>
    %70 = tpu.concatenate %69, %68, %69 in 1 : vector<8x19xf32>, vector<8x648xf32>, vector<8x19xf32> -> vector<8x686xf32>
    %71 = vector.extract_strided_slice %70 {offsets = [0, 19], sizes = [8, 648], strides = [1, 1]} : vector<8x686xf32> to vector<8x648xf32>
    %72 = vector.extract_strided_slice %70 {offsets = [0, 20], sizes = [8, 648], strides = [1, 1]} : vector<8x686xf32> to vector<8x648xf32>
    %73 = vector.extract_strided_slice %70 {offsets = [0, 37], sizes = [8, 648], strides = [1, 1]} : vector<8x686xf32> to vector<8x648xf32>
    %74 = vector.extract_strided_slice %70 {offsets = [0, 38], sizes = [8, 648], strides = [1, 1]} : vector<8x686xf32> to vector<8x648xf32>
    %75 = arith.maximumf %71, %72 : vector<8x648xf32>
    %76 = arith.maximumf %73, %74 : vector<8x648xf32>
    %77 = arith.maximumf %75, %76 : vector<8x648xf32>
    %cst_35 = arith.constant dense<0.000000e+00> : vector<8x200xf32>
    %78 = tpu.matmul %77, %4, %cst_35 {dimension_numbers = #tpu.dot_dimension_numbers<[1], [0], [0], [1], [0, 0, 1, 1], [], []>} : vector<8x648xf32>, vector<648x200xf32>, vector<8x200xf32> -> vector<8x200xf32>
    %cst_36 = arith.constant 0.000000e+00 : f32
    %79 = vector.broadcast %cst_36 : f32 to vector<8x11xf32>
    %80 = tpu.concatenate %79, %78, %79 in 1 : vector<8x11xf32>, vector<8x200xf32>, vector<8x11xf32> -> vector<8x222xf32>
    %c0_37 = arith.constant 0 : index
    %c0_38 = arith.constant 0 : index
    %81 = vector.load %arg14[%c0_37, %c0_38] : memref<16x72xf32, #tpu.memory_space<vmem>>, vector<16x72xf32>
    %c0_39 = arith.constant 0 : index
    %c0_40 = arith.constant 0 : index
    %82 = vector.load %arg15[%c0_39, %c0_40] : memref<16x1xf32, #tpu.memory_space<vmem>>, vector<16x1xf32>
    %83 = vector.extract_strided_slice %80 {offsets = [0, 0], sizes = [8, 200], strides = [1, 1]} : vector<8x222xf32> to vector<8x200xf32>
    %84 = vector.extract_strided_slice %80 {offsets = [0, 1], sizes = [8, 200], strides = [1, 1]} : vector<8x222xf32> to vector<8x200xf32>
    %85 = vector.extract_strided_slice %80 {offsets = [0, 2], sizes = [8, 200], strides = [1, 1]} : vector<8x222xf32> to vector<8x200xf32>
    %86 = vector.extract_strided_slice %80 {offsets = [0, 10], sizes = [8, 200], strides = [1, 1]} : vector<8x222xf32> to vector<8x200xf32>
    %87 = vector.extract_strided_slice %80 {offsets = [0, 11], sizes = [8, 200], strides = [1, 1]} : vector<8x222xf32> to vector<8x200xf32>
    %88 = vector.extract_strided_slice %80 {offsets = [0, 12], sizes = [8, 200], strides = [1, 1]} : vector<8x222xf32> to vector<8x200xf32>
    %89 = vector.extract_strided_slice %80 {offsets = [0, 20], sizes = [8, 200], strides = [1, 1]} : vector<8x222xf32> to vector<8x200xf32>
    %90 = vector.extract_strided_slice %80 {offsets = [0, 21], sizes = [8, 200], strides = [1, 1]} : vector<8x222xf32> to vector<8x200xf32>
    %91 = vector.extract_strided_slice %80 {offsets = [0, 22], sizes = [8, 200], strides = [1, 1]} : vector<8x222xf32> to vector<8x200xf32>
    %92 = tpu.concatenate %83, %84, %85, %86, %87, %88, %89, %90, %91 in 0 : vector<8x200xf32>, vector<8x200xf32>, vector<8x200xf32>, vector<8x200xf32>, vector<8x200xf32>, vector<8x200xf32>, vector<8x200xf32>, vector<8x200xf32>, vector<8x200xf32> -> vector<72x200xf32>
    %cst_41 = arith.constant dense<0.000000e+00> : vector<16x200xf32>
    %93 = tpu.matmul %81, %92, %cst_41 {dimension_numbers = #tpu.dot_dimension_numbers<[1], [0], [0], [1], [0, 0, 1, 1], [], []>} : vector<16x72xf32>, vector<72x200xf32>, vector<16x200xf32> -> vector<16x200xf32>
    %94 = vector.broadcast %82 : vector<16x1xf32> to vector<16x200xf32>
    %95 = arith.addf %93, %94 : vector<16x200xf32>
    %cst_42 = arith.constant 0.000000e+00 : f32
    %96 = vector.broadcast %cst_42 : f32 to vector<16x200xf32>
    %97 = arith.maximumf %95, %96 : vector<16x200xf32>
    %98 = vector.broadcast %2 : vector<1x200xf32> to vector<16x200xf32>
    %99 = arith.mulf %97, %98 : vector<16x200xf32>
    %cst_43 = arith.constant 0.000000e+00 : f32
    %100 = vector.broadcast %cst_43 : f32 to vector<16x11xf32>
    %101 = tpu.concatenate %100, %99, %100 in 1 : vector<16x11xf32>, vector<16x200xf32>, vector<16x11xf32> -> vector<16x222xf32>
    %c0_44 = arith.constant 0 : index
    %c0_45 = arith.constant 0 : index
    %102 = vector.load %arg16[%c0_44, %c0_45] : memref<16x144xf32, #tpu.memory_space<vmem>>, vector<16x144xf32>
    %c0_46 = arith.constant 0 : index
    %c0_47 = arith.constant 0 : index
    %103 = vector.load %arg17[%c0_46, %c0_47] : memref<16x1xf32, #tpu.memory_space<vmem>>, vector<16x1xf32>
    %104 = vector.extract_strided_slice %101 {offsets = [0, 0], sizes = [16, 200], strides = [1, 1]} : vector<16x222xf32> to vector<16x200xf32>
    %105 = vector.extract_strided_slice %101 {offsets = [0, 1], sizes = [16, 200], strides = [1, 1]} : vector<16x222xf32> to vector<16x200xf32>
    %106 = vector.extract_strided_slice %101 {offsets = [0, 2], sizes = [16, 200], strides = [1, 1]} : vector<16x222xf32> to vector<16x200xf32>
    %107 = vector.extract_strided_slice %101 {offsets = [0, 10], sizes = [16, 200], strides = [1, 1]} : vector<16x222xf32> to vector<16x200xf32>
    %108 = vector.extract_strided_slice %101 {offsets = [0, 11], sizes = [16, 200], strides = [1, 1]} : vector<16x222xf32> to vector<16x200xf32>
    %109 = vector.extract_strided_slice %101 {offsets = [0, 12], sizes = [16, 200], strides = [1, 1]} : vector<16x222xf32> to vector<16x200xf32>
    %110 = vector.extract_strided_slice %101 {offsets = [0, 20], sizes = [16, 200], strides = [1, 1]} : vector<16x222xf32> to vector<16x200xf32>
    %111 = vector.extract_strided_slice %101 {offsets = [0, 21], sizes = [16, 200], strides = [1, 1]} : vector<16x222xf32> to vector<16x200xf32>
    %112 = vector.extract_strided_slice %101 {offsets = [0, 22], sizes = [16, 200], strides = [1, 1]} : vector<16x222xf32> to vector<16x200xf32>
    %113 = tpu.concatenate %104, %105, %106, %107, %108, %109, %110, %111, %112 in 0 : vector<16x200xf32>, vector<16x200xf32>, vector<16x200xf32>, vector<16x200xf32>, vector<16x200xf32>, vector<16x200xf32>, vector<16x200xf32>, vector<16x200xf32>, vector<16x200xf32> -> vector<144x200xf32>
    %cst_48 = arith.constant dense<0.000000e+00> : vector<16x200xf32>
    %114 = tpu.matmul %102, %113, %cst_48 {dimension_numbers = #tpu.dot_dimension_numbers<[1], [0], [0], [1], [0, 0, 1, 1], [], []>} : vector<16x144xf32>, vector<144x200xf32>, vector<16x200xf32> -> vector<16x200xf32>
    %115 = vector.broadcast %103 : vector<16x1xf32> to vector<16x200xf32>
    %116 = arith.addf %114, %115 : vector<16x200xf32>
    %cst_49 = arith.constant 0.000000e+00 : f32
    %117 = vector.broadcast %cst_49 : f32 to vector<16x200xf32>
    %118 = arith.maximumf %116, %117 : vector<16x200xf32>
    %119 = vector.broadcast %2 : vector<1x200xf32> to vector<16x200xf32>
    %120 = arith.mulf %118, %119 : vector<16x200xf32>
    %cst_50 = arith.constant 0.000000e+00 : f32
    %121 = vector.broadcast %cst_50 : f32 to vector<16x11xf32>
    %122 = tpu.concatenate %121, %120, %121 in 1 : vector<16x11xf32>, vector<16x200xf32>, vector<16x11xf32> -> vector<16x222xf32>
    %123 = vector.extract_strided_slice %122 {offsets = [0, 11], sizes = [16, 200], strides = [1, 1]} : vector<16x222xf32> to vector<16x200xf32>
    %124 = vector.extract_strided_slice %122 {offsets = [0, 12], sizes = [16, 200], strides = [1, 1]} : vector<16x222xf32> to vector<16x200xf32>
    %125 = vector.extract_strided_slice %122 {offsets = [0, 21], sizes = [16, 200], strides = [1, 1]} : vector<16x222xf32> to vector<16x200xf32>
    %126 = vector.extract_strided_slice %122 {offsets = [0, 22], sizes = [16, 200], strides = [1, 1]} : vector<16x222xf32> to vector<16x200xf32>
    %127 = arith.maximumf %123, %124 : vector<16x200xf32>
    %128 = arith.maximumf %125, %126 : vector<16x200xf32>
    %129 = arith.maximumf %127, %128 : vector<16x200xf32>
    %cst_51 = arith.constant dense<0.000000e+00> : vector<16x72xf32>
    %130 = tpu.matmul %129, %5, %cst_51 {dimension_numbers = #tpu.dot_dimension_numbers<[1], [0], [0], [1], [0, 0, 1, 1], [], []>} : vector<16x200xf32>, vector<200x72xf32>, vector<16x72xf32> -> vector<16x72xf32>
    %cst_52 = arith.constant 0.000000e+00 : f32
    %131 = vector.broadcast %cst_52 : f32 to vector<16x7xf32>
    %132 = tpu.concatenate %131, %130, %131 in 1 : vector<16x7xf32>, vector<16x72xf32>, vector<16x7xf32> -> vector<16x86xf32>
    %c0_53 = arith.constant 0 : index
    %c0_54 = arith.constant 0 : index
    %133 = vector.load %arg18[%c0_53, %c0_54] : memref<32x144xf32, #tpu.memory_space<vmem>>, vector<32x144xf32>
    %c0_55 = arith.constant 0 : index
    %c0_56 = arith.constant 0 : index
    %134 = vector.load %arg19[%c0_55, %c0_56] : memref<32x1xf32, #tpu.memory_space<vmem>>, vector<32x1xf32>
    %135 = vector.extract_strided_slice %132 {offsets = [0, 0], sizes = [16, 72], strides = [1, 1]} : vector<16x86xf32> to vector<16x72xf32>
    %136 = vector.extract_strided_slice %132 {offsets = [0, 1], sizes = [16, 72], strides = [1, 1]} : vector<16x86xf32> to vector<16x72xf32>
    %137 = vector.extract_strided_slice %132 {offsets = [0, 2], sizes = [16, 72], strides = [1, 1]} : vector<16x86xf32> to vector<16x72xf32>
    %138 = vector.extract_strided_slice %132 {offsets = [0, 6], sizes = [16, 72], strides = [1, 1]} : vector<16x86xf32> to vector<16x72xf32>
    %139 = vector.extract_strided_slice %132 {offsets = [0, 7], sizes = [16, 72], strides = [1, 1]} : vector<16x86xf32> to vector<16x72xf32>
    %140 = vector.extract_strided_slice %132 {offsets = [0, 8], sizes = [16, 72], strides = [1, 1]} : vector<16x86xf32> to vector<16x72xf32>
    %141 = vector.extract_strided_slice %132 {offsets = [0, 12], sizes = [16, 72], strides = [1, 1]} : vector<16x86xf32> to vector<16x72xf32>
    %142 = vector.extract_strided_slice %132 {offsets = [0, 13], sizes = [16, 72], strides = [1, 1]} : vector<16x86xf32> to vector<16x72xf32>
    %143 = vector.extract_strided_slice %132 {offsets = [0, 14], sizes = [16, 72], strides = [1, 1]} : vector<16x86xf32> to vector<16x72xf32>
    %144 = tpu.concatenate %135, %136, %137, %138, %139, %140, %141, %142, %143 in 0 : vector<16x72xf32>, vector<16x72xf32>, vector<16x72xf32>, vector<16x72xf32>, vector<16x72xf32>, vector<16x72xf32>, vector<16x72xf32>, vector<16x72xf32>, vector<16x72xf32> -> vector<144x72xf32>
    %cst_57 = arith.constant dense<0.000000e+00> : vector<32x72xf32>
    %145 = tpu.matmul %133, %144, %cst_57 {dimension_numbers = #tpu.dot_dimension_numbers<[1], [0], [0], [1], [0, 0, 1, 1], [], []>} : vector<32x144xf32>, vector<144x72xf32>, vector<32x72xf32> -> vector<32x72xf32>
    %146 = vector.broadcast %134 : vector<32x1xf32> to vector<32x72xf32>
    %147 = arith.addf %145, %146 : vector<32x72xf32>
    %cst_58 = arith.constant 0.000000e+00 : f32
    %148 = vector.broadcast %cst_58 : f32 to vector<32x72xf32>
    %149 = arith.maximumf %147, %148 : vector<32x72xf32>
    %150 = vector.broadcast %3 : vector<1x72xf32> to vector<32x72xf32>
    %151 = arith.mulf %149, %150 : vector<32x72xf32>
    %cst_59 = arith.constant 0.000000e+00 : f32
    %152 = vector.broadcast %cst_59 : f32 to vector<32x7xf32>
    %153 = tpu.concatenate %152, %151, %152 in 1 : vector<32x7xf32>, vector<32x72xf32>, vector<32x7xf32> -> vector<32x86xf32>
    %c0_60 = arith.constant 0 : index
    %c0_61 = arith.constant 0 : index
    %154 = vector.load %arg20[%c0_60, %c0_61] : memref<32x288xf32, #tpu.memory_space<vmem>>, vector<32x288xf32>
    %c0_62 = arith.constant 0 : index
    %c0_63 = arith.constant 0 : index
    %155 = vector.load %arg21[%c0_62, %c0_63] : memref<32x1xf32, #tpu.memory_space<vmem>>, vector<32x1xf32>
    %156 = vector.extract_strided_slice %153 {offsets = [0, 0], sizes = [32, 72], strides = [1, 1]} : vector<32x86xf32> to vector<32x72xf32>
    %157 = vector.extract_strided_slice %153 {offsets = [0, 1], sizes = [32, 72], strides = [1, 1]} : vector<32x86xf32> to vector<32x72xf32>
    %158 = vector.extract_strided_slice %153 {offsets = [0, 2], sizes = [32, 72], strides = [1, 1]} : vector<32x86xf32> to vector<32x72xf32>
    %159 = vector.extract_strided_slice %153 {offsets = [0, 6], sizes = [32, 72], strides = [1, 1]} : vector<32x86xf32> to vector<32x72xf32>
    %160 = vector.extract_strided_slice %153 {offsets = [0, 7], sizes = [32, 72], strides = [1, 1]} : vector<32x86xf32> to vector<32x72xf32>
    %161 = vector.extract_strided_slice %153 {offsets = [0, 8], sizes = [32, 72], strides = [1, 1]} : vector<32x86xf32> to vector<32x72xf32>
    %162 = vector.extract_strided_slice %153 {offsets = [0, 12], sizes = [32, 72], strides = [1, 1]} : vector<32x86xf32> to vector<32x72xf32>
    %163 = vector.extract_strided_slice %153 {offsets = [0, 13], sizes = [32, 72], strides = [1, 1]} : vector<32x86xf32> to vector<32x72xf32>
    %164 = vector.extract_strided_slice %153 {offsets = [0, 14], sizes = [32, 72], strides = [1, 1]} : vector<32x86xf32> to vector<32x72xf32>
    %165 = tpu.concatenate %156, %157, %158, %159, %160, %161, %162, %163, %164 in 0 : vector<32x72xf32>, vector<32x72xf32>, vector<32x72xf32>, vector<32x72xf32>, vector<32x72xf32>, vector<32x72xf32>, vector<32x72xf32>, vector<32x72xf32>, vector<32x72xf32> -> vector<288x72xf32>
    %cst_64 = arith.constant dense<0.000000e+00> : vector<32x72xf32>
    %166 = tpu.matmul %154, %165, %cst_64 {dimension_numbers = #tpu.dot_dimension_numbers<[1], [0], [0], [1], [0, 0, 1, 1], [], []>} : vector<32x288xf32>, vector<288x72xf32>, vector<32x72xf32> -> vector<32x72xf32>
    %167 = vector.broadcast %155 : vector<32x1xf32> to vector<32x72xf32>
    %168 = arith.addf %166, %167 : vector<32x72xf32>
    %cst_65 = arith.constant 0.000000e+00 : f32
    %169 = vector.broadcast %cst_65 : f32 to vector<32x72xf32>
    %170 = arith.maximumf %168, %169 : vector<32x72xf32>
    %171 = vector.broadcast %3 : vector<1x72xf32> to vector<32x72xf32>
    %172 = arith.mulf %170, %171 : vector<32x72xf32>
    %cst_66 = arith.constant 0.000000e+00 : f32
    %173 = vector.broadcast %cst_66 : f32 to vector<32x7xf32>
    %174 = tpu.concatenate %173, %172, %173 in 1 : vector<32x7xf32>, vector<32x72xf32>, vector<32x7xf32> -> vector<32x86xf32>
    %c0_67 = arith.constant 0 : index
    %c0_68 = arith.constant 0 : index
    %175 = vector.load %arg22[%c0_67, %c0_68] : memref<16x128xf32, #tpu.memory_space<vmem>>, vector<16x128xf32>
    %c0_69 = arith.constant 0 : index
    %c0_70 = arith.constant 0 : index
    %176 = vector.load %arg23[%c0_69, %c0_70] : memref<16x128xf32, #tpu.memory_space<vmem>>, vector<16x128xf32>
    %c0_71 = arith.constant 0 : index
    %c0_72 = arith.constant 0 : index
    %177 = vector.load %arg24[%c0_71, %c0_72] : memref<16x128xf32, #tpu.memory_space<vmem>>, vector<16x128xf32>
    %c0_73 = arith.constant 0 : index
    %c0_74 = arith.constant 0 : index
    %178 = vector.load %arg25[%c0_73, %c0_74] : memref<16x128xf32, #tpu.memory_space<vmem>>, vector<16x128xf32>
    %c0_75 = arith.constant 0 : index
    %c0_76 = arith.constant 0 : index
    %179 = vector.load %arg26[%c0_75, %c0_76] : memref<16x1xf32, #tpu.memory_space<vmem>>, vector<16x1xf32>
    %180 = vector.extract_strided_slice %174 {offsets = [0, 7], sizes = [32, 72], strides = [1, 1]} : vector<32x86xf32> to vector<32x72xf32>
    %181 = vector.extract_strided_slice %174 {offsets = [0, 8], sizes = [32, 72], strides = [1, 1]} : vector<32x86xf32> to vector<32x72xf32>
    %182 = vector.extract_strided_slice %174 {offsets = [0, 13], sizes = [32, 72], strides = [1, 1]} : vector<32x86xf32> to vector<32x72xf32>
    %183 = vector.extract_strided_slice %174 {offsets = [0, 14], sizes = [32, 72], strides = [1, 1]} : vector<32x86xf32> to vector<32x72xf32>
    %184 = tpu.concatenate %180, %181, %182, %183 in 0 : vector<32x72xf32>, vector<32x72xf32>, vector<32x72xf32>, vector<32x72xf32> -> vector<128x72xf32>
    %cst_77 = arith.constant dense<0.000000e+00> : vector<16x72xf32>
    %185 = tpu.matmul %175, %184, %cst_77 {dimension_numbers = #tpu.dot_dimension_numbers<[1], [0], [0], [1], [0, 0, 1, 1], [], []>} : vector<16x128xf32>, vector<128x72xf32>, vector<16x72xf32> -> vector<16x72xf32>
    %186 = vector.broadcast %179 : vector<16x1xf32> to vector<16x72xf32>
    %187 = arith.addf %185, %186 : vector<16x72xf32>
    %cst_78 = arith.constant 0.000000e+00 : f32
    %188 = vector.broadcast %cst_78 : f32 to vector<16x72xf32>
    %189 = arith.maximumf %187, %188 : vector<16x72xf32>
    %cst_79 = arith.constant dense<0.000000e+00> : vector<16x72xf32>
    %190 = tpu.matmul %176, %184, %cst_79 {dimension_numbers = #tpu.dot_dimension_numbers<[1], [0], [0], [1], [0, 0, 1, 1], [], []>} : vector<16x128xf32>, vector<128x72xf32>, vector<16x72xf32> -> vector<16x72xf32>
    %191 = vector.broadcast %179 : vector<16x1xf32> to vector<16x72xf32>
    %192 = arith.addf %190, %191 : vector<16x72xf32>
    %cst_80 = arith.constant 0.000000e+00 : f32
    %193 = vector.broadcast %cst_80 : f32 to vector<16x72xf32>
    %194 = arith.maximumf %192, %193 : vector<16x72xf32>
    %cst_81 = arith.constant dense<0.000000e+00> : vector<16x72xf32>
    %195 = tpu.matmul %177, %184, %cst_81 {dimension_numbers = #tpu.dot_dimension_numbers<[1], [0], [0], [1], [0, 0, 1, 1], [], []>} : vector<16x128xf32>, vector<128x72xf32>, vector<16x72xf32> -> vector<16x72xf32>
    %196 = vector.broadcast %179 : vector<16x1xf32> to vector<16x72xf32>
    %197 = arith.addf %195, %196 : vector<16x72xf32>
    %cst_82 = arith.constant 0.000000e+00 : f32
    %198 = vector.broadcast %cst_82 : f32 to vector<16x72xf32>
    %199 = arith.maximumf %197, %198 : vector<16x72xf32>
    %cst_83 = arith.constant dense<0.000000e+00> : vector<16x72xf32>
    %200 = tpu.matmul %178, %184, %cst_83 {dimension_numbers = #tpu.dot_dimension_numbers<[1], [0], [0], [1], [0, 0, 1, 1], [], []>} : vector<16x128xf32>, vector<128x72xf32>, vector<16x72xf32> -> vector<16x72xf32>
    %201 = vector.broadcast %179 : vector<16x1xf32> to vector<16x72xf32>
    %202 = arith.addf %200, %201 : vector<16x72xf32>
    %cst_84 = arith.constant 0.000000e+00 : f32
    %203 = vector.broadcast %cst_84 : f32 to vector<16x72xf32>
    %204 = arith.maximumf %202, %203 : vector<16x72xf32>
    %205 = tpu.concatenate %189, %194, %199, %204 in 1 : vector<16x72xf32>, vector<16x72xf32>, vector<16x72xf32>, vector<16x72xf32> -> vector<16x288xf32>
    %cst_85 = arith.constant dense<0.000000e+00> : vector<16x200xf32>
    %206 = tpu.matmul %205, %6, %cst_85 {dimension_numbers = #tpu.dot_dimension_numbers<[1], [0], [0], [1], [0, 0, 1, 1], [], []>} : vector<16x288xf32>, vector<288x200xf32>, vector<16x200xf32> -> vector<16x200xf32>
    %cst_86 = arith.constant 0.000000e+00 : f32
    %207 = vector.broadcast %cst_86 : f32 to vector<16x11xf32>
    %208 = tpu.concatenate %207, %206, %207 in 1 : vector<16x11xf32>, vector<16x200xf32>, vector<16x11xf32> -> vector<16x222xf32>
    %209 = tpu.concatenate %208, %122 in 0 : vector<16x222xf32>, vector<16x222xf32> -> vector<32x222xf32>
    %c0_87 = arith.constant 0 : index
    %c0_88 = arith.constant 0 : index
    %210 = vector.load %arg27[%c0_87, %c0_88] : memref<16x288xf32, #tpu.memory_space<vmem>>, vector<16x288xf32>
    %c0_89 = arith.constant 0 : index
    %c0_90 = arith.constant 0 : index
    %211 = vector.load %arg28[%c0_89, %c0_90] : memref<16x1xf32, #tpu.memory_space<vmem>>, vector<16x1xf32>
    %212 = vector.extract_strided_slice %209 {offsets = [0, 0], sizes = [32, 200], strides = [1, 1]} : vector<32x222xf32> to vector<32x200xf32>
    %213 = vector.extract_strided_slice %209 {offsets = [0, 1], sizes = [32, 200], strides = [1, 1]} : vector<32x222xf32> to vector<32x200xf32>
    %214 = vector.extract_strided_slice %209 {offsets = [0, 2], sizes = [32, 200], strides = [1, 1]} : vector<32x222xf32> to vector<32x200xf32>
    %215 = vector.extract_strided_slice %209 {offsets = [0, 10], sizes = [32, 200], strides = [1, 1]} : vector<32x222xf32> to vector<32x200xf32>
    %216 = vector.extract_strided_slice %209 {offsets = [0, 11], sizes = [32, 200], strides = [1, 1]} : vector<32x222xf32> to vector<32x200xf32>
    %217 = vector.extract_strided_slice %209 {offsets = [0, 12], sizes = [32, 200], strides = [1, 1]} : vector<32x222xf32> to vector<32x200xf32>
    %218 = vector.extract_strided_slice %209 {offsets = [0, 20], sizes = [32, 200], strides = [1, 1]} : vector<32x222xf32> to vector<32x200xf32>
    %219 = vector.extract_strided_slice %209 {offsets = [0, 21], sizes = [32, 200], strides = [1, 1]} : vector<32x222xf32> to vector<32x200xf32>
    %220 = vector.extract_strided_slice %209 {offsets = [0, 22], sizes = [32, 200], strides = [1, 1]} : vector<32x222xf32> to vector<32x200xf32>
    %221 = tpu.concatenate %212, %213, %214, %215, %216, %217, %218, %219, %220 in 0 : vector<32x200xf32>, vector<32x200xf32>, vector<32x200xf32>, vector<32x200xf32>, vector<32x200xf32>, vector<32x200xf32>, vector<32x200xf32>, vector<32x200xf32>, vector<32x200xf32> -> vector<288x200xf32>
    %cst_91 = arith.constant dense<0.000000e+00> : vector<16x200xf32>
    %222 = tpu.matmul %210, %221, %cst_91 {dimension_numbers = #tpu.dot_dimension_numbers<[1], [0], [0], [1], [0, 0, 1, 1], [], []>} : vector<16x288xf32>, vector<288x200xf32>, vector<16x200xf32> -> vector<16x200xf32>
    %223 = vector.broadcast %211 : vector<16x1xf32> to vector<16x200xf32>
    %224 = arith.addf %222, %223 : vector<16x200xf32>
    %cst_92 = arith.constant 0.000000e+00 : f32
    %225 = vector.broadcast %cst_92 : f32 to vector<16x200xf32>
    %226 = arith.maximumf %224, %225 : vector<16x200xf32>
    %227 = vector.broadcast %2 : vector<1x200xf32> to vector<16x200xf32>
    %228 = arith.mulf %226, %227 : vector<16x200xf32>
    %cst_93 = arith.constant 0.000000e+00 : f32
    %229 = vector.broadcast %cst_93 : f32 to vector<16x11xf32>
    %230 = tpu.concatenate %229, %228, %229 in 1 : vector<16x11xf32>, vector<16x200xf32>, vector<16x11xf32> -> vector<16x222xf32>
    %c0_94 = arith.constant 0 : index
    %c0_95 = arith.constant 0 : index
    %231 = vector.load %arg29[%c0_94, %c0_95] : memref<16x144xf32, #tpu.memory_space<vmem>>, vector<16x144xf32>
    %c0_96 = arith.constant 0 : index
    %c0_97 = arith.constant 0 : index
    %232 = vector.load %arg30[%c0_96, %c0_97] : memref<16x1xf32, #tpu.memory_space<vmem>>, vector<16x1xf32>
    %233 = vector.extract_strided_slice %230 {offsets = [0, 0], sizes = [16, 200], strides = [1, 1]} : vector<16x222xf32> to vector<16x200xf32>
    %234 = vector.extract_strided_slice %230 {offsets = [0, 1], sizes = [16, 200], strides = [1, 1]} : vector<16x222xf32> to vector<16x200xf32>
    %235 = vector.extract_strided_slice %230 {offsets = [0, 2], sizes = [16, 200], strides = [1, 1]} : vector<16x222xf32> to vector<16x200xf32>
    %236 = vector.extract_strided_slice %230 {offsets = [0, 10], sizes = [16, 200], strides = [1, 1]} : vector<16x222xf32> to vector<16x200xf32>
    %237 = vector.extract_strided_slice %230 {offsets = [0, 11], sizes = [16, 200], strides = [1, 1]} : vector<16x222xf32> to vector<16x200xf32>
    %238 = vector.extract_strided_slice %230 {offsets = [0, 12], sizes = [16, 200], strides = [1, 1]} : vector<16x222xf32> to vector<16x200xf32>
    %239 = vector.extract_strided_slice %230 {offsets = [0, 20], sizes = [16, 200], strides = [1, 1]} : vector<16x222xf32> to vector<16x200xf32>
    %240 = vector.extract_strided_slice %230 {offsets = [0, 21], sizes = [16, 200], strides = [1, 1]} : vector<16x222xf32> to vector<16x200xf32>
    %241 = vector.extract_strided_slice %230 {offsets = [0, 22], sizes = [16, 200], strides = [1, 1]} : vector<16x222xf32> to vector<16x200xf32>
    %242 = tpu.concatenate %233, %234, %235, %236, %237, %238, %239, %240, %241 in 0 : vector<16x200xf32>, vector<16x200xf32>, vector<16x200xf32>, vector<16x200xf32>, vector<16x200xf32>, vector<16x200xf32>, vector<16x200xf32>, vector<16x200xf32>, vector<16x200xf32> -> vector<144x200xf32>
    %cst_98 = arith.constant dense<0.000000e+00> : vector<16x200xf32>
    %243 = tpu.matmul %231, %242, %cst_98 {dimension_numbers = #tpu.dot_dimension_numbers<[1], [0], [0], [1], [0, 0, 1, 1], [], []>} : vector<16x144xf32>, vector<144x200xf32>, vector<16x200xf32> -> vector<16x200xf32>
    %244 = vector.broadcast %232 : vector<16x1xf32> to vector<16x200xf32>
    %245 = arith.addf %243, %244 : vector<16x200xf32>
    %cst_99 = arith.constant 0.000000e+00 : f32
    %246 = vector.broadcast %cst_99 : f32 to vector<16x200xf32>
    %247 = arith.maximumf %245, %246 : vector<16x200xf32>
    %248 = vector.broadcast %2 : vector<1x200xf32> to vector<16x200xf32>
    %249 = arith.mulf %247, %248 : vector<16x200xf32>
    %cst_100 = arith.constant 0.000000e+00 : f32
    %250 = vector.broadcast %cst_100 : f32 to vector<16x11xf32>
    %251 = tpu.concatenate %250, %249, %250 in 1 : vector<16x11xf32>, vector<16x200xf32>, vector<16x11xf32> -> vector<16x222xf32>
    %c0_101 = arith.constant 0 : index
    %c0_102 = arith.constant 0 : index
    %252 = vector.load %arg31[%c0_101, %c0_102] : memref<8x64xf32, #tpu.memory_space<vmem>>, vector<8x64xf32>
    %c0_103 = arith.constant 0 : index
    %c0_104 = arith.constant 0 : index
    %253 = vector.load %arg32[%c0_103, %c0_104] : memref<8x64xf32, #tpu.memory_space<vmem>>, vector<8x64xf32>
    %c0_105 = arith.constant 0 : index
    %c0_106 = arith.constant 0 : index
    %254 = vector.load %arg33[%c0_105, %c0_106] : memref<8x64xf32, #tpu.memory_space<vmem>>, vector<8x64xf32>
    %c0_107 = arith.constant 0 : index
    %c0_108 = arith.constant 0 : index
    %255 = vector.load %arg34[%c0_107, %c0_108] : memref<8x64xf32, #tpu.memory_space<vmem>>, vector<8x64xf32>
    %c0_109 = arith.constant 0 : index
    %c0_110 = arith.constant 0 : index
    %256 = vector.load %arg35[%c0_109, %c0_110] : memref<8x1xf32, #tpu.memory_space<vmem>>, vector<8x1xf32>
    %257 = vector.extract_strided_slice %251 {offsets = [0, 11], sizes = [16, 200], strides = [1, 1]} : vector<16x222xf32> to vector<16x200xf32>
    %258 = vector.extract_strided_slice %251 {offsets = [0, 12], sizes = [16, 200], strides = [1, 1]} : vector<16x222xf32> to vector<16x200xf32>
    %259 = vector.extract_strided_slice %251 {offsets = [0, 21], sizes = [16, 200], strides = [1, 1]} : vector<16x222xf32> to vector<16x200xf32>
    %260 = vector.extract_strided_slice %251 {offsets = [0, 22], sizes = [16, 200], strides = [1, 1]} : vector<16x222xf32> to vector<16x200xf32>
    %261 = tpu.concatenate %257, %258, %259, %260 in 0 : vector<16x200xf32>, vector<16x200xf32>, vector<16x200xf32>, vector<16x200xf32> -> vector<64x200xf32>
    %cst_111 = arith.constant dense<0.000000e+00> : vector<8x200xf32>
    %262 = tpu.matmul %252, %261, %cst_111 {dimension_numbers = #tpu.dot_dimension_numbers<[1], [0], [0], [1], [0, 0, 1, 1], [], []>} : vector<8x64xf32>, vector<64x200xf32>, vector<8x200xf32> -> vector<8x200xf32>
    %263 = vector.broadcast %256 : vector<8x1xf32> to vector<8x200xf32>
    %264 = arith.addf %262, %263 : vector<8x200xf32>
    %cst_112 = arith.constant 0.000000e+00 : f32
    %265 = vector.broadcast %cst_112 : f32 to vector<8x200xf32>
    %266 = arith.maximumf %264, %265 : vector<8x200xf32>
    %cst_113 = arith.constant dense<0.000000e+00> : vector<8x200xf32>
    %267 = tpu.matmul %253, %261, %cst_113 {dimension_numbers = #tpu.dot_dimension_numbers<[1], [0], [0], [1], [0, 0, 1, 1], [], []>} : vector<8x64xf32>, vector<64x200xf32>, vector<8x200xf32> -> vector<8x200xf32>
    %268 = vector.broadcast %256 : vector<8x1xf32> to vector<8x200xf32>
    %269 = arith.addf %267, %268 : vector<8x200xf32>
    %cst_114 = arith.constant 0.000000e+00 : f32
    %270 = vector.broadcast %cst_114 : f32 to vector<8x200xf32>
    %271 = arith.maximumf %269, %270 : vector<8x200xf32>
    %cst_115 = arith.constant dense<0.000000e+00> : vector<8x200xf32>
    %272 = tpu.matmul %254, %261, %cst_115 {dimension_numbers = #tpu.dot_dimension_numbers<[1], [0], [0], [1], [0, 0, 1, 1], [], []>} : vector<8x64xf32>, vector<64x200xf32>, vector<8x200xf32> -> vector<8x200xf32>
    %273 = vector.broadcast %256 : vector<8x1xf32> to vector<8x200xf32>
    %274 = arith.addf %272, %273 : vector<8x200xf32>
    %cst_116 = arith.constant 0.000000e+00 : f32
    %275 = vector.broadcast %cst_116 : f32 to vector<8x200xf32>
    %276 = arith.maximumf %274, %275 : vector<8x200xf32>
    %cst_117 = arith.constant dense<0.000000e+00> : vector<8x200xf32>
    %277 = tpu.matmul %255, %261, %cst_117 {dimension_numbers = #tpu.dot_dimension_numbers<[1], [0], [0], [1], [0, 0, 1, 1], [], []>} : vector<8x64xf32>, vector<64x200xf32>, vector<8x200xf32> -> vector<8x200xf32>
    %278 = vector.broadcast %256 : vector<8x1xf32> to vector<8x200xf32>
    %279 = arith.addf %277, %278 : vector<8x200xf32>
    %cst_118 = arith.constant 0.000000e+00 : f32
    %280 = vector.broadcast %cst_118 : f32 to vector<8x200xf32>
    %281 = arith.maximumf %279, %280 : vector<8x200xf32>
    %282 = tpu.concatenate %266, %271, %276, %281 in 1 : vector<8x200xf32>, vector<8x200xf32>, vector<8x200xf32>, vector<8x200xf32> -> vector<8x800xf32>
    %cst_119 = arith.constant dense<0.000000e+00> : vector<8x648xf32>
    %283 = tpu.matmul %282, %7, %cst_119 {dimension_numbers = #tpu.dot_dimension_numbers<[1], [0], [0], [1], [0, 0, 1, 1], [], []>} : vector<8x800xf32>, vector<800x648xf32>, vector<8x648xf32> -> vector<8x648xf32>
    %cst_120 = arith.constant 0.000000e+00 : f32
    %284 = vector.broadcast %cst_120 : f32 to vector<8x19xf32>
    %285 = tpu.concatenate %284, %283, %284 in 1 : vector<8x19xf32>, vector<8x648xf32>, vector<8x19xf32> -> vector<8x686xf32>
    %286 = tpu.concatenate %285, %70 in 0 : vector<8x686xf32>, vector<8x686xf32> -> vector<16x686xf32>
    %c0_121 = arith.constant 0 : index
    %c0_122 = arith.constant 0 : index
    %287 = vector.load %arg36[%c0_121, %c0_122] : memref<8x144xf32, #tpu.memory_space<vmem>>, vector<8x144xf32>
    %c0_123 = arith.constant 0 : index
    %c0_124 = arith.constant 0 : index
    %288 = vector.load %arg37[%c0_123, %c0_124] : memref<8x1xf32, #tpu.memory_space<vmem>>, vector<8x1xf32>
    %289 = vector.extract_strided_slice %286 {offsets = [0, 0], sizes = [16, 648], strides = [1, 1]} : vector<16x686xf32> to vector<16x648xf32>
    %290 = vector.extract_strided_slice %286 {offsets = [0, 1], sizes = [16, 648], strides = [1, 1]} : vector<16x686xf32> to vector<16x648xf32>
    %291 = vector.extract_strided_slice %286 {offsets = [0, 2], sizes = [16, 648], strides = [1, 1]} : vector<16x686xf32> to vector<16x648xf32>
    %292 = vector.extract_strided_slice %286 {offsets = [0, 18], sizes = [16, 648], strides = [1, 1]} : vector<16x686xf32> to vector<16x648xf32>
    %293 = vector.extract_strided_slice %286 {offsets = [0, 19], sizes = [16, 648], strides = [1, 1]} : vector<16x686xf32> to vector<16x648xf32>
    %294 = vector.extract_strided_slice %286 {offsets = [0, 20], sizes = [16, 648], strides = [1, 1]} : vector<16x686xf32> to vector<16x648xf32>
    %295 = vector.extract_strided_slice %286 {offsets = [0, 36], sizes = [16, 648], strides = [1, 1]} : vector<16x686xf32> to vector<16x648xf32>
    %296 = vector.extract_strided_slice %286 {offsets = [0, 37], sizes = [16, 648], strides = [1, 1]} : vector<16x686xf32> to vector<16x648xf32>
    %297 = vector.extract_strided_slice %286 {offsets = [0, 38], sizes = [16, 648], strides = [1, 1]} : vector<16x686xf32> to vector<16x648xf32>
    %298 = tpu.concatenate %289, %290, %291, %292, %293, %294, %295, %296, %297 in 0 : vector<16x648xf32>, vector<16x648xf32>, vector<16x648xf32>, vector<16x648xf32>, vector<16x648xf32>, vector<16x648xf32>, vector<16x648xf32>, vector<16x648xf32>, vector<16x648xf32> -> vector<144x648xf32>
    %cst_125 = arith.constant dense<0.000000e+00> : vector<8x648xf32>
    %299 = tpu.matmul %287, %298, %cst_125 {dimension_numbers = #tpu.dot_dimension_numbers<[1], [0], [0], [1], [0, 0, 1, 1], [], []>} : vector<8x144xf32>, vector<144x648xf32>, vector<8x648xf32> -> vector<8x648xf32>
    %300 = vector.broadcast %288 : vector<8x1xf32> to vector<8x648xf32>
    %301 = arith.addf %299, %300 : vector<8x648xf32>
    %cst_126 = arith.constant 0.000000e+00 : f32
    %302 = vector.broadcast %cst_126 : f32 to vector<8x648xf32>
    %303 = arith.maximumf %301, %302 : vector<8x648xf32>
    %304 = vector.broadcast %1 : vector<1x648xf32> to vector<8x648xf32>
    %305 = arith.mulf %303, %304 : vector<8x648xf32>
    %cst_127 = arith.constant 0.000000e+00 : f32
    %306 = vector.broadcast %cst_127 : f32 to vector<8x19xf32>
    %307 = tpu.concatenate %306, %305, %306 in 1 : vector<8x19xf32>, vector<8x648xf32>, vector<8x19xf32> -> vector<8x686xf32>
    %c0_128 = arith.constant 0 : index
    %c0_129 = arith.constant 0 : index
    %308 = vector.load %arg38[%c0_128, %c0_129] : memref<8x72xf32, #tpu.memory_space<vmem>>, vector<8x72xf32>
    %c0_130 = arith.constant 0 : index
    %c0_131 = arith.constant 0 : index
    %309 = vector.load %arg39[%c0_130, %c0_131] : memref<8x1xf32, #tpu.memory_space<vmem>>, vector<8x1xf32>
    %310 = vector.extract_strided_slice %307 {offsets = [0, 0], sizes = [8, 648], strides = [1, 1]} : vector<8x686xf32> to vector<8x648xf32>
    %311 = vector.extract_strided_slice %307 {offsets = [0, 1], sizes = [8, 648], strides = [1, 1]} : vector<8x686xf32> to vector<8x648xf32>
    %312 = vector.extract_strided_slice %307 {offsets = [0, 2], sizes = [8, 648], strides = [1, 1]} : vector<8x686xf32> to vector<8x648xf32>
    %313 = vector.extract_strided_slice %307 {offsets = [0, 18], sizes = [8, 648], strides = [1, 1]} : vector<8x686xf32> to vector<8x648xf32>
    %314 = vector.extract_strided_slice %307 {offsets = [0, 19], sizes = [8, 648], strides = [1, 1]} : vector<8x686xf32> to vector<8x648xf32>
    %315 = vector.extract_strided_slice %307 {offsets = [0, 20], sizes = [8, 648], strides = [1, 1]} : vector<8x686xf32> to vector<8x648xf32>
    %316 = vector.extract_strided_slice %307 {offsets = [0, 36], sizes = [8, 648], strides = [1, 1]} : vector<8x686xf32> to vector<8x648xf32>
    %317 = vector.extract_strided_slice %307 {offsets = [0, 37], sizes = [8, 648], strides = [1, 1]} : vector<8x686xf32> to vector<8x648xf32>
    %318 = vector.extract_strided_slice %307 {offsets = [0, 38], sizes = [8, 648], strides = [1, 1]} : vector<8x686xf32> to vector<8x648xf32>
    %319 = tpu.concatenate %310, %311, %312, %313, %314, %315, %316, %317, %318 in 0 : vector<8x648xf32>, vector<8x648xf32>, vector<8x648xf32>, vector<8x648xf32>, vector<8x648xf32>, vector<8x648xf32>, vector<8x648xf32>, vector<8x648xf32>, vector<8x648xf32> -> vector<72x648xf32>
    %cst_132 = arith.constant dense<0.000000e+00> : vector<8x648xf32>
    %320 = tpu.matmul %308, %319, %cst_132 {dimension_numbers = #tpu.dot_dimension_numbers<[1], [0], [0], [1], [0, 0, 1, 1], [], []>} : vector<8x72xf32>, vector<72x648xf32>, vector<8x648xf32> -> vector<8x648xf32>
    %321 = vector.broadcast %309 : vector<8x1xf32> to vector<8x648xf32>
    %322 = arith.addf %320, %321 : vector<8x648xf32>
    %cst_133 = arith.constant 0.000000e+00 : f32
    %323 = vector.broadcast %cst_133 : f32 to vector<8x648xf32>
    %324 = arith.maximumf %322, %323 : vector<8x648xf32>
    %325 = vector.broadcast %1 : vector<1x648xf32> to vector<8x648xf32>
    %326 = arith.mulf %324, %325 : vector<8x648xf32>
    %cst_134 = arith.constant 0.000000e+00 : f32
    %327 = vector.broadcast %cst_134 : f32 to vector<8x19xf32>
    %328 = tpu.concatenate %327, %326, %327 in 1 : vector<8x19xf32>, vector<8x648xf32>, vector<8x19xf32> -> vector<8x686xf32>
    %c0_135 = arith.constant 0 : index
    %c0_136 = arith.constant 0 : index
    %329 = vector.load %arg40[%c0_135, %c0_136] : memref<8x1xf32, #tpu.memory_space<vmem>>, vector<8x1xf32>
    %c0_137 = arith.constant 0 : index
    %c0_138 = arith.constant 0 : index
    %330 = vector.load %arg41[%c0_137, %c0_138] : memref<1x1xf32, #tpu.memory_space<vmem>>, vector<1x1xf32>
    %331 = vector.extract_strided_slice %328 {offsets = [0, 19], sizes = [8, 648], strides = [1, 1]} : vector<8x686xf32> to vector<8x648xf32>
    %332 = vector.broadcast %329 : vector<8x1xf32> to vector<8x648xf32>
    %333 = arith.mulf %331, %332 : vector<8x648xf32>
    %cst_139 = arith.constant dense<0.000000e+00> : vector<648xf32>
    %334 = vector.multi_reduction <add>, %333, %cst_139 [0] : vector<8x648xf32> to vector<648xf32>
    %335 = vector.shape_cast %334 : vector<648xf32> to vector<1x648xf32>
    %336 = vector.broadcast %330 : vector<1x1xf32> to vector<1x648xf32>
    %337 = arith.addf %335, %336 : vector<1x648xf32>
    %c0_140 = arith.constant 0 : index
    %c0_141 = arith.constant 0 : index
    %338 = vector.load %arg42[%c0_140, %c0_141] : memref<1x648xf32, #tpu.memory_space<vmem>>, vector<1x648xf32>
    tpu.vector_store %arg42[%c0_140, %c0_141], %337 {strides = array<i32>} : memref<1x648xf32, #tpu.memory_space<vmem>>, vector<1x648xf32>,
    return
  }
}

</mosaic_0001>

<bundles_post_ra>
// kernel: unet_forward.1
= control target key start
LH: loop header
LB: loop body
LE: loop exit
PB: predicated region body
PF: predicated region fallthrough
CT: control target
= control target key end

     0   :  { %s8518_s6 = smov 1   ;;  %s8519_s10 = smov 2   ;;  %s12144_s0 = inlined_call_operand.smem [shape: u32[43], index: -1, kind: input, shape index: {}] }
   0x1   :  { %s8596_s5 = sld [smem:[%s12144_s0]]   ;;  %s8520_s14 = smov 3  }
   0x2   :  { %s8601_s9 = sld [smem:[%s12144_s0 + %s8518_s6]]   ;;  %s8521_s18 = smov 4  }
   0x3   :  { %s8606_s13 = sld [smem:[%s12144_s0 + %s8519_s10]]   ;;  %s8522_s22 = smov 5  }
   0x4   :  { %s8611_s17 = sld [smem:[%s12144_s0 + %s8520_s14]]   ;;  %s8523_s26 = smov 6  }
   0x5   :  { %s8616_s21 = sld [smem:[%s12144_s0 + %s8521_s18]]   ;;  %s8524_s30 = smov 7  }
   0x6   :  { %s8621_s25 = sld [smem:[%s12144_s0 + %s8522_s22]]   ;;  %s8525_s4 = smov 8  }
   0x7   :  { %s8626_s29 = sld [smem:[%s12144_s0 + %s8523_s26]]   ;;  %s8526_s10 = smov 9  }
   0x8   :  { %s8631_s3 = sld [smem:[%s12144_s0 + %s8524_s30]]   ;;  %s8527_s15 = smov 10  }
   0x9   :  { %s8636_s8 = sld [smem:[%s12144_s0 + %s8525_s4]]   ;;  %s8528_s20 = smov 11  }
   0xa   :  { %12203 = sst [smem:[#allocation9_spill]] %s8611_s17  ;;  %s8529_s26 = smov 12  }
   0xb   :  { %s8641_s14 = sld [smem:[%s12144_s0 + %s8526_s10]]   ;;  %s8530_s1 = smov 13  }
   0xc   :  { %12204 = sst [smem:[#allocation10_spill]] %s8621_s25  ;;  %s8531_s7 = smov 14  }
   0xd   :  { %s8646_s19 = sld [smem:[%s12144_s0 + %s8527_s15]]   ;;  %s8532_s15 = smov 15  }
   0xe   :  { %12205 = sst [smem:[#allocation11_spill]] %s8631_s3  ;;  %s8533_s22 = smov 16  }
   0xf   :  { %s8651_s24 = sld [smem:[%s12144_s0 + %s8528_s20]]   ;;  %s8534_s28 = smov 17  }
  0x10   :  { %s8656_s30 = sld [smem:[%s12144_s0 + %s8529_s26]]   ;;  %s8559_s10 = smov 42  }
  0x11   :  { %s8661_s6 = sld [smem:[%s12144_s0 + %s8530_s1]]  }
  0x12   :  { %s8666_s12 = sld [smem:[%s12144_s0 + %s8531_s7]]   ;;  %s8535_s7 = smov 18  }
  0x13   :  { %s8671_s20 = sld [smem:[%s12144_s0 + %s8532_s15]]   ;;  %s8536_s15 = smov 19  }
  0x14   :  { %s8676_s27 = sld [smem:[%s12144_s0 + %s8533_s22]]   ;;  %s8537_s22 = smov 20  }
  0x15   :  { %s8681_s4 = sld [smem:[%s12144_s0 + %s8534_s28]]   ;;  %s8538_s28 = smov 21  }
  0x16   :  { %s8686_s3 = sld [smem:[%s12144_s0 + %s8535_s7]]   ;;  %s8539_s7 = smov 22  }
  0x17   :  { %s8691_s17 = sld [smem:[%s12144_s0 + %s8536_s15]]   ;;  %s8540_s15 = smov 23  }
  0x18   :  { %s8696_s25 = sld [smem:[%s12144_s0 + %s8537_s22]]   ;;  %s8541_s22 = smov 24  }
  0x1a   :  { %12206 = sst [smem:[#allocation12_spill]] %s8676_s27 }
  0x1b   :  { %s8701_s27 = sld [smem:[%s12144_s0 + %s8538_s28]]   ;;  %s8542_s28 = smov 25  }
  0x1c   :  { %12207 = sst [smem:[#allocation13_spill]] %s8686_s3 }
  0x1d   :  { %12208 = sst [smem:[#allocation14_spill]] %s8691_s17 }
  0x1e   :  { %12209 = sst [smem:[#allocation15_spill]] %s8696_s25 }
  0x1f   :  { %s8706_s3 = sld [smem:[%s12144_s0 + %s8539_s7]]   ;;  %s8543_s7 = smov 26  }
  0x20   :  { %s8711_s17 = sld [smem:[%s12144_s0 + %s8540_s15]]   ;;  %s8544_s15 = smov 27  }
  0x21   :  { %12210 = sst [smem:[#allocation16_spill]] %s8701_s27 }
  0x22   :  { %s8716_s25 = sld [smem:[%s12144_s0 + %s8541_s22]]   ;;  %s8545_s22 = smov 28  }
  0x23   :  { %s8721_s27 = sld [smem:[%s12144_s0 + %s8542_s28]]   ;;  %s8546_s28 = smov 29  }
  0x25   :  { %12211 = sst [smem:[#allocation17_spill]] %s8706_s3 }
  0x26   :  { %12212 = sst [smem:[#allocation18_spill]] %s8711_s17 }
  0x27   :  { %s8726_s3 = sld [smem:[%s12144_s0 + %s8543_s7]]   ;;  %s8547_s7 = smov 30  }
  0x28   :  { %12213 = sst [smem:[#allocation19_spill]] %s8716_s25 }
  0x29   :  { %12214 = sst [smem:[#allocation20_spill]] %s8721_s27 }
  0x2a   :  { %s8731_s17 = sld [smem:[%s12144_s0 + %s8544_s15]]   ;;  %s8548_s15 = smov 31  }
  0x2b   :  { %s8736_s25 = sld [smem:[%s12144_s0 + %s8545_s22]]   ;;  %s8549_s22 = smov 32  }
  0x2c   :  { %s8741_s27 = sld [smem:[%s12144_s0 + %s8546_s28]]   ;;  %s8550_s28 = smov 33  }
  0x2d   :  { %12215 = sst [smem:[#allocation21_spill]] %s8726_s3 }
  0x2e   :  { %s8746_s3 = sld [smem:[%s12144_s0 + %s8547_s7]]   ;;  %s8551_s7 = smov 34  }
  0x30   :  { %12216 = sst [smem:[#allocation22_spill]] %s8731_s17 }
  0x31   :  { %12217 = sst [smem:[#allocation23_spill]] %s8736_s25 }
  0x32   :  { %12218 = sst [smem:[#allocation24_spill]] %s8741_s27 }
  0x33   :  { %s8751_s17 = sld [smem:[%s12144_s0 + %s8548_s15]]   ;;  %s8552_s15 = smov 35  }
  0x34   :  { %12219 = sst [smem:[#allocation25_spill]] %s8746_s3 }
  0x35   :  { %s8756_s25 = sld [smem:[%s12144_s0 + %s8549_s22]]   ;;  %s8553_s22 = smov 36  }
  0x36   :  { %s8761_s27 = sld [smem:[%s12144_s0 + %s8550_s28]]   ;;  %s8554_s28 = smov 37  }
  0x37   :  { %s8766_s3 = sld [smem:[%s12144_s0 + %s8551_s7]]   ;;  %s8555_s7 = smov 38  }
  0x39   :  { %12220 = sst [smem:[#allocation26_spill]] %s8751_s17 }
  0x3a   :  { %s8771_s17 = sld [smem:[%s12144_s0 + %s8552_s15]]   ;;  %s8556_s15 = smov 39  }
  0x3b   :  { %12221 = sst [smem:[#allocation27_spill]] %s8756_s25 }
  0x3c   :  { %12222 = sst [smem:[#allocation28_spill]] %s8761_s27 }
  0x3d   :  { %12223 = sst [smem:[#allocation29_spill]] %s8766_s3 }
  0x3e   :  { %s8776_s25 = sld [smem:[%s12144_s0 + %s8553_s22]]   ;;  %s8557_s22 = smov 40  }
  0x3f   :  { %s8781_s27 = sld [smem:[%s12144_s0 + %s8554_s28]]   ;;  %s8558_s28 = smov 41  }
  0x40   :  { %12224 = sst [smem:[#allocation30_spill]] %s8771_s17 }
  0x41   :  { %s8786_s3 = sld [smem:[%s12144_s0 + %s8555_s7]]  }
  0x42   :  { %s8791_s17 = sld [smem:[%s12144_s0 + %s8556_s15]]  }
  0x44   :  { %12225 = sst [smem:[#allocation31_spill]] %s8776_s25 }
  0x45   :  { %12226 = sst [smem:[#allocation32_spill]] %s8781_s27 }
  0x46   :  { %s8796_s25 = sld [smem:[%s12144_s0 + %s8557_s22]]  }
  0x47   :  { %12227 = sst [smem:[#allocation33_spill]] %s8786_s3 }
  0x48   :  { %s6955_s27 = sld [smem:[%s12144_s0 + %s8558_s28]]  }
  0x49   :  { %s8804_s3 = sld [smem:[%s12144_s0 + %s8559_s10]]  }
  0x4e   :  { %v90_v0 = vstv %s6955_s27 }
  0x4f   :  { %91 = vst [vmem:[#allocation2] sm:$0x1] %v90_v0 }
  0x50   :  { %92 = vsyncpa [#allocation4], 0  ;;  %s106_s15 = sshll.u32 %s8616_s21, 4  ;;  %s107_s15 = int_to_ptr.hbm [resolvable:$true] %s106_s15 }
  0x51   :  { %93 = vsyncpa [#allocation6], 0  ;;  %s8560_s16 = smov [#allocation3]   ;;  %s121_s22 = sshll.u32 %s8626_s29, 4  ;;  %s122_s22 = int_to_ptr.hbm [resolvable:$true] %s121_s22 }
  0x52   :  { %s108_s18 = sshll.u32 %s8560_s16, 4  ;;  %s8466_s23 = sshra.s32 %s107_s15, 4  ;;  %s109_s18 = int_to_ptr.vmem [resolvable:$true] %s108_s18  ;;  %s8467_s23 = int_to_ptr.hbm [resolvable:$true] %s8466_s23 }
  0x53   :  { %s8468_s26 = scalar_lea.hbm %s8467_s23, 1296  ;;  %s8470_s0 = scalar_lea.hbm %s8616_s21, 1296 }
  0x54   :  { %p8469_p0 = scmp.ne.s32.totalorder %s8467_s23, %s8468_s26  ;;  %p8471_p1 = scmp.lt.s32.totalorder %s8467_s23, %s8616_s21 }
  0x55   :  { %p8472_p2 = scmp.lt.s32.totalorder %s8470_s0, %s8468_s26 }
  0x57   :  { %p8473_p3 = por %p8472_p2, %p8471_p1 }
  0x59   :  { %p8474_p4 = pnand %p8473_p3, %p8469_p0 }
  0x5b   :  { %8477 = shalt.err (!%p8474_p4)
}
  0x5c   :  { %s8561_s27 = smov 256   ;;  %s8562_s28 = smov 16  }
  0x5d   :  { %114 = dma.hbm_to_vmem [thread:$0]  %s107_s15, 20736, %s109_s18, [#allocation4], %s8561_s27, %s8561_s27, %s8562_s28  }
  0x5e   :  { %s8563_s1 = smov [#allocation5]   ;;  %s8490_s10 = sshra.s32 %s122_s22, 4  ;;  %s8491_s10 = int_to_ptr.hbm [resolvable:$true] %s8490_s10 }
  0x5f   :  { %s123_s2 = sshll.u32 %s8563_s1, 4  ;;  %s8492_s7 = scalar_lea.hbm %s8491_s10, 576  ;;  %s124_s2 = int_to_ptr.vmem [resolvable:$true] %s123_s2 }
  0x60   :  { %p8493_p5 = scmp.ne.s32.totalorder %s8491_s10, %s8492_s7  ;;  %s8494_s11 = scalar_lea.hbm %s8626_s29, 576 }
  0x61   :  { %p8495_p6 = scmp.lt.s32.totalorder %s8491_s10, %s8626_s29  ;;  %p8496_p7 = scmp.lt.s32.totalorder %s8494_s11, %s8492_s7 }
  0x63   :  { %p8497_p8 = por %p8496_p7, %p8495_p6 }
  0x65   :  { %p8498_p9 = pnand %p8497_p8, %p8493_p5 }
  0x67   :  { %8501 = shalt.err (!%p8498_p9)
}
  0x68   :  { %129 = dma.hbm_to_vmem [thread:$0]  %s122_s22, 9216, %s124_s2, [#allocation6], %s8561_s27, %s8561_s27, %s8562_s28  }
  0x69   :  { %8514 = dma.done.wait [#allocation4], 20736  }
  0x6a   :  { %8515 = vsyncadd [#allocation4], 4294946560 }
  0x6b   :  { %8516 = dma.done.wait [#allocation6], 9216  }
  0x6c   :  { %8517 = vsyncadd [#allocation6], 4294958080  ;;  %v208_v1 = vld [vmem:[%s8596_s5] sm:$0x3f]  ;;  %s8564_s21 = smov 126   ;;  %s8565_s29 = smov 127  }
  0x6d   :  { %v8815_v2 = vperm.slane %v208_v1, 0  ;;  %v8817_v3 = vperm.slane %v208_v1, 1  ;;  %v8823_v5 = vperm.slane %v208_v1, 2  ;;  %v8825_v6 = vperm.slane %v208_v1, 3  ;;  %s8566_s15 = smov 110   ;;  %s8567_s5 = smov 109  }
  0x6e   :  { %v8832_v8 = vperm.slane %v208_v1, 4  ;;  %v8834_v9 = vperm.slane %v208_v1, 5  ;;  %s8568_s16 = smov 108   ;;  %s8569_s18 = smov 92   ;;  %vm1098_vm0 = vcmask 1039360   ;;  %vm1122_vm1 = vcmask 1031168  }
  0x6f   :  { %v7167_v4 = vpack.i.bf16 %v8817_v3, %v8815_v2  ;;  %v7172_v7 = vpack.i.bf16 %v8825_v6, %v8823_v5  ;;  %s8570_s22 = smov 90   ;;  %s8571_s23 = smov 91   ;;  %vm12164_vm2 = vcmask 1040384   ;;  %vm12169_vm3 = vcmask 900096  }
  0x70   :  { %v7187_v10 = vpack.i.bf16 %v8834_v9, %v8832_v8  ;;  %vm12163_vm4 = vcmask 1041408   ;;  %vm12171_vm5 = vcmask 891904   ;;  %vm12162_vm6 = vcmask 1042432   ;;  %s8581_s26 = smov 120   ;;  %s8582_s0 = smov 115  }
  0x71   :  { %7168 = vrot.lane.b32.xlu1 %v7167_v4, %s8564_s21  ;;  %7158 = vrot.lane.b32.xlu0 %v7167_v4, %s8565_s29  ;;  %vm1194_vm7 = vcmask 883712   ;;  %vm12170_vm8 = vcmask 752640   ;;  %vm1293_vm9 = vcmask 1043456   ;;  %vm12168_vm10 = vcmask 744448   ;;  %s8583_s27 = smov 122   ;;  %s8584_s1 = smov 121  }
  0x72   :  { %7178 = vrot.lane.b32.xlu2 %v7167_v4, %s8566_s15  ;;  %vm12167_vm11 = vcmask 736256   ;;  %vm1300_vm12 = vcmask 1044480   ;;  %vm1307_vm13 = vcmask 1045504   ;;  %vm1314_vm14 = vcmask 1046528   ;;  %s8585_s2 = smov 114   ;;  %s12242_s10 = sld [smem:[#allocation13_spill]] }
  0x73   :  { %vm1326_vm15 = vcmask 72704   ;;  %s12243_s7 = sld [smem:[#allocation9_spill]] }
  0x74   :  { %s12244_s11 = sld [smem:[#allocation16_spill]] }
  0x79   :  { %7173 = vrot.lane.b32.xlu1 %v7172_v7, %s8564_s21  ;;  %7163 = vrot.lane.b32.xlu0 %v7172_v7, %s8565_s29 }
  0x7a   :  { %7183 = vrot.lane.b32.xlu2 %v7172_v7, %s8566_s15 }
  0x81   :  { %7193 = vrot.lane.b32.xlu1 %v7167_v4, %s8567_s5  ;;  %7188 = vrot.lane.b32.xlu0 %v7187_v10, %s8565_s29 }
  0x82   :  { %7198 = vrot.lane.b32.xlu2 %v7172_v7, %s8567_s5 }
  0x89   :  { %7208 = vrot.lane.b32.xlu1 %v7167_v4, %s8568_s16  ;;  %7203 = vrot.lane.b32.xlu0 %v7187_v10, %s8564_s21 }
  0x8a   :  { %7213 = vrot.lane.b32.xlu2 %v7172_v7, %s8568_s16 }
  0x91   :  { %7223 = vrot.lane.b32.xlu1 %v7167_v4, %s8569_s18  ;;  %7218 = vrot.lane.b32.xlu0 %v7187_v10, %s8566_s15 }
  0x92   :  { %7228 = vrot.lane.b32.xlu2 %v7172_v7, %s8569_s18 }
  0x99   :  { %1256 = vrot.lane.b32.xlu1 %v8817_v3, %s8570_s22  ;;  %1254 = vrot.lane.b32.xlu0 %v8815_v2, %s8570_s22 }
  0x9a   :  { %1258 = vrot.lane.b32.xlu2 %v8823_v5, %s8570_s22 }
  0xa1   :  { %7233 = vrot.lane.b32.xlu1 %v7187_v10, %s8567_s5  ;;  %1260 = vrot.lane.b32.xlu0 %v8825_v6, %s8570_s22 }
  0xa2   :  { %7238 = vrot.lane.b32.xlu2 %v7167_v4, %s8571_s23 }
  0xa9   :  { %7248 = vrot.lane.b32.xlu1 %v7187_v10, %s8568_s16  ;;  %7243 = vrot.lane.b32.xlu0 %v7172_v7, %s8571_s23 }
  0xaa   :  { %7253 = vrot.lane.b32.xlu2 %v7187_v10, %s8569_s18 }
  0xb1   :  { %1238 = vrot.lane.b32.xlu1 %v8832_v8, %s8571_s23  ;;  %1262 = vrot.lane.b32.xlu0 %v8832_v8, %s8570_s22 }
  0xb2   :  { %1264 = vrot.lane.b32.xlu2 %v8834_v9, %s8570_s22 }
  0xb9   :  { %1240 = vrot.lane.b32.xlu0 %v8834_v9, %s8571_s23 }
  0xcc   :  { %v8869_v11 = vpop.permute.xlu2 %7178 }
  0xcd   :  { %v7181_v30 = vunpack.i.h.bf16 %v8869_v11  ;;  %v7180_v31 = vunpack.i.l.bf16 %v8869_v11 }
  0xcf   :  { %v1147_v45 = vsel %vm12169_vm3, %v7180_v31, %v7181_v30  ;;  %v1072_v31 = vld [vmem:[%s8641_s14] sm:$0xff]  ;;  %s8575_s14 = smov 107  }
  0xd4   :  { %v8871_v12 = vpop.permute.xlu2 %7183 }
  0xd5   :  { %v7186_v57 = vunpack.i.h.bf16 %v8871_v12  ;;  %v7185_v58 = vunpack.i.l.bf16 %v8871_v12 }
  0xdc   :  { %v8873_v13 = vpop.permute.xlu2 %7198 }
  0xdd   :  { %v7201_v7 = vunpack.i.h.bf16 %v8873_v13  ;;  %v7200_v10 = vunpack.i.l.bf16 %v8873_v13 }
  0xe3   :  { %v8875_v14 = vpop.permute.xlu1 %7168  ;;  %v8877_v15 = vpop.permute.xlu0 %7158 }
  0xe4   :  { %v8879_v16 = vpop.permute.xlu2 %7213  ;;  %v7161_v23 = vunpack.i.h.bf16 %v8877_v15  ;;  %v7160_v24 = vunpack.i.l.bf16 %v8877_v15  ;;  %v7171_v27 = vunpack.i.h.bf16 %v8875_v14  ;;  %v7170_v28 = vunpack.i.l.bf16 %v8875_v14 }
  0xe5   :  { %v7215_v13 = vunpack.i.l.bf16 %v8879_v16 }
  0xe6   :  { %v1099_v29 = vsel %vm1098_vm0, %v7160_v24, %v7161_v23  ;;  %v1123_v32 = vsel %vm1122_vm1, %v7170_v28, %v7171_v27 }
  0xe7   :  { %v1273_v33 = vsel %vm12164_vm2, %v8815_v2, %v1099_v29  ;;  %v8972_v29 = vld [vmem:[%s8636_s8] sm:$0xff]  ;;  %s8573_s8 = smov 19  }
  0xe8   :  { %v1280_v46 = vsel %vm12163_vm4, %v1273_v33, %v1123_v32  ;;  %v7216_v32 = vunpack.i.h.bf16 %v8879_v16 }
  0xe9   :  { %v1287_v55 = vsel %vm12162_vm6, %v1280_v46, %v1147_v45 }
  0xeb   :  { %v8881_v17 = vpop.permute.xlu1 %7173  ;;  %v8883_v18 = vpop.permute.xlu0 %7163 }
  0xec   :  { %v8885_v19 = vpop.permute.xlu2 %7228  ;;  %v7166_v40 = vunpack.i.h.bf16 %v8883_v18  ;;  %v7165_v41 = vunpack.i.l.bf16 %v8883_v18  ;;  %v7176_v47 = vunpack.i.h.bf16 %v8881_v17  ;;  %v7175_v49 = vunpack.i.l.bf16 %v8881_v17 }
  0xee   :  { %v1101_v53 = vsel %vm1098_vm0, %v7165_v41, %v7166_v40  ;;  %v1125_v60 = vsel %vm1122_vm1, %v7175_v49, %v7176_v47  ;;  %v1100_v33 = vsel %vm1098_vm0, %v7161_v23, %v7165_v41  ;;  %v1124_v16 = vsel %vm1122_vm1, %v7171_v27, %v7175_v49 }
  0xef   :  { %v1275_v61 = vsel %vm12164_vm2, %v8823_v5, %v1101_v53  ;;  %v1149_v5 = vsel %vm12169_vm3, %v7185_v58, %v7186_v57  ;;  %v1274_v15 = vsel %vm12164_vm2, %v8817_v3, %v1100_v33  ;;  %v7231_v23 = vunpack.i.h.bf16 %v8885_v19 }
  0xf0   :  { %v1282_v28 = vsel %vm12163_vm4, %v1275_v61, %v1125_v60  ;;  %v7230_v41 = vunpack.i.l.bf16 %v8885_v19  ;;  %v1148_v3 = vsel %vm12169_vm3, %v7181_v30, %v7185_v58  ;;  %v1281_v49 = vsel %vm12163_vm4, %v1274_v15, %v1124_v16 }
  0xf1   :  { %v1288_v58 = vsel %vm12162_vm6, %v1281_v49, %v1148_v3 }
  0xf3   :  { %v8887_v20 = vpop.permute.xlu1 %7193  ;;  %v8889_v21 = vpop.permute.xlu0 %7188 }
  0xf4   :  { %v8891_v22 = vpop.permute.xlu2 %1258  ;;  %v7196_v34 = vunpack.i.h.bf16 %v8887_v20  ;;  %v7195_v35 = vunpack.i.l.bf16 %v8887_v20 }
  0xf6   :  { %v1171_v48 = vsel %vm12171_vm5, %v7195_v35, %v7196_v34  ;;  %v8572_v35 = vmov 0  }
  0xf7   :  { %v1294_v56 = vsel %vm1293_vm9, %v1287_v55, %v1171_v48  ;;  %7257 = vset.pattern.permute.xlu1 %v8572_v35  ;;  %7363 = vset.pattern.permute.xlu2 %v8572_v35  ;;  %v7190_v48 = vunpack.i.l.bf16 %v8889_v21  ;;  %v1172_v55 = vsel %vm12171_vm5, %v7196_v34, %v7200_v10 }
  0xf8   :  { %1323 = vperm.xlu1 %7257, %v1072_v31   ;;  %7469 = vset.pattern.permute.xlu0 %v8572_v35  ;;  %v1295_v17 = vsel %vm1293_vm9, %v1288_v58, %v1172_v55 }
  0xf9   :  { %v1102_v11 = vsel %vm1098_vm0, %v7166_v40, %v7190_v48 }
  0xfa   :  { %v1276_v34 = vsel %vm12164_vm2, %v8825_v6, %v1102_v11 }
  0xfb   :  { %v8895_v25 = vpop.permute.xlu1 %7208  ;;  %v8897_v26 = vpop.permute.xlu0 %7203 }
  0xfc   :  { %v7211_v36 = vunpack.i.h.bf16 %v8895_v25  ;;  %v7210_v37 = vunpack.i.l.bf16 %v8895_v25  ;;  %v8923_v44 = vpop.permute.xlu2 %7238  ;;  %v7205_v27 = vunpack.i.l.bf16 %v8897_v26  ;;  %v7206_v40 = vunpack.i.h.bf16 %v8897_v26 }
  0xfd   :  { %v7241_v50 = vunpack.i.h.bf16 %v8923_v44  ;;  %v7240_v51 = vunpack.i.l.bf16 %v8923_v44 }
  0xfe   :  { %v1195_v52 = vsel %vm1194_vm7, %v7210_v37, %v7211_v36  ;;  %v1173_v37 = vsel %vm12171_vm5, %v7200_v10, %v7201_v7  ;;  %v1126_v60 = vsel %vm1122_vm1, %v7176_v47, %v7205_v27  ;;  %v1196_v20 = vsel %vm1194_vm7, %v7211_v36, %v7215_v13 }
  0xff   :  { %v1301_v59 = vsel %vm1300_vm12, %v1294_v56, %v1195_v52  ;;  %v1243_v0 = vsel %vm12168_vm10, %v7240_v51, %v7241_v50  ;;  %v1197_v52 = vsel %vm1194_vm7, %v7215_v13, %v7216_v32  ;;  %v1127_v13 = vsel %vm1122_vm1, %v7205_v27, %v7206_v40 }
 0x103   :  { %v8915_v38 = vpop.permute.xlu1 %7223  ;;  %v8917_v39 = vpop.permute.xlu0 %7218 }
 0x104   :  { %v7226_v42 = vunpack.i.h.bf16 %v8915_v38  ;;  %v7225_v43 = vunpack.i.l.bf16 %v8915_v38  ;;  %v9004_v53 = vpop.permute.xlu2 %7253  ;;  %v7220_v30 = vunpack.i.l.bf16 %v8917_v39  ;;  %v7221_v6 = vunpack.i.h.bf16 %v8917_v39 }
 0x106   :  { %v1219_v54 = vsel %vm12170_vm8, %v7225_v43, %v7226_v42  ;;  %v1289_v43 = vsel %vm12162_vm6, %v1282_v28, %v1149_v5  ;;  %v1150_v25 = vsel %vm12169_vm3, %v7186_v57, %v7220_v30  ;;  %v1151_v33 = vsel %vm12169_vm3, %v7220_v30, %v7221_v6 }
 0x107   :  { %v1308_v1 = vsel %vm1307_vm13, %v1301_v59, %v1219_v54  ;;  %v1296_v14 = vsel %vm1293_vm9, %v1289_v43, %v1173_v37  ;;  %v7191_v59 = vunpack.i.h.bf16 %v8889_v21  ;;  %v1220_v21 = vsel %vm12170_vm8, %v7226_v42, %v7230_v41 }
 0x108   :  { %v1315_v24 = vsel %vm1314_vm14, %v1308_v1, %v1243_v0  ;;  %v1303_v54 = vsel %vm1300_vm12, %v1296_v14, %v1197_v52  ;;  %v1283_v0 = vsel %vm12163_vm4, %v1276_v34, %v1126_v60  ;;  %v1302_v1 = vsel %vm1300_vm12, %v1295_v17, %v1196_v20 }
 0x109   :  { %v1309_v42 = vsel %vm1307_vm13, %v1302_v1, %v1220_v21  ;;  %v1103_v5 = vsel %vm1098_vm0, %v7190_v48, %v7191_v59  ;;  %v1278_v28 = vsel %vm12164_vm2, %v8834_v9, %v7191_v59  ;;  %v209_v59 = vld [vmem:[%s8601_s9] sm:$0x3f]  ;;  %s8574_s9 = smov 11  }
 0x10a   :  { %v9104_v17 = vperm.slane %v209_v59, 1 }
 0x10b   :  { %v1257_v62 = vpop.permute.xlu1 %1256  ;;  %v1255_v63 = vpop.permute.xlu0 %1254 }
 0x10c   :  { %v1267_v2 = vsel %vm12167_vm11, %v1255_v63, %v1257_v62  ;;  %v1268_v4 = vsel %vm12167_vm11, %v1257_v62, %v8891_v22  ;;  %v1265_v10 = vpop.permute.xlu2 %1264  ;;  %12229 = vst [vmem:[#allocation35_spill] sm:$0xff] %v9104_v17 }
 0x10d   :  { %6957 = vmatpush.msk.msra.mxu0 %vm12164_vm2, %v1267_v2  ;;  %6959 = vmatpush.msk.msra.mxu1 %vm12164_vm2, %v1268_v4  ;;  %v7255_v2 = vunpack.i.l.bf16 %v9004_v53 }
 0x10f   :  { %1357 = vmatpush.msra.mxu0 %v1315_v24  ;;  %v1222_v43 = vsel %vm12170_vm8, %v7231_v23, %v7255_v2 }
 0x110   :  { %6958 = vmatmul.msk.f32.vlgmr.msra.gmra.mxu0 %vm1326_vm15, %v8972_v29 }
 0x113   :  { %v8991_v45 = vpop.permute.xlu1 %7233  ;;  %v1261_v46 = vpop.permute.xlu0 %1260 }
 0x114   :  { %v1269_v51 = vsel %vm12167_vm11, %v8891_v22, %v1261_v46  ;;  %v1221_v22 = vsel %vm12170_vm8, %v7230_v41, %v7231_v23  ;;  %v7235_v56 = vunpack.i.l.bf16 %v8991_v45 }
 0x115   :  { %6961 = vmatpush.msk.msra.mxu2 %vm12164_vm2, %v1269_v51  ;;  %v1310_v18 = vsel %vm1307_vm13, %v1303_v54, %v1221_v22 }
 0x116   :  { %v1174_v26 = vsel %vm12171_vm5, %v7201_v7, %v7235_v56  ;;  %v1290_v7 = vsel %vm12162_vm6, %v1283_v0, %v1150_v25 }
 0x117   :  { %v1297_v44 = vsel %vm1293_vm9, %v1290_v7, %v1174_v26 }
 0x11b   :  { %v7249_v61 = vpop.permute.xlu1 %7248  ;;  %v7244_v62 = vpop.permute.xlu0 %7243 }
 0x11c   :  { %v7250_v36 = vunpack.i.l.bf16 %v7249_v61  ;;  %v7246_v47 = vunpack.i.h.bf16 %v7244_v62  ;;  %v7245_v63 = vunpack.i.l.bf16 %v7244_v62  ;;  %v7251_v31 = vunpack.i.h.bf16 %v7249_v61 }
 0x11e   :  { %v1244_v38 = vsel %vm12168_vm10, %v7241_v50, %v7245_v63  ;;  %v1245_v12 = vsel %vm12168_vm10, %v7245_v63, %v7246_v47  ;;  %v1198_v57 = vsel %vm1194_vm7, %v7216_v32, %v7250_v36  ;;  %v7236_v50 = vunpack.i.h.bf16 %v8991_v45 }
 0x11f   :  { %v1316_v4 = vsel %vm1314_vm14, %v1309_v42, %v1244_v38  ;;  %v1317_v39 = vsel %vm1314_vm14, %v1310_v18, %v1245_v12  ;;  %v1304_v24 = vsel %vm1300_vm12, %v1297_v44, %v1198_v57  ;;  %v1277_v32 = vsel %vm12164_vm2, %v8832_v8, %v1103_v5 }
 0x120   :  { %1377 = vmatpush.msra.mxu1 %v1316_v4  ;;  %1397 = vmatpush.msra.mxu2 %v1317_v39  ;;  %v1311_v15 = vsel %vm1307_vm13, %v1304_v24, %v1222_v43  ;;  %v1285_v8 = vsel %vm12163_vm4, %v1278_v28, %v7206_v40  ;;  %v7256_v45 = vunpack.i.h.bf16 %v9004_v53  ;;  %v1175_v48 = vsel %vm12171_vm5, %v7235_v56, %v7236_v50 }
 0x121   :  { %6962 = vmatmul.msk.f32.vlgmr.msra.gmra.mxu2 %vm1326_vm15, %v8972_v29  ;;  %6960 = vmatmul.msk.f32.vlgmr.msra.gmra.mxu1 %vm1326_vm15, %v8972_v29  ;;  %v1284_v23 = vsel %vm12163_vm4, %v1277_v32, %v1127_v13  ;;  %v1199_v51 = vsel %vm1194_vm7, %v7250_v36, %v7251_v31  ;;  %v9100_v18 = vperm.slane %v209_v59, 0  ;;  %v9110_v57 = vperm.slane %v209_v59, 5 }
 0x122   :  { %6967 = vmatpush.msk.msrb.mxu1 %vm12164_vm2, %v1265_v10  ;;  %v1291_v14 = vsel %vm12162_vm6, %v1284_v23, %v1151_v33  ;;  %v1223_v49 = vsel %vm12170_vm8, %v7255_v2, %v7256_v45  ;;  %v9113_v4 = vperm.slane %v209_v59, 4  ;;  %v9115_v5 = vperm.slane %v209_v59, 3 }
 0x123   :  { %v1239_v35 = vpop.permute.xlu1 %1238  ;;  %v1263_v37 = vpop.permute.xlu0 %1262  ;;  %v1298_v27 = vsel %vm1293_vm9, %v1291_v14, %v1175_v48  ;;  %12228 = vst [vmem:[#allocation34_spill] sm:$0xff] %v9100_v18  ;;  %vm2652_vm4 = vcmask 867328  }
 0x124   :  { %v1270_v16 = vsel %vm12167_vm11, %v1261_v46, %v1263_v37  ;;  %v1246_v9 = vsel %vm12168_vm10, %v7246_v47, %v1239_v35  ;;  %v1271_v41 = vsel %vm12167_vm11, %v1263_v37, %v1265_v10  ;;  %v1292_v46 = vsel %vm12162_vm6, %v1285_v8, %v7221_v6  ;;  %12231 = vst [vmem:[#allocation37_spill] sm:$0xff] %v9110_v57 }
 0x125   :  { %6963 = vmatpush.msk.msra.mxu3 %vm12164_vm2, %v1270_v16  ;;  %v1318_v19 = vsel %vm1314_vm14, %v1311_v15, %v1246_v9  ;;  %6965 = vmatpush.msk.msrb.mxu0 %vm12164_vm2, %v1271_v41  ;;  %v1299_v52 = vsel %vm1293_vm9, %v1292_v46, %v7236_v50  ;;  %v1305_v53 = vsel %vm1300_vm12, %v1298_v27, %v1199_v51  ;;  %vm12166_vm9 = vcmask 154624  }
 0x126   :  { %v1306_v3 = vsel %vm1300_vm12, %v1299_v52, %v7251_v31  ;;  %v1312_v30 = vsel %vm1307_vm13, %v1305_v53, %v1223_v49  ;;  %12232 = vst [vmem:[#allocation38_spill] sm:$0xff] %v9113_v4  ;;  %vm12165_vm12 = vcmask 220160   ;;  %vm2587_vm6 = vcmask 678912  }
 0x127   :  { %1417 = vmatpush.msra.mxu3 %v1318_v19  ;;  %v1313_v54 = vsel %vm1307_vm13, %v1306_v3, %v7256_v45  ;;  %12233 = vst [vmem:[#allocation39_spill] sm:$0xff] %v9115_v5  ;;  %vm9252_vm13 = vmneg %vm12166_vm9  ;;  %vm2644_vm2 = vcmask 875520  }
 0x128   :  { %6964 = vmatmul.msk.f32.vlgmr.msra.gmra.mxu3 %vm1326_vm15, %v8972_v29 }
 0x12b   :  { %v1241_v22 = vpop.permute.xlu0 %1240 }
 0x12c   :  { %v1320_v55 = vsel %vm1314_vm14, %v1313_v54, %v1241_v22  ;;  %v1247_v11 = vsel %vm12168_vm10, %v1239_v35, %v1241_v22 }
 0x12d   :  { %1457 = vmatpush.msrb.mxu1 %v1320_v55  ;;  %v1319_v56 = vsel %vm1314_vm14, %v1312_v30, %v1247_v11  ;;  %vm12199_vm14 = vcmask 588800  }
 0x12e   :  { %1437 = vmatpush.msrb.mxu0 %v1319_v56  ;;  %6968 = vmatmul.msk.f32.vlgmr.msrb.gmra.mxu1 %vm1326_vm15, %v8972_v29 }
 0x12f   :  { %6966 = vmatmul.msk.f32.vlgmr.msrb.gmra.mxu0 %vm1326_vm15, %v8972_v29  ;;  %v9106_v29 = vperm.slane %v209_v59, 2  ;;  %vm2333_vm15 = vcmask 64512  }
 0x131   :  { %12230 = vst [vmem:[#allocation36_spill] sm:$0xff] %v9106_v29 }
 0x16a   :  { %v1324_v58 = vpop.permute.xlu1 %1323 }
 0x18d   :  { %v1359_v60 = vpop.f32.mrf.mxu0 }
 0x18e   :  { %v1360_v20 = vadd.f32 %v1359_v60, %v1324_v58 }
 0x190   :  { %v1462_v34 = vmax.f32 %v1360_v20, 0.0 }
 0x192   :  { %v1481_v40 = vmul.f32 %v9100_v18, %v1462_v34 }
 0x194   :  { %1493 = vrot.lane.b32.xlu2 %v1481_v40, %s8573_s8 }
 0x19e   :  { %v1379_v61 = vpop.f32.mrf.mxu1 }
 0x19f   :  { %v1380_v62 = vadd.f32 %v1379_v61, %v1324_v58 }
 0x1a1   :  { %v1463_v21 = vmax.f32 %v1380_v62, 0.0 }
 0x1a3   :  { %v1482_v47 = vmul.f32 %v9104_v17, %v1463_v21 }
 0x1a4   :  { %v1399_v25 = vpop.f32.mrf.mxu2 }
 0x1a5   :  { %v1400_v36 = vadd.f32 %v1399_v25, %v1324_v58 }
 0x1a7   :  { %v1464_v63 = vmax.f32 %v1400_v36, 0.0 }
 0x1a9   :  { %v1483_v0 = vmul.f32 %v9106_v29, %v1464_v63 }
 0x1ab   :  { %v1419_v6 = vpop.f32.mrf.mxu3  ;;  %v1459_v26 = vpop.f32.mrf.mxu1  ;;  %v7258_v1 = vpack.i.bf16 %v1483_v0, %v1482_v47 }
 0x1ac   :  { %v1420_v38 = vadd.f32 %v1419_v6, %v1324_v58  ;;  %v1460_v42 = vadd.f32 %v1459_v26, %v1324_v58  ;;  %v1439_v12 = vpop.f32.mrf.mxu0 }
 0x1ad   :  { %v1440_v2 = vadd.f32 %v1439_v12, %v1324_v58  ;;  %7259 = vrot.lane.b32.xlu0 %v7258_v1, %s8573_s8 }
 0x1ae   :  { %v1467_v39 = vmax.f32 %v1460_v42, 0.0  ;;  %v1465_v7 = vmax.f32 %v1420_v38, 0.0 }
 0x1af   :  { %v1466_v10 = vmax.f32 %v1440_v2, 0.0 }
 0x1b0   :  { %v1486_v44 = vmul.f32 %v9110_v57, %v1467_v39  ;;  %v1484_v24 = vmul.f32 %v9115_v5, %v1465_v7 }
 0x1b1   :  { %v1485_v50 = vmul.f32 %v9113_v4, %v1466_v10 }
 0x1b2   :  { %1503 = vrot.lane.b32.xlu2 %v1486_v44, %s8573_s8 }
 0x1b3   :  { %1501 = vrot.lane.b32.xlu1 %v1485_v50, %s8573_s8 }
 0x1b5   :  { %1499 = vrot.lane.b32.xlu0 %v1484_v24, %s8573_s8 }
 0x1ee   :  { %v9123_v28 = vpop.permute.xlu2 %1493 }
 0x1ef   :  { %v1517_v13 = vsel %vm12166_vm9, 0.0, %v9123_v28 }
 0x20c   :  { %v1504_v8 = vpop.permute.xlu2 %1503 }
 0x21f   :  { %v7260_v31 = vpop.permute.xlu0 %7259 }
 0x220   :  { %v7261_v32 = vunpack.i.l.bf16 %v7260_v31  ;;  %v7262_v37 = vunpack.i.h.bf16 %v7260_v31  ;;  %v9257_v31 = vld [vmem:[%s8646_s19] sm:$0xff]  ;;  %s8576_s19 = smov 106  }
 0x222   :  { %v9129_v33 = vsel %vm12166_vm9, %v9123_v28, %v7261_v32  ;;  %v9139_v15 = vsel %vm12166_vm9, %v7261_v32, %v7262_v37 }
 0x223   :  { %v7273_v35 = vpack.i.bf16 %v9129_v33, %v1517_v13 }
 0x225   :  { %7274 = vrot.lane.b32.xlu0 %v7273_v35, %s8569_s18  ;;  %7269 = vrot.lane.b32.xlu2 %v7273_v35, %s8571_s23  ;;  %v1502_v43 = vpop.permute.xlu1 %1501 }
 0x226   :  { %7264 = vrot.lane.b32.xlu1 %v7273_v35, %s8570_s22  ;;  %v9147_v45 = vsel %vm12166_vm9, %v1502_v43, %v1504_v8 }
 0x227   :  { %v1500_v16 = vpop.permute.xlu0 %1499  ;;  %v1519_v48 = vsel %vm12165_vm12, %v9147_v45, 0.0 }
 0x228   :  { %v9136_v9 = vsel %vm12166_vm9, %v1500_v16, %v1502_v43  ;;  %v9155_v19 = vsel %vm12166_vm9, %v7262_v37, %v1500_v16 }
 0x229   :  { %v7308_v41 = vpack.i.bf16 %v9136_v9, %v9139_v15  ;;  %v7343_v23 = vpack.i.bf16 %v9155_v19, %v1519_v48 }
 0x22d   :  { %7309 = vrot.lane.b32.xlu0 %v7308_v41, %s8571_s23  ;;  %7279 = vrot.lane.b32.xlu2 %v7273_v35, %s8568_s16 }
 0x22e   :  { %7284 = vrot.lane.b32.xlu1 %v7273_v35, %s8567_s5 }
 0x235   :  { %7314 = vrot.lane.b32.xlu0 %v7308_v41, %s8569_s18  ;;  %7334 = vrot.lane.b32.xlu2 %v7308_v41, %s8564_s21 }
 0x236   :  { %7289 = vrot.lane.b32.xlu1 %v7273_v35, %s8566_s15 }
 0x23d   :  { %7319 = vrot.lane.b32.xlu0 %v7308_v41, %s8568_s16  ;;  %7344 = vrot.lane.b32.xlu2 %v7343_v23, %s8570_s22 }
 0x23e   :  { %7294 = vrot.lane.b32.xlu1 %v7273_v35, %s8564_s21 }
 0x245   :  { %7324 = vrot.lane.b32.xlu0 %v7308_v41, %s8567_s5  ;;  %7349 = vrot.lane.b32.xlu2 %v7343_v23, %s8571_s23 }
 0x246   :  { %7299 = vrot.lane.b32.xlu1 %v7273_v35, %s8565_s29 }
 0x24d   :  { %7329 = vrot.lane.b32.xlu0 %v7308_v41, %s8566_s15  ;;  %7354 = vrot.lane.b32.xlu2 %v7343_v23, %s8569_s18 }
 0x24e   :  { %7304 = vrot.lane.b32.xlu1 %v7308_v41, %s8570_s22 }
 0x255   :  { %1580 = vrot.lane.b32.xlu0 %v1519_v48, %s8566_s15  ;;  %7359 = vrot.lane.b32.xlu2 %v7343_v23, %s8568_s16 }
 0x256   :  { %7339 = vrot.lane.b32.xlu1 %v7308_v41, %s8565_s29 }
 0x25d   :  { %1534 = vrot.lane.b32.xlu0 %v1519_v48, %s8565_s29  ;;  %1557 = vrot.lane.b32.xlu2 %v1519_v48, %s8564_s21 }
 0x25e   :  { %1603 = vrot.lane.b32.xlu1 %v1519_v48, %s8567_s5 }
 0x265   :  { %1553 = vrot.lane.b32.xlu0 %v9155_v19, %s8564_s21  ;;  %1576 = vrot.lane.b32.xlu2 %v9155_v19, %s8566_s15 }
 0x266   :  { %1599 = vrot.lane.b32.xlu1 %v9155_v19, %s8567_s5 }
 0x26e   :  { %1530 = vrot.lane.b32.xlu1 %v9155_v19, %s8565_s29 }
 0x27f   :  { %v9181_v46 = vpop.permute.xlu2 %7269 }
 0x280   :  { %v7272_v3 = vunpack.i.h.bf16 %v9181_v46  ;;  %v7271_v27 = vunpack.i.l.bf16 %v9181_v46 }
 0x282   :  { %v1674_v58 = vsel %vm12168_vm10, %v7271_v27, %v7272_v3 }
 0x287   :  { %v9183_v51 = vpop.permute.xlu2 %7279 }
 0x288   :  { %v7282_v30 = vunpack.i.h.bf16 %v9183_v51  ;;  %v7281_v56 = vunpack.i.l.bf16 %v9183_v51 }
 0x28a   :  { %v1628_v61 = vsel %vm1194_vm7, %v7281_v56, %v7282_v30 }
 0x28f   :  { %v9193_v22 = vpop.permute.xlu2 %7334 }
 0x290   :  { %v7336_v51 = vunpack.i.l.bf16 %v9193_v22 }
 0x297   :  { %v9185_v52 = vpop.permute.xlu0 %7274  ;;  %v9218_v21 = vpop.permute.xlu2 %7344 }
 0x298   :  { %v9187_v14 = vpop.permute.xlu1 %7264  ;;  %v7277_v54 = vunpack.i.h.bf16 %v9185_v52  ;;  %v7276_v55 = vunpack.i.l.bf16 %v9185_v52  ;;  %v7347_v13 = vunpack.i.h.bf16 %v9218_v21  ;;  %v7346_v35 = vunpack.i.l.bf16 %v9218_v21 }
 0x299   :  { %v7267_v49 = vunpack.i.h.bf16 %v9187_v14  ;;  %v7266_v53 = vunpack.i.l.bf16 %v9187_v14 }
 0x29a   :  { %v1651_v60 = vsel %vm12170_vm8, %v7276_v55, %v7277_v54 }
 0x29b   :  { %v1697_v11 = vsel %vm12167_vm11, %v7266_v53, %v7267_v49 }
 0x29c   :  { %1724 = vmatpush.msrb.mxu2 %v1697_v11 }
 0x29e   :  { %1725 = vmatpush.msrb.mxu2 %v1674_v58 }
 0x29f   :  { %v9203_v59 = vpop.permute.xlu0 %7309  ;;  %v9229_v6 = vpop.permute.xlu2 %7349 }
 0x2a0   :  { %v9208_v20 = vpop.permute.xlu1 %7284  ;;  %1726 = vmatpush.msrb.mxu2 %v1651_v60  ;;  %v7311_v43 = vunpack.i.l.bf16 %v9203_v59  ;;  %v7352_v16 = vunpack.i.h.bf16 %v9229_v6  ;;  %v7312_v48 = vunpack.i.h.bf16 %v9203_v59 }
 0x2a1   :  { %v7287_v34 = vunpack.i.h.bf16 %v9208_v20  ;;  %v7286_v40 = vunpack.i.l.bf16 %v9208_v20 }
 0x2a2   :  { %1727 = vmatpush.msrb.mxu2 %v1628_v61  ;;  %v1676_v61 = vsel %vm12168_vm10, %v7311_v43, %v7352_v16 }
 0x2a3   :  { %v1605_v62 = vsel %vm12171_vm5, %v7286_v40, %v7287_v34 }
 0x2a4   :  { %1728 = vmatpush.msrb.mxu2 %v1605_v62 }
 0x2a7   :  { %v9220_v25 = vpop.permute.xlu0 %7314  ;;  %v9242_v39 = vpop.permute.xlu2 %7354 }
 0x2a8   :  { %v9222_v36 = vpop.permute.xlu1 %7289  ;;  %v7316_v23 = vunpack.i.l.bf16 %v9220_v25  ;;  %v7357_v14 = vunpack.i.h.bf16 %v9242_v39  ;;  %v7317_v58 = vunpack.i.h.bf16 %v9220_v25  ;;  %v7356_v59 = vunpack.i.l.bf16 %v9242_v39 }
 0x2a9   :  { %v7292_v47 = vunpack.i.h.bf16 %v9222_v36  ;;  %v7291_v63 = vunpack.i.l.bf16 %v9222_v36 }
 0x2ab   :  { %v1582_v0 = vsel %vm12169_vm3, %v7291_v63, %v7292_v47  ;;  %v1677_v63 = vsel %vm12168_vm10, %v7352_v16, %v7312_v48 }
 0x2ac   :  { %1729 = vmatpush.msrb.mxu2 %v1582_v0 }
 0x2af   :  { %v9231_v26 = vpop.permute.xlu0 %7319  ;;  %v9274_v27 = vpop.permute.xlu2 %7359 }
 0x2b0   :  { %v9233_v1 = vpop.permute.xlu1 %7294  ;;  %v7321_v60 = vunpack.i.l.bf16 %v9231_v26  ;;  %v7362_v40 = vunpack.i.h.bf16 %v9274_v27  ;;  %v7322_v62 = vunpack.i.h.bf16 %v9231_v26  ;;  %v7361_v25 = vunpack.i.l.bf16 %v9274_v27 }
 0x2b1   :  { %v7297_v38 = vunpack.i.h.bf16 %v9233_v1  ;;  %v7296_v42 = vunpack.i.l.bf16 %v9233_v1  ;;  %v1653_v26 = vsel %vm12170_vm8, %v7316_v23, %v7357_v14 }
 0x2b2   :  { %v1629_v52 = vsel %vm1194_vm7, %v7282_v30, %v7321_v60  ;;  %v1632_v16 = vsel %vm1194_vm7, %v7322_v62, %v7361_v25 }
 0x2b3   :  { %v1559_v12 = vsel %vm1122_vm1, %v7296_v42, %v7297_v38  ;;  %v1560_v20 = vsel %vm1122_vm1, %v7297_v38, %v7336_v51 }
 0x2b4   :  { %1730 = vmatpush.msrb.mxu2 %v1559_v12 }
 0x2b7   :  { %v9240_v2 = vpop.permute.xlu0 %7324 }
 0x2b8   :  { %v9244_v7 = vpop.permute.xlu1 %7299  ;;  %v7326_v42 = vunpack.i.l.bf16 %v9240_v2 }
 0x2b9   :  { %v7302_v10 = vunpack.i.h.bf16 %v9244_v7  ;;  %v7301_v44 = vunpack.i.l.bf16 %v9244_v7 }
 0x2bb   :  { %v1536_v50 = vsel %vm1098_vm0, %v7301_v44, %v7302_v10  ;;  %v1654_v44 = vsel %vm12170_vm8, %v7357_v14, %v7317_v58 }
 0x2bc   :  { %1731 = vmatpush.msrb.mxu2 %v1536_v50  ;;  %v1655_v50 = vsel %vm12170_vm8, %v7317_v58, %v7356_v59 }
 0x2be   :  { %6970 = vmatpush.msk.msrb.mxu2 %vm9252_vm13, %v9123_v28  ;;  %v7351_v28 = vunpack.i.l.bf16 %v9229_v6 }
 0x2bf   :  { %v9262_v32 = vpop.permute.xlu0 %7329  ;;  %6971 = vmatmul.msk.f32.vlgmr.msrb.gmra.mxu2 %vm12199_vm14, %v9257_v31 }
 0x2c0   :  { %v7305_v37 = vpop.permute.xlu1 %7304  ;;  %v1678_v0 = vsel %vm12168_vm10, %v7312_v48, %v7351_v28  ;;  %v7327_v48 = vunpack.i.h.bf16 %v9240_v2 }
 0x2c1   :  { %v7307_v41 = vunpack.i.h.bf16 %v7305_v37  ;;  %v7306_v8 = vunpack.i.l.bf16 %v7305_v37  ;;  %v1521_v37 = vld [vmem:[%s8651_s24] sm:$0xff]  ;;  %s8577_s24 = smov 118  }
 0x2c2   :  { %1710 = vperm.xlu2 %7363, %v1521_v37  }
 0x2c3   :  { %v1698_v53 = vsel %vm12167_vm11, %v7267_v49, %v7306_v8  ;;  %v1699_v55 = vsel %vm12167_vm11, %v7306_v8, %v7347_v13  ;;  %v1700_v11 = vsel %vm12167_vm11, %v7347_v13, %v7307_v41  ;;  %v1701_v56 = vsel %vm12167_vm11, %v7307_v41, %v7346_v35 }
 0x2c4   :  { %1744 = vmatpush.msrb.mxu3 %v1698_v53  ;;  %1764 = vmatpush.msra.mxu0 %v1699_v55  ;;  %v1675_v49 = vsel %vm12168_vm10, %v7272_v3, %v7311_v43  ;;  %v1652_v3 = vsel %vm12170_vm8, %v7277_v54, %v7316_v23  ;;  %v7331_v13 = vunpack.i.l.bf16 %v9262_v32  ;;  %v1630_v54 = vsel %vm1194_vm7, %v7321_v60, %v7362_v40  ;;  %v1558_v23 = vpop.permute.xlu2 %1557 }
 0x2c5   :  { %1784 = vmatpush.msra.mxu1 %v1700_v11  ;;  %1804 = vmatpush.msra.mxu2 %v1701_v56  ;;  %v1631_v43 = vsel %vm1194_vm7, %v7362_v40, %v7322_v62  ;;  %v1606_v41 = vsel %vm12171_vm5, %v7287_v34, %v7326_v42  ;;  %v7332_v53 = vunpack.i.h.bf16 %v9262_v32 }
 0x2c6   :  { %1745 = vmatpush.msrb.mxu3 %v1675_v49  ;;  %1765 = vmatpush.msra.mxu0 %v1676_v61  ;;  %v1583_v8 = vsel %vm12169_vm3, %v7292_v47, %v7331_v13  ;;  %v7337_v47 = vunpack.i.h.bf16 %v9193_v22 }
 0x2c7   :  { %1785 = vmatpush.msra.mxu1 %v1677_v63  ;;  %1805 = vmatpush.msra.mxu2 %v1678_v0  ;;  %v9297_v46 = vpop.permute.xlu0 %1580 }
 0x2c8   :  { %v9303_v12 = vpop.permute.xlu1 %7339  ;;  %1746 = vmatpush.msrb.mxu3 %v1652_v3  ;;  %1766 = vmatpush.msra.mxu0 %v1653_v26  ;;  %v1586_v1 = vsel %vm12169_vm3, %v7332_v53, %v9297_v46  ;;  %v1563_v2 = vsel %vm1122_vm1, %v7337_v47, %v1558_v23 }
 0x2c9   :  { %1786 = vmatpush.msra.mxu1 %v1654_v44  ;;  %1806 = vmatpush.msra.mxu2 %v1655_v50  ;;  %v7341_v30 = vunpack.i.l.bf16 %v9303_v12  ;;  %v7342_v38 = vunpack.i.h.bf16 %v9303_v12 }
 0x2ca   :  { %1747 = vmatpush.msrb.mxu3 %v1629_v52  ;;  %1767 = vmatpush.msra.mxu0 %v1630_v54 }
 0x2cb   :  { %1787 = vmatpush.msra.mxu1 %v1631_v43  ;;  %1807 = vmatpush.msra.mxu2 %v1632_v16  ;;  %v1537_v55 = vsel %vm1098_vm0, %v7302_v10, %v7341_v30 }
 0x2cc   :  { %1748 = vmatpush.msrb.mxu3 %v1606_v41  ;;  %v1577_v10 = vpop.permute.xlu2 %1576 }
 0x2cd   :  { %v1584_v6 = vsel %vm12169_vm3, %v7331_v13, %v1577_v10  ;;  %v1585_v39 = vsel %vm12169_vm3, %v1577_v10, %v7332_v53 }
 0x2ce   :  { %1749 = vmatpush.msrb.mxu3 %v1583_v8 }
 0x2cf   :  { %v1535_v14 = vpop.permute.xlu0 %1534 }
 0x2d0   :  { %v1604_v34 = vpop.permute.xlu1 %1603  ;;  %1750 = vmatpush.msrb.mxu3 %v1560_v20  ;;  %v1540_v22 = vsel %vm1098_vm0, %v7342_v38, %v1535_v14 }
 0x2d1   :  { %v1609_v36 = vsel %vm12171_vm5, %v7327_v48, %v1604_v34 }
 0x2d2   :  { %1751 = vmatpush.msrb.mxu3 %v1537_v55  ;;  %1808 = vmatpush.msra.mxu2 %v1609_v36 }
 0x2d4   :  { %1752 = vmatpush.msrb.mxu3 %v9129_v33  ;;  %1809 = vmatpush.msra.mxu2 %v1586_v1 }
 0x2d5   :  { %6972 = vmatmul.msk.f32.vlgmr.msrb.gmra.mxu3 %vm12199_vm14, %v9257_v31 }
 0x2d6   :  { %1824 = vmatpush.msra.mxu3 %v7346_v35  ;;  %1810 = vmatpush.msra.mxu2 %v1563_v2 }
 0x2d7   :  { %v1554_v32 = vpop.permute.xlu0 %1553 }
 0x2d8   :  { %1825 = vmatpush.msra.mxu3 %v7351_v28  ;;  %v1600_v7 = vpop.permute.xlu1 %1599  ;;  %1811 = vmatpush.msra.mxu2 %v1540_v22  ;;  %v1561_v35 = vsel %vm1122_vm1, %v7336_v51, %v1554_v32  ;;  %v1562_v28 = vsel %vm1122_vm1, %v1554_v32, %v7337_v47 }
 0x2d9   :  { %v1607_v33 = vsel %vm12171_vm5, %v7326_v42, %v1600_v7  ;;  %v1608_v21 = vsel %vm12171_vm5, %v1600_v7, %v7327_v48 }
 0x2da   :  { %1826 = vmatpush.msra.mxu3 %v7356_v59  ;;  %1768 = vmatpush.msra.mxu0 %v1607_v33 }
 0x2db   :  { %1788 = vmatpush.msra.mxu1 %v1608_v21  ;;  %1812 = vmatpush.msra.mxu2 %v9136_v9 }
 0x2dc   :  { %1827 = vmatpush.msra.mxu3 %v7361_v25  ;;  %6975 = vmatmul.msk.f32.vlgmr.msra.gmra.mxu2 %vm12199_vm14, %v9257_v31 }
 0x2dd   :  { %1769 = vmatpush.msra.mxu0 %v1584_v6  ;;  %1789 = vmatpush.msra.mxu1 %v1585_v39 }
 0x2de   :  { %1828 = vmatpush.msra.mxu3 %v1604_v34 }
 0x2df   :  { %1770 = vmatpush.msra.mxu0 %v1561_v35  ;;  %1790 = vmatpush.msra.mxu1 %v1562_v28 }
 0x2e0   :  { %1829 = vmatpush.msra.mxu3 %v9297_v46  ;;  %v1531_v9 = vpop.permute.xlu1 %1530 }
 0x2e1   :  { %v1538_v27 = vsel %vm1098_vm0, %v7341_v30, %v1531_v9  ;;  %v1539_v11 = vsel %vm1098_vm0, %v1531_v9, %v7342_v38 }
 0x2e2   :  { %1830 = vmatpush.msra.mxu3 %v1558_v23  ;;  %1771 = vmatpush.msra.mxu0 %v1538_v27 }
 0x2e3   :  { %1791 = vmatpush.msra.mxu1 %v1539_v11 }
 0x2e4   :  { %1831 = vmatpush.msra.mxu3 %v1535_v14  ;;  %1772 = vmatpush.msra.mxu0 %v9139_v15 }
 0x2e5   :  { %1792 = vmatpush.msra.mxu1 %v9155_v19  ;;  %6973 = vmatmul.msk.f32.vlgmr.msra.gmra.mxu0 %vm12199_vm14, %v9257_v31 }
 0x2e6   :  { %6974 = vmatmul.msk.f32.vlgmr.msra.gmra.mxu1 %vm12199_vm14, %v9257_v31  ;;  %6976 = vmatpush.msk.msra.mxu3 %vm12165_vm12, %v9147_v45 }
 0x2e7   :  { %6977 = vmatmul.msk.f32.vlgmr.msra.gmra.mxu3 %vm12199_vm14, %v9257_v31 }
 0x31c   :  { %v1711_v56 = vpop.permute.xlu2 %1710 }
 0x342   :  { %v1734_v58 = vpop.f32.mrf.mxu2 }
 0x343   :  { %v1735_v59 = vadd.f32 %v1734_v58, %v1711_v56 }
 0x345   :  { %v1837_v60 = vmax.f32 %v1735_v59, 0.0 }
 0x347   :  { %v1843_v15 = vmul.f32 %v1837_v60, %v9100_v18 }
 0x349   :  { %1855 = vrot.lane.b32.xlu0 %v1843_v15, %s8573_s8 }
 0x358   :  { %v1754_v19 = vpop.f32.mrf.mxu3 }
 0x359   :  { %v1755_v40 = vadd.f32 %v1754_v19, %v1711_v56 }
 0x35b   :  { %v1838_v62 = vmax.f32 %v1755_v40, 0.0 }
 0x35d   :  { %v1844_v46 = vmul.f32 %v1838_v62, %v9104_v17 }
 0x35f   :  { %v1814_v49 = vpop.f32.mrf.mxu2 }
 0x360   :  { %v1815_v61 = vadd.f32 %v1814_v49, %v1711_v56 }
 0x362   :  { %v1841_v25 = vmax.f32 %v1815_v61, 0.0  ;;  %v1774_v63 = vpop.f32.mrf.mxu0 }
 0x363   :  { %v1794_v0 = vpop.f32.mrf.mxu1  ;;  %v1775_v45 = vadd.f32 %v1774_v63, %v1711_v56 }
 0x364   :  { %v1795_v42 = vadd.f32 %v1794_v0, %v1711_v56  ;;  %v1847_v31 = vmul.f32 %v1841_v25, %v9113_v4 }
 0x365   :  { %v1839_v3 = vmax.f32 %v1775_v45, 0.0 }
 0x366   :  { %v1840_v26 = vmax.f32 %v1795_v42, 0.0  ;;  %1863 = vrot.lane.b32.xlu0 %v1847_v31, %s8573_s8 }
 0x367   :  { %v1845_v12 = vmul.f32 %v1839_v3, %v9106_v29 }
 0x368   :  { %v1846_v44 = vmul.f32 %v1840_v26, %v9115_v5 }
 0x369   :  { %v7364_v50 = vpack.i.bf16 %v1845_v12, %v1844_v46 }
 0x36a   :  { %1861 = vrot.lane.b32.xlu2 %v1846_v44, %s8573_s8  ;;  %v1834_v13 = vpop.f32.mrf.mxu3 }
 0x36b   :  { %v1835_v52 = vadd.f32 %v1834_v13, %v1711_v56  ;;  %7365 = vrot.lane.b32.xlu1 %v7364_v50, %s8573_s8 }
 0x36d   :  { %v1842_v54 = vmax.f32 %v1835_v52, 0.0 }
 0x36f   :  { %v1848_v37 = vmul.f32 %v1842_v54, %v9110_v57 }
 0x373   :  { %1865 = vrot.lane.b32.xlu1 %v1848_v37, %s8573_s8 }
 0x3bb   :  { %v9386_v16 = vpop.permute.xlu0 %1855 }
 0x3bc   :  { %v1878_v8 = vsel %vm12166_vm9, 0.0, %v9386_v16 }
 0x3c4   :  { %v1862_v30 = vpop.permute.xlu2 %1861 }
 0x3d8   :  { %v1864_v53 = vpop.permute.xlu0 %1863 }
 0x3d9   :  { %v9407_v55 = vsel %vm12166_vm9, %v1862_v30, %v1864_v53 }
 0x3dd   :  { %v7366_v43 = vpop.permute.xlu1 %7365 }
 0x3de   :  { %v7368_v41 = vunpack.i.h.bf16 %v7366_v43  ;;  %v7367_v51 = vunpack.i.l.bf16 %v7366_v43 }
 0x3e0   :  { %v9391_v48 = vsel %vm12166_vm9, %v7368_v41, %v1862_v30  ;;  %v9395_v23 = vsel %vm12166_vm9, %v9386_v16, %v7367_v51  ;;  %v9398_v20 = vsel %vm12166_vm9, %v7367_v51, %v7368_v41 }
 0x3e1   :  { %v7379_v14 = vpack.i.bf16 %v9391_v48, %v9398_v20  ;;  %v7374_v34 = vpack.i.bf16 %v9395_v23, %v1878_v8 }
 0x3e3   :  { %7380 = vrot.lane.b32.xlu1 %v7379_v14, %s8570_s22  ;;  %7375 = vrot.lane.b32.xlu0 %v7374_v34, %s8571_s23 }
 0x3e4   :  { %7370 = vrot.lane.b32.xlu2 %v7374_v34, %s8570_s22 }
 0x3e5   :  { %v1866_v36 = vpop.permute.xlu1 %1865 }
 0x3e6   :  { %v9420_v47 = vsel %vm12166_vm9, %v1864_v53, %v1866_v36 }
 0x3e7   :  { %v1879_v1 = vsel %vm12165_vm12, %v9420_v47, 0.0 }
 0x3e8   :  { %v7449_v38 = vpack.i.bf16 %v1879_v1, %v9407_v55 }
 0x3eb   :  { %7390 = vrot.lane.b32.xlu1 %v7379_v14, %s8571_s23  ;;  %7385 = vrot.lane.b32.xlu0 %v7374_v34, %s8569_s18 }
 0x3ec   :  { %1961 = vrot.lane.b32.xlu2 %v9407_v55, %s8567_s5 }
 0x3f3   :  { %7400 = vrot.lane.b32.xlu1 %v7379_v14, %s8569_s18  ;;  %7395 = vrot.lane.b32.xlu0 %v7374_v34, %s8568_s16 }
 0x3f4   :  { %1938 = vrot.lane.b32.xlu2 %v9407_v55, %s8566_s15 }
 0x3fb   :  { %7410 = vrot.lane.b32.xlu1 %v7379_v14, %s8568_s16  ;;  %7405 = vrot.lane.b32.xlu0 %v7374_v34, %s8567_s5 }
 0x3fc   :  { %1915 = vrot.lane.b32.xlu2 %v9407_v55, %s8564_s21 }
 0x403   :  { %7420 = vrot.lane.b32.xlu1 %v7379_v14, %s8567_s5  ;;  %7415 = vrot.lane.b32.xlu0 %v7374_v34, %s8566_s15 }
 0x404   :  { %7450 = vrot.lane.b32.xlu2 %v7449_v38, %s8570_s22 }
 0x40b   :  { %7430 = vrot.lane.b32.xlu1 %v7379_v14, %s8566_s15  ;;  %7425 = vrot.lane.b32.xlu0 %v7374_v34, %s8564_s21 }
 0x40c   :  { %7455 = vrot.lane.b32.xlu2 %v7449_v38, %s8571_s23 }
 0x413   :  { %7440 = vrot.lane.b32.xlu1 %v7379_v14, %s8564_s21  ;;  %7435 = vrot.lane.b32.xlu0 %v7374_v34, %s8565_s29 }
 0x414   :  { %7460 = vrot.lane.b32.xlu2 %v7449_v38, %s8569_s18 }
 0x41b   :  { %7445 = vrot.lane.b32.xlu0 %v7379_v14, %s8565_s29  ;;  %1892 = vrot.lane.b32.xlu1 %v9407_v55, %s8565_s29 }
 0x41c   :  { %7465 = vrot.lane.b32.xlu2 %v7449_v38, %s8568_s16 }
 0x423   :  { %1940 = vrot.lane.b32.xlu0 %v1879_v1, %s8566_s15  ;;  %1917 = vrot.lane.b32.xlu1 %v1879_v1, %s8564_s21 }
 0x424   :  { %1963 = vrot.lane.b32.xlu2 %v1879_v1, %s8567_s5 }
 0x42c   :  { %1894 = vrot.lane.b32.xlu2 %v1879_v1, %s8565_s29 }
 0x43e   :  { %v7371_v2 = vpop.permute.xlu2 %7370 }
 0x43f   :  { %v7373_v22 = vunpack.i.h.bf16 %v7371_v2  ;;  %v7372_v7 = vunpack.i.l.bf16 %v7371_v2 }
 0x441   :  { %v2057_v33 = vsel %vm12167_vm11, %v7372_v7, %v7373_v22 }
 0x442   :  { %2083 = vmatpush.msrb.mxu0 %v2057_v33 }
 0x446   :  { %v9445_v21 = vpop.permute.xlu2 %1961 }
 0x44e   :  { %v9447_v10 = vpop.permute.xlu2 %1938 }
 0x455   :  { %v7381_v32 = vpop.permute.xlu1 %7380  ;;  %v7376_v6 = vpop.permute.xlu0 %7375 }
 0x456   :  { %v7383_v39 = vunpack.i.h.bf16 %v7381_v32  ;;  %v7382_v35 = vunpack.i.l.bf16 %v7381_v32  ;;  %v9449_v28 = vpop.permute.xlu2 %1915  ;;  %v7378_v9 = vunpack.i.h.bf16 %v7376_v6  ;;  %v7377_v27 = vunpack.i.l.bf16 %v7376_v6 }
 0x458   :  { %v2034_v11 = vsel %vm12168_vm10, %v7377_v27, %v7378_v9  ;;  %v2058_v56 = vsel %vm12167_vm11, %v7373_v22, %v7382_v35  ;;  %v2059_v58 = vsel %vm12167_vm11, %v7382_v35, %v7383_v39 }
 0x459   :  { %2084 = vmatpush.msrb.mxu0 %v2034_v11  ;;  %2103 = vmatpush.msrb.mxu1 %v2058_v56 }
 0x45a   :  { %2123 = vmatpush.msrb.mxu2 %v2059_v58 }
 0x45d   :  { %v7391_v59 = vpop.permute.xlu1 %7390  ;;  %v7386_v60 = vpop.permute.xlu0 %7385 }
 0x45e   :  { %v7393_v15 = vunpack.i.h.bf16 %v7391_v59  ;;  %v7392_v19 = vunpack.i.l.bf16 %v7391_v59  ;;  %v9454_v40 = vpop.permute.xlu2 %7450  ;;  %v7388_v49 = vunpack.i.h.bf16 %v7386_v60  ;;  %v7387_v61 = vunpack.i.l.bf16 %v7386_v60  ;;  %v1881_v59 = vld [vmem:[%s8661_s6] sm:$0xff]  ;;  %s8579_s6 = smov 116  }
 0x45f   :  { %v7452_v62 = vunpack.i.l.bf16 %v9454_v40  ;;  %2070 = vperm.xlu0 %7469, %v1881_v59  }
 0x460   :  { %v2011_v25 = vsel %vm12170_vm8, %v7387_v61, %v7388_v49  ;;  %v2035_v63 = vsel %vm12168_vm10, %v7378_v9, %v7392_v19  ;;  %v2036_v0 = vsel %vm12168_vm10, %v7392_v19, %v7393_v15 }
 0x461   :  { %2085 = vmatpush.msrb.mxu0 %v2011_v25  ;;  %2104 = vmatpush.msrb.mxu1 %v2035_v63  ;;  %v2060_v45 = vsel %vm12167_vm11, %v7383_v39, %v7452_v62 }
 0x462   :  { %2124 = vmatpush.msrb.mxu2 %v2036_v0  ;;  %2143 = vmatpush.msrb.mxu3 %v2060_v45 }
 0x465   :  { %v7401_v42 = vpop.permute.xlu1 %7400  ;;  %v7396_v31 = vpop.permute.xlu0 %7395 }
 0x466   :  { %v7403_v46 = vunpack.i.h.bf16 %v7401_v42  ;;  %v7402_v3 = vunpack.i.l.bf16 %v7401_v42  ;;  %v9463_v26 = vpop.permute.xlu2 %7455  ;;  %v7398_v12 = vunpack.i.h.bf16 %v7396_v31  ;;  %v7397_v44 = vunpack.i.l.bf16 %v7396_v31 }
 0x467   :  { %v7457_v50 = vunpack.i.l.bf16 %v9463_v26 }
 0x468   :  { %v1988_v13 = vsel %vm1194_vm7, %v7397_v44, %v7398_v12  ;;  %v2012_v52 = vsel %vm12170_vm8, %v7388_v49, %v7402_v3  ;;  %v2013_v54 = vsel %vm12170_vm8, %v7402_v3, %v7403_v46 }
 0x469   :  { %2086 = vmatpush.msrb.mxu0 %v1988_v13  ;;  %2105 = vmatpush.msrb.mxu1 %v2012_v52  ;;  %v2037_v37 = vsel %vm12168_vm10, %v7393_v15, %v7457_v50 }
 0x46a   :  { %2125 = vmatpush.msrb.mxu2 %v2013_v54  ;;  %2144 = vmatpush.msrb.mxu3 %v2037_v37  ;;  %v7453_v54 = vunpack.i.h.bf16 %v9454_v40 }
 0x46d   :  { %v7411_v43 = vpop.permute.xlu1 %7410  ;;  %v7406_v41 = vpop.permute.xlu0 %7405 }
 0x46e   :  { %v7413_v51 = vunpack.i.h.bf16 %v7411_v43  ;;  %v7412_v30 = vunpack.i.l.bf16 %v7411_v43  ;;  %v9472_v8 = vpop.permute.xlu2 %7460  ;;  %v7408_v14 = vunpack.i.h.bf16 %v7406_v41  ;;  %v7407_v34 = vunpack.i.l.bf16 %v7406_v41 }
 0x46f   :  { %v7462_v53 = vunpack.i.l.bf16 %v9472_v8 }
 0x470   :  { %v1965_v36 = vsel %vm12171_vm5, %v7407_v34, %v7408_v14  ;;  %v1989_v1 = vsel %vm1194_vm7, %v7398_v12, %v7412_v30  ;;  %v1990_v38 = vsel %vm1194_vm7, %v7412_v30, %v7413_v51  ;;  %v1880_v30 = vld [vmem:[%s8656_s30] sm:$0xff]  ;;  %v7463_v34 = vunpack.i.h.bf16 %v9472_v8  ;;  %s8578_s30 = smov 117  }
 0x471   :  { %2087 = vmatpush.msrb.mxu0 %v1965_v36  ;;  %2106 = vmatpush.msrb.mxu1 %v1989_v1  ;;  %v2014_v2 = vsel %vm12170_vm8, %v7403_v46, %v7462_v53  ;;  %v2061_v36 = vsel %vm12167_vm11, %v7452_v62, %v7453_v54  ;;  %vm2613_vm11 = vcmask 965632  }
 0x472   :  { %2126 = vmatpush.msrb.mxu2 %v1990_v38  ;;  %2145 = vmatpush.msrb.mxu3 %v2014_v2 }
 0x475   :  { %v7421_v22 = vpop.permute.xlu1 %7420  ;;  %v7416_v7 = vpop.permute.xlu0 %7415 }
 0x476   :  { %v7423_v33 = vunpack.i.h.bf16 %v7421_v22  ;;  %v7422_v32 = vunpack.i.l.bf16 %v7421_v22  ;;  %v9481_v6 = vpop.permute.xlu2 %7465  ;;  %v7418_v39 = vunpack.i.h.bf16 %v7416_v7  ;;  %v7417_v35 = vunpack.i.l.bf16 %v7416_v7 }
 0x477   :  { %v7467_v9 = vunpack.i.l.bf16 %v9481_v6  ;;  %v7468_v2 = vunpack.i.h.bf16 %v9481_v6 }
 0x478   :  { %v1942_v27 = vsel %vm12169_vm3, %v7417_v35, %v7418_v39  ;;  %v1966_v11 = vsel %vm12171_vm5, %v7408_v14, %v7422_v32  ;;  %v1967_v56 = vsel %vm12171_vm5, %v7422_v32, %v7423_v33  ;;  %v1968_v60 = vsel %vm12171_vm5, %v7423_v33, %v9445_v21 }
 0x479   :  { %2088 = vmatpush.msrb.mxu0 %v1942_v27  ;;  %2107 = vmatpush.msrb.mxu1 %v1966_v11  ;;  %v1991_v58 = vsel %vm1194_vm7, %v7413_v51, %v7467_v9  ;;  %v7458_v14 = vunpack.i.h.bf16 %v9463_v26  ;;  %v2015_v32 = vsel %vm12170_vm8, %v7462_v53, %v7463_v34  ;;  %v1992_v26 = vsel %vm1194_vm7, %v7467_v9, %v7468_v2 }
 0x47a   :  { %2127 = vmatpush.msrb.mxu2 %v1967_v56  ;;  %2146 = vmatpush.msrb.mxu3 %v1991_v58  ;;  %vm3132_vm8 = vcmask 56320  }
 0x47b   :  { %v2038_v33 = vsel %vm12168_vm10, %v7457_v50, %v7458_v14 }
 0x47c   :  { %2147 = vmatpush.msrb.mxu3 %v1968_v60 }
 0x47d   :  { %v7431_v15 = vpop.permute.xlu1 %7430  ;;  %v7426_v19 = vpop.permute.xlu0 %7425 }
 0x47e   :  { %v7433_v49 = vunpack.i.h.bf16 %v7431_v15  ;;  %v7432_v61 = vunpack.i.l.bf16 %v7431_v15  ;;  %v7428_v25 = vunpack.i.h.bf16 %v7426_v19  ;;  %v7427_v63 = vunpack.i.l.bf16 %v7426_v19 }
 0x480   :  { %v1919_v0 = vsel %vm1122_vm1, %v7427_v63, %v7428_v25  ;;  %v1943_v45 = vsel %vm12169_vm3, %v7418_v39, %v7432_v61  ;;  %v1944_v42 = vsel %vm12169_vm3, %v7432_v61, %v7433_v49  ;;  %v1945_v31 = vsel %vm12169_vm3, %v7433_v49, %v9447_v10 }
 0x481   :  { %2089 = vmatpush.msrb.mxu0 %v1919_v0  ;;  %2108 = vmatpush.msrb.mxu1 %v1943_v45 }
 0x482   :  { %2128 = vmatpush.msrb.mxu2 %v1944_v42  ;;  %2148 = vmatpush.msrb.mxu3 %v1945_v31 }
 0x485   :  { %v7441_v46 = vpop.permute.xlu1 %7440  ;;  %v7436_v3 = vpop.permute.xlu0 %7435 }
 0x486   :  { %v7443_v12 = vunpack.i.h.bf16 %v7441_v46  ;;  %v7442_v44 = vunpack.i.l.bf16 %v7441_v46  ;;  %v7438_v13 = vunpack.i.h.bf16 %v7436_v3  ;;  %v7437_v52 = vunpack.i.l.bf16 %v7436_v3 }
 0x488   :  { %v1896_v37 = vsel %vm1098_vm0, %v7437_v52, %v7438_v13  ;;  %v1920_v43 = vsel %vm1122_vm1, %v7428_v25, %v7442_v44  ;;  %v1921_v41 = vsel %vm1122_vm1, %v7442_v44, %v7443_v12  ;;  %v1922_v51 = vsel %vm1122_vm1, %v7443_v12, %v9449_v28 }
 0x489   :  { %2090 = vmatpush.msrb.mxu0 %v1896_v37  ;;  %2109 = vmatpush.msrb.mxu1 %v1920_v43 }
 0x48a   :  { %2129 = vmatpush.msrb.mxu2 %v1921_v41  ;;  %2149 = vmatpush.msrb.mxu3 %v1922_v51 }
 0x48b   :  { %6979 = vmatpush.msk.msrb.mxu0 %vm9252_vm13, %v9386_v16  ;;  %v1964_v16 = vpop.permute.xlu2 %1963 }
 0x48c   :  { %6980 = vmatmul.msk.f32.vlgmr.msrb.gmra.mxu0 %vm12199_vm14, %v1880_v30  ;;  %v1969_v50 = vsel %vm12171_vm5, %v9445_v21, %v1964_v16 }
 0x48d   :  { %2163 = vmatpush.msra.mxu0 %v2061_v36  ;;  %v1893_v1 = vpop.permute.xlu1 %1892  ;;  %v7446_v38 = vpop.permute.xlu0 %7445 }
 0x48e   :  { %v7448_v22 = vunpack.i.h.bf16 %v7446_v38  ;;  %v7447_v7 = vunpack.i.l.bf16 %v7446_v38 }
 0x48f   :  { %2164 = vmatpush.msra.mxu0 %v2038_v33 }
 0x490   :  { %v1897_v40 = vsel %vm1098_vm0, %v7438_v13, %v7447_v7  ;;  %v1898_v62 = vsel %vm1098_vm0, %v7447_v7, %v7448_v22  ;;  %v1899_v39 = vsel %vm1098_vm0, %v7448_v22, %v1893_v1 }
 0x491   :  { %2165 = vmatpush.msra.mxu0 %v2015_v32  ;;  %2110 = vmatpush.msrb.mxu1 %v1897_v40 }
 0x492   :  { %2130 = vmatpush.msrb.mxu2 %v1898_v62  ;;  %2150 = vmatpush.msrb.mxu3 %v1899_v39 }
 0x493   :  { %2166 = vmatpush.msra.mxu0 %v1992_v26  ;;  %2111 = vmatpush.msrb.mxu1 %v9395_v23  ;;  %v1895_v23 = vpop.permute.xlu2 %1894 }
 0x494   :  { %2131 = vmatpush.msrb.mxu2 %v9398_v20  ;;  %2151 = vmatpush.msrb.mxu3 %v9391_v48  ;;  %v1900_v20 = vsel %vm1098_vm0, %v1893_v1, %v1895_v23 }
 0x495   :  { %6981 = vmatmul.msk.f32.vlgmr.msrb.gmra.mxu1 %vm12199_vm14, %v1880_v30  ;;  %6982 = vmatmul.msk.f32.vlgmr.msrb.gmra.mxu2 %vm12199_vm14, %v1880_v30  ;;  %v1941_v8 = vpop.permute.xlu0 %1940  ;;  %v1918_v53 = vpop.permute.xlu1 %1917 }
 0x496   :  { %6983 = vmatmul.msk.f32.vlgmr.msrb.gmra.mxu3 %vm12199_vm14, %v1880_v30  ;;  %2167 = vmatpush.msra.mxu0 %v1969_v50  ;;  %v1946_v6 = vsel %vm12169_vm3, %v9447_v10, %v1941_v8  ;;  %v1923_v48 = vsel %vm1122_vm1, %v9449_v28, %v1918_v53 }
 0x497   :  { %2183 = vmatpush.msra.mxu1 %v7453_v54 }
 0x498   :  { %2168 = vmatpush.msra.mxu0 %v1946_v6 }
 0x499   :  { %2184 = vmatpush.msra.mxu1 %v7458_v14 }
 0x49a   :  { %2169 = vmatpush.msra.mxu0 %v1923_v48 }
 0x49b   :  { %2185 = vmatpush.msra.mxu1 %v7463_v34 }
 0x49c   :  { %2170 = vmatpush.msra.mxu0 %v1900_v20 }
 0x49d   :  { %2186 = vmatpush.msra.mxu1 %v7468_v2 }
 0x49e   :  { %2171 = vmatpush.msra.mxu0 %v9407_v55 }
 0x49f   :  { %2187 = vmatpush.msra.mxu1 %v1964_v16  ;;  %6984 = vmatmul.msk.f32.vlgmr.msra.gmra.mxu0 %vm12199_vm14, %v1880_v30 }
 0x4a1   :  { %2188 = vmatpush.msra.mxu1 %v1941_v8 }
 0x4a3   :  { %2189 = vmatpush.msra.mxu1 %v1918_v53 }
 0x4a5   :  { %2190 = vmatpush.msra.mxu1 %v1895_v23 }
 0x4a7   :  { %6985 = vmatpush.msk.msra.mxu1 %vm12165_vm12, %v9420_v47 }
 0x4a8   :  { %6986 = vmatmul.msk.f32.vlgmr.msra.gmra.mxu1 %vm12199_vm14, %v1880_v30 }
 0x4d1   :  { %v2071_v21 = vpop.permute.xlu0 %2070 }
 0x509   :  { %v2093_v10 = vpop.f32.mrf.mxu0 }
 0x50a   :  { %v2094_v28 = vadd.f32 %v2093_v10, %v2071_v21 }
 0x50c   :  { %v2196_v35 = vmax.f32 %v2094_v28, 0.0 }
 0x50e   :  { %v2202_v9 = vmul.f32 %v2196_v35, %v9100_v18 }
 0x510   :  { %2214 = vrot.lane.b32.xlu1 %v2202_v9, %s8573_s8 }
 0x512   :  { %v2113_v55 = vpop.f32.mrf.mxu1 }
 0x513   :  { %v2114_v27 = vadd.f32 %v2113_v55, %v2071_v21 }
 0x515   :  { %v2197_v56 = vmax.f32 %v2114_v27, 0.0 }
 0x517   :  { %v2203_v49 = vmul.f32 %v2197_v56, %v9104_v17  ;;  %v306_v56 = vld [vmem:[#allocation3 + $0x2f0] sm:$0xff] }
 0x518   :  { %v2133_v11 = vpop.f32.mrf.mxu2  ;;  %2376 = vmatpush.msrb.mxu0 %v306_v56  ;;  %v288_v56 = vld [vmem:[#allocation3 + $0x260] sm:$0xff] }
 0x519   :  { %v2134_v58 = vadd.f32 %v2133_v11, %v2071_v21  ;;  %v2153_v59 = vpop.f32.mrf.mxu3  ;;  %v242_v11 = vld [vmem:[#allocation3 + $0xf0] sm:$0xff] }
 0x51a   :  { %v2154_v60 = vadd.f32 %v2153_v59, %v2071_v21  ;;  %2336 = vmatpush.msra.mxu2 %v242_v11  ;;  %v304_v59 = vld [vmem:[#allocation3 + $0x2e0] sm:$0xff]  ;;  %v270_v11 = vld [vmem:[#allocation3 + $0x1d0] sm:$0xff] }
 0x51b   :  { %v2198_v15 = vmax.f32 %v2134_v58, 0.0  ;;  %v240_v58 = vld [vmem:[#allocation3 + $0xe0] sm:$0xff]  ;;  %2377 = vmatpush.msrb.mxu0 %v304_v59  ;;  %v222_v59 = vld [vmem:[#allocation3 + $0x50] sm:$0xff] }
 0x51c   :  { %v2199_v19 = vmax.f32 %v2154_v60, 0.0  ;;  %v2173_v47 = vpop.f32.mrf.mxu0  ;;  %2337 = vmatpush.msra.mxu2 %v240_v58  ;;  %v328_v58 = vld [vmem:[#allocation3 + $0x3a0] sm:$0xff] }
 0x51d   :  { %v2204_v61 = vmul.f32 %v2198_v15, %v9106_v29  ;;  %v2174_v63 = vadd.f32 %v2173_v47, %v2071_v21  ;;  %v302_v47 = vld [vmem:[#allocation3 + $0x2d0] sm:$0xff] }
 0x51e   :  { %v2205_v25 = vmul.f32 %v2199_v19, %v9115_v5  ;;  %v238_v19 = vld [vmem:[#allocation3 + $0xd0] sm:$0xff]  ;;  %2378 = vmatpush.msrb.mxu0 %v302_v47  ;;  %v220_v47 = vld [vmem:[#allocation3 + $0x40] sm:$0xff] }
 0x51f   :  { %v7470_v0 = vpack.i.bf16 %v2204_v61, %v2203_v49  ;;  %v2200_v45 = vmax.f32 %v2174_v63, 0.0  ;;  %v236_v49 = vld [vmem:[#allocation3 + $0xc0] sm:$0xff]  ;;  %2338 = vmatpush.msra.mxu2 %v238_v19  ;;  %v326_v19 = vld [vmem:[#allocation3 + $0x390] sm:$0xff] }
 0x520   :  { %2220 = vrot.lane.b32.xlu1 %v2205_v25, %s8573_s8  ;;  %v300_v61 = vld [vmem:[#allocation3 + $0x2c0] sm:$0xff] }
 0x521   :  { %7471 = vrot.lane.b32.xlu2 %v7470_v0, %s8573_s8  ;;  %v2206_v46 = vmul.f32 %v2200_v45, %v9113_v4  ;;  %2339 = vmatpush.msra.mxu2 %v236_v49  ;;  %v268_v49 = vld [vmem:[#allocation3 + $0x1c0] sm:$0xff] }
 0x522   :  { %2379 = vmatpush.msrb.mxu0 %v300_v61  ;;  %v284_v61 = vld [vmem:[#allocation3 + $0x240] sm:$0xff] }
 0x525   :  { %v2193_v42 = vpop.f32.mrf.mxu1 }
 0x526   :  { %v2194_v31 = vadd.f32 %v2193_v42, %v2071_v21  ;;  %v234_v42 = vld [vmem:[#allocation3 + $0xb0] sm:$0xff] }
 0x527   :  { %2340 = vmatpush.msra.mxu2 %v234_v42  ;;  %v266_v42 = vld [vmem:[#allocation3 + $0x1b0] sm:$0xff] }
 0x528   :  { %v2201_v3 = vmax.f32 %v2194_v31, 0.0  ;;  %v298_v31 = vld [vmem:[#allocation3 + $0x2b0] sm:$0xff] }
 0x529   :  { %2222 = vrot.lane.b32.xlu2 %v2206_v46, %s8573_s8  ;;  %2380 = vmatpush.msrb.mxu0 %v298_v31  ;;  %v282_v31 = vld [vmem:[#allocation3 + $0x230] sm:$0xff] }
 0x52a   :  { %v2207_v12 = vmul.f32 %v2201_v3, %v9110_v57 }
 0x52c   :  { %2224 = vrot.lane.b32.xlu0 %v2207_v12, %s8573_s8  ;;  %v232_v12 = vld [vmem:[#allocation3 + $0xa0] sm:$0xff] }
 0x52d   :  { %2341 = vmatpush.msra.mxu2 %v232_v12  ;;  %v280_v12 = vld [vmem:[#allocation3 + $0x220] sm:$0xff] }
 0x57b   :  { %v7472_v44 = vpop.permute.xlu2 %7471 }
 0x57c   :  { %v7474_v13 = vunpack.i.h.bf16 %v7472_v44  ;;  %v7473_v52 = vunpack.i.l.bf16 %v7472_v44  ;;  %v338_v44 = vld [vmem:[#allocation3 + $0x3f0] sm:$0xff] }
 0x57d   :  { %2396 = vmatpush.msrb.mxu1 %v338_v44  ;;  %v320_v44 = vld [vmem:[#allocation3 + $0x360] sm:$0xff] }
 0x57e   :  { %v9559_v37 = vsel %vm12166_vm9, %v7473_v52, %v7474_v13 }
 0x582   :  { %v9556_v54 = vpop.permute.xlu1 %2214 }
 0x583   :  { %v9563_v43 = vsel %vm12166_vm9, %v9556_v54, %v7473_v52  ;;  %v9567_v41 = vsel %vm12166_vm9, 0.0, %v9556_v54  ;;  %v2223_v30 = vpop.permute.xlu2 %2222 }
 0x584   :  { %2241 = vrot.lane.b32.xlu0 %v9567_v41, %s8565_s29  ;;  %v7475_v51 = vpack.i.bf16 %v9559_v37, %v9563_v43 }
 0x586   :  { %7476 = vrot.lane.b32.xlu1 %v7475_v51, %s8565_s29 }
 0x592   :  { %v2221_v14 = vpop.permute.xlu1 %2220 }
 0x593   :  { %v9575_v34 = vsel %vm12166_vm9, %v7474_v13, %v2221_v14  ;;  %v9578_v36 = vsel %vm12166_vm9, %v2221_v14, %v2223_v30  ;;  %v336_v14 = vld [vmem:[#allocation3 + $0x3e0] sm:$0xff] }
 0x594   :  { %v9582_v1 = vpack.i.bf16 %v9578_v36, %v9575_v34  ;;  %2397 = vmatpush.msrb.mxu1 %v336_v14 }
 0x596   :  { %7481 = vrot.lane.b32.xlu2 %v9582_v1, %s8565_s29 }
 0x59e   :  { %v2225_v38 = vpop.permute.xlu0 %2224 }
 0x59f   :  { %v9587_v2 = vsel %vm12166_vm9, %v2223_v30, %v2225_v38  ;;  %v296_v30 = vld [vmem:[#allocation3 + $0x2a0] sm:$0xff]  ;;  %v230_v38 = vld [vmem:[#allocation3 + $0x90] sm:$0xff]  ;;  %vm12172_vm9 = vcmask 957440  }
 0x5a0   :  { %12236 = vst [vmem:[#allocation40_spill] sm:$0xff] %v9587_v2  ;;  %v9591_v22 = vsel %vm12165_vm12, %v9587_v2, 0.0  ;;  %2381 = vmatpush.msrb.mxu0 %v296_v30  ;;  %2342 = vmatpush.msra.mxu2 %v230_v38  ;;  %v318_v30 = vld [vmem:[#allocation3 + $0x350] sm:$0xff]  ;;  %v212_v38 = vld [vmem:[#allocation3] sm:$0xff]  ;;  %vm2629_vm12 = vcmask 949248  }
 0x5a1   :  { %2251 = vrot.lane.b32.xlu1 %v9591_v22, %s8565_s29 }
 0x5f0   :  { %v7482_v7 = vpop.permute.xlu2 %7481 }
 0x5f1   :  { %v7484_v33 = vunpack.i.h.bf16 %v7482_v7  ;;  %v7483_v16 = vunpack.i.l.bf16 %v7482_v7 }
 0x5f3   :  { %v9596_v39 = vsel %vm1098_vm0, %v7483_v16, %v7484_v33 }
 0x5f4   :  { %v9615_v20 = vmax.f32 %v9575_v34, %v9596_v39 }
 0x5f6   :  { %v2242_v26 = vpop.permute.xlu0 %2241 }
 0x5f8   :  { %v7477_v32 = vpop.permute.xlu1 %7476 }
 0x5f9   :  { %v7479_v40 = vunpack.i.h.bf16 %v7477_v32  ;;  %v7478_v62 = vunpack.i.l.bf16 %v7477_v32  ;;  %v228_v32 = vld [vmem:[#allocation3 + $0x80] sm:$0xff] }
 0x5fa   :  { %2343 = vmatpush.msra.mxu2 %v228_v32 }
 0x5fb   :  { %v9599_v50 = vsel %vm1098_vm0, %v7478_v62, %v7479_v40  ;;  %v9602_v8 = vsel %vm1098_vm0, %v7479_v40, %v7483_v16  ;;  %v9605_v53 = vsel %vm1098_vm0, %v2242_v26, %v7478_v62  ;;  %v334_v16 = vld [vmem:[#allocation3 + $0x3d0] sm:$0xff]  ;;  %v292_v62 = vld [vmem:[#allocation3 + $0x280] sm:$0xff] }
 0x5fc   :  { %v2265_v6 = vmax.f32 %v9563_v43, %v9599_v50  ;;  %v2266_v48 = vmax.f32 %v9559_v37, %v9602_v8  ;;  %v2264_v23 = vmax.f32 %v9567_v41, %v9605_v53  ;;  %v274_v40 = vld [vmem:[#allocation3 + $0x1f0] sm:$0xff]  ;;  %v332_v26 = vld [vmem:[#allocation3 + $0x3c0] sm:$0xff]  ;;  %2398 = vmatpush.msrb.mxu1 %v334_v16 }
 0x5fd   :  { %2356 = vmatpush.msra.mxu3 %v274_v40 }
 0x5fe   :  { %v7485_v21 = vpack.i.bf16 %v2266_v48, %v2265_v6  ;;  %v7490_v10 = vpack.i.bf16 %v2264_v23, %v9615_v20  ;;  %2399 = vmatpush.msrb.mxu1 %v332_v26  ;;  %v370_v26 = vld [vmem:[#allocation3 + $0x4f0] sm:$0xff] }
 0x600   :  { %7486 = vrot.lane.b32.xlu2 %v7485_v21, %s8566_s15  ;;  %7491 = vrot.lane.b32.xlu0 %v7490_v10, %s8566_s15  ;;  %v330_v21 = vld [vmem:[#allocation3 + $0x3b0] sm:$0xff] }
 0x601   :  { %2400 = vmatpush.msrb.mxu1 %v330_v21  ;;  %v256_v21 = vld [vmem:[#allocation3 + $0x160] sm:$0xff] }
 0x603   :  { %2401 = vmatpush.msrb.mxu1 %v328_v58  ;;  %v237_v58 = vld [vmem:[#allocation3 + $0xc8] sm:$0xff] }
 0x605   :  { %2402 = vmatpush.msrb.mxu1 %v326_v19  ;;  %v360_v19 = vld [vmem:[#allocation3 + $0x4a0] sm:$0xff] }
 0x613   :  { %v9620_v28 = vpop.permute.xlu1 %2251 }
 0x614   :  { %v9624_v35 = vmax.f32 %v9591_v22, %v9620_v28  ;;  %v9628_v9 = vsel %vm1098_vm0, %v7484_v33, %v9620_v28  ;;  %v294_v33 = vld [vmem:[#allocation3 + $0x290] sm:$0xff] }
 0x615   :  { %v9632_v55 = vmax.f32 %v9578_v36, %v9628_v9  ;;  %2382 = vmatpush.msrb.mxu0 %v294_v33 }
 0x616   :  { %2286 = vrot.lane.b32.xlu2 %v9624_v35, %s8566_s15 }
 0x617   :  { %2284 = vrot.lane.b32.xlu1 %v9632_v55, %s8566_s15  ;;  %2383 = vmatpush.msrb.mxu0 %v292_v62  ;;  %v276_v62 = vld [vmem:[#allocation3 + $0x200] sm:$0xff] }
 0x65a   :  { %v7487_v27 = vpop.permute.xlu2 %7486 }
 0x65b   :  { %v7489_v60 = vunpack.i.h.bf16 %v7487_v27  ;;  %v7488_v15 = vunpack.i.l.bf16 %v7487_v27  ;;  %v224_v27 = vld [vmem:[#allocation3 + $0x60] sm:$0xff] }
 0x65d   :  { %v2289_v45 = vsel %vm12169_vm3, %v7488_v15, %v7489_v60 }
 0x65e   :  { %v2300_v52 = vmax.f32 %v2265_v6, %v2289_v45  ;;  %v226_v6 = vld [vmem:[#allocation3 + $0x70] sm:$0xff] }
 0x65f   :  { %2344 = vmatpush.msra.mxu2 %v226_v6  ;;  %v218_v45 = vld [vmem:[#allocation3 + $0x30] sm:$0xff]  ;;  %v243_v6 = vld [vmem:[#allocation3 + $0xf8] sm:$0xff] }
 0x661   :  { %2345 = vmatpush.msra.mxu2 %v224_v27  ;;  %v312_v27 = vld [vmem:[#allocation3 + $0x320] sm:$0xff] }
 0x663   :  { %2346 = vmatpush.msra.mxu2 %v222_v59  ;;  %v310_v59 = vld [vmem:[#allocation3 + $0x310] sm:$0xff] }
 0x665   :  { %2347 = vmatpush.msra.mxu2 %v220_v47  ;;  %v233_v47 = vld [vmem:[#allocation3 + $0xa8] sm:$0xff] }
 0x667   :  { %2348 = vmatpush.msra.mxu2 %v218_v45  ;;  %v229_v45 = vld [vmem:[#allocation3 + $0x88] sm:$0xff] }
 0x670   :  { %v2287_v10 = vpop.permute.xlu2 %2286 }
 0x672   :  { %v9638_v25 = vpop.permute.xlu0 %7491 }
 0x673   :  { %v7494_v63 = vunpack.i.h.bf16 %v9638_v25  ;;  %v7493_v0 = vunpack.i.l.bf16 %v9638_v25  ;;  %v368_v25 = vld [vmem:[#allocation3 + $0x4e0] sm:$0xff] }
 0x675   :  { %v2288_v46 = vsel %vm12169_vm3, %v7494_v63, %v7488_v15  ;;  %v2290_v3 = vsel %vm12169_vm3, %v7489_v60, %v7493_v0  ;;  %v2304_v60 = vmax.f32 %v9624_v35, %v2287_v10  ;;  %v286_v15 = vld [vmem:[#allocation3 + $0x250] sm:$0xff]  ;;  %v324_v63 = vld [vmem:[#allocation3 + $0x380] sm:$0xff] }
 0x676   :  { %v2299_v13 = vmax.f32 %v2264_v23, %v2288_v46  ;;  %v2301_v51 = vmax.f32 %v2266_v48, %v2290_v3  ;;  %v272_v48 = vld [vmem:[#allocation3 + $0x1e0] sm:$0xff]  ;;  %v290_v23 = vld [vmem:[#allocation3 + $0x270] sm:$0xff]  ;;  %2403 = vmatpush.msrb.mxu1 %v324_v63 }
 0x677   :  { %2357 = vmatpush.msra.mxu3 %v272_v48  ;;  %2384 = vmatpush.msrb.mxu0 %v290_v23  ;;  %v322_v35 = vld [vmem:[#allocation3 + $0x370] sm:$0xff]  ;;  %v216_v46 = vld [vmem:[#allocation3 + $0x20] sm:$0xff]  ;;  %v241_v23 = vld [vmem:[#allocation3 + $0xe8] sm:$0xff] }
 0x678   :  { %2311 = vrot.lane.b32.xlu1 %v2299_v13, %s8567_s5  ;;  %v7495_v7 = vpack.i.bf16 %v2301_v51, %v2300_v52  ;;  %v264_v3 = vld [vmem:[#allocation3 + $0x1a0] sm:$0xff]  ;;  %v214_v13 = vld [vmem:[#allocation3 + $0x10] sm:$0xff]  ;;  %2404 = vmatpush.msrb.mxu1 %v322_v35 }
 0x679   :  { %2358 = vmatpush.msra.mxu3 %v270_v11  ;;  %2385 = vmatpush.msrb.mxu0 %v288_v56  ;;  %v262_v52 = vld [vmem:[#allocation3 + $0x190] sm:$0xff]  ;;  %v316_v48 = vld [vmem:[#allocation3 + $0x340] sm:$0xff] }
 0x67a   :  { %7496 = vrot.lane.b32.xlu0 %v7495_v7, %s8567_s5  ;;  %2349 = vmatpush.msra.mxu2 %v216_v46  ;;  %v278_v51 = vld [vmem:[#allocation3 + $0x210] sm:$0xff]  ;;  %v260_v7 = vld [vmem:[#allocation3 + $0x180] sm:$0xff]  ;;  %v225_v46 = vld [vmem:[#allocation3 + $0x68] sm:$0xff] }
 0x67b   :  { %2386 = vmatpush.msrb.mxu0 %v286_v15  ;;  %2359 = vmatpush.msra.mxu3 %v268_v49  ;;  %v364_v11 = vld [vmem:[#allocation3 + $0x4c0] sm:$0xff]  ;;  %v254_v56 = vld [vmem:[#allocation3 + $0x150] sm:$0xff]  ;;  %v235_v15 = vld [vmem:[#allocation3 + $0xb8] sm:$0xff] }
 0x67c   :  { %2405 = vmatpush.msrb.mxu1 %v320_v44  ;;  %2350 = vmatpush.msra.mxu2 %v214_v13  ;;  %v358_v49 = vld [vmem:[#allocation3 + $0x490] sm:$0xff]  ;;  %v356_v63 = vld [vmem:[#allocation3 + $0x480] sm:$0xff] }
 0x67d   :  { %2387 = vmatpush.msrb.mxu0 %v284_v61  ;;  %2360 = vmatpush.msra.mxu3 %v266_v42  ;;  %v231_v61 = vld [vmem:[#allocation3 + $0x98] sm:$0xff]  ;;  %v354_v42 = vld [vmem:[#allocation3 + $0x470] sm:$0xff]  ;;  %v352_v35 = vld [vmem:[#allocation3 + $0x460] sm:$0xff] }
 0x67e   :  { %2406 = vmatpush.msrb.mxu1 %v318_v30  ;;  %2351 = vmatpush.msra.mxu2 %v212_v38  ;;  %v252_v44 = vld [vmem:[#allocation3 + $0x140] sm:$0xff]  ;;  %v275_v30 = vld [vmem:[#allocation3 + $0x1f8] sm:$0xff]  ;;  %v346_v38 = vld [vmem:[#allocation3 + $0x430] sm:$0xff] }
 0x67f   :  { %2388 = vmatpush.msrb.mxu0 %v282_v31  ;;  %2361 = vmatpush.msra.mxu3 %v264_v3  ;;  %v227_v31 = vld [vmem:[#allocation3 + $0x78] sm:$0xff]  ;;  %v350_v3 = vld [vmem:[#allocation3 + $0x450] sm:$0xff]  ;;  %v308_v13 = vld [vmem:[#allocation3 + $0x300] sm:$0xff] }
 0x680   :  { %2416 = vmatpush.msrb.mxu2 %v370_v26  ;;  %2407 = vmatpush.msrb.mxu1 %v316_v48  ;;  %v246_v26 = vld [vmem:[#allocation3 + $0x110] sm:$0xff]  ;;  %v215_v48 = vld [vmem:[#allocation3 + $0x18] sm:$0xff] }
 0x681   :  { %2389 = vmatpush.msrb.mxu0 %v280_v12  ;;  %2362 = vmatpush.msra.mxu3 %v262_v52  ;;  %v223_v12 = vld [vmem:[#allocation3 + $0x58] sm:$0xff]  ;;  %v348_v52 = vld [vmem:[#allocation3 + $0x440] sm:$0xff] }
 0x682   :  { %2321 = vrot.lane.b32.xlu0 %v2304_v60, %s8567_s5  ;;  %2417 = vmatpush.msrb.mxu2 %v368_v25  ;;  %v362_v60 = vld [vmem:[#allocation3 + $0x4b0] sm:$0xff]  ;;  %v269_v25 = vld [vmem:[#allocation3 + $0x1c8] sm:$0xff] }
 0x683   :  { %2390 = vmatpush.msrb.mxu0 %v278_v51  ;;  %2363 = vmatpush.msra.mxu3 %v260_v7  ;;  %v221_v51 = vld [vmem:[#allocation3 + $0x48] sm:$0xff]  ;;  %v219_v7 = vld [vmem:[#allocation3 + $0x38] sm:$0xff] }
 0x685   :  { %2391 = vmatpush.msrb.mxu0 %v276_v62  ;;  %v271_v62 = vld [vmem:[#allocation3 + $0x1d8] sm:$0xff] }
 0x687   :  { %2456 = vmatpush.msra.mxu0 %v243_v6  ;;  %v342_v6 = vld [vmem:[#allocation3 + $0x410] sm:$0xff] }
 0x689   :  { %v2285_v14 = vpop.permute.xlu1 %2284  ;;  %2457 = vmatpush.msra.mxu0 %v241_v23  ;;  %v340_v23 = vld [vmem:[#allocation3 + $0x400] sm:$0xff] }
 0x68a   :  { %v2291_v33 = vsel %vm12169_vm3, %v7493_v0, %v2285_v14  ;;  %v2292_v16 = vsel %vm12169_vm3, %v2285_v14, %v2287_v10  ;;  %v258_v0 = vld [vmem:[#allocation3 + $0x170] sm:$0xff]  ;;  %v239_v10 = vld [vmem:[#allocation3 + $0xd8] sm:$0xff]  ;;  %vm2885_vm3 = vcmask 130048  }
 0x68b   :  { %v2303_v32 = vmax.f32 %v9632_v55, %v2292_v16  ;;  %v2302_v40 = vmax.f32 %v9615_v20, %v2291_v33  ;;  %v314_v55 = vld [vmem:[#allocation3 + $0x330] sm:$0xff]  ;;  %2364 = vmatpush.msra.mxu3 %v258_v0  ;;  %2458 = vmatpush.msra.mxu0 %v239_v10  ;;  %v273_v33 = vld [vmem:[#allocation3 + $0x1e8] sm:$0xff]  ;;  %v248_v16 = vld [vmem:[#allocation3 + $0x120] sm:$0xff] }
 0x68c   :  { %v366_v20 = vld [vmem:[#allocation3 + $0x4d0] sm:$0xff]  ;;  %2408 = vmatpush.msrb.mxu1 %v314_v55  ;;  %v244_v0 = vld [vmem:[#allocation3 + $0x100] sm:$0xff]  ;;  %v265_v10 = vld [vmem:[#allocation3 + $0x1a8] sm:$0xff] }
 0x68d   :  { %2319 = vrot.lane.b32.xlu1 %v2303_v32, %s8567_s5  ;;  %2317 = vrot.lane.b32.xlu2 %v2302_v40, %s8567_s5  ;;  %v250_v14 = vld [vmem:[#allocation3 + $0x130] sm:$0xff]  ;;  %v344_v32 = vld [vmem:[#allocation3 + $0x420] sm:$0xff]  ;;  %v217_v40 = vld [vmem:[#allocation3 + $0x28] sm:$0xff] }
 0x68e   :  { %2418 = vmatpush.msrb.mxu2 %v366_v20  ;;  %2365 = vmatpush.msra.mxu3 %v256_v21  ;;  %v372_v55 = vld [vmem:[#allocation3 + $0x500] sm:$0xff]  ;;  %v213_v20 = vld [vmem:[#allocation3 + $0x8] sm:$0xff]  ;;  %v267_v21 = vld [vmem:[#allocation3 + $0x1b8] sm:$0xff] }
 0x68f   :  { %2409 = vmatpush.msrb.mxu1 %v312_v27  ;;  %2459 = vmatpush.msra.mxu0 %v237_v58  ;;  %v263_v27 = vld [vmem:[#allocation3 + $0x198] sm:$0xff]  ;;  %v257_v58 = vld [vmem:[#allocation3 + $0x168] sm:$0xff] }
 0x690   :  { %2419 = vmatpush.msrb.mxu2 %v364_v11  ;;  %2366 = vmatpush.msra.mxu3 %v254_v56  ;;  %v261_v11 = vld [vmem:[#allocation3 + $0x188] sm:$0xff]  ;;  %v259_v56 = vld [vmem:[#allocation3 + $0x178] sm:$0xff] }
 0x691   :  { %2410 = vmatpush.msrb.mxu1 %v310_v59  ;;  %2460 = vmatpush.msra.mxu0 %v235_v15  ;;  %v255_v59 = vld [vmem:[#allocation3 + $0x158] sm:$0xff] }
 0x692   :  { %2420 = vmatpush.msrb.mxu2 %v362_v60  ;;  %2367 = vmatpush.msra.mxu3 %v252_v44  ;;  %v253_v60 = vld [vmem:[#allocation3 + $0x148] sm:$0xff]  ;;  %v251_v15 = vld [vmem:[#allocation3 + $0x138] sm:$0xff] }
 0x693   :  { %2461 = vmatpush.msra.mxu0 %v233_v47  ;;  %2411 = vmatpush.msrb.mxu1 %v308_v13  ;;  %v247_v47 = vld [vmem:[#allocation3 + $0x118] sm:$0xff] }
 0x694   :  { %2421 = vmatpush.msrb.mxu2 %v360_v19  ;;  %2368 = vmatpush.msra.mxu3 %v250_v14  ;;  %v249_v19 = vld [vmem:[#allocation3 + $0x128] sm:$0xff]  ;;  %v339_v44 = vld [vmem:[#allocation3 + $0x3f8] sm:$0xff] }
 0x695   :  { %2462 = vmatpush.msra.mxu0 %v231_v61  ;;  %2476 = vmatpush.msra.mxu1 %v275_v30  ;;  %v371_v13 = vld [vmem:[#allocation3 + $0x4f8] sm:$0xff]  ;;  %v369_v30 = vld [vmem:[#allocation3 + $0x4e8] sm:$0xff] }
 0x696   :  { %2422 = vmatpush.msrb.mxu2 %v358_v49  ;;  %2369 = vmatpush.msra.mxu3 %v248_v16  ;;  %v245_v49 = vld [vmem:[#allocation3 + $0x108] sm:$0xff]  ;;  %v303_v14 = vld [vmem:[#allocation3 + $0x2d8] sm:$0xff] }
 0x697   :  { %2463 = vmatpush.msra.mxu0 %v229_v45  ;;  %2477 = vmatpush.msra.mxu1 %v273_v33  ;;  %v301_v33 = vld [vmem:[#allocation3 + $0x2c8] sm:$0xff] }
 0x698   :  { %2423 = vmatpush.msrb.mxu2 %v356_v63  ;;  %2370 = vmatpush.msra.mxu3 %v246_v26  ;;  %v333_v16 = vld [vmem:[#allocation3 + $0x3c8] sm:$0xff] }
 0x699   :  { %2464 = vmatpush.msra.mxu0 %v227_v31  ;;  %2478 = vmatpush.msra.mxu1 %v271_v62  ;;  %v331_v62 = vld [vmem:[#allocation3 + $0x3b8] sm:$0xff] }
 0x69a   :  { %2424 = vmatpush.msrb.mxu2 %v354_v42  ;;  %2371 = vmatpush.msra.mxu3 %v244_v0  ;;  %v361_v0 = vld [vmem:[#allocation3 + $0x4a8] sm:$0xff] }
 0x69b   :  { %2465 = vmatpush.msra.mxu0 %v225_v46  ;;  %2479 = vmatpush.msra.mxu1 %v269_v25  ;;  %v329_v25 = vld [vmem:[#allocation3 + $0x3a8] sm:$0xff] }
 0x69c   :  { %2425 = vmatpush.msrb.mxu2 %v352_v35  ;;  %2451 = vmatpush.msrb.mxu3 %v372_v55  ;;  %v307_v35 = vld [vmem:[#allocation3 + $0x2f8] sm:$0xff] }
 0x69d   :  { %2466 = vmatpush.msra.mxu0 %v223_v12  ;;  %2480 = vmatpush.msra.mxu1 %v267_v21  ;;  %v327_v55 = vld [vmem:[#allocation3 + $0x398] sm:$0xff]  ;;  %v293_v21 = vld [vmem:[#allocation3 + $0x288] sm:$0xff] }
 0x69e   :  { %2426 = vmatpush.msrb.mxu2 %v350_v3 }
 0x69f   :  { %2467 = vmatpush.msra.mxu0 %v221_v51  ;;  %2481 = vmatpush.msra.mxu1 %v265_v10  ;;  %v337_v51 = vld [vmem:[#allocation3 + $0x3e8] sm:$0xff] }
 0x6a0   :  { %2427 = vmatpush.msrb.mxu2 %v348_v52  ;;  %v305_v52 = vld [vmem:[#allocation3 + $0x2e8] sm:$0xff] }
 0x6a1   :  { %2468 = vmatpush.msra.mxu0 %v219_v7  ;;  %2482 = vmatpush.msra.mxu1 %v263_v27  ;;  %v367_v7 = vld [vmem:[#allocation3 + $0x4d8] sm:$0xff]  ;;  %v325_v10 = vld [vmem:[#allocation3 + $0x388] sm:$0xff] }
 0x6a2   :  { %2428 = vmatpush.msrb.mxu2 %v346_v38  ;;  %v335_v38 = vld [vmem:[#allocation3 + $0x3d8] sm:$0xff] }
 0x6a3   :  { %2469 = vmatpush.msra.mxu0 %v217_v40  ;;  %2483 = vmatpush.msra.mxu1 %v261_v11  ;;  %v299_v40 = vld [vmem:[#allocation3 + $0x2b8] sm:$0xff]  ;;  %v357_v11 = vld [vmem:[#allocation3 + $0x488] sm:$0xff] }
 0x6a4   :  { %2429 = vmatpush.msrb.mxu2 %v344_v32  ;;  %v365_v32 = vld [vmem:[#allocation3 + $0x4c8] sm:$0xff] }
 0x6a5   :  { %2470 = vmatpush.msra.mxu0 %v215_v48  ;;  %2484 = vmatpush.msra.mxu1 %v259_v56  ;;  %v297_v48 = vld [vmem:[#allocation3 + $0x2a8] sm:$0xff]  ;;  %v291_v56 = vld [vmem:[#allocation3 + $0x278] sm:$0xff] }
 0x6a6   :  { %2430 = vmatpush.msrb.mxu2 %v342_v6  ;;  %v363_v6 = vld [vmem:[#allocation3 + $0x4b8] sm:$0xff] }
 0x6a7   :  { %2471 = vmatpush.msra.mxu0 %v213_v20  ;;  %2485 = vmatpush.msra.mxu1 %v257_v58  ;;  %v359_v20 = vld [vmem:[#allocation3 + $0x498] sm:$0xff] }
 0x6a8   :  { %2431 = vmatpush.msrb.mxu2 %v340_v23  ;;  %v295_v23 = vld [vmem:[#allocation3 + $0x298] sm:$0xff] }
 0x6a9   :  { %2486 = vmatpush.msra.mxu1 %v255_v59 }
 0x6ab   :  { %2487 = vmatpush.msra.mxu1 %v253_v60  ;;  %v323_v60 = vld [vmem:[#allocation3 + $0x378] sm:$0xff] }
 0x6ad   :  { %2488 = vmatpush.msra.mxu1 %v251_v15  ;;  %v373_v15 = vld [vmem:[#allocation3 + $0x508] sm:$0xff] }
 0x6af   :  { %2489 = vmatpush.msra.mxu1 %v249_v19  ;;  %v355_v19 = vld [vmem:[#allocation3 + $0x478] sm:$0xff] }
 0x6b1   :  { %2490 = vmatpush.msra.mxu1 %v247_v47  ;;  %v289_v47 = vld [vmem:[#allocation3 + $0x268] sm:$0xff] }
 0x6b3   :  { %2491 = vmatpush.msra.mxu1 %v245_v49  ;;  %v321_v49 = vld [vmem:[#allocation3 + $0x368] sm:$0xff] }
 0x6e7   :  { %v2318_v42 = vpop.permute.xlu2 %2317 }
 0x6ea   :  { %v2312_v31 = vpop.permute.xlu1 %2311 }
 0x6ec   :  { %v7497_v61 = vpop.permute.xlu0 %7496 }
 0x6ed   :  { %v7499_v63 = vunpack.i.h.bf16 %v7497_v61  ;;  %v7498_v45 = vunpack.i.l.bf16 %v7497_v61  ;;  %v353_v61 = vld [vmem:[#allocation3 + $0x468] sm:$0xff] }
 0x6ef   :  { %v2323_v46 = vsel %vm12171_vm5, %v2312_v31, %v7498_v45  ;;  %v9661_v3 = vsel %vm12171_vm5, %v7498_v45, %v7499_v63  ;;  %v9664_v12 = vsel %vm12171_vm5, %v7499_v63, %v2318_v42  ;;  %v287_v63 = vld [vmem:[#allocation3 + $0x258] sm:$0xff]  ;;  %v285_v31 = vld [vmem:[#allocation3 + $0x248] sm:$0xff] }
 0x6f0   :  { %2352 = vmatmul.f32.vlgmr.msra.gmra.mxu2 %v2323_v46  ;;  %2372 = vmatmul.f32.vlgmr.msra.gmra.mxu3 %v9661_v3  ;;  %v319_v45 = vld [vmem:[#allocation3 + $0x358] sm:$0xff] }
 0x6f1   :  { %2392 = vmatmul.f32.vlgmr.msrb.gmra.mxu0 %v9664_v12  ;;  %2496 = vmatpush.msra.mxu3 %v307_v35  ;;  %v317_v35 = vld [vmem:[#allocation3 + $0x348] sm:$0xff] }
 0x6f2   :  { %2516 = vmatpush.msra.mxu2 %v339_v44  ;;  %2536 = vmatpush.msrb.mxu0 %v371_v13  ;;  %v283_v44 = vld [vmem:[#allocation3 + $0x238] sm:$0xff] }
 0x6f3   :  { %2497 = vmatpush.msra.mxu3 %v305_v52  ;;  %v315_v13 = vld [vmem:[#allocation3 + $0x338] sm:$0xff] }
 0x6f4   :  { %2517 = vmatpush.msra.mxu2 %v337_v51  ;;  %2537 = vmatpush.msrb.mxu0 %v369_v30  ;;  %v9668_v26 = vpop.permute.xlu0 %2321  ;;  %v347_v52 = vld [vmem:[#allocation3 + $0x438] sm:$0xff]  ;;  %v281_v51 = vld [vmem:[#allocation3 + $0x228] sm:$0xff] }
 0x6f5   :  { %2498 = vmatpush.msra.mxu3 %v303_v14  ;;  %v313_v30 = vld [vmem:[#allocation3 + $0x328] sm:$0xff] }
 0x6f6   :  { %2518 = vmatpush.msra.mxu2 %v335_v38  ;;  %2538 = vmatpush.msrb.mxu0 %v367_v7  ;;  %v345_v14 = vld [vmem:[#allocation3 + $0x428] sm:$0xff]  ;;  %v279_v38 = vld [vmem:[#allocation3 + $0x218] sm:$0xff] }
 0x6f7   :  { %2499 = vmatpush.msra.mxu3 %v301_v33  ;;  %v311_v7 = vld [vmem:[#allocation3 + $0x318] sm:$0xff] }
 0x6f8   :  { %2519 = vmatpush.msra.mxu2 %v333_v16  ;;  %2539 = vmatpush.msrb.mxu0 %v365_v32  ;;  %v343_v33 = vld [vmem:[#allocation3 + $0x418] sm:$0xff]  ;;  %v277_v16 = vld [vmem:[#allocation3 + $0x208] sm:$0xff] }
 0x6f9   :  { %6987 = vmatmul.msk.f32.vlgmr.msrb.gmra.mxu3 %vm2333_vm15, %v9668_v26  ;;  %2472 = vmatmul.f32.vlgmr.msra.gmra.mxu0 %v2323_v46  ;;  %v349_v46 = vld [vmem:[#allocation3 + $0x448] sm:$0xff] }
 0x6fa   :  { %2500 = vmatpush.msra.mxu3 %v299_v40  ;;  %2520 = vmatpush.msra.mxu2 %v331_v62  ;;  %v309_v32 = vld [vmem:[#allocation3 + $0x308] sm:$0xff] }
 0x6fb   :  { %2540 = vmatpush.msrb.mxu0 %v363_v6 }
 0x6fc   :  { %2501 = vmatpush.msra.mxu3 %v297_v48  ;;  %2521 = vmatpush.msra.mxu2 %v329_v25 }
 0x6fd   :  { %2541 = vmatpush.msrb.mxu0 %v361_v0 }
 0x6fe   :  { %2502 = vmatpush.msra.mxu3 %v295_v23  ;;  %2522 = vmatpush.msra.mxu2 %v327_v55 }
 0x6ff   :  { %v2320_v27 = vpop.permute.xlu1 %2319  ;;  %2542 = vmatpush.msrb.mxu0 %v359_v20 }
 0x700   :  { %v2326_v58 = vsel %vm12171_vm5, %v2318_v42, %v2320_v27  ;;  %v2327_v59 = vsel %vm12171_vm5, %v2320_v27, %v9668_v26  ;;  %2503 = vmatpush.msra.mxu3 %v293_v21  ;;  %2523 = vmatpush.msra.mxu2 %v325_v10  ;;  %v351_v42 = vld [vmem:[#allocation3 + $0x458] sm:$0xff]  ;;  %vm3135_vm5 = vcmask 646144  }
 0x701   :  { %2412 = vmatmul.f32.vlgmr.msrb.gmra.mxu1 %v2326_v58  ;;  %2432 = vmatmul.f32.vlgmr.msrb.gmra.mxu2 %v2327_v59 }
 0x702   :  { %2543 = vmatpush.msrb.mxu0 %v357_v11  ;;  %2504 = vmatpush.msra.mxu3 %v291_v56 }
 0x703   :  { %2524 = vmatpush.msra.mxu2 %v323_v60  ;;  %2571 = vmatpush.msrb.mxu1 %v373_v15 }
 0x704   :  { %2544 = vmatpush.msrb.mxu0 %v355_v19  ;;  %2505 = vmatpush.msra.mxu3 %v289_v47 }
 0x705   :  { %2525 = vmatpush.msra.mxu2 %v321_v49 }
 0x706   :  { %2545 = vmatpush.msrb.mxu0 %v353_v61  ;;  %2506 = vmatpush.msra.mxu3 %v287_v63 }
 0x707   :  { %2526 = vmatpush.msra.mxu2 %v319_v45 }
 0x708   :  { %2546 = vmatpush.msrb.mxu0 %v351_v42  ;;  %2507 = vmatpush.msra.mxu3 %v285_v31 }
 0x709   :  { %2492 = vmatmul.f32.vlgmr.msra.gmra.mxu1 %v9661_v3  ;;  %2527 = vmatpush.msra.mxu2 %v317_v35  ;;  %v341_v3 = vld [vmem:[#allocation3 + $0x408] sm:$0xff] }
 0x70a   :  { %2547 = vmatpush.msrb.mxu0 %v349_v46  ;;  %2508 = vmatpush.msra.mxu3 %v283_v44  ;;  %v2592_v35 = vld [vmem:[%s8671_s20 + $0x8] sm:$0xff]  ;;  %v2591_v46 = vld [vmem:[%s8671_s20] sm:$0xff]  ;;  %s8580_s20 = smov 7  }
 0x70b   :  { %2528 = vmatpush.msra.mxu2 %v315_v13 }
 0x70c   :  { %2548 = vmatpush.msrb.mxu0 %v347_v52  ;;  %2509 = vmatpush.msra.mxu3 %v281_v51 }
 0x70d   :  { %2529 = vmatpush.msra.mxu2 %v313_v30 }
 0x70e   :  { %2549 = vmatpush.msrb.mxu0 %v345_v14  ;;  %2510 = vmatpush.msra.mxu3 %v279_v38 }
 0x70f   :  { %2530 = vmatpush.msra.mxu2 %v311_v7 }
 0x710   :  { %2550 = vmatpush.msrb.mxu0 %v343_v33  ;;  %2511 = vmatpush.msra.mxu3 %v277_v16 }
 0x711   :  { %2531 = vmatpush.msra.mxu2 %v309_v32  ;;  %6988 = vmatmul.msk.f32.vlgmr.msrb.gmra.mxu1 %vm2333_vm15, %v9668_v26  ;;  %vm2582_vm15 = vcmask 89088  }
 0x712   :  { %2551 = vmatpush.msrb.mxu0 %v341_v3  ;;  %2512 = vmatmul.f32.vlgmr.msra.gmra.mxu3 %v9664_v12  ;;  %vm9710_vm10 = vmneg %vm2582_vm15 }
 0x713   :  { %2532 = vmatmul.f32.vlgmr.msra.gmra.mxu2 %v2326_v58  ;;  %2552 = vmatmul.f32.vlgmr.msrb.gmra.mxu0 %v2327_v59 }
 0x76e   :  { %v2393_v48 = vpop.f32.mrf.mxu0 }
 0x773   :  { %v2353_v40 = vpop.f32.mrf.mxu2  ;;  %v2373_v62 = vpop.f32.mrf.mxu3 }
 0x774   :  { %v2374_v6 = vadd.f32 %v2373_v62, %v2353_v40 }
 0x776   :  { %v2394_v0 = vadd.f32 %v2393_v48, %v2374_v6  ;;  %v2473_v26 = vpop.f32.mrf.mxu0 }
 0x77c   :  { %v2453_v21 = vpop.f32.mrf.mxu3 }
 0x77e   :  { %v2413_v25 = vpop.f32.mrf.mxu1 }
 0x77f   :  { %v2414_v23 = vadd.f32 %v2413_v25, %v2394_v0 }
 0x784   :  { %v2433_v55 = vpop.f32.mrf.mxu2 }
 0x785   :  { %v2434_v20 = vadd.f32 %v2433_v55, %v2414_v23 }
 0x786   :  { %v2493_v27 = vpop.f32.mrf.mxu1 }
 0x787   :  { %v2454_v10 = vadd.f32 %v2453_v21, %v2434_v20  ;;  %v2494_v11 = vadd.f32 %v2493_v27, %v2473_v26 }
 0x789   :  { %2578 = vrot.lane.b32.xlu2 %v2454_v10, %s8574_s9 }
 0x78e   :  { %v2573_v19 = vpop.f32.mrf.mxu1 }
 0x790   :  { %v2553_v60 = vpop.f32.mrf.mxu0 }
 0x795   :  { %v2513_v12 = vpop.f32.mrf.mxu3 }
 0x796   :  { %v2514_v56 = vadd.f32 %v2513_v12, %v2494_v11  ;;  %v2533_v58 = vpop.f32.mrf.mxu2 }
 0x798   :  { %v2534_v59 = vadd.f32 %v2533_v58, %v2514_v56 }
 0x79a   :  { %v2554_v15 = vadd.f32 %v2553_v60, %v2534_v59 }
 0x79c   :  { %v2574_v47 = vadd.f32 %v2573_v19, %v2554_v15 }
 0x79e   :  { %2580 = vrot.lane.b32.xlu0 %v2574_v47, %s8574_s9  ;;  %v2589_v47 = vld [vmem:[%s8666_s12] sm:$0xff] }
 0x7e3   :  { %v9681_v49 = vpop.permute.xlu2 %2578 }
 0x7e4   :  { %v2586_v45 = vsel %vm2582_vm15, 0.0, %v9681_v49 }
 0x810   :  { %v2581_v61 = vpop.permute.xlu0 %2580 }
 0x811   :  { %v9685_v63 = vsel %vm2582_vm15, %v9681_v49, %v2581_v61  ;;  %v2590_v61 = vld [vmem:[%s8666_s12 + $0x8] sm:$0xff]  ;;  %s12240_s12 = sld [smem:[#allocation10_spill]] }
 0x812   :  { %v2588_v42 = vsel %vm2587_vm6, %v9685_v63, 0.0 }
 0x813   :  { %v7510_v31 = vpack.i.bf16 %v2588_v42, %v2586_v45 }
 0x815   :  { %7511 = vrot.lane.b32.xlu0 %v7510_v31, %s8568_s16  ;;  %7506 = vrot.lane.b32.xlu2 %v7510_v31, %s8575_s14 }
 0x816   :  { %7501 = vrot.lane.b32.xlu1 %v7510_v31, %s8576_s19 }
 0x81d   :  { %7526 = vrot.lane.b32.xlu0 %v7510_v31, %s8577_s24  ;;  %7521 = vrot.lane.b32.xlu2 %v7510_v31, %s8578_s30 }
 0x81e   :  { %7516 = vrot.lane.b32.xlu1 %v7510_v31, %s8579_s6 }
 0x825   :  { %2663 = vperm.xlu0 %7469, %v2592_v35   ;;  %7536 = vrot.lane.b32.xlu2 %v7510_v31, %s8565_s29  ;;  %v210_v35 = vld [vmem:[%s8606_s13] sm:$0x3]  ;;  %s12239_s13 = sld [smem:[#allocation12_spill]] }
 0x826   :  { %7531 = vrot.lane.b32.xlu1 %v7510_v31, %s8564_s21 }
 0x82e   :  { %2658 = vperm.xlu1 %7257, %v2591_v46  }
 0x86f   :  { %v7507_v44 = vpop.permute.xlu2 %7506 }
 0x870   :  { %v7509_v51 = vunpack.i.h.bf16 %v7507_v44  ;;  %v7508_v30 = vunpack.i.l.bf16 %v7507_v44 }
 0x872   :  { %v2645_v3 = vsel %vm2644_vm2, %v7508_v30, %v7509_v51  ;;  %v9728_v30 = vperm.slane %v210_v35, 1 }
 0x877   :  { %v7522_v32 = vpop.permute.xlu2 %7521 }
 0x878   :  { %v7524_v48 = vunpack.i.h.bf16 %v7522_v32  ;;  %v7523_v25 = vunpack.i.l.bf16 %v7522_v32 }
 0x87a   :  { %v2622_v10 = vsel %vm12172_vm9, %v7523_v25, %v7524_v48 }
 0x87f   :  { %v7537_v26 = vpop.permute.xlu2 %7536 }
 0x880   :  { %v7539_v12 = vunpack.i.h.bf16 %v7537_v26  ;;  %v7538_v56 = vunpack.i.l.bf16 %v7537_v26 }
 0x882   :  { %v2599_v15 = vsel %vm1098_vm0, %v7538_v56, %v7539_v12  ;;  %v2758_v56 = vld [vmem:[%s8681_s4 + $0x8] sm:$0xff] }
 0x887   :  { %v7512_v13 = vpop.permute.xlu0 %7511 }
 0x888   :  { %v7502_v52 = vpop.permute.xlu1 %7501  ;;  %v7514_v7 = vunpack.i.h.bf16 %v7512_v13  ;;  %v7513_v33 = vunpack.i.l.bf16 %v7512_v13  ;;  %v9726_v13 = vperm.slane %v210_v35, 0 }
 0x889   :  { %v7504_v14 = vunpack.i.h.bf16 %v7502_v52  ;;  %v7503_v38 = vunpack.i.l.bf16 %v7502_v52 }
 0x88a   :  { %v2637_v40 = vsel %vm1194_vm7, %v7513_v33, %v7514_v7 }
 0x88b   :  { %2702 = vmatpush.msra.mxu1 %v7504_v14  ;;  %v2653_v16 = vsel %vm2652_vm4, %v7503_v38, %v7504_v14 }
 0x88c   :  { %2679 = vmatpush.msrb.mxu3 %v2653_v16 }
 0x88d   :  { %2703 = vmatpush.msra.mxu1 %v7509_v51 }
 0x88e   :  { %2680 = vmatpush.msrb.mxu3 %v2645_v3 }
 0x88f   :  { %2704 = vmatpush.msra.mxu1 %v7514_v7  ;;  %v7527_v62 = vpop.permute.xlu0 %7526 }
 0x890   :  { %v7517_v6 = vpop.permute.xlu1 %7516  ;;  %2681 = vmatpush.msrb.mxu3 %v2637_v40  ;;  %v7529_v55 = vunpack.i.h.bf16 %v7527_v62  ;;  %v7528_v20 = vunpack.i.l.bf16 %v7527_v62 }
 0x891   :  { %v7519_v0 = vunpack.i.h.bf16 %v7517_v6  ;;  %v7518_v23 = vunpack.i.l.bf16 %v7517_v6 }
 0x892   :  { %v2614_v27 = vsel %vm2613_vm11, %v7528_v20, %v7529_v55 }
 0x893   :  { %2705 = vmatpush.msra.mxu1 %v7519_v0  ;;  %v2630_v21 = vsel %vm2629_vm12, %v7518_v23, %v7519_v0 }
 0x894   :  { %2682 = vmatpush.msrb.mxu3 %v2630_v21 }
 0x895   :  { %2706 = vmatpush.msra.mxu1 %v7524_v48 }
 0x896   :  { %2683 = vmatpush.msrb.mxu3 %v2622_v10 }
 0x897   :  { %2707 = vmatpush.msra.mxu1 %v7529_v55  ;;  %v2664_v46 = vpop.permute.xlu0 %2663 }
 0x898   :  { %v7532_v11 = vpop.permute.xlu1 %7531  ;;  %2684 = vmatpush.msrb.mxu3 %v2614_v27 }
 0x899   :  { %v7534_v58 = vunpack.i.h.bf16 %v7532_v11  ;;  %v7533_v59 = vunpack.i.l.bf16 %v7532_v11 }
 0x89b   :  { %2708 = vmatpush.msra.mxu1 %v7534_v58  ;;  %v2606_v60 = vsel %vm1122_vm1, %v7533_v59, %v7534_v58 }
 0x89c   :  { %2685 = vmatpush.msrb.mxu3 %v2606_v60 }
 0x89d   :  { %2709 = vmatpush.msra.mxu1 %v7539_v12  ;;  %v2757_v12 = vld [vmem:[%s8681_s4] sm:$0xff]  ;;  %s12241_s4 = sld [smem:[#allocation14_spill]] }
 0x89e   :  { %2686 = vmatpush.msrb.mxu3 %v2599_v15 }
 0x89f   :  { %6993 = vmatpush.msk.msra.mxu1 %vm2587_vm6, %v9685_v63 }
 0x8a0   :  { %6990 = vmatpush.msk.msrb.mxu3 %vm9710_vm10, %v9681_v49  ;;  %6994 = vmatmul.msk.f32.vlgmr.msra.gmra.mxu1 %vm12199_vm14, %v2589_v47  ;;  %v2659_v42 = vpop.permute.xlu1 %2658 }
 0x8a1   :  { %6991 = vmatmul.msk.f32.vlgmr.msrb.gmra.mxu3 %vm12199_vm14, %v2589_v47 }
 0x8a8   :  { %6995 = vmatmul.msk.f32.gmra.mxu1 %vm12199_vm14, %v2590_v61 }
 0x8a9   :  { %6992 = vmatmul.msk.f32.gmra.mxu3 %vm12199_vm14, %v2590_v61 }
 0x91d   :  { %v2712_v45 = vpop.f32.mrf.mxu1 }
 0x91e   :  { %v2713_v32 = vadd.f32 %v2712_v45, %v2659_v42 }
 0x920   :  { %v2719_v40 = vmax.f32 %v2713_v32, 0.0 }
 0x922   :  { %v2728_v62 = vmul.f32 %v9728_v30, %v2719_v40 }
 0x924   :  { %v2689_v31 = vpop.f32.mrf.mxu3 }
 0x925   :  { %v2690_v44 = vadd.f32 %v2689_v31, %v2659_v42  ;;  %v2715_v63 = vpop.f32.mrf.mxu1 }
 0x926   :  { %v2716_v52 = vadd.f32 %v2715_v63, %v2664_v46 }
 0x927   :  { %v2718_v49 = vmax.f32 %v2690_v44, 0.0 }
 0x928   :  { %v2721_v51 = vmax.f32 %v2716_v52, 0.0 }
 0x929   :  { %v2727_v14 = vmul.f32 %v9726_v13, %v2718_v49 }
 0x92a   :  { %v2730_v38 = vmul.f32 %v9728_v30, %v2721_v51 }
 0x92b   :  { %2735 = vrot.lane.b32.xlu1 %v2727_v14, %s8574_s9 }
 0x92c   :  { %2741 = vrot.lane.b32.xlu0 %v2730_v38, %s8574_s9  ;;  %v2692_v7 = vpop.f32.mrf.mxu3 }
 0x92d   :  { %v2693_v33 = vadd.f32 %v2692_v7, %v2664_v46 }
 0x92f   :  { %v2720_v16 = vmax.f32 %v2693_v33, 0.0 }
 0x931   :  { %v2729_v3 = vmul.f32 %v9726_v13, %v2720_v16 }
 0x933   :  { %2739 = vrot.lane.b32.xlu2 %v2729_v3, %s8574_s9 }
 0x93b   :  { %2737 = vrot.lane.b32.xlu2 %v2728_v62, %s8574_s9 }
 0x98d   :  { %v9738_v6 = vpop.permute.xlu2 %2739 }
 0x98e   :  { %v2750_v10 = vsel %vm2582_vm15, 0.0, %v9738_v6 }
 0x995   :  { %v2738_v48 = vpop.permute.xlu2 %2737 }
 0x99d   :  { %v9740_v25 = vpop.permute.xlu1 %2735 }
 0x99e   :  { %v9744_v0 = vsel %vm2582_vm15, %v9740_v25, %v2738_v48  ;;  %v2749_v23 = vsel %vm2582_vm15, 0.0, %v9740_v25  ;;  %v2742_v55 = vpop.permute.xlu0 %2741 }
 0x99f   :  { %v2751_v20 = vsel %vm2587_vm6, %v9744_v0, 0.0  ;;  %v9752_v21 = vsel %vm2582_vm15, %v9738_v6, %v2742_v55 }
 0x9a0   :  { %v2752_v26 = vsel %vm2587_vm6, %v9752_v21, 0.0  ;;  %v7545_v27 = vpack.i.bf16 %v2751_v20, %v2749_v23 }
 0x9a1   :  { %v7555_v11 = vpack.i.bf16 %v2752_v26, %v2750_v10 }
 0x9a2   :  { %7546 = vrot.lane.b32.xlu0 %v7545_v27, %s8568_s16  ;;  %7541 = vrot.lane.b32.xlu1 %v7545_v27, %s8575_s14 }
 0x9a3   :  { %7556 = vrot.lane.b32.xlu2 %v7555_v11, %s8568_s16 }
 0x9aa   :  { %7551 = vrot.lane.b32.xlu0 %v7555_v11, %s8575_s14  ;;  %7566 = vrot.lane.b32.xlu1 %v7555_v11, %s8579_s6 }
 0x9ab   :  { %7561 = vrot.lane.b32.xlu2 %v7545_v27, %s8579_s6 }
 0x9b2   :  { %7576 = vrot.lane.b32.xlu0 %v7555_v11, %s8578_s30  ;;  %7571 = vrot.lane.b32.xlu1 %v7545_v27, %s8578_s30 }
 0x9b3   :  { %7586 = vrot.lane.b32.xlu2 %v7555_v11, %s8577_s24 }
 0x9ba   :  { %7581 = vrot.lane.b32.xlu0 %v7545_v27, %s8577_s24  ;;  %7596 = vrot.lane.b32.xlu1 %v7555_v11, %s8564_s21 }
 0x9bb   :  { %7591 = vrot.lane.b32.xlu2 %v7545_v27, %s8564_s21 }
 0x9c2   :  { %7606 = vrot.lane.b32.xlu0 %v7555_v11, %s8565_s29  ;;  %7601 = vrot.lane.b32.xlu1 %v7545_v27, %s8565_s29 }
 0x9c3   :  { %7611 = vrot.lane.b32.xlu2 %v7555_v11, %s8576_s19 }
 0x9ca   :  { %7616 = vrot.lane.b32.xlu0 %v7545_v27, %s8576_s19  ;;  %2877 = vperm.xlu1 %7257, %v2757_v12  }
 0x9cb   :  { %2882 = vperm.xlu2 %7363, %v2758_v56  }
 0x9fd   :  { %v7557_v58 = vpop.permute.xlu2 %7556 }
 0x9fe   :  { %v7559_v51 = vunpack.i.h.bf16 %v7557_v58  ;;  %v7558_v14 = vunpack.i.l.bf16 %v7557_v58 }
 0xa00   :  { %v2842_v62 = vsel %vm1194_vm7, %v7558_v14, %v7559_v51 }
 0xa05   :  { %v7562_v59 = vpop.permute.xlu2 %7561 }
 0xa06   :  { %v7564_v55 = vunpack.i.h.bf16 %v7562_v59  ;;  %v7563_v20 = vunpack.i.l.bf16 %v7562_v59 }
 0xa08   :  { %v2827_v58 = vsel %vm2629_vm12, %v7563_v20, %v7564_v55 }
 0xa0d   :  { %v9776_v60 = vpop.permute.xlu2 %7586 }
 0xa0e   :  { %v7588_v59 = vunpack.i.l.bf16 %v9776_v60 }
 0xa14   :  { %v7547_v15 = vpop.permute.xlu0 %7546  ;;  %v7542_v47 = vpop.permute.xlu1 %7541 }
 0xa15   :  { %v9778_v61 = vpop.permute.xlu2 %7591  ;;  %v7544_v31 = vunpack.i.h.bf16 %v7542_v47  ;;  %v7543_v35 = vunpack.i.l.bf16 %v7542_v47  ;;  %v7549_v33 = vunpack.i.h.bf16 %v7547_v15  ;;  %v7548_v16 = vunpack.i.l.bf16 %v7547_v15 }
 0xa16   :  { %v7589_v15 = vunpack.i.h.bf16 %v9776_v60  ;;  %v7593_v60 = vunpack.i.l.bf16 %v9778_v61 }
 0xa17   :  { %v2855_v32 = vsel %vm2644_vm2, %v7543_v35, %v7544_v31  ;;  %v2841_v10 = vsel %vm1194_vm7, %v7548_v16, %v7549_v33 }
 0xa1c   :  { %v7552_v45 = vpop.permute.xlu0 %7551  ;;  %v7567_v42 = vpop.permute.xlu1 %7566 }
 0xa1d   :  { %v7554_v46 = vunpack.i.h.bf16 %v7552_v45  ;;  %v7553_v44 = vunpack.i.l.bf16 %v7552_v45  ;;  %v7612_v63 = vpop.permute.xlu2 %7611  ;;  %v7569_v3 = vunpack.i.h.bf16 %v7567_v42  ;;  %v7568_v40 = vunpack.i.l.bf16 %v7567_v42 }
 0xa1e   :  { %v7614_v52 = vunpack.i.h.bf16 %v7612_v63  ;;  %v7613_v49 = vunpack.i.l.bf16 %v7612_v63 }
 0xa1f   :  { %2938 = vmatpush.msrb.mxu1 %v7554_v46  ;;  %v2856_v38 = vsel %vm2644_vm2, %v7553_v44, %v7554_v46  ;;  %v2828_v11 = vsel %vm2629_vm12, %v7568_v40, %v7569_v3 }
 0xa20   :  { %2892 = vmatpush.msra.mxu3 %v2856_v38  ;;  %2975 = vmatpush.msra.mxu0 %v7614_v52  ;;  %v2870_v7 = vsel %vm2652_vm4, %v7613_v49, %v7614_v52  ;;  %v2800_v52 = vsel %vm2613_vm11, %v7588_v59, %v7589_v15  ;;  %v7594_v49 = vunpack.i.h.bf16 %v9778_v61 }
 0xa21   :  { %2929 = vmatpush.msrb.mxu2 %v2870_v7  ;;  %2939 = vmatpush.msrb.mxu1 %v7544_v31 }
 0xa22   :  { %2893 = vmatpush.msra.mxu3 %v2855_v32 }
 0xa23   :  { %2940 = vmatpush.msrb.mxu1 %v7559_v51 }
 0xa24   :  { %v7577_v48 = vpop.permute.xlu0 %7576  ;;  %v7572_v23 = vpop.permute.xlu1 %7571  ;;  %2894 = vmatpush.msra.mxu3 %v2842_v62 }
 0xa25   :  { %2941 = vmatpush.msrb.mxu1 %v7549_v33  ;;  %v7579_v26 = vunpack.i.h.bf16 %v7577_v48  ;;  %v7578_v27 = vunpack.i.l.bf16 %v7577_v48  ;;  %v7574_v12 = vunpack.i.h.bf16 %v7572_v23  ;;  %v7573_v56 = vunpack.i.l.bf16 %v7572_v23  ;;  %v2753_v48 = vld [vmem:[%s12239_s13] sm:$0xff] }
 0xa26   :  { %2895 = vmatpush.msra.mxu3 %v2841_v10  ;;  %v2785_v33 = vsel %vm1122_vm1, %v7593_v60, %v7594_v49  ;;  %v2754_v10 = vld [vmem:[%s12239_s13 + $0x8] sm:$0xff] }
 0xa27   :  { %2942 = vmatpush.msrb.mxu1 %v7569_v3  ;;  %v2814_v47 = vsel %vm12172_vm9, %v7578_v27, %v7579_v26  ;;  %v2813_v46 = vsel %vm12172_vm9, %v7573_v56, %v7574_v12 }
 0xa28   :  { %2896 = vmatpush.msra.mxu3 %v2828_v11 }
 0xa29   :  { %2943 = vmatpush.msrb.mxu1 %v7564_v55 }
 0xa2a   :  { %2897 = vmatpush.msra.mxu3 %v2827_v58 }
 0xa2b   :  { %2944 = vmatpush.msrb.mxu1 %v7579_v26  ;;  %v2756_v26 = vld [vmem:[%s12239_s13 + $0x18] sm:$0xff] }
 0xa2c   :  { %v7582_v45 = vpop.permute.xlu0 %7581  ;;  %v7597_v42 = vpop.permute.xlu1 %7596  ;;  %2898 = vmatpush.msra.mxu3 %v2814_v47 }
 0xa2d   :  { %v7584_v31 = vunpack.i.h.bf16 %v7582_v45  ;;  %v7583_v35 = vunpack.i.l.bf16 %v7582_v45  ;;  %2945 = vmatpush.msrb.mxu1 %v7574_v12  ;;  %v7599_v44 = vunpack.i.h.bf16 %v7597_v42  ;;  %v7598_v63 = vunpack.i.l.bf16 %v7597_v42  ;;  %v2883_v45 = vpop.permute.xlu2 %2882 }
 0xa2e   :  { %2899 = vmatpush.msra.mxu3 %v2813_v46 }
 0xa2f   :  { %2946 = vmatpush.msrb.mxu1 %v7589_v15  ;;  %v2799_v51 = vsel %vm2613_vm11, %v7583_v35, %v7584_v31  ;;  %v2786_v14 = vsel %vm1122_vm1, %v7598_v63, %v7599_v44 }
 0xa30   :  { %2900 = vmatpush.msra.mxu3 %v2800_v52 }
 0xa31   :  { %2947 = vmatpush.msrb.mxu1 %v7584_v31 }
 0xa32   :  { %2901 = vmatpush.msra.mxu3 %v2799_v51 }
 0xa33   :  { %2948 = vmatpush.msrb.mxu1 %v7599_v44 }
 0xa34   :  { %v7607_v38 = vpop.permute.xlu0 %7606  ;;  %v7602_v7 = vpop.permute.xlu1 %7601  ;;  %2902 = vmatpush.msra.mxu3 %v2786_v14 }
 0xa35   :  { %v7609_v16 = vunpack.i.h.bf16 %v7607_v38  ;;  %v7608_v32 = vunpack.i.l.bf16 %v7607_v38  ;;  %v7604_v3 = vunpack.i.h.bf16 %v7602_v7  ;;  %v7603_v40 = vunpack.i.l.bf16 %v7602_v7  ;;  %2949 = vmatpush.msrb.mxu1 %v7594_v49 }
 0xa36   :  { %2903 = vmatpush.msra.mxu3 %v2785_v33 }
 0xa37   :  { %2950 = vmatpush.msrb.mxu1 %v7609_v16  ;;  %v2772_v61 = vsel %vm1098_vm0, %v7608_v32, %v7609_v16  ;;  %v2771_v62 = vsel %vm1098_vm0, %v7603_v40, %v7604_v3 }
 0xa38   :  { %2904 = vmatpush.msra.mxu3 %v2772_v61 }
 0xa39   :  { %2951 = vmatpush.msrb.mxu1 %v7604_v3 }
 0xa3a   :  { %2905 = vmatpush.msra.mxu3 %v2771_v62 }
 0xa3b   :  { %7002 = vmatpush.msk.msrb.mxu1 %vm2587_vm6, %v9752_v21 }
 0xa3c   :  { %v7617_v23 = vpop.permute.xlu0 %7616  ;;  %6997 = vmatpush.msk.msra.mxu3 %vm9710_vm10, %v9738_v6  ;;  %v2755_v6 = vld [vmem:[%s12239_s13 + $0x10] sm:$0xff]  ;;  %s12245_s13 = sld [smem:[#allocation15_spill]] }
 0xa3d   :  { %v7619_v55 = vunpack.i.h.bf16 %v7617_v23  ;;  %v7618_v20 = vunpack.i.l.bf16 %v7617_v23  ;;  %7003 = vmatpush.msk.msrb.mxu1 %vm2587_vm6, %v9744_v0  ;;  %v2878_v0 = vpop.permute.xlu1 %2877 }
 0xa3e   :  { %6999 = vmatpush.msk.msra.mxu3 %vm9710_vm10, %v9740_v25  ;;  %2954 = vmatmul.f32.vlgmr.msrb.gmra.mxu1 %v2753_v48 }
 0xa3f   :  { %2908 = vmatmul.f32.vlgmr.msra.gmra.mxu3 %v2753_v48  ;;  %2976 = vmatpush.msra.mxu0 %v7619_v55  ;;  %v2869_v21 = vsel %vm2652_vm4, %v7618_v20, %v7619_v55 }
 0xa40   :  { %2930 = vmatpush.msrb.mxu2 %v2869_v21  ;;  %7004 = vmatmul.msk.f32.vlgmr.msra.gmra.mxu0 %vm2885_vm3, %v2754_v10 }
 0xa41   :  { %7000 = vmatmul.msk.f32.vlgmr.msrb.gmra.mxu2 %vm2885_vm3, %v2754_v10 }
 0xa46   :  { %2957 = vmatmul.f32.gmra.mxu1 %v2755_v6 }
 0xa47   :  { %2911 = vmatmul.f32.gmra.mxu3 %v2755_v6 }
 0xa48   :  { %7005 = vmatmul.msk.f32.gmra.mxu0 %vm2885_vm3, %v2756_v26 }
 0xa49   :  { %7001 = vmatmul.msk.f32.gmra.mxu2 %vm2885_vm3, %v2756_v26 }
 0xabb   :  { %v2955_v25 = vpop.f32.mrf.mxu1 }
 0xabc   :  { %v2956_v27 = vadd.f32 %v2955_v25, %v2878_v0 }
 0xabd   :  { %v2978_v11 = vpop.f32.mrf.mxu0 }
 0xabe   :  { %v2979_v12 = vadd.f32 %v2978_v11, %v2956_v27 }
 0xac0   :  { %v2985_v56 = vmax.f32 %v2979_v12, 0.0 }
 0xac2   :  { %v2989_v58 = vmul.f32 %v2985_v56, %v9728_v30  ;;  %v2909_v15 = vpop.f32.mrf.mxu3 }
 0xac3   :  { %v2910_v59 = vadd.f32 %v2909_v15, %v2878_v0  ;;  %v2958_v47 = vpop.f32.mrf.mxu1 }
 0xac4   :  { %v2932_v42 = vpop.f32.mrf.mxu2  ;;  %2998 = vrot.lane.b32.xlu1 %v2989_v58, %s8574_s9  ;;  %v2959_v31 = vadd.f32 %v2958_v47, %v2883_v45 }
 0xac5   :  { %v2933_v35 = vadd.f32 %v2932_v42, %v2910_v59  ;;  %v2981_v46 = vpop.f32.mrf.mxu0 }
 0xac6   :  { %v2982_v52 = vadd.f32 %v2981_v46, %v2959_v31  ;;  %v389_v31 = vld [vmem:[%s12240_s12 + $0x78] sm:$0xff]  ;;  %v387_v46 = vld [vmem:[%s12240_s12 + $0x68] sm:$0xff] }
 0xac7   :  { %v2984_v44 = vmax.f32 %v2933_v35, 0.0  ;;  %v388_v35 = vld [vmem:[%s12240_s12 + $0x70] sm:$0xff]  ;;  %3078 = vmatpush.msra.mxu2 %v389_v31 }
 0xac8   :  { %v2987_v14 = vmax.f32 %v2982_v52, 0.0  ;;  %v397_v52 = vld [vmem:[%s12240_s12 + $0xb8] sm:$0xff] }
 0xac9   :  { %v2988_v63 = vmul.f32 %v2984_v44, %v9726_v13  ;;  %v398_v44 = vld [vmem:[%s12240_s12 + $0xc0] sm:$0xff]  ;;  %3079 = vmatpush.msra.mxu2 %v388_v35 }
 0xaca   :  { %v2912_v49 = vpop.f32.mrf.mxu3  ;;  %v2991_v33 = vmul.f32 %v2987_v14, %v9728_v30  ;;  %3108 = vmatpush.msrb.mxu0 %v398_v44  ;;  %v385_v14 = vld [vmem:[%s12240_s12 + $0x58] sm:$0xff]  ;;  %v374_v44 = vld [vmem:[%s12240_s12] sm:$0xff] }
 0xacb   :  { %v2913_v60 = vadd.f32 %v2912_v49, %v2883_v45  ;;  %2996 = vrot.lane.b32.xlu0 %v2988_v63, %s8574_s9  ;;  %3080 = vmatpush.msra.mxu2 %v387_v46 }
 0xacc   :  { %v2935_v51 = vpop.f32.mrf.mxu2  ;;  %3109 = vmatpush.msrb.mxu0 %v397_v52 }
 0xacd   :  { %v2936_v38 = vadd.f32 %v2935_v51, %v2913_v60  ;;  %v386_v60 = vld [vmem:[%s12240_s12 + $0x60] sm:$0xff]  ;;  %v396_v51 = vld [vmem:[%s12240_s12 + $0xb0] sm:$0xff] }
 0xace   :  { %3081 = vmatpush.msra.mxu2 %v386_v60  ;;  %3110 = vmatpush.msrb.mxu0 %v396_v51 }
 0xacf   :  { %v2986_v7 = vmax.f32 %v2936_v38, 0.0  ;;  %v395_v38 = vld [vmem:[%s12240_s12 + $0xa8] sm:$0xff] }
 0xad0   :  { %3082 = vmatpush.msra.mxu2 %v385_v14  ;;  %3111 = vmatpush.msrb.mxu0 %v395_v38 }
 0xad1   :  { %v2990_v16 = vmul.f32 %v2986_v7, %v9726_v13  ;;  %v384_v7 = vld [vmem:[%s12240_s12 + $0x50] sm:$0xff] }
 0xad2   :  { %3083 = vmatpush.msra.mxu2 %v384_v7 }
 0xad3   :  { %3000 = vrot.lane.b32.xlu2 %v2990_v16, %s8574_s9  ;;  %3002 = vrot.lane.b32.xlu0 %v2991_v33, %s8574_s9  ;;  %v394_v33 = vld [vmem:[%s12240_s12 + $0xa0] sm:$0xff]  ;;  %v383_v16 = vld [vmem:[%s12240_s12 + $0x48] sm:$0xff] }
 0xad4   :  { %3112 = vmatpush.msrb.mxu0 %v394_v33  ;;  %3084 = vmatpush.msra.mxu2 %v383_v16 }
 0xb2d   :  { %v9826_v32 = vpop.permute.xlu2 %3000 }
 0xb2e   :  { %v9830_v3 = vsel %vm2582_vm15, 0.0, %v9826_v32 }
 0xb2f   :  { %3022 = vrot.lane.b32.xlu0 %v9830_v3, %s8565_s29 }
 0xb36   :  { %v2999_v40 = vpop.permute.xlu1 %2998 }
 0xb3d   :  { %v9834_v61 = vpop.permute.xlu0 %2996 }
 0xb3e   :  { %v9838_v62 = vsel %vm2582_vm15, %v9834_v61, %v2999_v40  ;;  %v9842_v48 = vsel %vm2582_vm15, 0.0, %v9834_v61  ;;  %v393_v40 = vld [vmem:[%s12240_s12 + $0x98] sm:$0xff] }
 0xb3f   :  { %v9846_v23 = vsel %vm2587_vm6, %v9838_v62, 0.0  ;;  %3018 = vrot.lane.b32.xlu1 %v9842_v48, %s8565_s29  ;;  %3113 = vmatpush.msrb.mxu0 %v393_v40 }
 0xb40   :  { %3020 = vrot.lane.b32.xlu2 %v9846_v23, %s8565_s29 }
 0xb45   :  { %v3003_v55 = vpop.permute.xlu0 %3002 }
 0xb46   :  { %v9854_v20 = vsel %vm2582_vm15, %v9826_v32, %v3003_v55  ;;  %v382_v55 = vld [vmem:[%s12240_s12 + $0x40] sm:$0xff] }
 0xb47   :  { %v9858_v10 = vsel %vm2587_vm6, %v9854_v20, 0.0  ;;  %3085 = vmatpush.msra.mxu2 %v382_v55 }
 0xb48   :  { %3024 = vrot.lane.b32.xlu1 %v9858_v10, %s8565_s29 }
 0xb9a   :  { %v9862_v21 = vpop.permute.xlu2 %3020 }
 0xb9b   :  { %v3033_v6 = vmax.f32 %v9846_v23, %v9862_v21 }
 0xb9d   :  { %3042 = vrot.lane.b32.xlu0 %v3033_v6, %s8577_s24 }
 0xba1   :  { %v3023_v27 = vpop.permute.xlu0 %3022 }
 0xbb1   :  { %v3019_v26 = vpop.permute.xlu1 %3018 }
 0xbb2   :  { %v9869_v0 = vsel %vm1098_vm0, %v3019_v26, %v9862_v21  ;;  %v381_v26 = vld [vmem:[%s12240_s12 + $0x38] sm:$0xff] }
 0xbb3   :  { %v3032_v25 = vmax.f32 %v9842_v48, %v9869_v0  ;;  %3086 = vmatpush.msra.mxu2 %v381_v26 }
 0xbb5   :  { %3040 = vrot.lane.b32.xlu2 %v3032_v25, %s8577_s24 }
 0xbba   :  { %v9874_v11 = vpop.permute.xlu1 %3024 }
 0xbbb   :  { %v9878_v12 = vsel %vm1098_vm0, %v3023_v27, %v9874_v11  ;;  %v3035_v56 = vmax.f32 %v9858_v10, %v9874_v11  ;;  %v380_v27 = vld [vmem:[%s12240_s12 + $0x30] sm:$0xff] }
 0xbbc   :  { %v9884_v58 = vmax.f32 %v9830_v3, %v9878_v12  ;;  %3087 = vmatpush.msra.mxu2 %v380_v27 }
 0xbbd   :  { %3046 = vrot.lane.b32.xlu2 %v3035_v56, %s8577_s24 }
 0xbbe   :  { %3044 = vrot.lane.b32.xlu1 %v9884_v58, %s8577_s24 }
 0xc0f   :  { %v3041_v15 = vpop.permute.xlu2 %3040  ;;  %v3043_v59 = vpop.permute.xlu0 %3042 }
 0xc10   :  { %v3048_v47 = vsel %vm2613_vm11, %v3041_v15, %v3043_v59  ;;  %v3055_v45 = vmax.f32 %v3033_v6, %v3043_v59  ;;  %v392_v6 = vld [vmem:[%s12240_s12 + $0x90] sm:$0xff]  ;;  %v379_v15 = vld [vmem:[%s12240_s12 + $0x28] sm:$0xff]  ;;  %v378_v59 = vld [vmem:[%s12240_s12 + $0x20] sm:$0xff] }
 0xc11   :  { %v3054_v42 = vmax.f32 %v3032_v25, %v3048_v47  ;;  %v391_v25 = vld [vmem:[%s12240_s12 + $0x88] sm:$0xff]  ;;  %3114 = vmatpush.msrb.mxu0 %v392_v6  ;;  %3088 = vmatpush.msra.mxu2 %v379_v15  ;;  %v377_v47 = vld [vmem:[%s12240_s12 + $0x18] sm:$0xff] }
 0xc12   :  { %3064 = vrot.lane.b32.xlu1 %v3055_v45, %s8578_s30  ;;  %v376_v45 = vld [vmem:[%s12240_s12 + $0x10] sm:$0xff] }
 0xc13   :  { %3062 = vrot.lane.b32.xlu0 %v3054_v42, %s8578_s30  ;;  %3115 = vmatpush.msrb.mxu0 %v391_v25  ;;  %v375_v42 = vld [vmem:[%s12240_s12 + $0x8] sm:$0xff] }
 0xc14   :  { %3089 = vmatpush.msra.mxu2 %v378_v59  ;;  %v3149_v59 = vld [vmem:[%s12241_s4 + $0x18] sm:$0xff] }
 0xc16   :  { %3090 = vmatpush.msra.mxu2 %v377_v47  ;;  %v3146_v47 = vld [vmem:[%s12241_s4] sm:$0xff] }
 0xc17   :  { %v3047_v63 = vpop.permute.xlu2 %3046 }
 0xc18   :  { %v3057_v49 = vmax.f32 %v3035_v56, %v3047_v63  ;;  %v390_v56 = vld [vmem:[%s12240_s12 + $0x80] sm:$0xff]  ;;  %3091 = vmatpush.msra.mxu2 %v376_v45  ;;  %v3147_v45 = vld [vmem:[%s12241_s4 + $0x8] sm:$0xff]  ;;  %s12246_s12 = sld [smem:[#allocation21_spill]] }
 0xc19   :  { %3116 = vmatpush.msrb.mxu0 %v390_v56 }
 0xc1a   :  { %3092 = vmatpush.msra.mxu2 %v375_v42  ;;  %v3148_v42 = vld [vmem:[%s12241_s4 + $0x10] sm:$0xff]  ;;  %s12248_s4 = sld [smem:[#allocation18_spill]] }
 0xc1b   :  { %3068 = vrot.lane.b32.xlu0 %v3057_v49, %s8578_s30 }
 0xc1c   :  { %3093 = vmatpush.msra.mxu2 %v374_v44 }
 0xc30   :  { %v3045_v31 = vpop.permute.xlu1 %3044 }
 0xc31   :  { %v3049_v35 = vsel %vm2613_vm11, %v3045_v31, %v3047_v63 }
 0xc32   :  { %v3056_v46 = vmax.f32 %v9884_v58, %v3049_v35 }
 0xc34   :  { %3066 = vrot.lane.b32.xlu2 %v3056_v46, %s8578_s30 }
 0xc84   :  { %v3065_v52 = vpop.permute.xlu1 %3064 }
 0xc85   :  { %7006 = vmatmul.msk.f32.vlgmr.msrb.gmra.mxu0 %vm12199_vm14, %v3065_v52  ;;  %v3063_v49 = vpop.permute.xlu0 %3062 }
 0xc86   :  { %v3070_v60 = vsel %vm12172_vm9, %v3063_v49, %v3065_v52 }
 0xc87   :  { %3094 = vmatmul.f32.vlgmr.msra.gmra.mxu2 %v3070_v60 }
 0xc8d   :  { %v3069_v51 = vpop.permute.xlu0 %3068 }
 0xc8e   :  { %v3067_v14 = vpop.permute.xlu2 %3066  ;;  %7007 = vmatmul.msk.f32.gmra.mxu0 %vm12199_vm14, %v3069_v51 }
 0xc8f   :  { %v3071_v63 = vsel %vm12172_vm9, %v3067_v14, %v3069_v51  ;;  %vm3461_vm9 = vcmask 261120  }
 0xc90   :  { %3097 = vmatmul.f32.gmra.mxu2 %v3071_v63 }
 0xd02   :  { %v3118_v38 = vpop.f32.mrf.mxu0 }
 0xd0a   :  { %v3095_v58 = vpop.f32.mrf.mxu2 }
 0xd0b   :  { %v3119_v7 = vadd.f32 %v3118_v38, %v3095_v58  ;;  %v3121_v33 = vpop.f32.mrf.mxu0 }
 0xd0d   :  { %3126 = vrot.lane.b32.xlu2 %v3119_v7, %s8580_s20 }
 0xd13   :  { %v3098_v16 = vpop.f32.mrf.mxu2 }
 0xd14   :  { %v3122_v40 = vadd.f32 %v3121_v33, %v3098_v16 }
 0xd16   :  { %3128 = vrot.lane.b32.xlu1 %v3122_v40, %s8580_s20 }
 0xd67   :  { %v3127_v55 = vpop.permute.xlu2 %3126 }
 0xd68   :  { %v9928_v6 = vsel %vm3132_vm8, 0.0, %v3127_v55 }
 0xd69   :  { %v3136_v27 = vsel %vm3135_vm5, %v9928_v6, 0.0 }
 0xd88   :  { %v3129_v26 = vpop.permute.xlu1 %3128 }
 0xd89   :  { %v9931_v25 = vsel %vm3132_vm8, 0.0, %v3129_v26 }
 0xd8a   :  { %v3137_v56 = vsel %vm3135_vm5, %v9931_v25, 0.0 }
 0xd8b   :  { %v7630_v15 = vpack.i.bf16 %v3136_v27, %v3137_v56  ;;  %v3139_v27 = vld [vmem:[%s12242_s10 + $0x8] sm:$0xff] }
 0xd8d   :  { %7631 = vrot.lane.b32.xlu2 %v7630_v15, %s8581_s26  ;;  %7626 = vrot.lane.b32.xlu1 %v7630_v15, %s8579_s6 }
 0xd8e   :  { %7621 = vrot.lane.b32.xlu0 %v7630_v15, %s8582_s0 }
 0xd95   :  { %7646 = vrot.lane.b32.xlu2 %v7630_v15, %s8564_s21  ;;  %7641 = vrot.lane.b32.xlu1 %v7630_v15, %s8583_s27 }
 0xd96   :  { %7636 = vrot.lane.b32.xlu0 %v7630_v15, %s8584_s1 }
 0xd9d   :  { %3217 = vperm.xlu2 %7363, %v3149_v59   ;;  %7656 = vrot.lane.b32.xlu1 %v7630_v15, %s8585_s2 }
 0xd9e   :  { %7651 = vrot.lane.b32.xlu0 %v7630_v15, %s8565_s29 }
 0xda5   :  { %3202 = vperm.xlu2 %7363, %v3146_v47   ;;  %3207 = vperm.xlu1 %7257, %v3147_v45  }
 0xda6   :  { %3212 = vperm.xlu0 %7469, %v3148_v42   ;;  %v3141_v42 = vld [vmem:[%s12242_s10 + $0x18] sm:$0xff] }
 0xde7   :  { %v7632_v49 = vpop.permute.xlu2 %7631 }
 0xde8   :  { %v7633_v14 = vunpack.i.l.bf16 %v7632_v49  ;;  %v7634_v38 = vunpack.i.h.bf16 %v7632_v49  ;;  %v3142_v49 = vld [vmem:[%s12242_s10 + $0x20] sm:$0xff] }
 0xdef   :  { %v7647_v55 = vpop.permute.xlu2 %7646 }
 0xdf0   :  { %v7648_v15 = vunpack.i.l.bf16 %v7647_v55  ;;  %v7649_v47 = vunpack.i.h.bf16 %v7647_v55 }
 0xdff   :  { %v7627_v31 = vpop.permute.xlu1 %7626 }
 0xe00   :  { %v7622_v35 = vpop.permute.xlu0 %7621  ;;  %v7628_v52 = vunpack.i.l.bf16 %v7627_v31  ;;  %v7629_v60 = vunpack.i.h.bf16 %v7627_v31 }
 0xe01   :  { %v7623_v46 = vunpack.i.l.bf16 %v7622_v35  ;;  %v7624_v44 = vunpack.i.h.bf16 %v7622_v35  ;;  %v3138_v35 = vld [vmem:[%s12242_s10] sm:$0xff] }
 0xe03   :  { %3232 = vmatpush.msrb.mxu3 %v7623_v46  ;;  %v3143_v46 = vld [vmem:[%s12242_s10 + $0x28] sm:$0xff] }
 0xe05   :  { %3233 = vmatpush.msrb.mxu3 %v7624_v44  ;;  %v3140_v44 = vld [vmem:[%s12242_s10 + $0x10] sm:$0xff] }
 0xe07   :  { %3234 = vmatpush.msrb.mxu3 %v7628_v52  ;;  %v7642_v51 = vpop.permute.xlu1 %7641  ;;  %v3145_v52 = vld [vmem:[%s12242_s10 + $0x38] sm:$0xff] }
 0xe08   :  { %v7637_v63 = vpop.permute.xlu0 %7636  ;;  %v7643_v40 = vunpack.i.l.bf16 %v7642_v51  ;;  %v7644_v56 = vunpack.i.h.bf16 %v7642_v51 }
 0xe09   :  { %3235 = vmatpush.msrb.mxu3 %v7629_v60  ;;  %v7638_v58 = vunpack.i.l.bf16 %v7637_v63  ;;  %v7639_v7 = vunpack.i.h.bf16 %v7637_v63  ;;  %v3144_v60 = vld [vmem:[%s12242_s10 + $0x30] sm:$0xff]  ;;  %s12252_s10 = sld [smem:[#allocation22_spill]] }
 0xe0b   :  { %3236 = vmatpush.msrb.mxu3 %v7633_v14 }
 0xe0d   :  { %3237 = vmatpush.msrb.mxu3 %v7634_v38 }
 0xe0f   :  { %3238 = vmatpush.msrb.mxu3 %v7638_v58  ;;  %v7657_v33 = vpop.permute.xlu1 %7656  ;;  %v10325_v2 = vld [vmem:[%s12252_s10 + $0x10] sm:$0xff] }
 0xe10   :  { %v7658_v16 = vunpack.i.l.bf16 %v7657_v33  ;;  %v7659_v26 = vunpack.i.h.bf16 %v7657_v33  ;;  %v7652_v59 = vpop.permute.xlu0 %7651 }
 0xe11   :  { %3239 = vmatpush.msrb.mxu3 %v7639_v7  ;;  %v7653_v45 = vunpack.i.l.bf16 %v7652_v59  ;;  %v7654_v31 = vunpack.i.h.bf16 %v7652_v59  ;;  %v9966_v7 = vld [vmem:[%s12243_s7] ss:$0 sm:$0xff]  ;;  %s12271_s7 = sld [smem:[#allocation25_spill]] }
 0xe12   :  { %3275 = vmatpush.msra.mxu0 %v7658_v16 }
 0xe13   :  { %3240 = vmatpush.msrb.mxu3 %v7643_v40  ;;  %v3218_v40 = vpop.permute.xlu2 %3217 }
 0xe14   :  { %3276 = vmatpush.msra.mxu0 %v7659_v26 }
 0xe15   :  { %3241 = vmatpush.msrb.mxu3 %v7644_v56  ;;  %7010 = vmatmul.msk.f32.vlgmr.msra.gmra.mxu0 %vm2885_vm3, %v3139_v27 }
 0xe17   :  { %3242 = vmatpush.msrb.mxu3 %v7648_v15  ;;  %v3208_v63 = vpop.permute.xlu1 %3207 }
 0xe18   :  { %v3213_v26 = vpop.permute.xlu0 %3212 }
 0xe19   :  { %3243 = vmatpush.msrb.mxu3 %v7649_v47 }
 0xe1b   :  { %3244 = vmatpush.msrb.mxu3 %v7653_v45 }
 0xe1d   :  { %3245 = vmatpush.msrb.mxu3 %v7654_v31  ;;  %7011 = vmatmul.msk.f32.gmra.mxu0 %vm2885_vm3, %v3141_v42 }
 0xe1f   :  { %7008 = vmatpush.msk.msrb.mxu3 %vm3135_vm5, %v9931_v25 }
 0xe21   :  { %7009 = vmatpush.msk.msrb.mxu3 %vm3135_vm5, %v9928_v6 }
 0xe22   :  { %3248 = vmatmul.f32.vlgmr.msrb.gmra.mxu3 %v3138_v35  ;;  %v3203_v35 = vpop.permute.xlu2 %3202 }
 0xe25   :  { %7012 = vmatmul.msk.f32.gmra.mxu0 %vm2885_vm3, %v3143_v46 }
 0xe2a   :  { %3251 = vmatmul.f32.gmra.mxu3 %v3140_v44 }
 0xe2d   :  { %7013 = vmatmul.msk.f32.gmra.mxu0 %vm2885_vm3, %v3145_v52 }
 0xe32   :  { %3254 = vmatmul.f32.gmra.mxu3 %v3142_v49 }
 0xe3a   :  { %3257 = vmatmul.f32.gmra.mxu3 %v3144_v60 }
 0xe92   :  { %v3278_v51 = vpop.f32.mrf.mxu0 }
 0xe9a   :  { %v3281_v14 = vpop.f32.mrf.mxu0 }
 0xea2   :  { %v3284_v16 = vpop.f32.mrf.mxu0 }
 0xea5   :  { %v3249_v25 = vpop.f32.mrf.mxu3 }
 0xea6   :  { %v3250_v46 = vadd.f32 %v3249_v25, %v3203_v35 }
 0xea8   :  { %v3279_v49 = vadd.f32 %v3278_v51, %v3250_v46 }
 0xeaa   :  { %v3287_v42 = vpop.f32.mrf.mxu0 }
 0xead   :  { %v3252_v38 = vpop.f32.mrf.mxu3 }
 0xeae   :  { %v3253_v6 = vadd.f32 %v3252_v38, %v3208_v63 }
 0xeb0   :  { %v3282_v58 = vadd.f32 %v3281_v14, %v3253_v6  ;;  %v3290_v14 = vmax.f32 %v3279_v49, 0.0 }
 0xeb2   :  { %v3291_v33 = vmax.f32 %v3282_v58, 0.0  ;;  %v3297_v63 = vmul.f32 %v9966_v7, %v3290_v14 }
 0xeb4   :  { %v3298_v55 = vmul.f32 %v9966_v7, %v3291_v33 }
 0xeb5   :  { %v3255_v27 = vpop.f32.mrf.mxu3 }
 0xeb6   :  { %v3256_v56 = vadd.f32 %v3255_v27, %v3213_v26  ;;  %3307 = vrot.lane.b32.xlu2 %v3298_v55, %s8580_s20 }
 0xeb8   :  { %v3285_v15 = vadd.f32 %v3284_v16, %v3256_v56 }
 0xeba   :  { %v3292_v59 = vmax.f32 %v3285_v15, 0.0 }
 0xebc   :  { %v3299_v47 = vmul.f32 %v9966_v7, %v3292_v59 }
 0xebd   :  { %v3258_v45 = vpop.f32.mrf.mxu3 }
 0xebe   :  { %v3259_v31 = vadd.f32 %v3258_v45, %v3218_v40  ;;  %3309 = vrot.lane.b32.xlu1 %v3299_v47, %s8580_s20  ;;  %v3340_v47 = vld [vmem:[%s12244_s11 + $0x18] sm:$0xff]  ;;  %v3337_v45 = vld [vmem:[%s12244_s11] sm:$0xff] }
 0xec0   :  { %v3288_v44 = vadd.f32 %v3287_v42, %v3259_v31  ;;  %v3339_v42 = vld [vmem:[%s12244_s11 + $0x10] sm:$0xff]  ;;  %v3338_v31 = vld [vmem:[%s12244_s11 + $0x8] sm:$0xff]  ;;  %s12288_s11 = sld [smem:[#allocation29_spill]] }
 0xec2   :  { %v3293_v52 = vmax.f32 %v3288_v44, 0.0 }
 0xec4   :  { %v3300_v60 = vmul.f32 %v9966_v7, %v3293_v52 }
 0xec6   :  { %3311 = vrot.lane.b32.xlu0 %v3300_v60, %s8580_s20 }
 0xece   :  { %3305 = vrot.lane.b32.xlu0 %v3297_v63, %s8580_s20 }
 0xf10   :  { %v3308_v40 = vpop.permute.xlu2 %3307 }
 0xf11   :  { %v9988_v55 = vsel %vm3132_vm8, 0.0, %v3308_v40 }
 0xf12   :  { %v3322_v56 = vsel %vm3135_vm5, %v9988_v55, 0.0 }
 0xf30   :  { %v3310_v38 = vpop.permute.xlu1 %3309 }
 0xf31   :  { %v9977_v6 = vsel %vm3132_vm8, 0.0, %v3310_v38 }
 0xf32   :  { %v3323_v51 = vsel %vm3135_vm5, %v9977_v6, 0.0 }
 0xf38   :  { %v3312_v58 = vpop.permute.xlu0 %3311 }
 0xf39   :  { %v9980_v33 = vsel %vm3132_vm8, 0.0, %v3312_v58 }
 0xf3a   :  { %v3324_v25 = vsel %vm3135_vm5, %v9980_v33, 0.0 }
 0xf3b   :  { %v7680_v16 = vpack.i.bf16 %v3323_v51, %v3324_v25 }
 0xf3d   :  { %7681 = vrot.lane.b32.xlu2 %v7680_v16, %s8583_s27 }
 0xf40   :  { %v3306_v26 = vpop.permute.xlu0 %3305 }
 0xf41   :  { %v9991_v27 = vsel %vm3132_vm8, 0.0, %v3306_v26 }
 0xf42   :  { %v3321_v15 = vsel %vm3135_vm5, %v9991_v27, 0.0 }
 0xf43   :  { %v7665_v59 = vpack.i.bf16 %v3321_v15, %v3322_v56 }
 0xf45   :  { %7686 = vrot.lane.b32.xlu2 %v7680_v16, %s8579_s6  ;;  %7666 = vrot.lane.b32.xlu1 %v7665_v59, %s8583_s27 }
 0xf46   :  { %7661 = vrot.lane.b32.xlu0 %v7665_v59, %s8582_s0 }
 0xf4d   :  { %7691 = vrot.lane.b32.xlu2 %v7665_v59, %s8564_s21  ;;  %7671 = vrot.lane.b32.xlu1 %v7680_v16, %s8582_s0  ;;  %s12250_s0 = sld [smem:[#allocation20_spill]] }
 0xf4e   :  { %7701 = vrot.lane.b32.xlu0 %v7680_v16, %s8564_s21 }
 0xf55   :  { %7696 = vrot.lane.b32.xlu2 %v7665_v59, %s8581_s26  ;;  %7676 = vrot.lane.b32.xlu1 %v7665_v59, %s8579_s6 }
 0xf56   :  { %7706 = vrot.lane.b32.xlu0 %v7680_v16, %s8581_s26  ;;  %s12249_s26 = sld [smem:[#allocation19_spill]] }
 0xf5d   :  { %7726 = vrot.lane.b32.xlu2 %v7665_v59, %s8584_s1  ;;  %7716 = vrot.lane.b32.xlu1 %v7680_v16, %s8565_s29 }
 0xf5e   :  { %7711 = vrot.lane.b32.xlu0 %v7665_v59, %s8565_s29 }
 0xf65   :  { %3458 = vperm.xlu2 %7363, %v3340_v47   ;;  %7721 = vrot.lane.b32.xlu1 %v7680_v16, %s8584_s1 }
 0xf66   :  { %7731 = vrot.lane.b32.xlu0 %v7680_v16, %s8585_s2 }
 0xf6d   :  { %3443 = vperm.xlu2 %7363, %v3337_v45   ;;  %7736 = vrot.lane.b32.xlu1 %v7665_v59, %s8585_s2  ;;  %s12251_s2 = sld [smem:[#allocation23_spill]] }
 0xf6e   :  { %3453 = vperm.xlu0 %7469, %v3339_v42  }
 0xf75   :  { %3448 = vperm.xlu1 %7257, %v3338_v31  }
 0xf97   :  { %v7682_v35 = vpop.permute.xlu2 %7681 }
 0xf98   :  { %v7683_v46 = vunpack.i.l.bf16 %v7682_v35  ;;  %v7684_v44 = vunpack.i.h.bf16 %v7682_v35 }
 0xf9a   :  { %3474 = vmatpush.msra.mxu1 %v7683_v46 }
 0xf9c   :  { %3475 = vmatpush.msra.mxu1 %v7684_v44 }
 0xf9f   :  { %v7687_v49 = vpop.permute.xlu2 %7686 }
 0xfa0   :  { %v7688_v42 = vunpack.i.l.bf16 %v7687_v49  ;;  %v7689_v35 = vunpack.i.h.bf16 %v7687_v49 }
 0xfa7   :  { %v7692_v16 = vpop.permute.xlu2 %7691 }
 0xfa8   :  { %v7693_v15 = vunpack.i.l.bf16 %v7692_v16  ;;  %v7694_v47 = vunpack.i.h.bf16 %v7692_v16 }
 0xfb7   :  { %v7667_v52 = vpop.permute.xlu1 %7666 }
 0xfb8   :  { %v7668_v60 = vunpack.i.l.bf16 %v7667_v52  ;;  %v7662_v14 = vpop.permute.xlu0 %7661  ;;  %v7669_v63 = vunpack.i.h.bf16 %v7667_v52  ;;  %v7697_v52 = vpop.permute.xlu2 %7696 }
 0xfb9   :  { %v7663_v56 = vunpack.i.l.bf16 %v7662_v14  ;;  %v7664_v59 = vunpack.i.h.bf16 %v7662_v14  ;;  %v7699_v49 = vunpack.i.h.bf16 %v7697_v52 }
 0xfba   :  { %3476 = vmatpush.msra.mxu1 %v7668_v60 }
 0xfbc   :  { %3477 = vmatpush.msra.mxu1 %v7669_v63 }
 0xfbf   :  { %v7672_v38 = vpop.permute.xlu1 %7671 }
 0xfc0   :  { %v7673_v58 = vunpack.i.l.bf16 %v7672_v38  ;;  %v7702_v51 = vpop.permute.xlu0 %7701  ;;  %v7674_v40 = vunpack.i.h.bf16 %v7672_v38 }
 0xfc1   :  { %v7703_v25 = vunpack.i.l.bf16 %v7702_v51  ;;  %v7704_v26 = vunpack.i.h.bf16 %v7702_v51 }
 0xfc2   :  { %3503 = vmatpush.msrb.mxu2 %v7673_v58 }
 0xfc3   :  { %3478 = vmatpush.msra.mxu1 %v7703_v25  ;;  %v7698_v25 = vunpack.i.l.bf16 %v7697_v52 }
 0xfc4   :  { %3504 = vmatpush.msrb.mxu2 %v7674_v40 }
 0xfc5   :  { %3479 = vmatpush.msra.mxu1 %v7704_v26 }
 0xfc6   :  { %3505 = vmatpush.msrb.mxu2 %v7663_v56 }
 0xfc7   :  { %3480 = vmatpush.msra.mxu1 %v7693_v15  ;;  %v7677_v45 = vpop.permute.xlu1 %7676 }
 0xfc8   :  { %v7707_v31 = vpop.permute.xlu0 %7706  ;;  %3506 = vmatpush.msrb.mxu2 %v7664_v59  ;;  %v7678_v46 = vunpack.i.l.bf16 %v7677_v45  ;;  %v7679_v44 = vunpack.i.h.bf16 %v7677_v45  ;;  %v7727_v59 = vpop.permute.xlu2 %7726 }
 0xfc9   :  { %3481 = vmatpush.msra.mxu1 %v7694_v47  ;;  %v7708_v63 = vunpack.i.l.bf16 %v7707_v31  ;;  %v7709_v14 = vunpack.i.h.bf16 %v7707_v31  ;;  %v7728_v31 = vunpack.i.l.bf16 %v7727_v59 }
 0xfca   :  { %3507 = vmatpush.msrb.mxu2 %v7688_v42 }
 0xfcc   :  { %3508 = vmatpush.msrb.mxu2 %v7689_v35  ;;  %v7729_v35 = vunpack.i.h.bf16 %v7727_v59 }
 0xfce   :  { %3509 = vmatpush.msrb.mxu2 %v7678_v46  ;;  %v3325_v46 = vld [vmem:[%s12245_s13] sm:$0xff] }
 0xfcf   :  { %v7717_v60 = vpop.permute.xlu1 %7716 }
 0xfd0   :  { %v7718_v38 = vunpack.i.l.bf16 %v7717_v60  ;;  %v7712_v58 = vpop.permute.xlu0 %7711  ;;  %3510 = vmatpush.msrb.mxu2 %v7679_v44  ;;  %v7719_v51 = vunpack.i.h.bf16 %v7717_v60  ;;  %v3326_v44 = vld [vmem:[%s12245_s13 + $0x8] sm:$0xff]  ;;  %v3328_v60 = vld [vmem:[%s12245_s13 + $0x18] sm:$0xff] }
 0xfd1   :  { %v7713_v16 = vunpack.i.l.bf16 %v7712_v58  ;;  %v7714_v40 = vunpack.i.h.bf16 %v7712_v58  ;;  %v3332_v58 = vld [vmem:[%s12245_s13 + $0x38] sm:$0xff] }
 0xfd2   :  { %3482 = vmatpush.msra.mxu1 %v7718_v38  ;;  %3511 = vmatpush.msrb.mxu2 %v7708_v63  ;;  %v3329_v63 = vld [vmem:[%s12245_s13 + $0x20] sm:$0xff]  ;;  %v3331_v38 = vld [vmem:[%s12245_s13 + $0x30] sm:$0xff] }
 0xfd4   :  { %3483 = vmatpush.msra.mxu1 %v7719_v51  ;;  %3512 = vmatpush.msrb.mxu2 %v7709_v14  ;;  %v3333_v14 = vld [vmem:[%s12245_s13 + $0x40] sm:$0xff]  ;;  %v3334_v51 = vld [vmem:[%s12245_s13 + $0x48] sm:$0xff] }
 0xfd6   :  { %3484 = vmatpush.msra.mxu1 %v7713_v16  ;;  %3513 = vmatpush.msrb.mxu2 %v7698_v25  ;;  %v3335_v25 = vld [vmem:[%s12245_s13 + $0x50] sm:$0xff]  ;;  %v3336_v16 = vld [vmem:[%s12245_s13 + $0x58] sm:$0xff] }
 0xfd7   :  { %v7722_v26 = vpop.permute.xlu1 %7721 }
 0xfd8   :  { %v7723_v56 = vunpack.i.l.bf16 %v7722_v26  ;;  %v7732_v15 = vpop.permute.xlu0 %7731  ;;  %3485 = vmatpush.msra.mxu1 %v7714_v40  ;;  %3514 = vmatpush.msrb.mxu2 %v7699_v49  ;;  %v7724_v45 = vunpack.i.h.bf16 %v7722_v26  ;;  %v3459_v49 = vpop.permute.xlu2 %3458 }
 0xfd9   :  { %v7733_v47 = vunpack.i.l.bf16 %v7732_v15  ;;  %v7734_v42 = vunpack.i.h.bf16 %v7732_v15 }
 0xfda   :  { %7014 = vmatpush.msk.msra.mxu1 %vm3135_vm5, %v9980_v33  ;;  %3515 = vmatpush.msrb.mxu2 %v7723_v56 }
 0xfdb   :  { %3544 = vmatpush.msrb.mxu0 %v7733_v47 }
 0xfdc   :  { %7015 = vmatpush.msk.msra.mxu1 %vm3135_vm5, %v9977_v6  ;;  %3516 = vmatpush.msrb.mxu2 %v7724_v45 }
 0xfdd   :  { %3545 = vmatpush.msrb.mxu0 %v7734_v42 }
 0xfde   :  { %7016 = vmatpush.msk.msra.mxu1 %vm3135_vm5, %v9988_v55  ;;  %3517 = vmatpush.msrb.mxu2 %v7728_v31  ;;  %v3327_v55 = vld [vmem:[%s12245_s13 + $0x10] sm:$0xff] }
 0xfdf   :  { %v7737_v33 = vpop.permute.xlu1 %7736 }
 0xfe0   :  { %v7738_v52 = vunpack.i.l.bf16 %v7737_v33  ;;  %7017 = vmatpush.msk.msra.mxu1 %vm3135_vm5, %v9991_v27  ;;  %3518 = vmatpush.msrb.mxu2 %v7729_v35  ;;  %v7739_v6 = vunpack.i.h.bf16 %v7737_v33  ;;  %v3330_v27 = vld [vmem:[%s12245_s13 + $0x28] sm:$0xff]  ;;  %v3444_v56 = vpop.permute.xlu2 %3443  ;;  %s12317_s13 = sld [smem:[#allocation32_spill]] }
 0xfe1   :  { %3490 = vmatmul.f32.vlgmr.msra.gmra.mxu1 %v3325_v46  ;;  %3519 = vmatmul.f32.vlgmr.msrb.gmra.mxu2 %v3326_v44 }
 0xfe2   :  { %3546 = vmatpush.msrb.mxu0 %v7738_v52 }
 0xfe4   :  { %3547 = vmatpush.msrb.mxu0 %v7739_v6 }
 0xfe5   :  { %7018 = vmatmul.msk.f32.vlgmr.msrb.gmra.mxu0 %vm3461_vm9, %v3327_v55 }
 0xfe7   :  { %v3449_v42 = vpop.permute.xlu1 %3448 }
 0xfe9   :  { %3493 = vmatmul.f32.gmra.mxu1 %v3328_v60  ;;  %3522 = vmatmul.f32.gmra.mxu2 %v3329_v63 }
 0xfed   :  { %7019 = vmatmul.msk.f32.gmra.mxu0 %vm3461_vm9, %v3330_v27 }
 0xff1   :  { %3496 = vmatmul.f32.gmra.mxu1 %v3331_v38  ;;  %3525 = vmatmul.f32.gmra.mxu2 %v3332_v58  ;;  %v3454_v58 = vpop.permute.xlu0 %3453 }
 0xff5   :  { %7020 = vmatmul.msk.f32.gmra.mxu0 %vm3461_vm9, %v3333_v14 }
 0xff9   :  { %3499 = vmatmul.f32.gmra.mxu1 %v3334_v51  ;;  %3528 = vmatmul.f32.gmra.mxu2 %v3335_v25 }
 0xffd   :  { %7021 = vmatmul.msk.f32.gmra.mxu0 %vm3461_vm9, %v3336_v16 }
0x105e   :  { %v3491_v40 = vpop.f32.mrf.mxu1 }
0x105f   :  { %v3492_v59 = vadd.f32 %v3491_v40, %v3444_v56 }
0x1062   :  { %v3549_v26 = vpop.f32.mrf.mxu0 }
0x1064   :  { %v3520_v15 = vpop.f32.mrf.mxu2 }
0x1065   :  { %v3521_v45 = vadd.f32 %v3520_v15, %v3492_v59 }
0x1066   :  { %v3494_v47 = vpop.f32.mrf.mxu1 }
0x1067   :  { %v3495_v35 = vadd.f32 %v3494_v47, %v3449_v42  ;;  %v3550_v46 = vadd.f32 %v3549_v26, %v3521_v45 }
0x1069   :  { %v3561_v6 = vmax.f32 %v3550_v46, 0.0 }
0x106a   :  { %v3552_v31 = vpop.f32.mrf.mxu0 }
0x106b   :  { %v3565_v27 = vmul.f32 %v9966_v7, %v3561_v6 }
0x106c   :  { %v3523_v44 = vpop.f32.mrf.mxu2 }
0x106d   :  { %v3524_v33 = vadd.f32 %v3523_v44, %v3495_v35 }
0x106e   :  { %v3497_v52 = vpop.f32.mrf.mxu1 }
0x106f   :  { %v3553_v55 = vadd.f32 %v3552_v31, %v3524_v33  ;;  %v3498_v51 = vadd.f32 %v3497_v52, %v3454_v58 }
0x1071   :  { %v3562_v60 = vmax.f32 %v3553_v55, 0.0 }
0x1072   :  { %v3555_v63 = vpop.f32.mrf.mxu0 }
0x1073   :  { %v3566_v38 = vmul.f32 %v9966_v7, %v3562_v60 }
0x1074   :  { %v3526_v14 = vpop.f32.mrf.mxu2 }
0x1075   :  { %v7745_v25 = vpack.i.bf16 %v3565_v27, %v3566_v38  ;;  %v3527_v16 = vadd.f32 %v3526_v14, %v3498_v51 }
0x1076   :  { %v3500_v40 = vpop.f32.mrf.mxu1 }
0x1077   :  { %7746 = vrot.lane.b32.xlu1 %v7745_v25, %s8580_s20  ;;  %v3501_v26 = vadd.f32 %v3500_v40, %v3459_v49  ;;  %v3556_v56 = vadd.f32 %v3555_v63, %v3527_v16 }
0x1079   :  { %v3563_v45 = vmax.f32 %v3556_v56, 0.0 }
0x107a   :  { %v3558_v59 = vpop.f32.mrf.mxu0 }
0x107b   :  { %v3567_v35 = vmul.f32 %v9966_v7, %v3563_v45 }
0x107c   :  { %v3529_v15 = vpop.f32.mrf.mxu2 }
0x107d   :  { %v3530_v47 = vadd.f32 %v3529_v15, %v3501_v26 }
0x107f   :  { %v3559_v42 = vadd.f32 %v3558_v59, %v3530_v47 }
0x1081   :  { %v3564_v31 = vmax.f32 %v3559_v42, 0.0 }
0x1083   :  { %v3568_v46 = vmul.f32 %v9966_v7, %v3564_v31  ;;  %v3601_v31 = vld [vmem:[%s12246_s12] sm:$0xff] }
0x1085   :  { %v7740_v44 = vpack.i.bf16 %v3567_v35, %v3568_v46 }
0x1087   :  { %7741 = vrot.lane.b32.xlu0 %v7740_v44, %s8580_s20  ;;  %s12247_s20 = sld [smem:[#allocation17_spill]] }
0x10e9   :  { %v7747_v33 = vpop.permute.xlu1 %7746 }
0x10ea   :  { %v7749_v52 = vunpack.i.h.bf16 %v7747_v33  ;;  %v7748_v6 = vunpack.i.l.bf16 %v7747_v33  ;;  %v3602_v33 = vld [vmem:[%s12246_s12 + $0x8] sm:$0xff] }
0x10ec   :  { %v3585_v55 = vsel %vm3132_vm8, 0.0, %v7749_v52  ;;  %v3586_v49 = vsel %vm3132_vm8, 0.0, %v7748_v6 }
0x10ed   :  { %v3589_v60 = vsel %vm3135_vm5, %v3585_v55, 0.0  ;;  %v3590_v63 = vsel %vm3135_vm5, %v3586_v49, 0.0 }
0x10ee   :  { %v7755_v27 = vpack.i.bf16 %v3589_v60, %v3590_v63 }
0x10f0   :  { %7756 = vrot.lane.b32.xlu0 %v7755_v27, %s8584_s1 }
0x10f9   :  { %v7742_v38 = vpop.permute.xlu0 %7741 }
0x10fa   :  { %v7744_v58 = vunpack.i.h.bf16 %v7742_v38  ;;  %v7743_v7 = vunpack.i.l.bf16 %v7742_v38 }
0x10fc   :  { %v3587_v14 = vsel %vm3132_vm8, 0.0, %v7744_v58  ;;  %v3588_v51 = vsel %vm3132_vm8, 0.0, %v7743_v7  ;;  %vm12266_vm8 = vcmask 957440  }
0x10fd   :  { %v3591_v25 = vsel %vm3135_vm5, %v3587_v14, 0.0  ;;  %v3592_v16 = vsel %vm3135_vm5, %v3588_v51, 0.0  ;;  %vm12198_vm5 = vcmask 719872  }
0x10fe   :  { %v7750_v40 = vpack.i.bf16 %v3591_v25, %v3592_v16 }
0x1100   :  { %7751 = vrot.lane.b32.xlu2 %v7750_v40, %s8584_s1  ;;  %7761 = vrot.lane.b32.xlu1 %v7750_v40, %s8583_s27 }
0x1101   :  { %7771 = vrot.lane.b32.xlu0 %v7750_v40, %s8565_s29 }
0x1108   :  { %7776 = vrot.lane.b32.xlu1 %v7755_v27, %s8565_s29  ;;  %7766 = vrot.lane.b32.xlu2 %v7755_v27, %s8583_s27  ;;  %s8586_s27 = smov 72  }
0x115a   :  { %v7752_v26 = vpop.permute.xlu2 %7751 }
0x115b   :  { %v10060_v56 = vunpack.i.h.bf16 %v7752_v26  ;;  %v10062_v15 = vunpack.i.l.bf16 %v7752_v26  ;;  %7781 = vrot.lane.b32.xlu2 %v7752_v26, %s8584_s1 }
0x1162   :  { %v7767_v59 = vpop.permute.xlu2 %7766  ;;  %v7757_v47 = vpop.permute.xlu0 %7756 }
0x1163   :  { %v10065_v45 = vunpack.i.h.bf16 %v7757_v47  ;;  %v10067_v42 = vunpack.i.l.bf16 %v7757_v47  ;;  %7796 = vrot.lane.b32.xlu2 %v7767_v59, %s8584_s1  ;;  %7786 = vrot.lane.b32.xlu0 %v7757_v47, %s8584_s1 }
0x116b   :  { %3633 = vperm.xlu2 %7363, %v3601_v31   ;;  %v3595_v31 = vld [vmem:[%s12248_s4] sm:$0xff] }
0x1172   :  { %v7762_v35 = vpop.permute.xlu1 %7761 }
0x1173   :  { %v7772_v46 = vpop.permute.xlu0 %7771  ;;  %7791 = vrot.lane.b32.xlu1 %v7762_v35, %s8584_s1  ;;  %v3597_v35 = vld [vmem:[%s12249_s26] sm:$0xff] }
0x1174   :  { %7801 = vrot.lane.b32.xlu0 %v7772_v46, %s8584_s1  ;;  %v3594_v46 = vld [vmem:[%s12247_s20 + $0x8] sm:$0xff] }
0x117a   :  { %v7777_v44 = vpop.permute.xlu1 %7776 }
0x117b   :  { %7806 = vrot.lane.b32.xlu1 %v7777_v44, %s8584_s1  ;;  %v3596_v44 = vld [vmem:[%s12248_s4 + $0x8] sm:$0xff]  ;;  %s8587_s1 = smov 88  }
0x117c   :  { %3638 = vperm.xlu0 %7469, %v3602_v33   ;;  %v3600_v33 = vld [vmem:[%s12250_s0 + $0x8] sm:$0xff] }
0x11b5   :  { %v7782_v52 = vpop.permute.xlu2 %7781 }
0x11b6   :  { %v7783_v6 = vunpack.i.l.bf16 %v7782_v52  ;;  %v7784_v55 = vunpack.i.h.bf16 %v7782_v52  ;;  %v429_v52 = vld [vmem:[#allocation5 + $0xf0] sm:$0xff] }
0x11b8   :  { %3681 = vmatpush.msra.mxu3 %v7783_v6  ;;  %3706 = vmatpush.msrb.mxu1 %v7783_v6 }
0x11b9   :  { %3731 = vmatpush.msra.mxu2 %v7783_v6  ;;  %3756 = vmatpush.msra.mxu0 %v7783_v6  ;;  %v430_v6 = vld [vmem:[#allocation5 + $0xf8] sm:$0xff] }
0x11ba   :  { %3682 = vmatpush.msra.mxu3 %v7784_v55  ;;  %3707 = vmatpush.msrb.mxu1 %v7784_v55 }
0x11bb   :  { %3732 = vmatpush.msra.mxu2 %v7784_v55  ;;  %3757 = vmatpush.msra.mxu0 %v7784_v55  ;;  %v427_v55 = vld [vmem:[#allocation5 + $0xe0] sm:$0xff] }
0x11bd   :  { %v7797_v58 = vpop.permute.xlu2 %7796 }
0x11be   :  { %v7798_v14 = vunpack.i.l.bf16 %v7797_v58  ;;  %v7799_v25 = vunpack.i.h.bf16 %v7797_v58 }
0x11d5   :  { %v7787_v49 = vpop.permute.xlu0 %7786 }
0x11d6   :  { %v7788_v60 = vunpack.i.l.bf16 %v7787_v49  ;;  %v7789_v63 = vunpack.i.h.bf16 %v7787_v49  ;;  %v428_v49 = vld [vmem:[#allocation5 + $0xe8] sm:$0xff] }
0x11d8   :  { %3683 = vmatpush.msra.mxu3 %v7788_v60  ;;  %3708 = vmatpush.msrb.mxu1 %v7788_v60 }
0x11d9   :  { %3733 = vmatpush.msra.mxu2 %v7788_v60  ;;  %3758 = vmatpush.msra.mxu0 %v7788_v60  ;;  %v10100_v60 = vpop.permute.xlu2 %3633 }
0x11da   :  { %3684 = vmatpush.msra.mxu3 %v7789_v63  ;;  %3709 = vmatpush.msrb.mxu1 %v7789_v63 }
0x11db   :  { %3734 = vmatpush.msra.mxu2 %v7789_v63  ;;  %3759 = vmatpush.msra.mxu0 %v7789_v63  ;;  %v425_v63 = vld [vmem:[#allocation5 + $0xd0] sm:$0xff] }
0x11e5   :  { %v7792_v27 = vpop.permute.xlu1 %7791 }
0x11e6   :  { %v7793_v38 = vunpack.i.l.bf16 %v7792_v27  ;;  %v7794_v7 = vunpack.i.h.bf16 %v7792_v27  ;;  %v7802_v51 = vpop.permute.xlu0 %7801  ;;  %v426_v27 = vld [vmem:[#allocation5 + $0xd8] sm:$0xff] }
0x11e7   :  { %v7803_v16 = vunpack.i.l.bf16 %v7802_v51  ;;  %v7804_v26 = vunpack.i.h.bf16 %v7802_v51 }
0x11e8   :  { %3685 = vmatpush.msra.mxu3 %v7793_v38  ;;  %3710 = vmatpush.msrb.mxu1 %v7793_v38 }
0x11e9   :  { %3735 = vmatpush.msra.mxu2 %v7793_v38  ;;  %3760 = vmatpush.msra.mxu0 %v7793_v38 }
0x11ea   :  { %3686 = vmatpush.msra.mxu3 %v7794_v7  ;;  %3711 = vmatpush.msrb.mxu1 %v7794_v7 }
0x11eb   :  { %3736 = vmatpush.msra.mxu2 %v7794_v7  ;;  %3761 = vmatpush.msra.mxu0 %v7794_v7 }
0x11ec   :  { %3687 = vmatpush.msra.mxu3 %v7798_v14  ;;  %3712 = vmatpush.msrb.mxu1 %v7798_v14 }
0x11ed   :  { %3737 = vmatpush.msra.mxu2 %v7798_v14  ;;  %3762 = vmatpush.msra.mxu0 %v7798_v14  ;;  %v7807_v40 = vpop.permute.xlu1 %7806  ;;  %v423_v14 = vld [vmem:[#allocation5 + $0xc0] sm:$0xff] }
0x11ee   :  { %3688 = vmatpush.msra.mxu3 %v7799_v25  ;;  %3713 = vmatpush.msrb.mxu1 %v7799_v25  ;;  %v7808_v59 = vunpack.i.l.bf16 %v7807_v40  ;;  %v7809_v47 = vunpack.i.h.bf16 %v7807_v40 }
0x11ef   :  { %3738 = vmatpush.msra.mxu2 %v7799_v25  ;;  %3763 = vmatpush.msra.mxu0 %v7799_v25  ;;  %v424_v25 = vld [vmem:[#allocation5 + $0xc8] sm:$0xff] }
0x11f0   :  { %3689 = vmatpush.msra.mxu3 %v7803_v16  ;;  %3714 = vmatpush.msrb.mxu1 %v7803_v16 }
0x11f1   :  { %3739 = vmatpush.msra.mxu2 %v7803_v16  ;;  %3764 = vmatpush.msra.mxu0 %v7803_v16  ;;  %v469_v16 = vld [vmem:[#allocation5 + $0x230] sm:$0xff] }
0x11f2   :  { %3690 = vmatpush.msra.mxu3 %v7804_v26  ;;  %3715 = vmatpush.msrb.mxu1 %v7804_v26 }
0x11f3   :  { %3740 = vmatpush.msra.mxu2 %v7804_v26  ;;  %3765 = vmatpush.msra.mxu0 %v7804_v26  ;;  %v421_v26 = vld [vmem:[#allocation5 + $0xb0] sm:$0xff] }
0x11f4   :  { %3691 = vmatpush.msra.mxu3 %v7808_v59  ;;  %3716 = vmatpush.msrb.mxu1 %v7808_v59 }
0x11f5   :  { %3741 = vmatpush.msra.mxu2 %v7808_v59  ;;  %3766 = vmatpush.msra.mxu0 %v7808_v59  ;;  %v461_v59 = vld [vmem:[#allocation5 + $0x1f0] sm:$0xff] }
0x11f6   :  { %3692 = vmatpush.msra.mxu3 %v7809_v47  ;;  %3717 = vmatpush.msrb.mxu1 %v7809_v47 }
0x11f7   :  { %3742 = vmatpush.msra.mxu2 %v7809_v47  ;;  %3767 = vmatpush.msra.mxu0 %v7809_v47  ;;  %v422_v47 = vld [vmem:[#allocation5 + $0xb8] sm:$0xff] }
0x11f8   :  { %3693 = vmatpush.msra.mxu3 %v10062_v15  ;;  %3718 = vmatpush.msrb.mxu1 %v10062_v15 }
0x11f9   :  { %3743 = vmatpush.msra.mxu2 %v10062_v15  ;;  %3768 = vmatpush.msra.mxu0 %v10062_v15  ;;  %v3593_v15 = vld [vmem:[%s12247_s20] sm:$0xff] }
0x11fa   :  { %3694 = vmatpush.msra.mxu3 %v10060_v56  ;;  %3719 = vmatpush.msrb.mxu1 %v10060_v56 }
0x11fb   :  { %3744 = vmatpush.msra.mxu2 %v10060_v56  ;;  %3769 = vmatpush.msra.mxu0 %v10060_v56  ;;  %v3599_v56 = vld [vmem:[%s12250_s0] sm:$0xff] }
0x11fc   :  { %3695 = vmatpush.msra.mxu3 %v10067_v42  ;;  %3720 = vmatpush.msrb.mxu1 %v10067_v42 }
0x11fd   :  { %3745 = vmatpush.msra.mxu2 %v10067_v42  ;;  %3770 = vmatpush.msra.mxu0 %v10067_v42  ;;  %v3598_v42 = vld [vmem:[%s12249_s26 + $0x8] sm:$0xff] }
0x11fe   :  { %3696 = vmatpush.msra.mxu3 %v10065_v45  ;;  %3721 = vmatpush.msrb.mxu1 %v10065_v45 }
0x11ff   :  { %3746 = vmatpush.msra.mxu2 %v10065_v45  ;;  %3771 = vmatpush.msra.mxu0 %v10065_v45 }
0x1200   :  { %3697 = vmatmul.f32.vlgmr.msra.gmra.mxu3 %v3593_v15  ;;  %3722 = vmatmul.f32.vlgmr.msrb.gmra.mxu1 %v3595_v31  ;;  %v467_v15 = vld [vmem:[#allocation5 + $0x220] sm:$0xff] }
0x1201   :  { %3747 = vmatmul.f32.vlgmr.msra.gmra.mxu2 %v3597_v35  ;;  %3772 = vmatmul.f32.vlgmr.msra.gmra.mxu0 %v3599_v56  ;;  %v419_v31 = vld [vmem:[#allocation5 + $0xa0] sm:$0xff] }
0x1202   :  { %3816 = vmatpush.msrb.mxu3 %v429_v52  ;;  %3885 = vmatpush.msrb.mxu0 %v430_v6  ;;  %v459_v35 = vld [vmem:[#allocation5 + $0x1e0] sm:$0xff]  ;;  %v417_v6 = vld [vmem:[#allocation5 + $0x90] sm:$0xff] }
0x1203   :  { %3874 = vmatpush.msrb.mxu2 %v469_v16  ;;  %3839 = vmatpush.msra.mxu1 %v461_v59  ;;  %v413_v16 = vld [vmem:[#allocation5 + $0x70] sm:$0xff]  ;;  %v414_v59 = vld [vmem:[#allocation5 + $0x78] sm:$0xff] }
0x1204   :  { %3817 = vmatpush.msrb.mxu3 %v427_v55  ;;  %3886 = vmatpush.msrb.mxu0 %v428_v49  ;;  %v457_v55 = vld [vmem:[#allocation5 + $0x1d0] sm:$0xff] }
0x1205   :  { %3875 = vmatpush.msrb.mxu2 %v467_v15  ;;  %3840 = vmatpush.msra.mxu1 %v459_v35  ;;  %v453_v35 = vld [vmem:[#allocation5 + $0x1b0] sm:$0xff] }
0x1206   :  { %3818 = vmatpush.msrb.mxu3 %v425_v63  ;;  %3887 = vmatpush.msrb.mxu0 %v426_v27  ;;  %v418_v63 = vld [vmem:[#allocation5 + $0x98] sm:$0xff]  ;;  %v463_v27 = vld [vmem:[#allocation5 + $0x200] sm:$0xff] }
0x1207   :  { %3841 = vmatpush.msra.mxu1 %v457_v55  ;;  %v10117_v55 = vpack.i.bf16 %v9858_v10, %v9830_v3  ;;  %v403_v3 = vld [vmem:[#allocation5 + $0x20] sm:$0xff]  ;;  %v404_v10 = vld [vmem:[#allocation5 + $0x28] sm:$0xff] }
0x1208   :  { %3700 = vmatmul.f32.gmra.mxu3 %v3594_v46  ;;  %3725 = vmatmul.f32.gmra.mxu1 %v3596_v44  ;;  %v420_v46 = vld [vmem:[#allocation5 + $0xa8] sm:$0xff]  ;;  %v465_v44 = vld [vmem:[#allocation5 + $0x210] sm:$0xff] }
0x1209   :  { %3750 = vmatmul.f32.gmra.mxu2 %v3598_v42  ;;  %3775 = vmatmul.f32.gmra.mxu0 %v3600_v33  ;;  %v10106_v42 = vpop.permute.xlu0 %3638 }
0x120a   :  { %3819 = vmatpush.msrb.mxu3 %v423_v14  ;;  %3888 = vmatpush.msrb.mxu0 %v424_v25  ;;  %v416_v25 = vld [vmem:[#allocation5 + $0x88] sm:$0xff] }
0x120b   :  { %3876 = vmatpush.msrb.mxu2 %v465_v44  ;;  %v409_v44 = vld [vmem:[#allocation5 + $0x50] sm:$0xff] }
0x120c   :  { %3820 = vmatpush.msrb.mxu3 %v421_v26  ;;  %3889 = vmatpush.msrb.mxu0 %v422_v47  ;;  %v455_v26 = vld [vmem:[#allocation5 + $0x1c0] sm:$0xff] }
0x120d   :  { %3877 = vmatpush.msrb.mxu2 %v463_v27  ;;  %v411_v47 = vld [vmem:[#allocation5 + $0x60] sm:$0xff]  ;;  %3842 = vmatpush.msra.mxu1 %v455_v26  ;;  %v456_v27 = vld [vmem:[#allocation5 + $0x1c8] sm:$0xff]  ;;  %v454_v26 = vld [vmem:[#allocation5 + $0x1b8] sm:$0xff] }
0x120e   :  { %3821 = vmatpush.msrb.mxu3 %v419_v31  ;;  %3890 = vmatpush.msrb.mxu0 %v420_v46  ;;  %v460_v31 = vld [vmem:[#allocation5 + $0x1e8] sm:$0xff] }
0x120f   :  { %v412_v46 = vld [vmem:[#allocation5 + $0x68] sm:$0xff]  ;;  %3843 = vmatpush.msra.mxu1 %v453_v35  ;;  %v441_v35 = vld [vmem:[#allocation5 + $0x150] sm:$0xff] }
0x1210   :  { %3822 = vmatpush.msrb.mxu3 %v417_v6  ;;  %3891 = vmatpush.msrb.mxu0 %v418_v63  ;;  %v410_v6 = vld [vmem:[#allocation5 + $0x58] sm:$0xff]  ;;  %v408_v63 = vld [vmem:[#allocation5 + $0x48] sm:$0xff] }
0x1212   :  { %3892 = vmatpush.msrb.mxu0 %v416_v25  ;;  %v399_v25 = vld [vmem:[#allocation5] sm:$0xff] }
0x1214   :  { %3893 = vmatpush.msrb.mxu0 %v414_v59  ;;  %v447_v59 = vld [vmem:[#allocation5 + $0x180] sm:$0xff] }
0x1216   :  { %3894 = vmatpush.msrb.mxu0 %v412_v46  ;;  %v439_v46 = vld [vmem:[#allocation5 + $0x140] sm:$0xff] }
0x1218   :  { %3895 = vmatpush.msrb.mxu0 %v410_v6  ;;  %v435_v6 = vld [vmem:[#allocation5 + $0x120] sm:$0xff] }
0x121a   :  { %3896 = vmatpush.msrb.mxu0 %v408_v63  ;;  %v438_v63 = vld [vmem:[#allocation5 + $0x138] sm:$0xff] }
0x127d   :  { %v3723_v45 = vpop.f32.mrf.mxu1 }
0x127e   :  { %v3724_v38 = vadd.f32 %v3723_v45, %v10100_v60  ;;  %v3773_v58 = vpop.f32.mrf.mxu0 }
0x127f   :  { %v3774_v7 = vadd.f32 %v3773_v58, %v10100_v60  ;;  %v415_v58 = vld [vmem:[#allocation5 + $0x80] sm:$0xff] }
0x1280   :  { %v3729_v51 = vmax.f32 %v3724_v38, 0.0  ;;  %3823 = vmatpush.msrb.mxu3 %v415_v58  ;;  %v406_v58 = vld [vmem:[#allocation5 + $0x38] sm:$0xff] }
0x1281   :  { %v3779_v40 = vmax.f32 %v3774_v7, 0.0  ;;  %3897 = vmatpush.msrb.mxu0 %v406_v58  ;;  %v434_v58 = vld [vmem:[#allocation5 + $0x118] sm:$0xff] }
0x1282   :  { %3783 = vrot.lane.b32.xlu2 %v3729_v51, %s8586_s27  ;;  %3824 = vmatpush.msrb.mxu3 %v413_v16  ;;  %v449_v16 = vld [vmem:[#allocation5 + $0x190] sm:$0xff] }
0x1283   :  { %3799 = vrot.lane.b32.xlu1 %v3779_v40, %s8587_s1  ;;  %v462_v40 = vld [vmem:[#allocation5 + $0x1f8] sm:$0xff]  ;;  %3898 = vmatpush.msrb.mxu0 %v404_v10  ;;  %v432_v10 = vld [vmem:[#allocation5 + $0x108] sm:$0xff] }
0x1284   :  { %v3748_v56 = vpop.f32.mrf.mxu2  ;;  %3908 = vmatpush.msra.mxu2 %v462_v40  ;;  %3825 = vmatpush.msrb.mxu3 %v411_v47  ;;  %v400_v40 = vld [vmem:[#allocation5 + $0x8] sm:$0xff] }
0x1285   :  { %v3749_v33 = vadd.f32 %v3748_v56, %v10100_v60  ;;  %v3726_v52 = vpop.f32.mrf.mxu1  ;;  %v452_v47 = vld [vmem:[#allocation5 + $0x1a8] sm:$0xff] }
0x1286   :  { %v3727_v49 = vadd.f32 %v3726_v52, %v10106_v42  ;;  %v3776_v45 = vpop.f32.mrf.mxu0  ;;  %v451_v52 = vld [vmem:[#allocation5 + $0x1a0] sm:$0xff]  ;;  %3909 = vmatpush.msra.mxu2 %v460_v31  ;;  %3826 = vmatpush.msrb.mxu3 %v409_v44  ;;  %v450_v31 = vld [vmem:[#allocation5 + $0x198] sm:$0xff]  ;;  %v444_v44 = vld [vmem:[#allocation5 + $0x168] sm:$0xff] }
0x1287   :  { %v3777_v38 = vadd.f32 %v3776_v45, %v10106_v42  ;;  %v3754_v7 = vmax.f32 %v3749_v33, 0.0  ;;  %v458_v33 = vld [vmem:[#allocation5 + $0x1d8] sm:$0xff]  ;;  %3844 = vmatpush.msra.mxu1 %v451_v52 }
0x1288   :  { %v3730_v14 = vmax.f32 %v3727_v49, 0.0  ;;  %v407_v49 = vld [vmem:[#allocation5 + $0x40] sm:$0xff]  ;;  %3910 = vmatpush.msra.mxu2 %v458_v33  ;;  %v437_v33 = vld [vmem:[#allocation5 + $0x130] sm:$0xff]  ;;  %v442_v52 = vld [vmem:[#allocation5 + $0x158] sm:$0xff] }
0x1289   :  { %v3780_v51 = vmax.f32 %v3777_v38, 0.0  ;;  %v405_v38 = vld [vmem:[#allocation5 + $0x30] sm:$0xff]  ;;  %3827 = vmatpush.msrb.mxu3 %v407_v49  ;;  %3845 = vmatpush.msra.mxu1 %v449_v16  ;;  %v440_v49 = vld [vmem:[#allocation5 + $0x148] sm:$0xff] }
0x128a   :  { %3791 = vrot.lane.b32.xlu2 %v3754_v7, %s8562_s28  ;;  %3911 = vmatpush.msra.mxu2 %v456_v27  ;;  %v401_v7 = vld [vmem:[#allocation5 + $0x10] sm:$0xff]  ;;  %v431_v27 = vld [vmem:[#allocation5 + $0x100] sm:$0xff] }
0x128b   :  { %3801 = vrot.lane.b32.xlu0 %v3780_v51, %s8587_s1  ;;  %3785 = vrot.lane.b32.xlu1 %v3730_v14, %s8586_s27  ;;  %v402_v14 = vld [vmem:[#allocation5 + $0x18] sm:$0xff]  ;;  %v10124_v51 = vpack.i.bf16 %v9846_v23, %v9842_v48  ;;  %v443_v48 = vld [vmem:[#allocation5 + $0x160] sm:$0xff]  ;;  %v448_v23 = vld [vmem:[#allocation5 + $0x188] sm:$0xff] }
0x128c   :  { %v3751_v15 = vpop.f32.mrf.mxu2  ;;  %3828 = vmatpush.msrb.mxu3 %v405_v38  ;;  %3899 = vmatpush.msrb.mxu0 %v402_v14  ;;  %v436_v38 = vld [vmem:[#allocation5 + $0x128] sm:$0xff] }
0x128d   :  { %v3752_v56 = vadd.f32 %v3751_v15, %v10106_v42  ;;  %3912 = vmatpush.msra.mxu2 %v454_v26  ;;  %3846 = vmatpush.msra.mxu1 %v447_v59  ;;  %v445_v15 = vld [vmem:[#allocation5 + $0x170] sm:$0xff]  ;;  %v468_v26 = vld [vmem:[#allocation5 + $0x228] sm:$0xff]  ;;  %v466_v59 = vld [vmem:[#allocation5 + $0x218] sm:$0xff] }
0x128e   :  { %3829 = vmatpush.msrb.mxu3 %v403_v3  ;;  %3900 = vmatpush.msrb.mxu0 %v400_v40  ;;  %v3698_v3 = vpop.f32.mrf.mxu3  ;;  %v470_v40 = vld [vmem:[#allocation5 + $0x238] sm:$0xff] }
0x128f   :  { %v3755_v45 = vmax.f32 %v3752_v56, 0.0  ;;  %3913 = vmatpush.msra.mxu2 %v452_v47  ;;  %3847 = vmatpush.msra.mxu1 %v445_v15  ;;  %v446_v56 = vld [vmem:[#allocation5 + $0x178] sm:$0xff]  ;;  %v464_v15 = vld [vmem:[#allocation5 + $0x208] sm:$0xff] }
0x1290   :  { %3830 = vmatpush.msrb.mxu3 %v401_v7  ;;  %v3699_v7 = vadd.f32 %v3698_v3, %v10100_v60 }
0x1291   :  { %3914 = vmatpush.msra.mxu2 %v450_v31  ;;  %3848 = vmatpush.msra.mxu1 %v443_v48 }
0x1292   :  { %7811 = vrot.lane.b32.xlu2 %v10117_v55, %s8577_s24  ;;  %3831 = vmatpush.msrb.mxu3 %v399_v25  ;;  %v3704_v14 = vmax.f32 %v3699_v7, 0.0 }
0x1293   :  { %3793 = vrot.lane.b32.xlu0 %v3755_v45, %s8562_s28  ;;  %3915 = vmatpush.msra.mxu2 %v448_v23  ;;  %v433_v45 = vld [vmem:[#allocation5 + $0x110] sm:$0xff] }
0x1294   :  { %3849 = vmatpush.msra.mxu1 %v441_v35  ;;  %3943 = vmatpush.msra.mxu3 %v470_v40 }
0x1295   :  { %3916 = vmatpush.msra.mxu2 %v446_v56 }
0x1296   :  { %3850 = vmatpush.msra.mxu1 %v439_v46  ;;  %3944 = vmatpush.msra.mxu3 %v468_v26  ;;  %v3701_v35 = vpop.f32.mrf.mxu3 }
0x1297   :  { %3917 = vmatpush.msra.mxu2 %v444_v44 }
0x1298   :  { %3851 = vmatpush.msra.mxu1 %v437_v33  ;;  %3945 = vmatpush.msra.mxu3 %v466_v59  ;;  %v3702_v33 = vadd.f32 %v3701_v35, %v10106_v42 }
0x1299   :  { %3918 = vmatpush.msra.mxu2 %v442_v52 }
0x129a   :  { %3852 = vmatpush.msra.mxu1 %v435_v6  ;;  %3946 = vmatpush.msra.mxu3 %v464_v15  ;;  %v3705_v52 = vmax.f32 %v3702_v33, 0.0 }
0x129b   :  { %7816 = vrot.lane.b32.xlu0 %v10124_v51, %s8577_s24  ;;  %3919 = vmatpush.msra.mxu2 %v440_v49 }
0x129c   :  { %3853 = vmatpush.msra.mxu1 %v433_v45 }
0x129d   :  { %3920 = vmatpush.msra.mxu2 %v438_v63 }
0x129e   :  { %3854 = vmatpush.msra.mxu1 %v431_v27 }
0x129f   :  { %3921 = vmatpush.msra.mxu2 %v436_v38 }
0x12a1   :  { %3922 = vmatpush.msra.mxu2 %v434_v58 }
0x12a3   :  { %3923 = vmatpush.msra.mxu2 %v432_v10 }
0x12dc   :  { %v3784_v25 = vpop.permute.xlu2 %3783 }
0x12dd   :  { %v3805_v16 = vsel %vm12199_vm14, %v3704_v14, %v3784_v25 }
0x12de   :  { %3832 = vmatmul.f32.vlgmr.msrb.gmra.mxu3 %v3805_v16  ;;  %3901 = vmatmul.f32.vlgmr.msrb.gmra.mxu0 %v3805_v16 }
0x12e4   :  { %v3792_v47 = vpop.permute.xlu2 %3791 }
0x12e5   :  { %v3807_v56 = vsel %vm2885_vm3, %v3784_v25, %v3792_v47 }
0x12ec   :  { %v7812_v31 = vpop.permute.xlu2 %7811 }
0x12ed   :  { %v7814_v48 = vunpack.i.h.bf16 %v7812_v31  ;;  %v7813_v23 = vunpack.i.l.bf16 %v7812_v31 }
0x12ef   :  { %v4049_v60 = vsel %vm2613_vm11, %v7813_v23, %v7814_v48 }
0x12f0   :  { %4214 = vmatpush.msrb.mxu1 %v4049_v60 }
0x12f5   :  { %v3800_v46 = vpop.permute.xlu1 %3799 }
0x12f6   :  { %7022 = vmatmul.msk.f32.vlgmr.msrb.gmra.mxu2 %vm3461_vm9, %v3800_v46  ;;  %v3810_v44 = vsel %vm12198_vm5, %v3807_v56, %v3800_v46 }
0x12f7   :  { %4283 = vmatpush.msrb.mxu2 %v7814_v48  ;;  %3855 = vmatmul.f32.vlgmr.msra.gmra.mxu1 %v3810_v44 }
0x12fd   :  { %v3802_v6 = vpop.permute.xlu0 %3801  ;;  %v3786_v49 = vpop.permute.xlu1 %3785 }
0x12fe   :  { %7023 = vmatmul.msk.f32.gmra.mxu2 %vm3461_vm9, %v3802_v6  ;;  %v3806_v45 = vsel %vm12199_vm14, %v3705_v52, %v3786_v49 }
0x12ff   :  { %3835 = vmatmul.f32.gmra.mxu3 %v3806_v45  ;;  %3904 = vmatmul.f32.gmra.mxu0 %v3806_v45 }
0x1305   :  { %v3794_v63 = vpop.permute.xlu0 %3793 }
0x1306   :  { %v3808_v27 = vsel %vm2885_vm3, %v3786_v49, %v3794_v63  ;;  %3924 = vmatmul.f32.vlgmr.msra.gmra.mxu2 %v3810_v44 }
0x1307   :  { %7024 = vmatmul.msk.f32.vlgmr.msra.gmra.mxu3 %vm3461_vm9, %v3800_v46  ;;  %v3811_v38 = vsel %vm12198_vm5, %v3808_v27, %v3802_v6  ;;  %vm12267_vm5 = vmmov %vm12266_vm8 }
0x1308   :  { %3858 = vmatmul.f32.gmra.mxu1 %v3811_v38  ;;  %vm12269_vm14 = vmmov %vm12267_vm5 }
0x130d   :  { %v7817_v58 = vpop.permute.xlu0 %7816 }
0x130e   :  { %v7819_v42 = vunpack.i.h.bf16 %v7817_v58  ;;  %v7818_v3 = vunpack.i.l.bf16 %v7817_v58  ;;  %3927 = vmatmul.f32.gmra.mxu2 %v3811_v38 }
0x130f   :  { %7025 = vmatmul.msk.f32.gmra.mxu3 %vm3461_vm9, %v3802_v6 }
0x1310   :  { %4284 = vmatpush.msrb.mxu2 %v7819_v42  ;;  %v4048_v10 = vsel %vm2613_vm11, %v7818_v3, %v7819_v42 }
0x1311   :  { %4215 = vmatpush.msrb.mxu1 %v4048_v10 }
0x135b   :  { %v3902_v48 = vpop.f32.mrf.mxu0 }
0x1361   :  { %v3833_v14 = vpop.f32.mrf.mxu3 }
0x1374   :  { %v3856_v7 = vpop.f32.mrf.mxu1 }
0x1375   :  { %v3857_v25 = vadd.f32 %v3856_v7, %v3833_v14 }
0x1379   :  { %v3879_v16 = vpop.f32.mrf.mxu2 }
0x137a   :  { %v3880_v40 = vadd.f32 %v3879_v16, %v3857_v25 }
0x137c   :  { %3958 = vrot.lane.b32.xlu0 %v3880_v40, %s8574_s9  ;;  %v3905_v46 = vpop.f32.mrf.mxu0 }
0x1381   :  { %v3882_v26 = vpop.f32.mrf.mxu2 }
0x1382   :  { %v3836_v59 = vpop.f32.mrf.mxu3 }
0x1384   :  { %7821 = vrot.lane.b32.xlu0 %v10117_v55, %s8564_s21 }
0x1385   :  { %v3859_v47 = vpop.f32.mrf.mxu1 }
0x1386   :  { %v3860_v15 = vadd.f32 %v3859_v47, %v3836_v59 }
0x1388   :  { %v3883_v31 = vadd.f32 %v3882_v26, %v3860_v15 }
0x1389   :  { %v3925_v23 = vpop.f32.mrf.mxu2 }
0x138a   :  { %v3948_v60 = vpop.f32.mrf.mxu3  ;;  %3962 = vrot.lane.b32.xlu1 %v3883_v31, %s8574_s9  ;;  %v3926_v35 = vadd.f32 %v3925_v23, %v3902_v48 }
0x138c   :  { %7836 = vrot.lane.b32.xlu0 %v10124_v51, %s8575_s14  ;;  %v3949_v56 = vadd.f32 %v3948_v60, %v3926_v35 }
0x1391   :  { %v3928_v44 = vpop.f32.mrf.mxu2 }
0x1392   :  { %v3929_v33 = vadd.f32 %v3928_v44, %v3905_v46  ;;  %v3951_v52 = vpop.f32.mrf.mxu3  ;;  %3960 = vrot.lane.b32.xlu1 %v3949_v56, %s8574_s9 }
0x1394   :  { %v3952_v6 = vadd.f32 %v3951_v52, %v3929_v33  ;;  %7846 = vrot.lane.b32.xlu0 %v10124_v51, %s8568_s16 }
0x1396   :  { %3964 = vrot.lane.b32.xlu2 %v3952_v6, %s8574_s9 }
0x139a   :  { %7826 = vrot.lane.b32.xlu1 %v10117_v55, %s8575_s14 }
0x139c   :  { %7856 = vrot.lane.b32.xlu0 %v10117_v55, %s8579_s6 }
0x139e   :  { %7831 = vrot.lane.b32.xlu2 %v10124_v51, %s8564_s21 }
0x13a2   :  { %7861 = vrot.lane.b32.xlu1 %v10124_v51, %s8576_s19 }
0x13a6   :  { %7841 = vrot.lane.b32.xlu2 %v10117_v55, %s8568_s16 }
0x13ae   :  { %7851 = vrot.lane.b32.xlu2 %v10117_v55, %s8576_s19 }
0x13b6   :  { %7866 = vrot.lane.b32.xlu2 %v10124_v51, %s8579_s6 }
0x13ee   :  { %v10166_v45 = vpop.permute.xlu0 %3958 }
0x13ef   :  { %v3972_v10 = vsel %vm2582_vm15, 0.0, %v10166_v45 }
0x13f0   :  { %v3965_v49 = vpop.permute.xlu2 %3964 }
0x13f6   :  { %v10172_v38 = vpop.permute.xlu0 %7821 }
0x13f8   :  { %v10168_v63 = vpop.permute.xlu2 %7831 }
0x13f9   :  { %v7833_v17 = vunpack.i.l.bf16 %v10168_v63 }
0x13fc   :  { %v10170_v27 = vpop.permute.xlu1 %3962 }
0x13fd   :  { %v10188_v16 = vsel %vm2582_vm15, %v10170_v27, %v3965_v49  ;;  %v3973_v15 = vsel %vm2582_vm15, 0.0, %v10170_v27 }
0x13fe   :  { %v10194_v59 = vpop.permute.xlu0 %7836  ;;  %v3975_v31 = vsel %vm2587_vm6, %v10188_v16, 0.0 }
0x13ff   :  { %v12176_v23 = vunpack.i.h.bf16 %v10194_v59  ;;  %v7838_v60 = vunpack.i.l.bf16 %v10194_v59  ;;  %v7905_v44 = vpack.i.bf16 %v3975_v31, %v3973_v15 }
0x1400   :  { %v10174_v58 = vpop.permute.xlu2 %7841 }
0x1401   :  { %v4160_v33 = vsel %vm2644_vm2, %v7838_v60, %v12176_v23 }
0x1404   :  { %v3961_v42 = vpop.permute.xlu1 %3960 }
0x1405   :  { %v10178_v3 = vsel %vm2582_vm15, %v10166_v45, %v3961_v42 }
0x1406   :  { %v3974_v7 = vsel %vm2587_vm6, %v10178_v3, 0.0  ;;  %v10246_v15 = vpop.permute.xlu0 %7846 }
0x1407   :  { %v7880_v14 = vpack.i.bf16 %v3974_v7, %v3972_v10  ;;  %v3982_v10 = vld [vmem:[%s12251_s2] sm:$0xff]  ;;  %v3983_v7 = vld [vmem:[%s12251_s2 + $0x8] sm:$0xff] }
0x1408   :  { %v10184_v25 = vpop.permute.xlu2 %7851 }
0x1409   :  { %v12174_v40 = vunpack.i.h.bf16 %v10184_v25  ;;  %v7853_v26 = vunpack.i.l.bf16 %v10184_v25  ;;  %7881 = vrot.lane.b32.xlu1 %v7880_v14, %s8575_s14  ;;  %7876 = vrot.lane.b32.xlu0 %v7880_v14, %s8564_s21 }
0x140a   :  { %7871 = vrot.lane.b32.xlu2 %v7880_v14, %s8577_s24 }
0x140b   :  { %v4189_v47 = vsel %vm2652_vm4, %v7853_v26, %v12174_v40 }
0x140c   :  { %4272 = vmatpush.msra.mxu0 %v4189_v47  ;;  %v10204_v48 = vpop.permute.xlu1 %7826 }
0x140d   :  { %v12177_v35 = vunpack.i.h.bf16 %v10204_v48  ;;  %v7828_v56 = vunpack.i.l.bf16 %v10204_v48 }
0x140f   :  { %v4161_v46 = vsel %vm2644_vm2, %v7828_v56, %v12177_v35 }
0x1410   :  { %4237 = vmatpush.msrb.mxu3 %v4161_v46  ;;  %v10242_v26 = vpop.permute.xlu2 %7866 }
0x1411   :  { %7891 = vrot.lane.b32.xlu1 %v7880_v14, %s8568_s16  ;;  %7886 = vrot.lane.b32.xlu0 %v7880_v14, %s8565_s29 }
0x1412   :  { %7906 = vrot.lane.b32.xlu2 %v7905_v44, %s8575_s14  ;;  %4238 = vmatpush.msrb.mxu3 %v4160_v33  ;;  %v7843_v33 = vunpack.i.l.bf16 %v10174_v58 }
0x1414   :  { %v10219_v52 = vpop.permute.xlu1 %7861 }
0x1415   :  { %v12173_v6 = vunpack.i.h.bf16 %v10219_v52  ;;  %v7863_v49 = vunpack.i.l.bf16 %v10219_v52 }
0x1417   :  { %v4188_v42 = vsel %vm2652_vm4, %v7863_v49, %v12173_v6 }
0x1418   :  { %4273 = vmatpush.msra.mxu0 %v4188_v42 }
0x1419   :  { %7896 = vrot.lane.b32.xlu1 %v7905_v44, %s8577_s24  ;;  %7926 = vrot.lane.b32.xlu0 %v7905_v44, %s8576_s19 }
0x141a   :  { %7916 = vrot.lane.b32.xlu2 %v7905_v44, %s8568_s16 }
0x1421   :  { %7901 = vrot.lane.b32.xlu1 %v7905_v44, %s8564_s21  ;;  %7931 = vrot.lane.b32.xlu0 %v7880_v14, %s8579_s6 }
0x1422   :  { %7921 = vrot.lane.b32.xlu2 %v7880_v14, %s8576_s19 }
0x1429   :  { %7911 = vrot.lane.b32.xlu1 %v7905_v44, %s8565_s29  ;;  %7951 = vrot.lane.b32.xlu0 %v7905_v44, %s8578_s30 }
0x142a   :  { %7946 = vrot.lane.b32.xlu2 %v10124_v51, %s8578_s30 }
0x1431   :  { %7936 = vrot.lane.b32.xlu1 %v7905_v44, %s8579_s6  ;;  %4200 = vperm.xlu0 %7469, %v3982_v10   ;;  %v12184_v44 = vunpack.i.h.bf16 %v10174_v58 }
0x1432   :  { %4205 = vperm.xlu2 %7363, %v3983_v7   ;;  %v12183_v7 = vunpack.i.h.bf16 %v10246_v15 }
0x1439   :  { %7941 = vrot.lane.b32.xlu1 %v10117_v55, %s8578_s30  ;;  %v10255_v55 = vpop.permute.xlu0 %7856 }
0x143a   :  { %v12191_v35 = vunpack.i.h.bf16 %v10255_v55 }
0x1441   :  { %7956 = vrot.lane.b32.xlu1 %v7880_v14, %s8578_s30 }
0x1464   :  { %v10244_v47 = vpop.permute.xlu2 %7871 }
0x146c   :  { %v10248_v31 = vpop.permute.xlu2 %7906 }
0x146d   :  { %v12175_v51 = vunpack.i.h.bf16 %v10248_v31  ;;  %v7908_v60 = vunpack.i.l.bf16 %v10248_v31 }
0x146f   :  { %v4159_v56 = vsel %vm2644_vm2, %v7908_v60, %v12175_v51  ;;  %v7848_v60 = vunpack.i.l.bf16 %v10246_v15  ;;  %v4133_v51 = vsel %vm1194_vm7, %v7843_v33, %v12184_v44  ;;  %v12192_v33 = vunpack.i.h.bf16 %v10242_v26 }
0x1470   :  { %4239 = vmatpush.msrb.mxu3 %v4159_v56 }
0x1471   :  { %v4132_v23 = vsel %vm1194_vm7, %v7848_v60, %v12183_v7  ;;  %v7868_v60 = vunpack.i.l.bf16 %v10242_v26 }
0x1474   :  { %v10265_v10 = vpop.permute.xlu2 %7916 }
0x1475   :  { %v12185_v6 = vunpack.i.h.bf16 %v10265_v10  ;;  %v7918_v40 = vunpack.i.l.bf16 %v10265_v10 }
0x147b   :  { %v10257_v14 = vpop.permute.xlu0 %7876  ;;  %v10259_v46 = vpop.permute.xlu1 %7881 }
0x147c   :  { %v12182_v49 = vunpack.i.h.bf16 %v10259_v46  ;;  %v7883_v42 = vunpack.i.l.bf16 %v10259_v46 }
0x147e   :  { %v4158_v56 = vsel %vm2644_vm2, %v7883_v42, %v12182_v49  ;;  %v7858_v42 = vunpack.i.l.bf16 %v10255_v55 }
0x147f   :  { %4240 = vmatpush.msrb.mxu3 %v4158_v56 }
0x1480   :  { %v4105_v44 = vsel %vm2629_vm12, %v7858_v42, %v12191_v35 }
0x1481   :  { %4241 = vmatpush.msrb.mxu3 %v4133_v51  ;;  %v4131_v51 = vsel %vm1194_vm7, %v7918_v40, %v12185_v6  ;;  %v4104_v40 = vsel %vm2629_vm12, %v7868_v60, %v12192_v33  ;;  %v7873_v6 = vunpack.i.l.bf16 %v10244_v47  ;;  %v7824_v60 = vunpack.i.h.bf16 %v10172_v38 }
0x1482   :  { %v7823_v33 = vunpack.i.l.bf16 %v10172_v38 }
0x1483   :  { %v10281_v57 = vpop.permute.xlu0 %7886  ;;  %v10283_v4 = vpop.permute.xlu1 %7891  ;;  %4242 = vmatpush.msrb.mxu3 %v4132_v23 }
0x1484   :  { %v12188_v56 = vunpack.i.h.bf16 %v10283_v4  ;;  %v7893_v49 = vunpack.i.l.bf16 %v10283_v4  ;;  %v10296_v23 = vpop.permute.xlu2 %7921 }
0x1485   :  { %4243 = vmatpush.msrb.mxu3 %v4131_v51  ;;  %v7874_v51 = vunpack.i.h.bf16 %v10244_v47  ;;  %v12253_v18 = vunpack.i.h.bf16 %v10296_v23 }
0x1486   :  { %v4130_v7 = vsel %vm1194_vm7, %v7893_v49, %v12188_v56  ;;  %v7923_v49 = vunpack.i.l.bf16 %v10296_v23 }
0x1487   :  { %4244 = vmatpush.msrb.mxu3 %v4130_v7 }
0x1488   :  { %v4186_v38 = vsel %vm2652_vm4, %v7923_v49, %v12253_v18  ;;  %v7879_v18 = vunpack.i.h.bf16 %v10257_v14 }
0x1489   :  { %4245 = vmatpush.msrb.mxu3 %v4105_v44 }
0x148b   :  { %v10308_v7 = vpop.permute.xlu0 %7926  ;;  %v7897_v56 = vpop.permute.xlu1 %7896  ;;  %4246 = vmatpush.msrb.mxu3 %v4104_v40  ;;  %v7834_v40 = vunpack.i.h.bf16 %v10168_v63 }
0x148c   :  { %v7929_v29 = vunpack.i.h.bf16 %v10308_v7  ;;  %v7928_v44 = vunpack.i.l.bf16 %v10308_v7  ;;  %v7899_v42 = vunpack.i.h.bf16 %v7897_v56  ;;  %v7898_v35 = vunpack.i.l.bf16 %v7897_v56 }
0x148d   :  { %v4046_v56 = vsel %vm2613_vm11, %v7873_v6, %v7874_v51  ;;  %v7878_v6 = vunpack.i.l.bf16 %v10257_v14 }
0x148e   :  { %4285 = vmatpush.msrb.mxu2 %v7899_v42  ;;  %v4047_v47 = vsel %vm2613_vm11, %v7898_v35, %v7899_v42  ;;  %v4187_v5 = vsel %vm2652_vm4, %v7928_v44, %v7929_v29  ;;  %v12254_v35 = vunpack.i.h.bf16 %v10204_v48  ;;  %v4021_v44 = vsel %vm1122_vm1, %v7823_v33, %v7824_v60 }
0x148f   :  { %4216 = vmatpush.msrb.mxu1 %v4047_v47  ;;  %4274 = vmatpush.msra.mxu0 %v4187_v5  ;;  %v4020_v5 = vsel %vm1122_vm1, %v7833_v17, %v7834_v40  ;;  %v12255_v48 = vunpack.i.h.bf16 %v10194_v59  ;;  %v12256_v33 = vunpack.i.h.bf16 %v10248_v31  ;;  %v12257_v42 = vunpack.i.h.bf16 %v10259_v46 }
0x1490   :  { %4286 = vmatpush.msrb.mxu2 %v7874_v51  ;;  %v4018_v14 = vsel %vm1122_vm1, %v7878_v6, %v7879_v18  ;;  %v12258_v59 = vunpack.i.h.bf16 %v10174_v58  ;;  %v7889_v31 = vunpack.i.h.bf16 %v10281_v57  ;;  %v7888_v46 = vunpack.i.l.bf16 %v10281_v57 }
0x1491   :  { %4217 = vmatpush.msrb.mxu1 %v4046_v56  ;;  %4275 = vmatpush.msra.mxu0 %v4186_v38  ;;  %v12259_v38 = vunpack.i.h.bf16 %v10246_v15  ;;  %v12261_v58 = vunpack.i.h.bf16 %v10283_v4  ;;  %v12265_v6 = vunpack.i.h.bf16 %v10219_v52 }
0x1492   :  { %4287 = vmatpush.msrb.mxu2 %v7824_v60  ;;  %7034 = vmatmul.msk.f32.vlgmr.msra.gmra.mxu0 %vm3461_vm9, %v10325_v2  ;;  %v10344_v60 = vld [vmem:[%s12252_s10 + $0x28] sm:$0xff]  ;;  %v3996_v57 = vsel %vm1098_vm0, %v7888_v46, %v7889_v31 }
0x1493   :  { %4306 = vmatpush.msrb.mxu0 %v12254_v35  ;;  %v7902_v63 = vpop.permute.xlu1 %7901  ;;  %4218 = vmatpush.msrb.mxu1 %v4021_v44  ;;  %v7932_v35 = vpop.permute.xlu0 %7931 }
0x1494   :  { %v7904_v51 = vunpack.i.h.bf16 %v7902_v63  ;;  %v7903_v49 = vunpack.i.l.bf16 %v7902_v63  ;;  %4288 = vmatpush.msrb.mxu2 %v7834_v40  ;;  %v7934_v15 = vunpack.i.h.bf16 %v7932_v35  ;;  %v12263_v63 = vunpack.i.h.bf16 %v10242_v26  ;;  %v7947_v26 = vpop.permute.xlu2 %7946 }
0x1495   :  { %4307 = vmatpush.msrb.mxu0 %v12255_v48  ;;  %4219 = vmatpush.msrb.mxu1 %v4020_v5  ;;  %v7948_v5 = vunpack.i.l.bf16 %v7947_v26 }
0x1496   :  { %4289 = vmatpush.msrb.mxu2 %v7904_v51  ;;  %v4019_v17 = vsel %vm1122_vm1, %v7903_v49, %v7904_v51 }
0x1497   :  { %4308 = vmatpush.msrb.mxu0 %v12256_v33  ;;  %4220 = vmatpush.msrb.mxu1 %v4019_v17  ;;  %v12268_v33 = vunpack.i.h.bf16 %v10296_v23  ;;  %v3980_v23 = vld [vmem:[%s12252_s10 + $0x20] sm:$0xff] }
0x1498   :  { %4290 = vmatpush.msrb.mxu2 %v7879_v18 }
0x1499   :  { %4309 = vmatpush.msrb.mxu0 %v12257_v42  ;;  %4221 = vmatpush.msrb.mxu1 %v4018_v14 }
0x149a   :  { %4291 = vmatpush.msrb.mxu2 %v9874_v11  ;;  %7035 = vmatmul.msk.f32.gmra.mxu0 %vm3461_vm9, %v10344_v60  ;;  %v12260_v11 = vunpack.i.h.bf16 %v10265_v10  ;;  %v7933_v10 = vunpack.i.l.bf16 %v7932_v35 }
0x149b   :  { %4310 = vmatpush.msrb.mxu0 %v12258_v59  ;;  %v7912_v47 = vpop.permute.xlu1 %7911  ;;  %4222 = vmatpush.msrb.mxu1 %v9878_v12 }
0x149c   :  { %v7914_v40 = vunpack.i.h.bf16 %v7912_v47  ;;  %v7913_v56 = vunpack.i.l.bf16 %v7912_v47  ;;  %4292 = vmatpush.msrb.mxu2 %v9862_v21  ;;  %v12262_v21 = vunpack.i.h.bf16 %v10255_v55  ;;  %v7949_v55 = vunpack.i.h.bf16 %v7947_v26 }
0x149d   :  { %4311 = vmatpush.msrb.mxu0 %v12259_v38  ;;  %4223 = vmatpush.msrb.mxu1 %v9869_v0 }
0x149e   :  { %4293 = vmatpush.msrb.mxu2 %v7914_v40  ;;  %v3997_v12 = vsel %vm1098_vm0, %v7913_v56, %v7914_v40  ;;  %v4076_v48 = vsel %vm12267_vm5, %v7948_v5, %v7949_v55 }
0x149f   :  { %4312 = vmatpush.msrb.mxu0 %v12260_v11  ;;  %4224 = vmatpush.msrb.mxu1 %v3997_v12 }
0x14a0   :  { %4294 = vmatpush.msrb.mxu2 %v7889_v31 }
0x14a1   :  { %4313 = vmatpush.msrb.mxu0 %v12261_v58  ;;  %4225 = vmatpush.msrb.mxu1 %v3996_v57  ;;  %v4206_v58 = vpop.permute.xlu2 %4205 }
0x14a2   :  { %7036 = vmatpush.msk.msrb.mxu2 %vm2587_vm6, %v9854_v20  ;;  %v3976_v20 = vld [vmem:[%s12252_s10] sm:$0xff] }
0x14a3   :  { %4314 = vmatpush.msrb.mxu0 %v12262_v21  ;;  %v7937_v0 = vpop.permute.xlu1 %7936  ;;  %7027 = vmatpush.msk.msrb.mxu1 %vm9710_vm10, %v9826_v32 }
0x14a4   :  { %v7939_v4 = vunpack.i.h.bf16 %v7937_v0  ;;  %v7938_v44 = vunpack.i.l.bf16 %v7937_v0  ;;  %7037 = vmatpush.msk.msrb.mxu2 %vm2587_vm6, %v9838_v62  ;;  %v4102_v62 = vsel %vm2629_vm12, %v7933_v10, %v7934_v15 }
0x14a5   :  { %4315 = vmatpush.msrb.mxu0 %v12263_v63  ;;  %7029 = vmatpush.msk.msrb.mxu1 %vm9710_vm10, %v9834_v61  ;;  %v7952_v61 = vpop.permute.xlu0 %7951 }
0x14a6   :  { %7038 = vmatpush.msk.msrb.mxu2 %vm2587_vm6, %v10188_v16  ;;  %v4103_v32 = vsel %vm2629_vm12, %v7938_v44, %v7939_v4  ;;  %v7954_v51 = vunpack.i.h.bf16 %v7952_v61  ;;  %v7953_v49 = vunpack.i.l.bf16 %v7952_v61 }
0x14a7   :  { %4316 = vmatpush.msrb.mxu0 %v7939_v4  ;;  %7031 = vmatpush.msk.msrb.mxu1 %vm9710_vm10, %v10170_v27  ;;  %v12264_v27 = vunpack.i.h.bf16 %v10184_v25  ;;  %v3979_v25 = vld [vmem:[%s12252_s10 + $0x18] sm:$0xff] }
0x14a8   :  { %4247 = vmatpush.msrb.mxu3 %v4103_v32  ;;  %7039 = vmatpush.msk.msrb.mxu2 %vm2587_vm6, %v10178_v3  ;;  %v4075_v52 = vsel %vm12269_vm14, %v7953_v49, %v7954_v51 }
0x14a9   :  { %4317 = vmatpush.msrb.mxu0 %v7934_v15  ;;  %7033 = vmatpush.msk.msrb.mxu1 %vm9710_vm10, %v10166_v45 }
0x14aa   :  { %4248 = vmatpush.msrb.mxu3 %v4102_v62  ;;  %4299 = vmatmul.f32.vlgmr.msrb.gmra.mxu2 %v3976_v20 }
0x14ab   :  { %4230 = vmatmul.f32.vlgmr.msrb.gmra.mxu1 %v3976_v20  ;;  %v7942_v16 = vpop.permute.xlu1 %7941 }
0x14ac   :  { %4341 = vmatpush.msra.mxu1 %v12264_v27  ;;  %v7944_v3 = vunpack.i.h.bf16 %v7942_v16  ;;  %v7943_v18 = vunpack.i.l.bf16 %v7942_v16 }
0x14ad   :  { %v4201_v12 = vpop.permute.xlu0 %4200 }
0x14ae   :  { %4342 = vmatpush.msra.mxu1 %v12265_v6  ;;  %4318 = vmatpush.msrb.mxu0 %v7944_v3  ;;  %v4077_v45 = vsel %vm12266_vm8, %v7943_v18, %v7944_v3  ;;  %vm12270_vm8 = vmmov %vm12267_vm5 }
0x14af   :  { %4249 = vmatpush.msrb.mxu3 %v4077_v45 }
0x14b0   :  { %4343 = vmatpush.msra.mxu1 %v7929_v29  ;;  %4319 = vmatpush.msrb.mxu0 %v7949_v55  ;;  %v3977_v29 = vld [vmem:[%s12252_s10 + $0x8] sm:$0xff] }
0x14b1   :  { %4250 = vmatpush.msrb.mxu3 %v4076_v48 }
0x14b2   :  { %4344 = vmatpush.msra.mxu1 %v12268_v33  ;;  %4302 = vmatmul.f32.gmra.mxu2 %v3979_v25 }
0x14b3   :  { %4233 = vmatmul.f32.gmra.mxu1 %v3979_v25  ;;  %4320 = vmatpush.msrb.mxu0 %v7954_v51  ;;  %v7957_v17 = vpop.permute.xlu1 %7956 }
0x14b4   :  { %4251 = vmatpush.msrb.mxu3 %v4075_v52  ;;  %v7959_v7 = vunpack.i.h.bf16 %v7957_v17  ;;  %v7958_v42 = vunpack.i.l.bf16 %v7957_v17 }
0x14b6   :  { %4321 = vmatpush.msrb.mxu0 %v7959_v7  ;;  %v4074_v14 = vsel %vm12270_vm8, %v7958_v42, %v7959_v7 }
0x14b7   :  { %4252 = vmatpush.msrb.mxu3 %v4074_v14  ;;  %4322 = vmatmul.f32.vlgmr.msrb.gmra.mxu0 %v3977_v29 }
0x14b8   :  { %4253 = vmatmul.f32.vlgmr.msrb.gmra.mxu3 %v3977_v29 }
0x14bb   :  { %7040 = vmatmul.msk.f32.vlgmr.msra.gmra.mxu1 %vm3461_vm9, %v10325_v2 }
0x14bf   :  { %4325 = vmatmul.f32.gmra.mxu0 %v3980_v23 }
0x14c0   :  { %4256 = vmatmul.f32.gmra.mxu3 %v3980_v23 }
0x14c3   :  { %7041 = vmatmul.msk.f32.gmra.mxu1 %vm3461_vm9, %v10344_v60 }
0x150f   :  { %v4277_v59 = vpop.f32.mrf.mxu0 }
0x1517   :  { %v4280_v31 = vpop.f32.mrf.mxu0 }
0x1528   :  { %v4231_v47 = vpop.f32.mrf.mxu1 }
0x1529   :  { %v4232_v57 = vadd.f32 %v4231_v47, %v4201_v12  ;;  %v4387_v47 = vld [vmem:[%s12271_s7 + $0x8] sm:$0xff] }
0x152d   :  { %v4300_v46 = vpop.f32.mrf.mxu2 }
0x152e   :  { %v4301_v26 = vadd.f32 %v4300_v46, %v4201_v12 }
0x1530   :  { %v4234_v40 = vpop.f32.mrf.mxu1 }
0x1531   :  { %v4235_v63 = vadd.f32 %v4234_v40, %v4206_v58 }
0x1534   :  { %v4323_v56 = vpop.f32.mrf.mxu0 }
0x1535   :  { %v4303_v11 = vpop.f32.mrf.mxu2  ;;  %v4324_v16 = vadd.f32 %v4323_v56, %v4301_v26 }
0x1536   :  { %v4304_v35 = vadd.f32 %v4303_v11, %v4206_v58 }
0x1538   :  { %v4346_v38 = vpop.f32.mrf.mxu1 }
0x1539   :  { %v4347_v3 = vadd.f32 %v4346_v38, %v4324_v16 }
0x153b   :  { %v4254_v21 = vpop.f32.mrf.mxu3  ;;  %v4353_v6 = vmax.f32 %v4347_v3, 0.0 }
0x153c   :  { %v4255_v2 = vadd.f32 %v4254_v21, %v4232_v57  ;;  %v4326_v0 = vpop.f32.mrf.mxu0 }
0x153d   :  { %v4327_v15 = vadd.f32 %v4326_v0, %v4304_v35  ;;  %v4357_v51 = vmul.f32 %v4353_v6, %v9728_v30 }
0x153e   :  { %v4278_v10 = vadd.f32 %v4277_v59, %v4255_v2  ;;  %v4386_v59 = vld [vmem:[%s12271_s7] sm:$0xff] }
0x1540   :  { %v4349_v4 = vpop.f32.mrf.mxu1  ;;  %v4352_v44 = vmax.f32 %v4278_v10, 0.0 }
0x1541   :  { %v4350_v60 = vadd.f32 %v4349_v4, %v4327_v15 }
0x1542   :  { %v4356_v32 = vmul.f32 %v4352_v44, %v9726_v13 }
0x1543   :  { %v4355_v20 = vmax.f32 %v4350_v60, 0.0  ;;  %v4257_v62 = vpop.f32.mrf.mxu3 }
0x1544   :  { %v4258_v27 = vadd.f32 %v4257_v62, %v4235_v63  ;;  %4364 = vrot.lane.b32.xlu0 %v4356_v32, %s8574_s9 }
0x1545   :  { %v4359_v61 = vmul.f32 %v4355_v20, %v9728_v30 }
0x1546   :  { %v4281_v55 = vadd.f32 %v4280_v31, %v4258_v27 }
0x1547   :  { %4370 = vrot.lane.b32.xlu2 %v4359_v61, %s8574_s9 }
0x1548   :  { %v4354_v5 = vmax.f32 %v4281_v55, 0.0 }
0x154a   :  { %v4358_v18 = vmul.f32 %v4354_v5, %v9726_v13 }
0x154c   :  { %4368 = vrot.lane.b32.xlu1 %v4358_v18, %s8574_s9 }
0x1554   :  { %4366 = vrot.lane.b32.xlu1 %v4357_v51, %s8574_s9 }
0x15a1   :  { %v4371_v49 = vpop.permute.xlu2 %4370 }
0x15b6   :  { %v10429_v17 = vpop.permute.xlu0 %4364 }
0x15b7   :  { %v4378_v29 = vsel %vm2582_vm15, 0.0, %v10429_v17 }
0x15be   :  { %v10418_v45 = vpop.permute.xlu1 %4368 }
0x15bf   :  { %v10422_v25 = vsel %vm2582_vm15, %v10418_v45, %v4371_v49  ;;  %v4379_v48 = vsel %vm2582_vm15, 0.0, %v10418_v45 }
0x15c0   :  { %v4381_v33 = vsel %vm2587_vm6, %v10422_v25, 0.0 }
0x15c1   :  { %v7975_v52 = vpack.i.bf16 %v4381_v33, %v4379_v48 }
0x15c3   :  { %7976 = vrot.lane.b32.xlu1 %v7975_v52, %s8568_s16 }
0x15c6   :  { %v4367_v7 = vpop.permute.xlu1 %4366 }
0x15c7   :  { %v10433_v42 = vsel %vm2582_vm15, %v10429_v17, %v4367_v7 }
0x15c8   :  { %v4380_v14 = vsel %vm2587_vm6, %v10433_v42, 0.0 }
0x15c9   :  { %v7980_v23 = vpack.i.bf16 %v4380_v14, %v4378_v29 }
0x15cb   :  { %7981 = vrot.lane.b32.xlu1 %v7980_v23, %s8579_s6  ;;  %7966 = vrot.lane.b32.xlu2 %v7980_v23, %s8568_s16 }
0x15cc   :  { %7961 = vrot.lane.b32.xlu0 %v7980_v23, %s8575_s14 }
0x15d3   :  { %8006 = vrot.lane.b32.xlu1 %v7975_v52, %s8577_s24  ;;  %7971 = vrot.lane.b32.xlu2 %v7975_v52, %s8575_s14  ;;  %s12274_s14 = sld [smem:[#allocation24_spill]] }
0x15d4   :  { %7986 = vrot.lane.b32.xlu0 %v7975_v52, %s8579_s6  ;;  %s12287_s6 = sld [smem:[#allocation11_spill]] }
0x15db   :  { %8011 = vrot.lane.b32.xlu1 %v7980_v23, %s8564_s21  ;;  %7996 = vrot.lane.b32.xlu2 %v7975_v52, %s8578_s30 }
0x15dc   :  { %7991 = vrot.lane.b32.xlu0 %v7980_v23, %s8578_s30 }
0x15e3   :  { %8031 = vrot.lane.b32.xlu1 %v7975_v52, %s8576_s19  ;;  %8001 = vrot.lane.b32.xlu2 %v7980_v23, %s8577_s24 }
0x15e4   :  { %8016 = vrot.lane.b32.xlu0 %v7975_v52, %s8564_s21 }
0x15eb   :  { %4506 = vperm.xlu1 %7257, %v4386_v59   ;;  %8021 = vrot.lane.b32.xlu2 %v7975_v52, %s8565_s29 }
0x15ec   :  { %8026 = vrot.lane.b32.xlu0 %v7980_v23, %s8565_s29 }
0x15f3   :  { %8036 = vrot.lane.b32.xlu2 %v7980_v23, %s8576_s19  ;;  %s12282_s19 = sld [smem:[#allocation26_spill]] }
0x15f4   :  { %4511 = vperm.xlu0 %7469, %v4387_v47  }
0x1625   :  { %v7967_v31 = vpop.permute.xlu2 %7966 }
0x1626   :  { %v7969_v10 = vunpack.i.h.bf16 %v7967_v31  ;;  %v7968_v4 = vunpack.i.l.bf16 %v7967_v31 }
0x1628   :  { %v4470_v32 = vsel %vm1194_vm7, %v7968_v4, %v7969_v10  ;;  %v4383_v4 = vld [vmem:[%s12274_s14 + $0x8] sm:$0xff] }
0x162d   :  { %v7972_v46 = vpop.permute.xlu2 %7971 }
0x162e   :  { %v7974_v40 = vunpack.i.h.bf16 %v7972_v46  ;;  %v7973_v56 = vunpack.i.l.bf16 %v7972_v46 }
0x1630   :  { %4566 = vmatpush.msra.mxu2 %v7974_v40  ;;  %v4485_v38 = vsel %vm2644_vm2, %v7973_v56, %v7974_v40 }
0x1631   :  { %4520 = vmatpush.msra.mxu3 %v4485_v38 }
0x1635   :  { %v7977_v11 = vpop.permute.xlu1 %7976  ;;  %v7997_v12 = vpop.permute.xlu2 %7996 }
0x1636   :  { %v7979_v35 = vunpack.i.h.bf16 %v7977_v11  ;;  %v7978_v21 = vunpack.i.l.bf16 %v7977_v11  ;;  %v7999_v16 = vunpack.i.h.bf16 %v7997_v12  ;;  %v7998_v55 = vunpack.i.l.bf16 %v7997_v12 }
0x1638   :  { %v4471_v60 = vsel %vm1194_vm7, %v7978_v21, %v7979_v35 }
0x163d   :  { %v7982_v58 = vpop.permute.xlu1 %7981  ;;  %v8002_v2 = vpop.permute.xlu2 %8001 }
0x163e   :  { %v7962_v57 = vpop.permute.xlu0 %7961  ;;  %v7984_v62 = vunpack.i.h.bf16 %v7982_v58  ;;  %v7983_v26 = vunpack.i.l.bf16 %v7982_v58  ;;  %v8004_v29 = vunpack.i.h.bf16 %v8002_v2  ;;  %v8003_v14 = vunpack.i.l.bf16 %v8002_v2 }
0x163f   :  { %v7964_v0 = vunpack.i.h.bf16 %v7962_v57  ;;  %v7963_v15 = vunpack.i.l.bf16 %v7962_v57 }
0x1640   :  { %v4456_v18 = vsel %vm2629_vm12, %v7983_v26, %v7984_v62  ;;  %v4428_v46 = vsel %vm2613_vm11, %v8003_v14, %v8004_v29 }
0x1641   :  { %4567 = vmatpush.msra.mxu2 %v7964_v0  ;;  %v4484_v44 = vsel %vm2644_vm2, %v7963_v15, %v7964_v0  ;;  %vm12272_vm2 = vmmov %vm12267_vm5 }
0x1642   :  { %4521 = vmatpush.msra.mxu3 %v4484_v44  ;;  %v4443_v51 = vsel %vm12272_vm2, %v7998_v55, %v7999_v16  ;;  %vm12273_vm14 = vmmov %vm12272_vm2 }
0x1643   :  { %4568 = vmatpush.msra.mxu2 %v7979_v35  ;;  %vm12283_vm5 = vmmov %vm12272_vm2 }
0x1644   :  { %4522 = vmatpush.msra.mxu3 %v4471_v60  ;;  %vm12285_vm8 = vmmov %vm12272_vm2 }
0x1645   :  { %4569 = vmatpush.msra.mxu2 %v7969_v10  ;;  %v8007_v63 = vpop.permute.xlu1 %8006  ;;  %v8022_v5 = vpop.permute.xlu2 %8021 }
0x1646   :  { %v7987_v20 = vpop.permute.xlu0 %7986  ;;  %4523 = vmatpush.msra.mxu3 %v4470_v32  ;;  %v8009_v48 = vunpack.i.h.bf16 %v8007_v63  ;;  %v8008_v33 = vunpack.i.l.bf16 %v8007_v63  ;;  %v8024_v0 = vunpack.i.h.bf16 %v8022_v5  ;;  %v8023_v15 = vunpack.i.l.bf16 %v8022_v5 }
0x1647   :  { %v7989_v61 = vunpack.i.h.bf16 %v7987_v20  ;;  %v7988_v27 = vunpack.i.l.bf16 %v7987_v20 }
0x1648   :  { %v4429_v47 = vsel %vm2613_vm11, %v8008_v33, %v8009_v48  ;;  %v4401_v63 = vsel %vm1098_vm0, %v8023_v15, %v8024_v0 }
0x1649   :  { %4570 = vmatpush.msra.mxu2 %v7989_v61  ;;  %v4457_v3 = vsel %vm2629_vm12, %v7988_v27, %v7989_v61  ;;  %v4385_v61 = vld [vmem:[%s12274_s14 + $0x18] sm:$0xff]  ;;  %v4382_v27 = vld [vmem:[%s12274_s14] sm:$0xff]  ;;  %vm12280_vm12 = vmmov %vm12272_vm2 }
0x164a   :  { %4524 = vmatpush.msra.mxu3 %v4457_v3 }
0x164b   :  { %4571 = vmatpush.msra.mxu2 %v7984_v62 }
0x164c   :  { %4525 = vmatpush.msra.mxu3 %v4456_v18 }
0x164d   :  { %4572 = vmatpush.msra.mxu2 %v7999_v16  ;;  %v8012_v6 = vpop.permute.xlu1 %8011  ;;  %v8037_v59 = vpop.permute.xlu2 %8036  ;;  %v4384_v16 = vld [vmem:[%s12274_s14 + $0x10] sm:$0xff] }
0x164e   :  { %v7992_v49 = vpop.permute.xlu0 %7991  ;;  %4526 = vmatpush.msra.mxu3 %v4443_v51  ;;  %v8039_v40 = vunpack.i.h.bf16 %v8037_v59  ;;  %v8038_v56 = vunpack.i.l.bf16 %v8037_v59  ;;  %v8014_v58 = vunpack.i.h.bf16 %v8012_v6  ;;  %v8013_v57 = vunpack.i.l.bf16 %v8012_v6 }
0x164f   :  { %v7994_v52 = vunpack.i.h.bf16 %v7992_v49  ;;  %v7993_v7 = vunpack.i.l.bf16 %v7992_v49 }
0x1650   :  { %v4498_v44 = vsel %vm2652_vm4, %v8038_v56, %v8039_v40  ;;  %v4414_v60 = vsel %vm1122_vm1, %v8013_v57, %v8014_v58 }
0x1651   :  { %4573 = vmatpush.msra.mxu2 %v7994_v52  ;;  %v4442_v23 = vsel %vm12273_vm14, %v7993_v7, %v7994_v52  ;;  %vm12289_vm14 = vcmask 588800  }
0x1652   :  { %4527 = vmatpush.msra.mxu3 %v4442_v23 }
0x1653   :  { %4574 = vmatpush.msra.mxu2 %v8009_v48 }
0x1654   :  { %4528 = vmatpush.msra.mxu3 %v4429_v47 }
0x1655   :  { %4575 = vmatpush.msra.mxu2 %v8004_v29  ;;  %v8032_v31 = vpop.permute.xlu1 %8031 }
0x1656   :  { %v8034_v38 = vunpack.i.h.bf16 %v8032_v31  ;;  %v8033_v11 = vunpack.i.l.bf16 %v8032_v31  ;;  %v8017_v12 = vpop.permute.xlu0 %8016  ;;  %4529 = vmatpush.msra.mxu3 %v4428_v46 }
0x1657   :  { %v8019_v35 = vunpack.i.h.bf16 %v8017_v12  ;;  %v8018_v21 = vunpack.i.l.bf16 %v8017_v12 }
0x1658   :  { %4603 = vmatpush.msra.mxu0 %v8034_v38  ;;  %v4499_v2 = vsel %vm2652_vm4, %v8033_v11, %v8034_v38  ;;  %vm12275_vm4 = vmmov %vm12272_vm2 }
0x1659   :  { %4576 = vmatpush.msra.mxu2 %v8019_v35  ;;  %v4415_v10 = vsel %vm1122_vm1, %v8018_v21, %v8019_v35  ;;  %4557 = vmatpush.msrb.mxu1 %v4499_v2 }
0x165a   :  { %4530 = vmatpush.msra.mxu3 %v4415_v10  ;;  %4604 = vmatpush.msra.mxu0 %v8039_v40 }
0x165b   :  { %4577 = vmatpush.msra.mxu2 %v8014_v58  ;;  %4558 = vmatpush.msrb.mxu1 %v4498_v44 }
0x165c   :  { %4531 = vmatpush.msra.mxu3 %v4414_v60  ;;  %7050 = vmatmul.msk.f32.vlgmr.msra.gmra.mxu0 %vm2885_vm3, %v4383_v4 }
0x165d   :  { %4578 = vmatpush.msra.mxu2 %v8024_v0  ;;  %7046 = vmatmul.msk.f32.vlgmr.msrb.gmra.mxu1 %vm2885_vm3, %v4383_v4  ;;  %v4507_v5 = vpop.permute.xlu1 %4506 }
0x165e   :  { %v8027_v32 = vpop.permute.xlu0 %8026  ;;  %4532 = vmatpush.msra.mxu3 %v4401_v63 }
0x165f   :  { %v8029_v20 = vunpack.i.h.bf16 %v8027_v32  ;;  %v8028_v62 = vunpack.i.l.bf16 %v8027_v32 }
0x1661   :  { %4579 = vmatpush.msra.mxu2 %v8029_v20  ;;  %v4400_v26 = vsel %vm1098_vm0, %v8028_v62, %v8029_v20 }
0x1662   :  { %4533 = vmatpush.msra.mxu3 %v4400_v26 }
0x1663   :  { %7048 = vmatpush.msk.msra.mxu2 %vm2587_vm6, %v10422_v25 }
0x1664   :  { %7043 = vmatpush.msk.msra.mxu3 %vm9710_vm10, %v10418_v45  ;;  %7051 = vmatmul.msk.f32.gmra.mxu0 %vm2885_vm3, %v4385_v61 }
0x1665   :  { %7049 = vmatpush.msk.msra.mxu2 %vm2587_vm6, %v10433_v42  ;;  %7047 = vmatmul.msk.f32.gmra.mxu1 %vm2885_vm3, %v4385_v61 }
0x1666   :  { %7045 = vmatpush.msk.msra.mxu3 %vm9710_vm10, %v10429_v17  ;;  %4582 = vmatmul.f32.vlgmr.msra.gmra.mxu2 %v4382_v27  ;;  %v4512_v33 = vpop.permute.xlu0 %4511  ;;  %vm12278_vm10 = vmmov %vm12272_vm2 }
0x1667   :  { %4536 = vmatmul.f32.vlgmr.msra.gmra.mxu3 %v4382_v27 }
0x166e   :  { %4585 = vmatmul.f32.gmra.mxu2 %v4384_v16 }
0x166f   :  { %4539 = vmatmul.f32.gmra.mxu3 %v4384_v16 }
0x16d9   :  { %v4606_v25 = vpop.f32.mrf.mxu0 }
0x16da   :  { %v4560_v55 = vpop.f32.mrf.mxu1 }
0x16e1   :  { %v4609_v7 = vpop.f32.mrf.mxu0 }
0x16e2   :  { %v4563_v23 = vpop.f32.mrf.mxu1 }
0x16e9   :  { %v4583_v45 = vpop.f32.mrf.mxu2 }
0x16ea   :  { %v4584_v3 = vadd.f32 %v4583_v45, %v4507_v5  ;;  %v4537_v18 = vpop.f32.mrf.mxu3 }
0x16eb   :  { %v4538_v6 = vadd.f32 %v4537_v18, %v4507_v5 }
0x16ec   :  { %v4607_v51 = vadd.f32 %v4606_v25, %v4584_v3 }
0x16ed   :  { %v4561_v42 = vadd.f32 %v4560_v55, %v4538_v6 }
0x16ee   :  { %v4613_v49 = vmax.f32 %v4607_v51, 0.0 }
0x16ef   :  { %v4612_v48 = vmax.f32 %v4561_v42, 0.0 }
0x16f0   :  { %v4617_v19 = vmul.f32 %v4613_v49, %v9728_v30 }
0x16f1   :  { %v4616_v17 = vmul.f32 %v4612_v48, %v9726_v13  ;;  %v4586_v52 = vpop.f32.mrf.mxu2 }
0x16f2   :  { %v4587_v29 = vadd.f32 %v4586_v52, %v4512_v33  ;;  %v4540_v14 = vpop.f32.mrf.mxu3 }
0x16f3   :  { %v8045_v59 = vpack.i.bf16 %v4617_v19, %v4616_v17  ;;  %v4541_v47 = vadd.f32 %v4540_v14, %v4512_v33 }
0x16f4   :  { %v4610_v31 = vadd.f32 %v4609_v7, %v4587_v29 }
0x16f5   :  { %v4564_v46 = vadd.f32 %v4563_v23, %v4541_v47  ;;  %8046 = vrot.lane.b32.xlu0 %v8045_v59, %s8574_s9 }
0x16f6   :  { %v4615_v40 = vmax.f32 %v4610_v31, 0.0 }
0x16f7   :  { %v4614_v56 = vmax.f32 %v4564_v46, 0.0 }
0x16f8   :  { %v4619_v38 = vmul.f32 %v4615_v40, %v9728_v30 }
0x16f9   :  { %v4618_v11 = vmul.f32 %v4614_v56, %v9726_v13 }
0x16fb   :  { %v8040_v12 = vpack.i.bf16 %v4619_v38, %v4618_v11 }
0x16fd   :  { %8041 = vrot.lane.b32.xlu2 %v8040_v12, %s8574_s9  ;;  %s12277_s9 = sld [smem:[#allocation30_spill]] }
0x1703   :  { %v4646_v40 = vld [vmem:[%s12277_s9] sm:$0xff] }
0x1757   :  { %v8042_v58 = vpop.permute.xlu2 %8041 }
0x1758   :  { %v8044_v57 = vunpack.i.h.bf16 %v8042_v58  ;;  %v8043_v35 = vunpack.i.l.bf16 %v8042_v58 }
0x175a   :  { %v4633_v21 = vsel %vm2582_vm15, %v8043_v35, %v8044_v57  ;;  %v4639_v2 = vsel %vm2582_vm15, 0.0, %v8043_v35 }
0x175b   :  { %v4641_v0 = vsel %vm2587_vm6, %v4633_v21, 0.0 }
0x175c   :  { %v8065_v15 = vpack.i.bf16 %v4641_v0, %v4639_v2 }
0x175e   :  { %8056 = vrot.lane.b32.xlu1 %v8065_v15, %s8578_s30  ;;  %8066 = vrot.lane.b32.xlu0 %v8065_v15, %s8577_s24 }
0x1767   :  { %v8047_v30 = vpop.permute.xlu0 %8046 }
0x1768   :  { %v8049_v10 = vunpack.i.h.bf16 %v8047_v30  ;;  %v8048_v13 = vunpack.i.l.bf16 %v8047_v30 }
0x176a   :  { %v4632_v4 = vsel %vm2582_vm15, %v8048_v13, %v8049_v10  ;;  %v4638_v44 = vsel %vm2582_vm15, 0.0, %v8048_v13  ;;  %vm12281_vm15 = vmmov %vm12272_vm2 }
0x176b   :  { %v4640_v60 = vsel %vm2587_vm6, %v4632_v4, 0.0  ;;  %vm12276_vm6 = vmmov %vm12272_vm2 }
0x176c   :  { %v8075_v63 = vpack.i.bf16 %v4640_v60, %v4638_v44 }
0x176e   :  { %8076 = vrot.lane.b32.xlu0 %v8075_v63, %s8565_s29  ;;  %8061 = vrot.lane.b32.xlu1 %v8075_v63, %s8577_s24  ;;  %s12284_s24 = sld [smem:[#allocation27_spill]] }
0x176f   :  { %8051 = vrot.lane.b32.xlu2 %v8075_v63, %s8578_s30 }
0x1777   :  { %8071 = vrot.lane.b32.xlu2 %v8065_v15, %s8565_s29 }
0x17c9   :  { %v8052_v32 = vpop.permute.xlu2 %8051 }
0x17ca   :  { %v10508_v20 = vunpack.i.h.bf16 %v8052_v32  ;;  %v8053_v62 = vunpack.i.l.bf16 %v8052_v32 }
0x17cc   :  { %v10512_v26 = vsel %vm12275_vm4, %v8053_v62, %v10508_v20  ;;  %vm12290_vm4 = vmmov %vm12289_vm14 }
0x17cd   :  { %v8080_v61 = vpack.i.bf16 %v10508_v20, %v10512_v26 }
0x17cf   :  { %8081 = vrot.lane.b32.xlu2 %v8080_v61, %s8578_s30 }
0x17d0   :  { %v8057_v27 = vpop.permute.xlu1 %8056  ;;  %v8067_v16 = vpop.permute.xlu0 %8066 }
0x17d1   :  { %v10517_v25 = vunpack.i.h.bf16 %v8057_v27  ;;  %v8058_v55 = vunpack.i.l.bf16 %v8057_v27  ;;  %v8069_v5 = vunpack.i.h.bf16 %v8067_v16  ;;  %v8068_v45 = vunpack.i.l.bf16 %v8067_v16  ;;  %v8072_v3 = vpop.permute.xlu2 %8071 }
0x17d2   :  { %v8074_v18 = vunpack.i.h.bf16 %v8072_v3  ;;  %v8073_v6 = vunpack.i.l.bf16 %v8072_v3 }
0x17d3   :  { %v10521_v51 = vsel %vm12276_vm6, %v8058_v55, %v10517_v25  ;;  %v4670_v42 = vsel %vm2613_vm11, %v8068_v45, %v8069_v5  ;;  %v4643_v45 = vld [vmem:[%s12284_s24] sm:$0xff]  ;;  %vm12291_vm6 = vcmask 719872  }
0x17d4   :  { %v8095_v49 = vpack.i.bf16 %v8069_v5, %v4670_v42  ;;  %v4660_v48 = vsel %vm1098_vm0, %v8073_v6, %v8074_v18  ;;  %v8085_v33 = vpack.i.bf16 %v10517_v25, %v10521_v51  ;;  %v4642_v5 = vld [vmem:[%s12282_s19] sm:$0xff]  ;;  %v549_v42 = vld [vmem:[%s12287_s6 + $0x270] sm:$0xff] }
0x17d5   :  { %v8100_v19 = vpack.i.bf16 %v8074_v18, %v4660_v48  ;;  %v561_v18 = vld [vmem:[%s12287_s6 + $0x2d0] sm:$0xff]  ;;  %v555_v6 = vld [vmem:[%s12287_s6 + $0x2a0] sm:$0xff] }
0x17d6   :  { %8096 = vrot.lane.b32.xlu0 %v8095_v49, %s8578_s30  ;;  %8086 = vrot.lane.b32.xlu1 %v8085_v33, %s8578_s30  ;;  %v543_v49 = vld [vmem:[%s12287_s6 + $0x240] sm:$0xff]  ;;  %v537_v48 = vld [vmem:[%s12287_s6 + $0x210] sm:$0xff] }
0x17d7   :  { %8101 = vrot.lane.b32.xlu2 %v8100_v19, %s8578_s30  ;;  %v531_v33 = vld [vmem:[%s12287_s6 + $0x1e0] sm:$0xff] }
0x17d8   :  { %v4645_v19 = vld [vmem:[%s12288_s11] sm:$0xff] }
0x17e0   :  { %v8077_v17 = vpop.permute.xlu0 %8076  ;;  %v8062_v52 = vpop.permute.xlu1 %8061 }
0x17e1   :  { %v8079_v7 = vunpack.i.h.bf16 %v8077_v17  ;;  %v8078_v29 = vunpack.i.l.bf16 %v8077_v17  ;;  %v8064_v14 = vunpack.i.h.bf16 %v8062_v52  ;;  %v8063_v23 = vunpack.i.l.bf16 %v8062_v52  ;;  %v525_v17 = vld [vmem:[%s12287_s6 + $0x1b0] sm:$0xff] }
0x17e2   :  { %v513_v52 = vld [vmem:[%s12287_s6 + $0x150] sm:$0xff] }
0x17e3   :  { %v4659_v59 = vsel %vm1098_vm0, %v8078_v29, %v8079_v7  ;;  %v4669_v47 = vsel %vm2613_vm11, %v8063_v23, %v8064_v14  ;;  %vm12279_vm11 = vmmov %vm12272_vm2  ;;  %vm4732_vm2 = vcmask 523264   ;;  %v495_v29 = vld [vmem:[%s12287_s6 + $0xc0] sm:$0xff] }
0x17e4   :  { %v8105_v31 = vpack.i.bf16 %v8079_v7, %v4659_v59  ;;  %v8090_v46 = vpack.i.bf16 %v8064_v14, %v4669_v47  ;;  %v507_v7 = vld [vmem:[%s12287_s6 + $0x120] sm:$0xff]  ;;  %v489_v14 = vld [vmem:[%s12287_s6 + $0x90] sm:$0xff] }
0x17e5   :  { %v483_v23 = vld [vmem:[%s12287_s6 + $0x60] sm:$0xff]  ;;  %v477_v59 = vld [vmem:[%s12287_s6 + $0x30] sm:$0xff] }
0x17e6   :  { %8106 = vrot.lane.b32.xlu0 %v8105_v31, %s8578_s30  ;;  %8091 = vrot.lane.b32.xlu1 %v8090_v46, %s8578_s30  ;;  %s12286_s30 = sld [smem:[#allocation28_spill]]  ;;  %v471_v47 = vld [vmem:[%s12287_s6] sm:$0xff] }
0x17ec   :  { %v4644_v3 = vld [vmem:[%s12286_s30] sm:$0xff] }
0x17ee   :  { %4683 = vperm.xlu1 %7257, %v4646_v40  }
0x1829   :  { %v8082_v56 = vpop.permute.xlu2 %8081 }
0x182a   :  { %v10535_v12 = vunpack.i.h.bf16 %v8082_v56  ;;  %v8083_v58 = vunpack.i.l.bf16 %v8082_v56 }
0x182c   :  { %v4714_v15 = vsel %vm12279_vm11, %v8083_v58, %v10535_v12  ;;  %vm12293_vm11 = vcmask 891904  }
0x1831   :  { %v8102_v10 = vpop.permute.xlu2 %8101 }
0x1832   :  { %v10550_v44 = vunpack.i.h.bf16 %v8102_v10  ;;  %v8103_v60 = vunpack.i.l.bf16 %v8102_v10 }
0x1834   :  { %v4711_v16 = vsel %vm12283_vm5, %v8103_v60, %v10550_v44  ;;  %vm12296_vm5 = vcmask 744448  }
0x1848   :  { %v8097_v38 = vpop.permute.xlu0 %8096  ;;  %v8087_v11 = vpop.permute.xlu1 %8086 }
0x1849   :  { %v10537_v57 = vunpack.i.h.bf16 %v8087_v11  ;;  %v8088_v35 = vunpack.i.l.bf16 %v8087_v11  ;;  %v10539_v21 = vunpack.i.h.bf16 %v8097_v38  ;;  %v8098_v2 = vunpack.i.l.bf16 %v8097_v38 }
0x184b   :  { %4764 = vmatpush.msrb.mxu3 %v10537_v57  ;;  %v4715_v0 = vsel %vm12278_vm10, %v8088_v35, %v10537_v57  ;;  %v4713_v30 = vsel %vm12280_vm12, %v8098_v2, %v10539_v21  ;;  %vm12292_vm10 = vmmov %vm12291_vm6  ;;  %vm12294_vm12 = vcmask 752640  }
0x184c   :  { %4744 = vmatpush.msra.mxu1 %v4715_v0  ;;  %4789 = vmatpush.msrb.mxu0 %v4715_v0 }
0x184d   :  { %4834 = vmatpush.msrb.mxu2 %v4715_v0  ;;  %4765 = vmatpush.msrb.mxu3 %v10535_v12 }
0x184e   :  { %4745 = vmatpush.msra.mxu1 %v4714_v15  ;;  %4790 = vmatpush.msrb.mxu0 %v4714_v15 }
0x184f   :  { %4835 = vmatpush.msrb.mxu2 %v4714_v15  ;;  %4766 = vmatpush.msrb.mxu3 %v10539_v21 }
0x1850   :  { %4746 = vmatpush.msra.mxu1 %v4713_v30  ;;  %4791 = vmatpush.msrb.mxu0 %v4713_v30 }
0x1851   :  { %4836 = vmatpush.msrb.mxu2 %v4713_v30 }
0x1858   :  { %v8107_v13 = vpop.permute.xlu0 %8106  ;;  %v8092_v4 = vpop.permute.xlu1 %8091 }
0x1859   :  { %v10552_v63 = vunpack.i.h.bf16 %v8092_v4  ;;  %v8093_v32 = vunpack.i.l.bf16 %v8092_v4  ;;  %v10554_v62 = vunpack.i.h.bf16 %v8107_v13  ;;  %v8108_v61 = vunpack.i.l.bf16 %v8107_v13  ;;  %v657_v4 = vld [vmem:[%s12287_s6 + $0x5d0] sm:$0xff] }
0x185b   :  { %4767 = vmatpush.msrb.mxu3 %v10552_v63  ;;  %v4712_v27 = vsel %vm12281_vm15, %v8093_v32, %v10552_v63  ;;  %v4710_v55 = vsel %vm12285_vm8, %v8108_v61, %v10554_v62  ;;  %v645_v32 = vld [vmem:[%s12287_s6 + $0x570] sm:$0xff]  ;;  %v639_v61 = vld [vmem:[%s12287_s6 + $0x540] sm:$0xff]  ;;  %vm12295_vm15 = vcmask 900096   ;;  %vm12297_vm8 = vcmask 736256  }
0x185c   :  { %4747 = vmatpush.msra.mxu1 %v4712_v27  ;;  %4792 = vmatpush.msrb.mxu0 %v4712_v27 }
0x185d   :  { %4837 = vmatpush.msrb.mxu2 %v4712_v27  ;;  %4768 = vmatpush.msrb.mxu3 %v10550_v44 }
0x185e   :  { %4748 = vmatpush.msra.mxu1 %v4711_v16  ;;  %4793 = vmatpush.msrb.mxu0 %v4711_v16 }
0x185f   :  { %4838 = vmatpush.msrb.mxu2 %v4711_v16  ;;  %4769 = vmatpush.msrb.mxu3 %v10554_v62 }
0x1860   :  { %4749 = vmatpush.msra.mxu1 %v4710_v55  ;;  %4794 = vmatpush.msrb.mxu0 %v4710_v55  ;;  %v10627_v31 = vpop.permute.xlu1 %4683 }
0x1861   :  { %4839 = vmatpush.msrb.mxu2 %v4710_v55  ;;  %4770 = vmatpush.msrb.mxu3 %v10517_v25 }
0x1862   :  { %4750 = vmatpush.msra.mxu1 %v10521_v51  ;;  %4795 = vmatpush.msrb.mxu0 %v10521_v51 }
0x1863   :  { %4840 = vmatpush.msrb.mxu2 %v10521_v51  ;;  %4771 = vmatpush.msrb.mxu3 %v10508_v20 }
0x1864   :  { %4751 = vmatpush.msra.mxu1 %v10512_v26  ;;  %7053 = vmatmul.msk.f32.vlgmr.msrb.gmra.mxu3 %vm4732_vm2, %v4642_v5 }
0x1865   :  { %4796 = vmatpush.msrb.mxu0 %v10512_v26  ;;  %4841 = vmatpush.msrb.mxu2 %v10512_v26 }
0x1866   :  { %4854 = vmatpush.msra.mxu3 %v10537_v57  ;;  %7052 = vmatmul.msk.f32.vlgmr.msra.gmra.mxu1 %vm4732_vm2, %v4642_v5 }
0x1867   :  { %7054 = vmatmul.msk.f32.vlgmr.msrb.gmra.mxu0 %vm4732_vm2, %v4643_v45  ;;  %4809 = vmatpush.msrb.mxu1 %v10537_v57 }
0x1868   :  { %7056 = vmatmul.msk.f32.vlgmr.msrb.gmra.mxu2 %vm4732_vm2, %v4644_v3  ;;  %4879 = vmatpush.msra.mxu0 %v4715_v0 }
0x1869   :  { %4855 = vmatpush.msra.mxu3 %v10535_v12  ;;  %4810 = vmatpush.msrb.mxu1 %v10535_v12 }
0x186a   :  { %4880 = vmatpush.msra.mxu0 %v4714_v15  ;;  %4946 = vmatpush.msra.mxu2 %v561_v18  ;;  %v843_v18 = vld [vmem:[%s12287_s6 + $0xba0] sm:$0xff] }
0x186b   :  { %4856 = vmatpush.msra.mxu3 %v10539_v21  ;;  %4811 = vmatpush.msrb.mxu1 %v10539_v21 }
0x186c   :  { %4881 = vmatpush.msra.mxu0 %v4713_v30  ;;  %4947 = vmatpush.msra.mxu2 %v555_v6  ;;  %v615_v6 = vld [vmem:[%s12287_s6 + $0x480] sm:$0xff] }
0x186d   :  { %4857 = vmatpush.msra.mxu3 %v10552_v63  ;;  %4812 = vmatpush.msrb.mxu1 %v10552_v63 }
0x186e   :  { %4882 = vmatpush.msra.mxu0 %v4712_v27  ;;  %4948 = vmatpush.msra.mxu2 %v549_v42  ;;  %v633_v27 = vld [vmem:[%s12287_s6 + $0x510] sm:$0xff] }
0x186f   :  { %4858 = vmatpush.msra.mxu3 %v10550_v44  ;;  %4813 = vmatpush.msrb.mxu1 %v10550_v44  ;;  %v837_v42 = vld [vmem:[%s12287_s6 + $0xb70] sm:$0xff] }
0x1870   :  { %4883 = vmatpush.msra.mxu0 %v4711_v16  ;;  %4949 = vmatpush.msra.mxu2 %v543_v49  ;;  %v627_v16 = vld [vmem:[%s12287_s6 + $0x4e0] sm:$0xff]  ;;  %v609_v49 = vld [vmem:[%s12287_s6 + $0x450] sm:$0xff] }
0x1871   :  { %4859 = vmatpush.msra.mxu3 %v10554_v62  ;;  %4814 = vmatpush.msrb.mxu1 %v10554_v62 }
0x1872   :  { %4884 = vmatpush.msra.mxu0 %v4710_v55  ;;  %4950 = vmatpush.msra.mxu2 %v537_v48  ;;  %v831_v48 = vld [vmem:[%s12287_s6 + $0xb40] sm:$0xff] }
0x1873   :  { %4860 = vmatpush.msra.mxu3 %v10517_v25  ;;  %4815 = vmatpush.msrb.mxu1 %v10517_v25 }
0x1874   :  { %4885 = vmatpush.msra.mxu0 %v10521_v51  ;;  %4951 = vmatpush.msra.mxu2 %v531_v33  ;;  %v519_v51 = vld [vmem:[%s12287_s6 + $0x180] sm:$0xff] }
0x1875   :  { %4861 = vmatpush.msra.mxu3 %v10508_v20  ;;  %4816 = vmatpush.msrb.mxu1 %v10508_v20  ;;  %v603_v33 = vld [vmem:[%s12287_s6 + $0x420] sm:$0xff] }
0x1876   :  { %7057 = vmatmul.msk.f32.vlgmr.msra.gmra.mxu3 %vm4732_vm2, %v4644_v3  ;;  %4886 = vmatpush.msra.mxu0 %v10512_v26  ;;  %v501_v26 = vld [vmem:[%s12287_s6 + $0xf0] sm:$0xff] }
0x1877   :  { %7055 = vmatmul.msk.f32.vlgmr.msrb.gmra.mxu1 %vm4732_vm2, %v4643_v45  ;;  %7058 = vmatmul.msk.f32.vlgmr.msra.gmra.mxu0 %vm4732_vm2, %v4645_v19  ;;  %v621_v45 = vld [vmem:[%s12287_s6 + $0x4b0] sm:$0xff] }
0x1878   :  { %4899 = vmatpush.msra.mxu1 %v10537_v57  ;;  %4952 = vmatpush.msra.mxu2 %v525_v17  ;;  %v753_v17 = vld [vmem:[%s12287_s6 + $0x8d0] sm:$0xff] }
0x1879   :  { %4966 = vmatpush.msrb.mxu3 %v657_v4  ;;  %4986 = vmatpush.msrb.mxu0 %v753_v17  ;;  %v717_v4 = vld [vmem:[%s12287_s6 + $0x7b0] sm:$0xff]  ;;  %v556_v17 = vld [vmem:[%s12287_s6 + $0x2a8] sm:$0xff] }
0x187a   :  { %4900 = vmatpush.msra.mxu1 %v10535_v12  ;;  %4953 = vmatpush.msra.mxu2 %v519_v51  ;;  %v945_v51 = vld [vmem:[%s12287_s6 + $0xed0] sm:$0xff] }
0x187c   :  { %4901 = vmatpush.msra.mxu1 %v10539_v21  ;;  %4954 = vmatpush.msra.mxu2 %v513_v52  ;;  %v597_v52 = vld [vmem:[%s12287_s6 + $0x3f0] sm:$0xff] }
0x187e   :  { %4902 = vmatpush.msra.mxu1 %v10552_v63  ;;  %4955 = vmatpush.msra.mxu2 %v507_v7  ;;  %v819_v7 = vld [vmem:[%s12287_s6 + $0xae0] sm:$0xff] }
0x1880   :  { %4903 = vmatpush.msra.mxu1 %v10550_v44  ;;  %4956 = vmatpush.msra.mxu2 %v501_v26  ;;  %v651_v44 = vld [vmem:[%s12287_s6 + $0x5a0] sm:$0xff] }
0x1881   :  { %4967 = vmatpush.msrb.mxu3 %v651_v44  ;;  %v747_v26 = vld [vmem:[%s12287_s6 + $0x8a0] sm:$0xff] }
0x1882   :  { %4904 = vmatpush.msra.mxu1 %v10554_v62  ;;  %4957 = vmatpush.msra.mxu2 %v495_v29  ;;  %v10649_v62 = vpack.i.bf16 %v9563_v43, %v9567_v41  ;;  %v849_v41 = vld [vmem:[%s12287_s6 + $0xbd0] sm:$0xff]  ;;  %v939_v29 = vld [vmem:[%s12287_s6 + $0xea0] sm:$0xff] }
0x1883   :  { %4968 = vmatpush.msrb.mxu3 %v645_v32  ;;  %4987 = vmatpush.msrb.mxu0 %v747_v26  ;;  %v783_v44 = vld [vmem:[%s12287_s6 + $0x9c0] sm:$0xff]  ;;  %v1029_v32 = vld [vmem:[%s12287_s6 + $0x1170] sm:$0xff]  ;;  %v550_v26 = vld [vmem:[%s12287_s6 + $0x278] sm:$0xff] }
0x1884   :  { %4905 = vmatpush.msra.mxu1 %v10517_v25  ;;  %4958 = vmatpush.msra.mxu2 %v489_v14  ;;  %v591_v14 = vld [vmem:[%s12287_s6 + $0x3c0] sm:$0xff] }
0x1885   :  { %4969 = vmatpush.msrb.mxu3 %v639_v61  ;;  %v909_v61 = vld [vmem:[%s12287_s6 + $0xdb0] sm:$0xff] }
0x1886   :  { %4906 = vmatpush.msra.mxu1 %v10508_v20  ;;  %4959 = vmatpush.msra.mxu2 %v483_v23  ;;  %v813_v23 = vld [vmem:[%s12287_s6 + $0xab0] sm:$0xff] }
0x1887   :  { %7059 = vmatmul.msk.f32.vlgmr.msra.gmra.mxu1 %vm4732_vm2, %v4645_v19  ;;  %4970 = vmatpush.msrb.mxu3 %v633_v27  ;;  %v825_v19 = vld [vmem:[%s12287_s6 + $0xb10] sm:$0xff]  ;;  %v771_v27 = vld [vmem:[%s12287_s6 + $0x960] sm:$0xff]  ;;  %vm12299_vm2 = vmmov %vm12296_vm5 }
0x1888   :  { %4960 = vmatpush.msra.mxu2 %v477_v59  ;;  %5006 = vmatpush.msrb.mxu1 %v849_v41  ;;  %v741_v59 = vld [vmem:[%s12287_s6 + $0x870] sm:$0xff] }
0x1889   :  { %4971 = vmatpush.msrb.mxu3 %v627_v16  ;;  %4988 = vmatpush.msrb.mxu0 %v741_v59  ;;  %v1023_v16 = vld [vmem:[%s12287_s6 + $0x1140] sm:$0xff]  ;;  %v765_v41 = vld [vmem:[%s12287_s6 + $0x930] sm:$0xff] }
0x188a   :  { %4961 = vmatpush.msra.mxu2 %v471_v47  ;;  %5007 = vmatpush.msrb.mxu1 %v843_v18  ;;  %v933_v47 = vld [vmem:[%s12287_s6 + $0xe70] sm:$0xff]  ;;  %v759_v18 = vld [vmem:[%s12287_s6 + $0x900] sm:$0xff] }
0x188b   :  { %4972 = vmatpush.msrb.mxu3 %v621_v45  ;;  %v1017_v45 = vld [vmem:[%s12287_s6 + $0x1110] sm:$0xff]  ;;  %v675_v59 = vld [vmem:[%s12287_s6 + $0x660] sm:$0xff] }
0x188c   :  { %5008 = vmatpush.msrb.mxu1 %v837_v42  ;;  %5026 = vmatpush.msrb.mxu2 %v945_v51  ;;  %v1011_v42 = vld [vmem:[%s12287_s6 + $0x10e0] sm:$0xff] }
0x188d   :  { %4973 = vmatpush.msrb.mxu3 %v615_v6  ;;  %v897_v6 = vld [vmem:[%s12287_s6 + $0xd50] sm:$0xff]  ;;  %v687_v51 = vld [vmem:[%s12287_s6 + $0x6c0] sm:$0xff] }
0x188e   :  { %5009 = vmatpush.msrb.mxu1 %v831_v48  ;;  %5027 = vmatpush.msrb.mxu2 %v939_v29  ;;  %v693_v48 = vld [vmem:[%s12287_s6 + $0x6f0] sm:$0xff] }
0x188f   :  { %4974 = vmatpush.msrb.mxu3 %v609_v49  ;;  %v562_v49 = vld [vmem:[%s12287_s6 + $0x2d8] sm:$0xff]  ;;  %v681_v29 = vld [vmem:[%s12287_s6 + $0x690] sm:$0xff] }
0x1890   :  { %5010 = vmatpush.msrb.mxu1 %v825_v19  ;;  %5028 = vmatpush.msrb.mxu2 %v933_v47  ;;  %v891_v19 = vld [vmem:[%s12287_s6 + $0xd20] sm:$0xff] }
0x1891   :  { %4975 = vmatpush.msrb.mxu3 %v603_v33  ;;  %v1005_v33 = vld [vmem:[%s12287_s6 + $0x10b0] sm:$0xff]  ;;  %v987_v47 = vld [vmem:[%s12287_s6 + $0x1020] sm:$0xff] }
0x1892   :  { %5011 = vmatpush.msrb.mxu1 %v819_v7  ;;  %v885_v7 = vld [vmem:[%s12287_s6 + $0xcf0] sm:$0xff] }
0x1893   :  { %4976 = vmatpush.msrb.mxu3 %v597_v52  ;;  %v999_v52 = vld [vmem:[%s12287_s6 + $0x1080] sm:$0xff] }
0x1894   :  { %5012 = vmatpush.msrb.mxu1 %v813_v23  ;;  %v544_v23 = vld [vmem:[%s12287_s6 + $0x248] sm:$0xff] }
0x1895   :  { %4977 = vmatpush.msrb.mxu3 %v591_v14  ;;  %v879_v14 = vld [vmem:[%s12287_s6 + $0xcc0] sm:$0xff] }
0x18e3   :  { %v4753_v46 = vpop.f32.mrf.mxu1 }
0x18e4   :  { %v4754_v40 = vadd.f32 %v4753_v46, %v10627_v31  ;;  %v4798_v38 = vpop.f32.mrf.mxu0  ;;  %v585_v46 = vld [vmem:[%s12287_s6 + $0x390] sm:$0xff] }
0x18e5   :  { %v4799_v58 = vadd.f32 %v4798_v38, %v10627_v31  ;;  %v735_v38 = vld [vmem:[%s12287_s6 + $0x840] sm:$0xff]  ;;  %4978 = vmatpush.msrb.mxu3 %v585_v46  ;;  %v873_v46 = vld [vmem:[%s12287_s6 + $0xc90] sm:$0xff] }
0x18e6   :  { %v10630_v56 = vmax.f32 %v4754_v40, 0.0  ;;  %v10690_v40 = vpack.i.bf16 %v9575_v34, %v9559_v37  ;;  %4989 = vmatpush.msrb.mxu0 %v735_v38  ;;  %v981_v38 = vld [vmem:[%s12287_s6 + $0xff0] sm:$0xff] }
0x18e7   :  { %v10635_v12 = vpop.f32.mrf.mxu3  ;;  %v4821_v0 = vmax.f32 %v4799_v58, 0.0  ;;  %v801_v58 = vld [vmem:[%s12287_s6 + $0xa50] sm:$0xff] }
0x18e8   :  { %4962 = vmatmul.f32.vlgmr.msra.gmra.mxu2 %v10630_v56 }
0x18eb   :  { %v4843_v25 = vpop.f32.mrf.mxu2 }
0x18ec   :  { %v4844_v20 = vadd.f32 %v4843_v25, %v10627_v31  ;;  %v807_v25 = vld [vmem:[%s12287_s6 + $0xa80] sm:$0xff] }
0x18ed   :  { %5013 = vmatpush.msrb.mxu1 %v807_v25  ;;  %v669_v25 = vld [vmem:[%s12287_s6 + $0x630] sm:$0xff] }
0x18ee   :  { %v4866_v11 = vmax.f32 %v4844_v20, 0.0  ;;  %v579_v20 = vld [vmem:[%s12287_s6 + $0x360] sm:$0xff] }
0x18ef   :  { %4979 = vmatpush.msrb.mxu3 %v579_v20  ;;  %5014 = vmatpush.msrb.mxu1 %v801_v58  ;;  %v867_v20 = vld [vmem:[%s12287_s6 + $0xc60] sm:$0xff] }
0x18f0   :  { %4925 = vrot.lane.b32.xlu0 %v4866_v11, %s8562_s28  ;;  %v927_v11 = vld [vmem:[%s12287_s6 + $0xe40] sm:$0xff] }
0x18f1   :  { %5029 = vmatpush.msrb.mxu2 %v927_v11  ;;  %v532_v11 = vld [vmem:[%s12287_s6 + $0x1e8] sm:$0xff]  ;;  %v663_v58 = vld [vmem:[%s12287_s6 + $0x600] sm:$0xff] }
0x18f4   :  { %v4818_v57 = vpop.f32.mrf.mxu1  ;;  %v4888_v35 = vpop.f32.mrf.mxu0 }
0x18f5   :  { %v4819_v21 = vadd.f32 %v4818_v57, %v10627_v31  ;;  %v4889_v2 = vadd.f32 %v4888_v35, %v10627_v31  ;;  %v573_v57 = vld [vmem:[%s12287_s6 + $0x330] sm:$0xff] }
0x18f6   :  { %v729_v35 = vld [vmem:[%s12287_s6 + $0x810] sm:$0xff]  ;;  %4980 = vmatpush.msrb.mxu3 %v573_v57  ;;  %v975_v57 = vld [vmem:[%s12287_s6 + $0xfc0] sm:$0xff] }
0x18f7   :  { %v4822_v15 = vmax.f32 %v4819_v21, 0.0  ;;  %v4911_v30 = vmax.f32 %v4889_v2, 0.0  ;;  %v921_v21 = vld [vmem:[%s12287_s6 + $0xe10] sm:$0xff]  ;;  %v795_v2 = vld [vmem:[%s12287_s6 + $0xa20] sm:$0xff]  ;;  %4990 = vmatpush.msrb.mxu0 %v729_v35 }
0x18f8   :  { %5030 = vmatpush.msrb.mxu2 %v921_v21  ;;  %5015 = vmatpush.msrb.mxu1 %v795_v2  ;;  %v861_v35 = vld [vmem:[%s12287_s6 + $0xc30] sm:$0xff]  ;;  %v526_v21 = vld [vmem:[%s12287_s6 + $0x1b8] sm:$0xff] }
0x18f9   :  { %v8110_v10 = vpack.i.bf16 %v4822_v15, %v4821_v0  ;;  %v4863_v13 = vpop.f32.mrf.mxu3  ;;  %4934 = vrot.lane.b32.xlu1 %v4911_v30, %s8587_s1  ;;  %v567_v0 = vld [vmem:[%s12287_s6 + $0x300] sm:$0xff]  ;;  %v1041_v15 = vld [vmem:[%s12287_s6 + $0x11d0] sm:$0xff] }
0x18fa   :  { %v4864_v60 = vadd.f32 %v4863_v13, %v10627_v31  ;;  %v723_v30 = vld [vmem:[%s12287_s6 + $0x7e0] sm:$0xff]  ;;  %4981 = vmatpush.msrb.mxu3 %v567_v0  ;;  %v1065_v2 = vld [vmem:[%s12287_s6 + $0x1290] sm:$0xff] }
0x18fb   :  { %8111 = vrot.lane.b32.xlu2 %v8110_v10, %s8586_s27  ;;  %v789_v10 = vld [vmem:[%s12287_s6 + $0x9f0] sm:$0xff]  ;;  %v1035_v13 = vld [vmem:[%s12287_s6 + $0x11a0] sm:$0xff]  ;;  %4991 = vmatpush.msrb.mxu0 %v723_v30  ;;  %v520_v30 = vld [vmem:[%s12287_s6 + $0x188] sm:$0xff] }
0x18fc   :  { %v4867_v63 = vmax.f32 %v4864_v60, 0.0  ;;  %5046 = vmatpush.msra.mxu3 %v1041_v15  ;;  %v915_v60 = vld [vmem:[%s12287_s6 + $0xde0] sm:$0xff]  ;;  %5016 = vmatpush.msrb.mxu1 %v789_v10  ;;  %v969_v0 = vld [vmem:[%s12287_s6 + $0xf90] sm:$0xff] }
0x18fd   :  { %4992 = vmatpush.msrb.mxu0 %v717_v4  ;;  %5031 = vmatpush.msrb.mxu2 %v915_v60  ;;  %v855_v15 = vld [vmem:[%s12287_s6 + $0xc00] sm:$0xff]  ;;  %v754_v4 = vld [vmem:[%s12287_s6 + $0x8d8] sm:$0xff]  ;;  %v1053_v60 = vld [vmem:[%s12287_s6 + $0x1230] sm:$0xff] }
0x18fe   :  { %4927 = vrot.lane.b32.xlu0 %v4867_v63, %s8562_s28  ;;  %5047 = vmatpush.msra.mxu3 %v1035_v13  ;;  %v777_v63 = vld [vmem:[%s12287_s6 + $0x990] sm:$0xff]  ;;  %v1059_v10 = vld [vmem:[%s12287_s6 + $0x1260] sm:$0xff]  ;;  %s12304_s28 = sld [smem:[#allocation31_spill]] }
0x18ff   :  { %5017 = vmatpush.msrb.mxu1 %v783_v44  ;;  %5032 = vmatpush.msrb.mxu2 %v909_v61  ;;  %v963_v13 = vld [vmem:[%s12287_s6 + $0xf60] sm:$0xff]  ;;  %v514_v44 = vld [vmem:[%s12287_s6 + $0x158] sm:$0xff] }
0x1900   :  { %5048 = vmatpush.msra.mxu3 %v1029_v32  ;;  %v748_v32 = vld [vmem:[%s12287_s6 + $0x8a8] sm:$0xff]  ;;  %v1047_v61 = vld [vmem:[%s12287_s6 + $0x1200] sm:$0xff] }
0x1901   :  { %8126 = vrot.lane.b32.xlu1 %v10649_v62, %s8568_s16  ;;  %5018 = vmatpush.msrb.mxu1 %v777_v63  ;;  %v957_v63 = vld [vmem:[%s12287_s6 + $0xf30] sm:$0xff] }
0x1902   :  { %5049 = vmatpush.msra.mxu3 %v1023_v16  ;;  %v742_v16 = vld [vmem:[%s12287_s6 + $0x878] sm:$0xff] }
0x1903   :  { %5019 = vmatpush.msrb.mxu1 %v771_v27  ;;  %v951_v27 = vld [vmem:[%s12287_s6 + $0xf00] sm:$0xff] }
0x1904   :  { %v4908_v55 = vpop.f32.mrf.mxu1  ;;  %5050 = vmatpush.msra.mxu3 %v1017_v45  ;;  %v730_v45 = vld [vmem:[%s12287_s6 + $0x818] sm:$0xff] }
0x1905   :  { %v4909_v5 = vadd.f32 %v4908_v55, %v10627_v31  ;;  %v705_v55 = vld [vmem:[%s12287_s6 + $0x750] sm:$0xff]  ;;  %5020 = vmatpush.msrb.mxu1 %v765_v41  ;;  %v496_v41 = vld [vmem:[%s12287_s6 + $0xc8] sm:$0xff] }
0x1906   :  { %8116 = vrot.lane.b32.xlu0 %v10649_v62, %s8571_s23  ;;  %5051 = vmatpush.msra.mxu3 %v1011_v42  ;;  %v718_v42 = vld [vmem:[%s12287_s6 + $0x7b8] sm:$0xff] }
0x1907   :  { %v4912_v3 = vmax.f32 %v4909_v5, 0.0  ;;  %v903_v5 = vld [vmem:[%s12287_s6 + $0xd80] sm:$0xff]  ;;  %5021 = vmatpush.msrb.mxu1 %v759_v18  ;;  %v724_v18 = vld [vmem:[%s12287_s6 + $0x7e8] sm:$0xff] }
0x1908   :  { %5033 = vmatpush.msrb.mxu2 %v903_v5  ;;  %5052 = vmatpush.msra.mxu3 %v1005_v33  ;;  %v736_v5 = vld [vmem:[%s12287_s6 + $0x848] sm:$0xff] }
0x1909   :  { %4936 = vrot.lane.b32.xlu2 %v4912_v3, %s8587_s1  ;;  %8136 = vrot.lane.b32.xlu1 %v10649_v62, %s8570_s22  ;;  %v699_v3 = vld [vmem:[%s12287_s6 + $0x720] sm:$0xff]  ;;  %v472_v33 = vld [vmem:[%s12287_s6 + $0x8] sm:$0xff] }
0x190a   :  { %5034 = vmatpush.msrb.mxu2 %v897_v6  ;;  %5086 = vmatpush.msra.mxu1 %v562_v49  ;;  %v484_v6 = vld [vmem:[%s12287_s6 + $0x68] sm:$0xff]  ;;  %v478_v49 = vld [vmem:[%s12287_s6 + $0x38] sm:$0xff] }
0x190b   :  { %5053 = vmatpush.msra.mxu3 %v999_v52  ;;  %v688_v52 = vld [vmem:[%s12287_s6 + $0x6c8] sm:$0xff] }
0x190c   :  { %5035 = vmatpush.msrb.mxu2 %v891_v19  ;;  %5087 = vmatpush.msra.mxu1 %v556_v17  ;;  %v706_v19 = vld [vmem:[%s12287_s6 + $0x758] sm:$0xff]  ;;  %v700_v17 = vld [vmem:[%s12287_s6 + $0x728] sm:$0xff] }
0x190e   :  { %8131 = vrot.lane.b32.xlu0 %v10649_v62, %s8567_s5  ;;  %5036 = vmatpush.msrb.mxu2 %v885_v7  ;;  %v682_v7 = vld [vmem:[%s12287_s6 + $0x698] sm:$0xff] }
0x190f   :  { %5088 = vmatpush.msra.mxu1 %v550_v26  ;;  %v676_v26 = vld [vmem:[%s12287_s6 + $0x668] sm:$0xff] }
0x1910   :  { %5037 = vmatpush.msrb.mxu2 %v879_v14  ;;  %v664_v14 = vld [vmem:[%s12287_s6 + $0x608] sm:$0xff] }
0x1911   :  { %8121 = vrot.lane.b32.xlu2 %v10649_v62, %s8569_s18  ;;  %8141 = vrot.lane.b32.xlu1 %v10649_v62, %s8566_s15 }
0x1912   :  { %5089 = vmatpush.msra.mxu1 %v544_v23  ;;  %5038 = vmatpush.msrb.mxu2 %v873_v46 }
0x1914   :  { %5039 = vmatpush.msrb.mxu2 %v867_v20  ;;  %v844_v20 = vld [vmem:[%s12287_s6 + $0xba8] sm:$0xff] }
0x1916   :  { %8156 = vrot.lane.b32.xlu0 %v10690_v40, %s8569_s18  ;;  %5040 = vmatpush.msrb.mxu2 %v861_v35  ;;  %v832_v35 = vld [vmem:[%s12287_s6 + $0xb48] sm:$0xff] }
0x1918   :  { %5041 = vmatpush.msrb.mxu2 %v855_v15 }
0x1919   :  { %8151 = vrot.lane.b32.xlu2 %v10690_v40, %s8571_s23  ;;  %8146 = vrot.lane.b32.xlu1 %v10649_v62, %s8564_s21  ;;  %v711_v62 = vld [vmem:[%s12287_s6 + $0x780] sm:$0xff] }
0x191a   :  { %4993 = vmatpush.msrb.mxu0 %v711_v62  ;;  %5126 = vmatpush.msra.mxu2 %v754_v4  ;;  %v508_v62 = vld [vmem:[%s12287_s6 + $0x128] sm:$0xff]  ;;  %v946_v4 = vld [vmem:[%s12287_s6 + $0xed8] sm:$0xff] }
0x191c   :  { %4994 = vmatpush.msrb.mxu0 %v705_v55  ;;  %5127 = vmatpush.msra.mxu2 %v748_v32  ;;  %v502_v55 = vld [vmem:[%s12287_s6 + $0xf8] sm:$0xff]  ;;  %v808_v32 = vld [vmem:[%s12287_s6 + $0xa88] sm:$0xff] }
0x191e   :  { %8171 = vrot.lane.b32.xlu0 %v10690_v40, %s8566_s15  ;;  %4995 = vmatpush.msrb.mxu0 %v699_v3  ;;  %v490_v3 = vld [vmem:[%s12287_s6 + $0x98] sm:$0xff] }
0x191f   :  { %5128 = vmatpush.msra.mxu2 %v742_v16  ;;  %v610_v16 = vld [vmem:[%s12287_s6 + $0x458] sm:$0xff] }
0x1920   :  { %4996 = vmatpush.msrb.mxu0 %v693_v48  ;;  %v712_v48 = vld [vmem:[%s12287_s6 + $0x788] sm:$0xff] }
0x1921   :  { %8166 = vrot.lane.b32.xlu2 %v10690_v40, %s8567_s5  ;;  %8161 = vrot.lane.b32.xlu1 %v10690_v40, %s8568_s16 }
0x1922   :  { %4997 = vmatpush.msrb.mxu0 %v687_v51  ;;  %5129 = vmatpush.msra.mxu2 %v736_v5  ;;  %v694_v51 = vld [vmem:[%s12287_s6 + $0x6f8] sm:$0xff]  ;;  %v796_v5 = vld [vmem:[%s12287_s6 + $0xa28] sm:$0xff] }
0x1924   :  { %4998 = vmatpush.msrb.mxu0 %v681_v29  ;;  %5130 = vmatpush.msra.mxu2 %v730_v45  ;;  %v4774_v29 = vadd.f32 %v10635_v12, %v10627_v31  ;;  %v652_v12 = vld [vmem:[%s12287_s6 + $0x5a8] sm:$0xff] }
0x1926   :  { %8181 = vrot.lane.b32.xlu0 %v10690_v40, %s8564_s21  ;;  %v538_v40 = vld [vmem:[%s12287_s6 + $0x218] sm:$0xff]  ;;  %4999 = vmatpush.msrb.mxu0 %v675_v59  ;;  %v4777_v59 = vmax.f32 %v4774_v29, 0.0  ;;  %v904_v29 = vld [vmem:[%s12287_s6 + $0xd88] sm:$0xff] }
0x1927   :  { %5090 = vmatpush.msra.mxu1 %v538_v40  ;;  %5131 = vmatpush.msra.mxu2 %v724_v18  ;;  %v658_v40 = vld [vmem:[%s12287_s6 + $0x5d8] sm:$0xff] }
0x1928   :  { %5000 = vmatpush.msrb.mxu0 %v669_v25  ;;  %v850_v25 = vld [vmem:[%s12287_s6 + $0xbd8] sm:$0xff] }
0x1929   :  { %8176 = vrot.lane.b32.xlu2 %v9582_v1, %s8570_s22  ;;  %v993_v1 = vld [vmem:[%s12287_s6 + $0x1050] sm:$0xff]  ;;  %5091 = vmatpush.msra.mxu1 %v532_v11  ;;  %v646_v11 = vld [vmem:[%s12287_s6 + $0x578] sm:$0xff] }
0x192a   :  { %5054 = vmatpush.msra.mxu3 %v993_v1  ;;  %5001 = vmatpush.msrb.mxu0 %v663_v58  ;;  %v670_v1 = vld [vmem:[%s12287_s6 + $0x638] sm:$0xff] }
0x192b   :  { %5092 = vmatpush.msra.mxu1 %v526_v21  ;;  %5132 = vmatpush.msra.mxu2 %v718_v42  ;;  %v838_v58 = vld [vmem:[%s12287_s6 + $0xb78] sm:$0xff] }
0x192c   :  { %5055 = vmatpush.msra.mxu3 %v987_v47  ;;  %5078 = vmatpush.msra.mxu0 %v1065_v2  ;;  %v634_v21 = vld [vmem:[%s12287_s6 + $0x518] sm:$0xff] }
0x192d   :  { %5093 = vmatpush.msra.mxu1 %v520_v30  ;;  %5133 = vmatpush.msra.mxu2 %v712_v48  ;;  %v826_v2 = vld [vmem:[%s12287_s6 + $0xb18] sm:$0xff]  ;;  %v628_v30 = vld [vmem:[%s12287_s6 + $0x4e8] sm:$0xff] }
0x192e   :  { %5056 = vmatpush.msra.mxu3 %v981_v38  ;;  %5079 = vmatpush.msra.mxu0 %v1059_v10  ;;  %v922_v18 = vld [vmem:[%s12287_s6 + $0xe18] sm:$0xff]  ;;  %v916_v48 = vld [vmem:[%s12287_s6 + $0xde8] sm:$0xff] }
0x192f   :  { %5094 = vmatpush.msra.mxu1 %v514_v44  ;;  %5134 = vmatpush.msra.mxu2 %v706_v19  ;;  %v814_v44 = vld [vmem:[%s12287_s6 + $0xab8] sm:$0xff]  ;;  %v784_v19 = vld [vmem:[%s12287_s6 + $0x9c8] sm:$0xff] }
0x1930   :  { %5057 = vmatpush.msra.mxu3 %v975_v57  ;;  %5080 = vmatpush.msra.mxu0 %v1053_v60  ;;  %v640_v57 = vld [vmem:[%s12287_s6 + $0x548] sm:$0xff]  ;;  %v622_v60 = vld [vmem:[%s12287_s6 + $0x4b8] sm:$0xff] }
0x1931   :  { %5095 = vmatpush.msra.mxu1 %v508_v62  ;;  %5135 = vmatpush.msra.mxu2 %v700_v17  ;;  %v616_v62 = vld [vmem:[%s12287_s6 + $0x488] sm:$0xff]  ;;  %v598_v42 = vld [vmem:[%s12287_s6 + $0x3f8] sm:$0xff] }
0x1932   :  { %5058 = vmatpush.msra.mxu3 %v969_v0  ;;  %5081 = vmatpush.msra.mxu0 %v1047_v61  ;;  %v820_v0 = vld [vmem:[%s12287_s6 + $0xae8] sm:$0xff]  ;;  %v934_v61 = vld [vmem:[%s12287_s6 + $0xe78] sm:$0xff] }
0x1933   :  { %5096 = vmatpush.msra.mxu1 %v502_v55  ;;  %5136 = vmatpush.msra.mxu2 %v694_v51  ;;  %v928_v55 = vld [vmem:[%s12287_s6 + $0xe48] sm:$0xff]  ;;  %v910_v17 = vld [vmem:[%s12287_s6 + $0xdb8] sm:$0xff] }
0x1934   :  { %5059 = vmatpush.msra.mxu3 %v963_v13 }
0x1935   :  { %5097 = vmatpush.msra.mxu1 %v496_v41  ;;  %5137 = vmatpush.msra.mxu2 %v688_v52  ;;  %v604_v41 = vld [vmem:[%s12287_s6 + $0x428] sm:$0xff]  ;;  %v586_v52 = vld [vmem:[%s12287_s6 + $0x398] sm:$0xff] }
0x1936   :  { %5060 = vmatpush.msra.mxu3 %v957_v63  ;;  %v940_v63 = vld [vmem:[%s12287_s6 + $0xea8] sm:$0xff] }
0x1937   :  { %5098 = vmatpush.msra.mxu1 %v490_v3  ;;  %5138 = vmatpush.msra.mxu2 %v682_v7  ;;  %v778_v7 = vld [vmem:[%s12287_s6 + $0x998] sm:$0xff] }
0x1938   :  { %5061 = vmatpush.msra.mxu3 %v951_v27  ;;  %v802_v27 = vld [vmem:[%s12287_s6 + $0xa58] sm:$0xff] }
0x1939   :  { %5099 = vmatpush.msra.mxu1 %v484_v6  ;;  %5139 = vmatpush.msra.mxu2 %v676_v26 }
0x193b   :  { %5100 = vmatpush.msra.mxu1 %v478_v49  ;;  %5140 = vmatpush.msra.mxu2 %v670_v1  ;;  %v790_v49 = vld [vmem:[%s12287_s6 + $0x9f8] sm:$0xff] }
0x193d   :  { %5101 = vmatpush.msra.mxu1 %v472_v33  ;;  %5141 = vmatpush.msra.mxu2 %v664_v14  ;;  %v592_v33 = vld [vmem:[%s12287_s6 + $0x3c8] sm:$0xff] }
0x193e   :  { %v580_v14 = vld [vmem:[%s12287_s6 + $0x368] sm:$0xff] }
0x1955   :  { %v8112_v23 = vpop.permute.xlu2 %8111 }
0x1956   :  { %v8114_v47 = vunpack.i.h.bf16 %v8112_v23  ;;  %v8113_v46 = vunpack.i.l.bf16 %v8112_v23  ;;  %v772_v23 = vld [vmem:[%s12287_s6 + $0x968] sm:$0xff] }
0x1958   :  { %v10803_v38 = vsel %vm12289_vm14, %v8113_v46, %v8114_v47  ;;  %v10806_v31 = vsel %vm12290_vm4, %v4777_v59, %v8113_v46  ;;  %v898_v59 = vld [vmem:[%s12287_s6 + $0xd58] sm:$0xff]  ;;  %vm12300_vm14 = vcmask 154624  }
0x1959   :  { %4982 = vmatmul.f32.vlgmr.msrb.gmra.mxu3 %v10806_v31  ;;  %5002 = vmatmul.f32.vlgmr.msrb.gmra.mxu0 %v10803_v38  ;;  %vm12301_vm4 = vmmov %vm12300_vm14 }
0x195a   :  { %5106 = vmatpush.msrb.mxu0 %v658_v40  ;;  %5146 = vmatpush.msrb.mxu3 %v850_v25  ;;  %v574_v40 = vld [vmem:[%s12287_s6 + $0x338] sm:$0xff] }
0x195b   :  { %v766_v25 = vld [vmem:[%s12287_s6 + $0x938] sm:$0xff] }
0x195c   :  { %5107 = vmatpush.msrb.mxu0 %v652_v12  ;;  %5147 = vmatpush.msrb.mxu3 %v844_v20  ;;  %v892_v12 = vld [vmem:[%s12287_s6 + $0xd28] sm:$0xff] }
0x195d   :  { %v1060_v20 = vld [vmem:[%s12287_s6 + $0x1268] sm:$0xff] }
0x195e   :  { %5108 = vmatpush.msrb.mxu0 %v646_v11  ;;  %5148 = vmatpush.msrb.mxu3 %v838_v58  ;;  %v568_v11 = vld [vmem:[%s12287_s6 + $0x308] sm:$0xff] }
0x195f   :  { %v760_v58 = vld [vmem:[%s12287_s6 + $0x908] sm:$0xff] }
0x1960   :  { %5109 = vmatpush.msrb.mxu0 %v640_v57  ;;  %5149 = vmatpush.msrb.mxu3 %v832_v35  ;;  %v886_v35 = vld [vmem:[%s12287_s6 + $0xcf8] sm:$0xff] }
0x1962   :  { %5110 = vmatpush.msrb.mxu0 %v634_v21  ;;  %5150 = vmatpush.msrb.mxu3 %v826_v2  ;;  %v4926_v15 = vpop.permute.xlu0 %4925  ;;  %v1042_v21 = vld [vmem:[%s12287_s6 + $0x11d8] sm:$0xff] }
0x1963   :  { %v10821_v10 = vsel %vm2885_vm3, %v8114_v47, %v4926_v15  ;;  %v10823_v13 = vpop.permute.xlu2 %4936  ;;  %v1066_v47 = vld [vmem:[%s12287_s6 + $0x1298] sm:$0xff] }
0x1964   :  { %7060 = vmatmul.msk.f32.vlgmr.msra.gmra.mxu0 %vm3461_vm9, %v10823_v13  ;;  %5151 = vmatpush.msrb.mxu3 %v820_v0  ;;  %v1054_v2 = vld [vmem:[%s12287_s6 + $0x1238] sm:$0xff]  ;;  %v563_v0 = vld [vmem:[%s12287_s6 + $0x2e0] sm:$0xff] }
0x1965   :  { %5111 = vmatpush.msrb.mxu0 %v628_v30  ;;  %5022 = vmatmul.f32.vlgmr.msrb.gmra.mxu1 %v10821_v10  ;;  %v880_v30 = vld [vmem:[%s12287_s6 + $0xcc8] sm:$0xff] }
0x1966   :  { %5166 = vmatpush.msrb.mxu1 %v946_v4  ;;  %5152 = vmatpush.msrb.mxu3 %v814_v44  ;;  %v1036_v4 = vld [vmem:[%s12287_s6 + $0x11a8] sm:$0xff] }
0x1967   :  { %5112 = vmatpush.msrb.mxu0 %v622_v60  ;;  %v1048_v44 = vld [vmem:[%s12287_s6 + $0x1208] sm:$0xff]  ;;  %v557_v60 = vld [vmem:[%s12287_s6 + $0x2b0] sm:$0xff] }
0x1968   :  { %5167 = vmatpush.msrb.mxu1 %v940_v63  ;;  %5153 = vmatpush.msrb.mxu3 %v808_v32  ;;  %v874_v63 = vld [vmem:[%s12287_s6 + $0xc98] sm:$0xff]  ;;  %v659_v32 = vld [vmem:[%s12287_s6 + $0x5e0] sm:$0xff] }
0x1969   :  { %5113 = vmatpush.msrb.mxu0 %v616_v62  ;;  %v1030_v62 = vld [vmem:[%s12287_s6 + $0x1178] sm:$0xff] }
0x196a   :  { %5168 = vmatpush.msrb.mxu1 %v934_v61  ;;  %5154 = vmatpush.msrb.mxu3 %v802_v27  ;;  %v551_v27 = vld [vmem:[%s12287_s6 + $0x280] sm:$0xff] }
0x196b   :  { %5114 = vmatpush.msrb.mxu0 %v610_v16  ;;  %v10840_v45 = vpop.permute.xlu2 %8121  ;;  %v4935_v3 = vpop.permute.xlu1 %4934  ;;  %v868_v16 = vld [vmem:[%s12287_s6 + $0xc68] sm:$0xff] }
0x196c   :  { %5169 = vmatpush.msrb.mxu1 %v928_v55  ;;  %v10845_v6 = vsel %vm12291_vm6, %v4935_v3, %v10823_v13  ;;  %5155 = vmatpush.msrb.mxu3 %v796_v5  ;;  %v653_v55 = vld [vmem:[%s12287_s6 + $0x5b0] sm:$0xff]  ;;  %v1024_v5 = vld [vmem:[%s12287_s6 + $0x1148] sm:$0xff]  ;;  %vm12302_vm6 = vmmov %vm12301_vm4 }
0x196d   :  { %5115 = vmatpush.msrb.mxu0 %v604_v41  ;;  %5102 = vmatmul.f32.vlgmr.msra.gmra.mxu1 %v10630_v56  ;;  %v545_v41 = vld [vmem:[%s12287_s6 + $0x250] sm:$0xff] }
0x196e   :  { %5170 = vmatpush.msrb.mxu1 %v922_v18  ;;  %5062 = vmatmul.f32.vlgmr.msra.gmra.mxu3 %v10845_v6  ;;  %v862_v18 = vld [vmem:[%s12287_s6 + $0xc38] sm:$0xff] }
0x196f   :  { %5116 = vmatpush.msrb.mxu0 %v598_v42  ;;  %5156 = vmatpush.msrb.mxu3 %v790_v49  ;;  %v647_v49 = vld [vmem:[%s12287_s6 + $0x580] sm:$0xff] }
0x1970   :  { %5171 = vmatpush.msrb.mxu1 %v916_v48  ;;  %v4928_v51 = vpop.permute.xlu0 %4927 }
0x1971   :  { %5117 = vmatpush.msrb.mxu0 %v592_v33  ;;  %5157 = vmatpush.msrb.mxu3 %v784_v19  ;;  %v4929_v26 = vsel %vm2885_vm3, %v4926_v15, %v4928_v51  ;;  %v1018_v33 = vld [vmem:[%s12287_s6 + $0x1118] sm:$0xff]  ;;  %v539_v19 = vld [vmem:[%s12287_s6 + $0x220] sm:$0xff]  ;;  %v641_v51 = vld [vmem:[%s12287_s6 + $0x550] sm:$0xff] }
0x1972   :  { %v10860_v1 = vsel %vm12292_vm10, %v4929_v26, %v4935_v3  ;;  %5172 = vmatpush.msrb.mxu1 %v910_v17  ;;  %v856_v17 = vld [vmem:[%s12287_s6 + $0xc08] sm:$0xff]  ;;  %vm12303_vm10 = vmmov %vm12301_vm4 }
0x1973   :  { %5118 = vmatpush.msrb.mxu0 %v586_v52  ;;  %5158 = vmatpush.msrb.mxu3 %v778_v7  ;;  %v10866_v46 = vpop.permute.xlu2 %8151  ;;  %v10881_v15 = vpop.permute.xlu1 %8126  ;;  %v1012_v52 = vld [vmem:[%s12287_s6 + $0x10e8] sm:$0xff] }
0x1974   :  { %5173 = vmatpush.msrb.mxu1 %v904_v29  ;;  %5042 = vmatmul.f32.vlgmr.msrb.gmra.mxu2 %v10860_v1  ;;  %v533_v29 = vld [vmem:[%s12287_s6 + $0x1f0] sm:$0xff] }
0x1975   :  { %5119 = vmatpush.msrb.mxu0 %v580_v14  ;;  %5159 = vmatpush.msrb.mxu3 %v772_v23  ;;  %v755_v14 = vld [vmem:[%s12287_s6 + $0x8e0] sm:$0xff] }
0x1976   :  { %5174 = vmatpush.msrb.mxu1 %v898_v59  ;;  %5218 = vmatpush.msrb.mxu2 %v1066_v47  ;;  %v635_v23 = vld [vmem:[%s12287_s6 + $0x520] sm:$0xff]  ;;  %v1006_v59 = vld [vmem:[%s12287_s6 + $0x10b8] sm:$0xff] }
0x1977   :  { %5120 = vmatpush.msrb.mxu0 %v574_v40  ;;  %5160 = vmatpush.msrb.mxu3 %v766_v25  ;;  %v527_v47 = vld [vmem:[%s12287_s6 + $0x1c0] sm:$0xff]  ;;  %v749_v40 = vld [vmem:[%s12287_s6 + $0x8b0] sm:$0xff] }
0x1978   :  { %5175 = vmatpush.msrb.mxu1 %v892_v12  ;;  %5219 = vmatpush.msrb.mxu2 %v1060_v20  ;;  %v10875_v57 = vpop.permute.xlu0 %8116  ;;  %v629_v25 = vld [vmem:[%s12287_s6 + $0x4f0] sm:$0xff]  ;;  %v1000_v12 = vld [vmem:[%s12287_s6 + $0x1088] sm:$0xff] }
0x1979   :  { %5121 = vmatpush.msrb.mxu0 %v568_v11  ;;  %5161 = vmatpush.msrb.mxu3 %v760_v58  ;;  %v8124_v11 = vunpack.i.h.bf16 %v10840_v45  ;;  %v521_v58 = vld [vmem:[%s12287_s6 + $0x190] sm:$0xff] }
0x197a   :  { %5122 = vmatmul.f32.vlgmr.msrb.gmra.mxu0 %v10806_v31  ;;  %5162 = vmatmul.f32.vlgmr.msrb.gmra.mxu3 %v10821_v10 }
0x197b   :  { %5176 = vmatpush.msrb.mxu1 %v886_v35  ;;  %5186 = vmatpush.msra.mxu0 %v1042_v21  ;;  %v10892_v61 = vpop.permute.xlu2 %8166  ;;  %v10918_v26 = vpop.permute.xlu1 %8136  ;;  %v743_v35 = vld [vmem:[%s12287_s6 + $0x880] sm:$0xff] }
0x197c   :  { %5220 = vmatpush.msrb.mxu2 %v1054_v2  ;;  %5226 = vmatpush.msra.mxu3 %v563_v0  ;;  %v8168_v42 = vunpack.i.l.bf16 %v10892_v61  ;;  %v623_v2 = vld [vmem:[%s12287_s6 + $0x4c0] sm:$0xff]  ;;  %v994_v0 = vld [vmem:[%s12287_s6 + $0x1058] sm:$0xff] }
0x197d   :  { %5177 = vmatpush.msrb.mxu1 %v880_v30  ;;  %5187 = vmatpush.msra.mxu0 %v1036_v4  ;;  %v515_v30 = vld [vmem:[%s12287_s6 + $0x160] sm:$0xff]  ;;  %v737_v4 = vld [vmem:[%s12287_s6 + $0x850] sm:$0xff] }
0x197e   :  { %5221 = vmatpush.msrb.mxu2 %v1048_v44  ;;  %5227 = vmatpush.msra.mxu3 %v557_v60  ;;  %v617_v60 = vld [vmem:[%s12287_s6 + $0x490] sm:$0xff] }
0x197f   :  { %5142 = vmatmul.f32.vlgmr.msra.gmra.mxu2 %v10803_v38  ;;  %5178 = vmatpush.msrb.mxu1 %v874_v63  ;;  %v988_v63 = vld [vmem:[%s12287_s6 + $0x1028] sm:$0xff] }
0x1980   :  { %5246 = vmatpush.msra.mxu2 %v659_v32  ;;  %5188 = vmatpush.msra.mxu0 %v1030_v62  ;;  %v10900_v3 = vpop.permute.xlu0 %8131  ;;  %v509_v32 = vld [vmem:[%s12287_s6 + $0x130] sm:$0xff]  ;;  %v731_v62 = vld [vmem:[%s12287_s6 + $0x820] sm:$0xff] }
0x1981   :  { %5228 = vmatpush.msra.mxu3 %v551_v27  ;;  %5179 = vmatpush.msrb.mxu1 %v868_v16  ;;  %v8134_v48 = vunpack.i.h.bf16 %v10900_v3  ;;  %v611_v16 = vld [vmem:[%s12287_s6 + $0x460] sm:$0xff] }
0x1982   :  { %5247 = vmatpush.msra.mxu2 %v653_v55  ;;  %5189 = vmatpush.msra.mxu0 %v1024_v5  ;;  %v982_v55 = vld [vmem:[%s12287_s6 + $0xff8] sm:$0xff]  ;;  %v503_v5 = vld [vmem:[%s12287_s6 + $0x100] sm:$0xff] }
0x1983   :  { %5229 = vmatpush.msra.mxu3 %v545_v41  ;;  %5180 = vmatpush.msrb.mxu1 %v862_v18  ;;  %v10916_v7 = vsel %vm12293_vm11, %v8134_v48, %v8168_v42  ;;  %v10952_v27 = vpop.permute.xlu1 %8141  ;;  %v725_v41 = vld [vmem:[%s12287_s6 + $0x7f0] sm:$0xff]  ;;  %vm12305_vm11 = vmmov %vm12301_vm4 }
0x1984   :  { %5248 = vmatpush.msra.mxu2 %v647_v49  ;;  %5190 = vmatpush.msra.mxu0 %v1018_v33  ;;  %v605_v18 = vld [vmem:[%s12287_s6 + $0x430] sm:$0xff]  ;;  %v976_v49 = vld [vmem:[%s12287_s6 + $0xfc8] sm:$0xff] }
0x1985   :  { %5230 = vmatpush.msra.mxu3 %v539_v19  ;;  %5181 = vmatpush.msrb.mxu1 %v856_v17  ;;  %v8144_v19 = vunpack.i.h.bf16 %v10952_v27  ;;  %v497_v17 = vld [vmem:[%s12287_s6 + $0xd0] sm:$0xff] }
0x1986   :  { %5249 = vmatpush.msra.mxu2 %v641_v51  ;;  %5191 = vmatpush.msra.mxu0 %v1012_v52  ;;  %v719_v51 = vld [vmem:[%s12287_s6 + $0x7c0] sm:$0xff] }
0x1987   :  { %5231 = vmatpush.msra.mxu3 %v533_v29  ;;  %5182 = vmatmul.f32.vlgmr.msrb.gmra.mxu1 %v10860_v1  ;;  %v599_v29 = vld [vmem:[%s12287_s6 + $0x400] sm:$0xff] }
0x1988   :  { %7061 = vmatmul.msk.f32.vlgmr.msrb.gmra.mxu2 %vm3461_vm9, %v10823_v13  ;;  %5266 = vmatpush.msra.mxu1 %v755_v14  ;;  %v10931_v20 = vpop.permute.xlu0 %8156  ;;  %v970_v14 = vld [vmem:[%s12287_s6 + $0xf98] sm:$0xff] }
0x1989   :  { %5250 = vmatpush.msra.mxu2 %v635_v23  ;;  %5192 = vmatpush.msra.mxu0 %v1006_v59  ;;  %v8158_v21 = vunpack.i.l.bf16 %v10931_v20  ;;  %v491_v23 = vld [vmem:[%s12287_s6 + $0xa0] sm:$0xff]  ;;  %v713_v59 = vld [vmem:[%s12287_s6 + $0x790] sm:$0xff] }
0x198a   :  { %5232 = vmatpush.msra.mxu3 %v527_v47  ;;  %5267 = vmatpush.msra.mxu1 %v749_v40  ;;  %v593_v40 = vld [vmem:[%s12287_s6 + $0x3d0] sm:$0xff] }
0x198b   :  { %5251 = vmatpush.msra.mxu2 %v629_v25  ;;  %5193 = vmatpush.msra.mxu0 %v1000_v12  ;;  %v10946_v44 = vsel %vm12294_vm12, %v8124_v11, %v8158_v21  ;;  %v964_v25 = vld [vmem:[%s12287_s6 + $0xf68] sm:$0xff]  ;;  %v485_v12 = vld [vmem:[%s12287_s6 + $0x70] sm:$0xff]  ;;  %vm12306_vm12 = vmmov %vm12297_vm8 }
0x198c   :  { %5233 = vmatpush.msra.mxu3 %v521_v58  ;;  %5268 = vmatpush.msra.mxu1 %v743_v35  ;;  %v707_v58 = vld [vmem:[%s12287_s6 + $0x760] sm:$0xff] }
0x198d   :  { %5252 = vmatpush.msra.mxu2 %v623_v2  ;;  %5194 = vmatpush.msra.mxu0 %v994_v0  ;;  %v587_v35 = vld [vmem:[%s12287_s6 + $0x3a0] sm:$0xff]  ;;  %v958_v2 = vld [vmem:[%s12287_s6 + $0xf38] sm:$0xff] }
0x198e   :  { %5234 = vmatpush.msra.mxu3 %v515_v30  ;;  %5269 = vmatpush.msra.mxu1 %v737_v4  ;;  %v479_v0 = vld [vmem:[%s12287_s6 + $0x40] sm:$0xff]  ;;  %v701_v30 = vld [vmem:[%s12287_s6 + $0x730] sm:$0xff] }
0x198f   :  { %5253 = vmatpush.msra.mxu2 %v617_v60  ;;  %5195 = vmatpush.msra.mxu0 %v988_v63  ;;  %v581_v4 = vld [vmem:[%s12287_s6 + $0x370] sm:$0xff]  ;;  %v952_v60 = vld [vmem:[%s12287_s6 + $0xf08] sm:$0xff] }
0x1990   :  { %5235 = vmatpush.msra.mxu3 %v509_v32  ;;  %5270 = vmatpush.msra.mxu1 %v731_v62  ;;  %v10960_v33 = vpop.permute.xlu0 %8171  ;;  %v473_v63 = vld [vmem:[%s12287_s6 + $0x10] sm:$0xff]  ;;  %v575_v32 = vld [vmem:[%s12287_s6 + $0x340] sm:$0xff] }
0x1991   :  { %5254 = vmatpush.msra.mxu2 %v611_v16  ;;  %5196 = vmatpush.msra.mxu0 %v982_v55  ;;  %v8173_v52 = vunpack.i.l.bf16 %v10960_v33  ;;  %v695_v62 = vld [vmem:[%s12287_s6 + $0x700] sm:$0xff] }
0x1992   :  { %5236 = vmatpush.msra.mxu3 %v503_v5  ;;  %5271 = vmatpush.msra.mxu1 %v725_v41  ;;  %v851_v16 = vld [vmem:[%s12287_s6 + $0xbe0] sm:$0xff]  ;;  %v569_v5 = vld [vmem:[%s12287_s6 + $0x310] sm:$0xff] }
0x1993   :  { %5255 = vmatpush.msra.mxu2 %v605_v18  ;;  %5197 = vmatpush.msra.mxu0 %v976_v49  ;;  %v10975_v47 = vsel %vm12295_vm15, %v8144_v19, %v8173_v52  ;;  %v947_v55 = vld [vmem:[%s12287_s6 + $0xee0] sm:$0xff]  ;;  %v689_v41 = vld [vmem:[%s12287_s6 + $0x6d0] sm:$0xff]  ;;  %vm12307_vm15 = vmmov %vm12299_vm2 }
0x1994   :  { %5237 = vmatpush.msra.mxu3 %v497_v17  ;;  %5272 = vmatpush.msra.mxu1 %v719_v51  ;;  %v845_v18 = vld [vmem:[%s12287_s6 + $0xbb0] sm:$0xff]  ;;  %v1043_v17 = vld [vmem:[%s12287_s6 + $0x11e0] sm:$0xff] }
0x1995   :  { %5256 = vmatpush.msra.mxu2 %v599_v29  ;;  %5198 = vmatpush.msra.mxu0 %v970_v14  ;;  %v941_v49 = vld [vmem:[%s12287_s6 + $0xeb0] sm:$0xff]  ;;  %v683_v51 = vld [vmem:[%s12287_s6 + $0x6a0] sm:$0xff] }
0x1996   :  { %5238 = vmatpush.msra.mxu3 %v491_v23  ;;  %5273 = vmatpush.msra.mxu1 %v713_v59  ;;  %v839_v29 = vld [vmem:[%s12287_s6 + $0xb80] sm:$0xff]  ;;  %v1037_v23 = vld [vmem:[%s12287_s6 + $0x11b0] sm:$0xff] }
0x1997   :  { %5257 = vmatpush.msra.mxu2 %v593_v40  ;;  %5199 = vmatpush.msra.mxu0 %v964_v25  ;;  %v935_v14 = vld [vmem:[%s12287_s6 + $0xe80] sm:$0xff]  ;;  %v677_v59 = vld [vmem:[%s12287_s6 + $0x670] sm:$0xff] }
0x1998   :  { %5239 = vmatpush.msra.mxu3 %v485_v12  ;;  %5274 = vmatpush.msra.mxu1 %v707_v58  ;;  %v833_v40 = vld [vmem:[%s12287_s6 + $0xb50] sm:$0xff]  ;;  %v1031_v12 = vld [vmem:[%s12287_s6 + $0x1180] sm:$0xff] }
0x1999   :  { %5258 = vmatpush.msra.mxu2 %v587_v35  ;;  %5200 = vmatpush.msra.mxu0 %v958_v2  ;;  %v929_v25 = vld [vmem:[%s12287_s6 + $0xe50] sm:$0xff]  ;;  %v671_v58 = vld [vmem:[%s12287_s6 + $0x640] sm:$0xff] }
0x199a   :  { %5240 = vmatpush.msra.mxu3 %v479_v0  ;;  %5275 = vmatpush.msra.mxu1 %v701_v30  ;;  %v827_v35 = vld [vmem:[%s12287_s6 + $0xb20] sm:$0xff]  ;;  %v1025_v0 = vld [vmem:[%s12287_s6 + $0x1150] sm:$0xff] }
0x199b   :  { %5259 = vmatpush.msra.mxu2 %v581_v4  ;;  %5201 = vmatpush.msra.mxu0 %v952_v60  ;;  %v923_v2 = vld [vmem:[%s12287_s6 + $0xe20] sm:$0xff]  ;;  %v665_v30 = vld [vmem:[%s12287_s6 + $0x610] sm:$0xff] }
0x199c   :  { %5241 = vmatpush.msra.mxu3 %v473_v63  ;;  %5202 = vmatmul.f32.vlgmr.msra.gmra.mxu0 %v10845_v6  ;;  %v821_v4 = vld [vmem:[%s12287_s6 + $0xaf0] sm:$0xff]  ;;  %v1019_v63 = vld [vmem:[%s12287_s6 + $0x1120] sm:$0xff] }
0x199d   :  { %5242 = vmatmul.f32.vlgmr.msra.gmra.mxu3 %v10630_v56  ;;  %5260 = vmatpush.msra.mxu2 %v575_v32  ;;  %v917_v60 = vld [vmem:[%s12287_s6 + $0xdf0] sm:$0xff]  ;;  %v1067_v32 = vld [vmem:[%s12287_s6 + $0x12a0] sm:$0xff] }
0x199e   :  { %5276 = vmatpush.msra.mxu1 %v695_v62  ;;  %5286 = vmatpush.msrb.mxu0 %v851_v16  ;;  %v815_v62 = vld [vmem:[%s12287_s6 + $0xac0] sm:$0xff] }
0x199f   :  { %5306 = vmatpush.msrb.mxu3 %v947_v55  ;;  %5261 = vmatpush.msra.mxu2 %v569_v5  ;;  %v911_v16 = vld [vmem:[%s12287_s6 + $0xdc0] sm:$0xff]  ;;  %v1013_v55 = vld [vmem:[%s12287_s6 + $0x10f0] sm:$0xff] }
0x19a0   :  { %5277 = vmatpush.msra.mxu1 %v689_v41  ;;  %5287 = vmatpush.msrb.mxu0 %v845_v18  ;;  %v1061_v5 = vld [vmem:[%s12287_s6 + $0x1270] sm:$0xff] }
0x19a1   :  { %5307 = vmatpush.msrb.mxu3 %v941_v49  ;;  %5262 = vmatmul.f32.vlgmr.msra.gmra.mxu2 %v10806_v31  ;;  %v809_v41 = vld [vmem:[%s12287_s6 + $0xa90] sm:$0xff]  ;;  %v1007_v49 = vld [vmem:[%s12287_s6 + $0x10c0] sm:$0xff] }
0x19a2   :  { %5326 = vmatpush.msrb.mxu2 %v1043_v17  ;;  %5278 = vmatpush.msra.mxu1 %v683_v51  ;;  %v905_v18 = vld [vmem:[%s12287_s6 + $0xd90] sm:$0xff]  ;;  %v1055_v17 = vld [vmem:[%s12287_s6 + $0x1240] sm:$0xff] }
0x19a3   :  { %5288 = vmatpush.msrb.mxu0 %v839_v29  ;;  %5308 = vmatpush.msrb.mxu3 %v935_v14  ;;  %v803_v51 = vld [vmem:[%s12287_s6 + $0xa60] sm:$0xff]  ;;  %v1001_v14 = vld [vmem:[%s12287_s6 + $0x1090] sm:$0xff] }
0x19a4   :  { %5327 = vmatpush.msrb.mxu2 %v1037_v23  ;;  %5279 = vmatpush.msra.mxu1 %v677_v59  ;;  %v899_v29 = vld [vmem:[%s12287_s6 + $0xd60] sm:$0xff]  ;;  %v1049_v23 = vld [vmem:[%s12287_s6 + $0x1210] sm:$0xff] }
0x19a5   :  { %5289 = vmatpush.msrb.mxu0 %v833_v40  ;;  %5309 = vmatpush.msrb.mxu3 %v929_v25  ;;  %v797_v59 = vld [vmem:[%s12287_s6 + $0xa30] sm:$0xff]  ;;  %v660_v25 = vld [vmem:[%s12287_s6 + $0x5e8] sm:$0xff] }
0x19a6   :  { %5328 = vmatpush.msrb.mxu2 %v1031_v12  ;;  %5280 = vmatpush.msra.mxu1 %v671_v58  ;;  %v893_v40 = vld [vmem:[%s12287_s6 + $0xd30] sm:$0xff]  ;;  %v995_v12 = vld [vmem:[%s12287_s6 + $0x1060] sm:$0xff] }
0x19a7   :  { %5290 = vmatpush.msrb.mxu0 %v827_v35  ;;  %5310 = vmatpush.msrb.mxu3 %v923_v2  ;;  %v791_v58 = vld [vmem:[%s12287_s6 + $0xa00] sm:$0xff]  ;;  %v654_v2 = vld [vmem:[%s12287_s6 + $0x5b8] sm:$0xff] }
0x19a8   :  { %5329 = vmatpush.msrb.mxu2 %v1025_v0  ;;  %5281 = vmatpush.msra.mxu1 %v665_v30  ;;  %v887_v35 = vld [vmem:[%s12287_s6 + $0xd00] sm:$0xff]  ;;  %v989_v0 = vld [vmem:[%s12287_s6 + $0x1030] sm:$0xff] }
0x19a9   :  { %5291 = vmatpush.msrb.mxu0 %v821_v4  ;;  %5311 = vmatpush.msrb.mxu3 %v917_v60  ;;  %v785_v30 = vld [vmem:[%s12287_s6 + $0x9d0] sm:$0xff]  ;;  %v648_v60 = vld [vmem:[%s12287_s6 + $0x588] sm:$0xff] }
0x19aa   :  { %5282 = vmatmul.f32.vlgmr.msra.gmra.mxu1 %v10803_v38  ;;  %5330 = vmatpush.msrb.mxu2 %v1019_v63  ;;  %v881_v4 = vld [vmem:[%s12287_s6 + $0xcd0] sm:$0xff]  ;;  %v983_v63 = vld [vmem:[%s12287_s6 + $0x1000] sm:$0xff] }
0x19ab   :  { %5358 = vmatpush.msrb.mxu1 %v1067_v32  ;;  %5292 = vmatpush.msrb.mxu0 %v815_v62  ;;  %v779_v32 = vld [vmem:[%s12287_s6 + $0x9a0] sm:$0xff] }
0x19ac   :  { %5312 = vmatpush.msrb.mxu3 %v911_v16  ;;  %5331 = vmatpush.msrb.mxu2 %v1013_v55  ;;  %v875_v62 = vld [vmem:[%s12287_s6 + $0xca0] sm:$0xff]  ;;  %v642_v16 = vld [vmem:[%s12287_s6 + $0x558] sm:$0xff]  ;;  %v977_v55 = vld [vmem:[%s12287_s6 + $0xfd0] sm:$0xff] }
0x19ad   :  { %5359 = vmatpush.msrb.mxu1 %v1061_v5  ;;  %5293 = vmatpush.msrb.mxu0 %v809_v41  ;;  %v773_v5 = vld [vmem:[%s12287_s6 + $0x970] sm:$0xff] }
0x19ae   :  { %5313 = vmatpush.msrb.mxu3 %v905_v18  ;;  %5332 = vmatpush.msrb.mxu2 %v1007_v49  ;;  %v869_v41 = vld [vmem:[%s12287_s6 + $0xc70] sm:$0xff]  ;;  %v636_v18 = vld [vmem:[%s12287_s6 + $0x528] sm:$0xff]  ;;  %v971_v49 = vld [vmem:[%s12287_s6 + $0xfa0] sm:$0xff] }
0x19af   :  { %5360 = vmatpush.msrb.mxu1 %v1055_v17  ;;  %5294 = vmatpush.msrb.mxu0 %v803_v51  ;;  %v767_v17 = vld [vmem:[%s12287_s6 + $0x940] sm:$0xff] }
0x19b0   :  { %5314 = vmatpush.msrb.mxu3 %v899_v29  ;;  %5333 = vmatpush.msrb.mxu2 %v1001_v14  ;;  %v863_v51 = vld [vmem:[%s12287_s6 + $0xc40] sm:$0xff]  ;;  %v630_v29 = vld [vmem:[%s12287_s6 + $0x4f8] sm:$0xff]  ;;  %v965_v14 = vld [vmem:[%s12287_s6 + $0xf70] sm:$0xff] }
0x19b1   :  { %5361 = vmatpush.msrb.mxu1 %v1049_v23  ;;  %5295 = vmatpush.msrb.mxu0 %v797_v59  ;;  %v761_v23 = vld [vmem:[%s12287_s6 + $0x910] sm:$0xff] }
0x19b2   :  { %5315 = vmatpush.msrb.mxu3 %v893_v40  ;;  %5334 = vmatpush.msrb.mxu2 %v995_v12  ;;  %v857_v59 = vld [vmem:[%s12287_s6 + $0xc10] sm:$0xff]  ;;  %v624_v40 = vld [vmem:[%s12287_s6 + $0x4c8] sm:$0xff] }
0x19b3   :  { %5386 = vmatpush.msra.mxu1 %v660_v25  ;;  %5296 = vmatpush.msrb.mxu0 %v791_v58  ;;  %v959_v25 = vld [vmem:[%s12287_s6 + $0xf40] sm:$0xff]  ;;  %v564_v12 = vld [vmem:[%s12287_s6 + $0x2e8] sm:$0xff] }
0x19b4   :  { %7062 = vmatmul.msk.f32.vlgmr.msrb.gmra.mxu1 %vm3461_vm9, %v10823_v13  ;;  %5316 = vmatpush.msrb.mxu3 %v887_v35  ;;  %v756_v58 = vld [vmem:[%s12287_s6 + $0x8e8] sm:$0xff]  ;;  %v618_v35 = vld [vmem:[%s12287_s6 + $0x498] sm:$0xff] }
0x19b5   :  { %5387 = vmatpush.msra.mxu1 %v654_v2  ;;  %5335 = vmatpush.msrb.mxu2 %v989_v0  ;;  %v953_v2 = vld [vmem:[%s12287_s6 + $0xf10] sm:$0xff]  ;;  %v558_v0 = vld [vmem:[%s12287_s6 + $0x2b8] sm:$0xff] }
0x19b6   :  { %5297 = vmatpush.msrb.mxu0 %v785_v30  ;;  %5317 = vmatpush.msrb.mxu3 %v881_v4  ;;  %v750_v30 = vld [vmem:[%s12287_s6 + $0x8b8] sm:$0xff]  ;;  %v612_v4 = vld [vmem:[%s12287_s6 + $0x468] sm:$0xff] }
0x19b7   :  { %5388 = vmatpush.msra.mxu1 %v648_v60  ;;  %5336 = vmatpush.msrb.mxu2 %v983_v63  ;;  %v852_v60 = vld [vmem:[%s12287_s6 + $0xbe8] sm:$0xff] }
0x19b8   :  { %5298 = vmatpush.msrb.mxu0 %v779_v32  ;;  %5318 = vmatpush.msrb.mxu3 %v875_v62  ;;  %v552_v63 = vld [vmem:[%s12287_s6 + $0x288] sm:$0xff]  ;;  %v606_v62 = vld [vmem:[%s12287_s6 + $0x438] sm:$0xff] }
0x19b9   :  { %5389 = vmatpush.msra.mxu1 %v642_v16  ;;  %5337 = vmatpush.msrb.mxu2 %v977_v55  ;;  %v744_v32 = vld [vmem:[%s12287_s6 + $0x888] sm:$0xff]  ;;  %v846_v16 = vld [vmem:[%s12287_s6 + $0xbb8] sm:$0xff] }
0x19ba   :  { %5299 = vmatpush.msrb.mxu0 %v773_v5  ;;  %5319 = vmatpush.msrb.mxu3 %v869_v41  ;;  %v546_v55 = vld [vmem:[%s12287_s6 + $0x258] sm:$0xff]  ;;  %v600_v41 = vld [vmem:[%s12287_s6 + $0x408] sm:$0xff] }
0x19bb   :  { %5390 = vmatpush.msra.mxu1 %v636_v18  ;;  %5338 = vmatpush.msrb.mxu2 %v971_v49  ;;  %v738_v5 = vld [vmem:[%s12287_s6 + $0x858] sm:$0xff]  ;;  %v840_v18 = vld [vmem:[%s12287_s6 + $0xb88] sm:$0xff] }
0x19bc   :  { %5300 = vmatpush.msrb.mxu0 %v767_v17  ;;  %5320 = vmatpush.msrb.mxu3 %v863_v51  ;;  %v540_v49 = vld [vmem:[%s12287_s6 + $0x228] sm:$0xff]  ;;  %v594_v51 = vld [vmem:[%s12287_s6 + $0x3d8] sm:$0xff] }
0x19bd   :  { %5391 = vmatpush.msra.mxu1 %v630_v29  ;;  %5339 = vmatpush.msrb.mxu2 %v965_v14  ;;  %v732_v17 = vld [vmem:[%s12287_s6 + $0x828] sm:$0xff]  ;;  %v834_v29 = vld [vmem:[%s12287_s6 + $0xb58] sm:$0xff] }
0x19be   :  { %5301 = vmatpush.msrb.mxu0 %v761_v23  ;;  %5321 = vmatpush.msrb.mxu3 %v857_v59  ;;  %v534_v14 = vld [vmem:[%s12287_s6 + $0x1f8] sm:$0xff]  ;;  %v588_v59 = vld [vmem:[%s12287_s6 + $0x3a8] sm:$0xff] }
0x19bf   :  { %5392 = vmatpush.msra.mxu1 %v624_v40  ;;  %5302 = vmatmul.f32.vlgmr.msrb.gmra.mxu0 %v10821_v10  ;;  %v726_v23 = vld [vmem:[%s12287_s6 + $0x7f8] sm:$0xff]  ;;  %v828_v40 = vld [vmem:[%s12287_s6 + $0xb28] sm:$0xff] }
0x19c0   :  { %5322 = vmatmul.f32.vlgmr.msrb.gmra.mxu3 %v10860_v1  ;;  %5340 = vmatpush.msrb.mxu2 %v959_v25  ;;  %v528_v25 = vld [vmem:[%s12287_s6 + $0x1c8] sm:$0xff] }
0x19c1   :  { %5366 = vmatpush.msra.mxu0 %v564_v12  ;;  %5406 = vmatpush.msra.mxu3 %v756_v58  ;;  %v720_v12 = vld [vmem:[%s12287_s6 + $0x7c8] sm:$0xff]  ;;  %v582_v58 = vld [vmem:[%s12287_s6 + $0x378] sm:$0xff] }
0x19c2   :  { %5393 = vmatpush.msra.mxu1 %v618_v35  ;;  %5341 = vmatpush.msrb.mxu2 %v953_v2  ;;  %v822_v35 = vld [vmem:[%s12287_s6 + $0xaf8] sm:$0xff] }
0x19c3   :  { %5367 = vmatpush.msra.mxu0 %v558_v0  ;;  %5407 = vmatpush.msra.mxu3 %v750_v30  ;;  %v522_v2 = vld [vmem:[%s12287_s6 + $0x198] sm:$0xff]  ;;  %v576_v30 = vld [vmem:[%s12287_s6 + $0x348] sm:$0xff] }
0x19c4   :  { %5342 = vmatmul.f32.vlgmr.msrb.gmra.mxu2 %v10845_v6  ;;  %5394 = vmatpush.msra.mxu1 %v612_v4  ;;  %v714_v0 = vld [vmem:[%s12287_s6 + $0x798] sm:$0xff]  ;;  %v816_v4 = vld [vmem:[%s12287_s6 + $0xac8] sm:$0xff] }
0x19c5   :  { %5426 = vmatpush.msra.mxu2 %v852_v60  ;;  %5368 = vmatpush.msra.mxu0 %v552_v63  ;;  %v516_v60 = vld [vmem:[%s12287_s6 + $0x168] sm:$0xff] }
0x19c6   :  { %5408 = vmatpush.msra.mxu3 %v744_v32  ;;  %5395 = vmatpush.msra.mxu1 %v606_v62  ;;  %v708_v63 = vld [vmem:[%s12287_s6 + $0x768] sm:$0xff]  ;;  %v570_v32 = vld [vmem:[%s12287_s6 + $0x318] sm:$0xff] }
0x19c7   :  { %5427 = vmatpush.msra.mxu2 %v846_v16  ;;  %5369 = vmatpush.msra.mxu0 %v546_v55  ;;  %v810_v62 = vld [vmem:[%s12287_s6 + $0xa98] sm:$0xff] }
0x19c8   :  { %5409 = vmatpush.msra.mxu3 %v738_v5  ;;  %5396 = vmatpush.msra.mxu1 %v600_v41  ;;  %v510_v16 = vld [vmem:[%s12287_s6 + $0x138] sm:$0xff]  ;;  %v1044_v5 = vld [vmem:[%s12287_s6 + $0x11e8] sm:$0xff] }
0x19c9   :  { %5428 = vmatpush.msra.mxu2 %v840_v18  ;;  %5370 = vmatpush.msra.mxu0 %v540_v49  ;;  %v702_v55 = vld [vmem:[%s12287_s6 + $0x738] sm:$0xff]  ;;  %v804_v41 = vld [vmem:[%s12287_s6 + $0xa68] sm:$0xff] }
0x19ca   :  { %5410 = vmatpush.msra.mxu3 %v732_v17  ;;  %5397 = vmatpush.msra.mxu1 %v594_v51  ;;  %v504_v18 = vld [vmem:[%s12287_s6 + $0x108] sm:$0xff]  ;;  %v1038_v17 = vld [vmem:[%s12287_s6 + $0x11b8] sm:$0xff] }
0x19cb   :  { %5429 = vmatpush.msra.mxu2 %v834_v29  ;;  %5371 = vmatpush.msra.mxu0 %v534_v14  ;;  %v696_v49 = vld [vmem:[%s12287_s6 + $0x708] sm:$0xff]  ;;  %v798_v51 = vld [vmem:[%s12287_s6 + $0xa38] sm:$0xff] }
0x19cc   :  { %5411 = vmatpush.msra.mxu3 %v726_v23  ;;  %5398 = vmatpush.msra.mxu1 %v588_v59  ;;  %v498_v29 = vld [vmem:[%s12287_s6 + $0xd8] sm:$0xff]  ;;  %v1032_v23 = vld [vmem:[%s12287_s6 + $0x1188] sm:$0xff] }
0x19cd   :  { %5430 = vmatpush.msra.mxu2 %v828_v40  ;;  %5372 = vmatpush.msra.mxu0 %v528_v25  ;;  %v690_v14 = vld [vmem:[%s12287_s6 + $0x6d8] sm:$0xff]  ;;  %v792_v59 = vld [vmem:[%s12287_s6 + $0xa08] sm:$0xff] }
0x19ce   :  { %5412 = vmatpush.msra.mxu3 %v720_v12  ;;  %5399 = vmatpush.msra.mxu1 %v582_v58  ;;  %v492_v40 = vld [vmem:[%s12287_s6 + $0xa8] sm:$0xff]  ;;  %v1026_v12 = vld [vmem:[%s12287_s6 + $0x1158] sm:$0xff] }
0x19cf   :  { %5431 = vmatpush.msra.mxu2 %v822_v35  ;;  %5373 = vmatpush.msra.mxu0 %v522_v2  ;;  %v684_v25 = vld [vmem:[%s12287_s6 + $0x6a8] sm:$0xff]  ;;  %v786_v58 = vld [vmem:[%s12287_s6 + $0x9d8] sm:$0xff] }
0x19d0   :  { %5413 = vmatpush.msra.mxu3 %v714_v0  ;;  %5400 = vmatpush.msra.mxu1 %v576_v30  ;;  %v486_v35 = vld [vmem:[%s12287_s6 + $0x78] sm:$0xff]  ;;  %v1020_v0 = vld [vmem:[%s12287_s6 + $0x1128] sm:$0xff] }
0x19d1   :  { %5432 = vmatpush.msra.mxu2 %v816_v4  ;;  %5374 = vmatpush.msra.mxu0 %v516_v60  ;;  %v678_v2 = vld [vmem:[%s12287_s6 + $0x678] sm:$0xff]  ;;  %v780_v30 = vld [vmem:[%s12287_s6 + $0x9a8] sm:$0xff] }
0x19d2   :  { %5414 = vmatpush.msra.mxu3 %v708_v63  ;;  %5401 = vmatpush.msra.mxu1 %v570_v32  ;;  %v480_v4 = vld [vmem:[%s12287_s6 + $0x48] sm:$0xff]  ;;  %v1014_v63 = vld [vmem:[%s12287_s6 + $0x10f8] sm:$0xff] }
0x19d3   :  { %5433 = vmatpush.msra.mxu2 %v810_v62  ;;  %5375 = vmatpush.msra.mxu0 %v510_v16  ;;  %v672_v60 = vld [vmem:[%s12287_s6 + $0x648] sm:$0xff]  ;;  %v774_v32 = vld [vmem:[%s12287_s6 + $0x978] sm:$0xff] }
0x19d4   :  { %5402 = vmatmul.f32.vlgmr.msra.gmra.mxu1 %v10806_v31  ;;  %5415 = vmatpush.msra.mxu3 %v702_v55  ;;  %v474_v62 = vld [vmem:[%s12287_s6 + $0x18] sm:$0xff]  ;;  %v1008_v55 = vld [vmem:[%s12287_s6 + $0x10c8] sm:$0xff] }
0x19d5   :  { %5466 = vmatpush.msrb.mxu1 %v1044_v5  ;;  %5434 = vmatpush.msra.mxu2 %v804_v41  ;;  %v666_v16 = vld [vmem:[%s12287_s6 + $0x618] sm:$0xff]  ;;  %v768_v5 = vld [vmem:[%s12287_s6 + $0x948] sm:$0xff] }
0x19d6   :  { %5376 = vmatpush.msra.mxu0 %v504_v18  ;;  %5416 = vmatpush.msra.mxu3 %v696_v49  ;;  %v948_v41 = vld [vmem:[%s12287_s6 + $0xee8] sm:$0xff]  ;;  %v1002_v49 = vld [vmem:[%s12287_s6 + $0x1098] sm:$0xff] }
0x19d7   :  { %5467 = vmatpush.msrb.mxu1 %v1038_v17  ;;  %5435 = vmatpush.msra.mxu2 %v798_v51  ;;  %v1068_v18 = vld [vmem:[%s12287_s6 + $0x12a8] sm:$0xff]  ;;  %v762_v17 = vld [vmem:[%s12287_s6 + $0x918] sm:$0xff] }
0x19d8   :  { %5377 = vmatpush.msra.mxu0 %v498_v29  ;;  %5417 = vmatpush.msra.mxu3 %v690_v14  ;;  %v942_v51 = vld [vmem:[%s12287_s6 + $0xeb8] sm:$0xff]  ;;  %v996_v14 = vld [vmem:[%s12287_s6 + $0x1068] sm:$0xff] }
0x19d9   :  { %5468 = vmatpush.msrb.mxu1 %v1032_v23  ;;  %5436 = vmatpush.msra.mxu2 %v792_v59  ;;  %v1062_v29 = vld [vmem:[%s12287_s6 + $0x1278] sm:$0xff]  ;;  %v565_v23 = vld [vmem:[%s12287_s6 + $0x2f0] sm:$0xff]  ;;  %v936_v59 = vld [vmem:[%s12287_s6 + $0xe88] sm:$0xff] }
0x19da   :  { %5378 = vmatpush.msra.mxu0 %v492_v40  ;;  %5418 = vmatpush.msra.mxu3 %v684_v25  ;;  %v1056_v40 = vld [vmem:[%s12287_s6 + $0x1248] sm:$0xff]  ;;  %v990_v25 = vld [vmem:[%s12287_s6 + $0x1038] sm:$0xff] }
0x19db   :  { %5469 = vmatpush.msrb.mxu1 %v1026_v12  ;;  %5437 = vmatpush.msra.mxu2 %v786_v58  ;;  %v559_v12 = vld [vmem:[%s12287_s6 + $0x2c0] sm:$0xff]  ;;  %v930_v58 = vld [vmem:[%s12287_s6 + $0xe58] sm:$0xff] }
0x19dc   :  { %5379 = vmatpush.msra.mxu0 %v486_v35  ;;  %5419 = vmatpush.msra.mxu3 %v678_v2  ;;  %v1050_v35 = vld [vmem:[%s12287_s6 + $0x1218] sm:$0xff]  ;;  %v984_v2 = vld [vmem:[%s12287_s6 + $0x1008] sm:$0xff] }
0x19dd   :  { %5470 = vmatpush.msrb.mxu1 %v1020_v0  ;;  %5438 = vmatpush.msra.mxu2 %v780_v30  ;;  %v553_v0 = vld [vmem:[%s12287_s6 + $0x290] sm:$0xff] }
0x19de   :  { %5380 = vmatpush.msra.mxu0 %v480_v4  ;;  %5420 = vmatpush.msra.mxu3 %v672_v60  ;;  %v661_v30 = vld [vmem:[%s12287_s6 + $0x5f0] sm:$0xff]  ;;  %v924_v4 = vld [vmem:[%s12287_s6 + $0xe28] sm:$0xff]  ;;  %v978_v60 = vld [vmem:[%s12287_s6 + $0xfd8] sm:$0xff] }
0x19df   :  { %5471 = vmatpush.msrb.mxu1 %v1014_v63  ;;  %5439 = vmatpush.msra.mxu2 %v774_v32  ;;  %v547_v63 = vld [vmem:[%s12287_s6 + $0x260] sm:$0xff] }
0x19e0   :  { %5381 = vmatpush.msra.mxu0 %v474_v62  ;;  %5421 = vmatpush.msra.mxu3 %v666_v16  ;;  %v655_v32 = vld [vmem:[%s12287_s6 + $0x5c0] sm:$0xff]  ;;  %v918_v62 = vld [vmem:[%s12287_s6 + $0xdf8] sm:$0xff]  ;;  %v972_v16 = vld [vmem:[%s12287_s6 + $0xfa8] sm:$0xff] }
0x19e1   :  { %5472 = vmatpush.msrb.mxu1 %v1008_v55  ;;  %5382 = vmatmul.f32.vlgmr.msra.gmra.mxu0 %v10630_v56  ;;  %v541_v55 = vld [vmem:[%s12287_s6 + $0x230] sm:$0xff] }
0x19e2   :  { %5422 = vmatmul.f32.vlgmr.msra.gmra.mxu3 %v10803_v38  ;;  %5440 = vmatpush.msra.mxu2 %v768_v5  ;;  %v649_v5 = vld [vmem:[%s12287_s6 + $0x590] sm:$0xff] }
0x19e3   :  { %5446 = vmatpush.msrb.mxu0 %v948_v41  ;;  %5498 = vmatpush.msrb.mxu3 %v1068_v18  ;;  %v912_v41 = vld [vmem:[%s12287_s6 + $0xdc8] sm:$0xff]  ;;  %v966_v18 = vld [vmem:[%s12287_s6 + $0xf78] sm:$0xff] }
0x19e4   :  { %5473 = vmatpush.msrb.mxu1 %v1002_v49  ;;  %5441 = vmatpush.msra.mxu2 %v762_v17  ;;  %v535_v49 = vld [vmem:[%s12287_s6 + $0x200] sm:$0xff] }
0x19e5   :  { %5447 = vmatpush.msrb.mxu0 %v942_v51  ;;  %5499 = vmatpush.msrb.mxu3 %v1062_v29  ;;  %v643_v17 = vld [vmem:[%s12287_s6 + $0x560] sm:$0xff]  ;;  %v906_v51 = vld [vmem:[%s12287_s6 + $0xd98] sm:$0xff]  ;;  %v960_v29 = vld [vmem:[%s12287_s6 + $0xf48] sm:$0xff] }
0x19e6   :  { %5442 = vmatmul.f32.vlgmr.msra.gmra.mxu2 %v10821_v10  ;;  %5474 = vmatpush.msrb.mxu1 %v996_v14  ;;  %v529_v14 = vld [vmem:[%s12287_s6 + $0x1d0] sm:$0xff] }
0x19e7   :  { %5506 = vmatpush.msrb.mxu2 %v565_v23  ;;  %5448 = vmatpush.msrb.mxu0 %v936_v59  ;;  %v637_v23 = vld [vmem:[%s12287_s6 + $0x530] sm:$0xff]  ;;  %v900_v59 = vld [vmem:[%s12287_s6 + $0xd68] sm:$0xff] }
0x19e8   :  { %5500 = vmatpush.msrb.mxu3 %v1056_v40  ;;  %5475 = vmatpush.msrb.mxu1 %v990_v25  ;;  %v954_v40 = vld [vmem:[%s12287_s6 + $0xf18] sm:$0xff]  ;;  %v523_v25 = vld [vmem:[%s12287_s6 + $0x1a0] sm:$0xff] }
0x19e9   :  { %5507 = vmatpush.msrb.mxu2 %v559_v12  ;;  %5449 = vmatpush.msrb.mxu0 %v930_v58  ;;  %v631_v12 = vld [vmem:[%s12287_s6 + $0x500] sm:$0xff]  ;;  %v894_v58 = vld [vmem:[%s12287_s6 + $0xd38] sm:$0xff] }
0x19ea   :  { %5501 = vmatpush.msrb.mxu3 %v1050_v35  ;;  %5476 = vmatpush.msrb.mxu1 %v984_v2  ;;  %v517_v35 = vld [vmem:[%s12287_s6 + $0x170] sm:$0xff] }
0x19eb   :  { %5508 = vmatpush.msrb.mxu2 %v553_v0  ;;  %5450 = vmatpush.msrb.mxu0 %v924_v4  ;;  %v853_v2 = vld [vmem:[%s12287_s6 + $0xbf0] sm:$0xff]  ;;  %v511_v4 = vld [vmem:[%s12287_s6 + $0x140] sm:$0xff] }
0x19ec   :  { %5526 = vmatpush.msra.mxu3 %v661_v30  ;;  %5477 = vmatpush.msrb.mxu1 %v978_v60  ;;  %v625_v0 = vld [vmem:[%s12287_s6 + $0x4d0] sm:$0xff]  ;;  %v888_v30 = vld [vmem:[%s12287_s6 + $0xd08] sm:$0xff]  ;;  %v4983_v60 = vpop.f32.mrf.mxu3 }
0x19ed   :  { %7063 = vmatmul.msk.f32.vlgmr.msrb.gmra.mxu3 %vm3461_vm9, %v10823_v13  ;;  %5509 = vmatpush.msrb.mxu2 %v547_v63  ;;  %v847_v63 = vld [vmem:[%s12287_s6 + $0xbc0] sm:$0xff] }
0x19ee   :  { %5527 = vmatpush.msra.mxu3 %v655_v32  ;;  %5451 = vmatpush.msrb.mxu0 %v918_v62  ;;  %v619_v32 = vld [vmem:[%s12287_s6 + $0x4a0] sm:$0xff]  ;;  %v882_v62 = vld [vmem:[%s12287_s6 + $0xcd8] sm:$0xff] }
0x19ef   :  { %5478 = vmatpush.msrb.mxu1 %v972_v16  ;;  %5510 = vmatpush.msrb.mxu2 %v541_v55  ;;  %v505_v16 = vld [vmem:[%s12287_s6 + $0x110] sm:$0xff]  ;;  %v4963_v55 = vpop.f32.mrf.mxu2 }
0x19f0   :  { %5528 = vmatpush.msra.mxu3 %v649_v5  ;;  %5452 = vmatpush.msrb.mxu0 %v912_v41  ;;  %v841_v5 = vld [vmem:[%s12287_s6 + $0xb90] sm:$0xff] }
0x19f1   :  { %5479 = vmatpush.msrb.mxu1 %v966_v18  ;;  %5511 = vmatpush.msrb.mxu2 %v535_v49  ;;  %v613_v41 = vld [vmem:[%s12287_s6 + $0x470] sm:$0xff]  ;;  %v4984_v18 = vadd.f32 %v4983_v60, %v4963_v55  ;;  %v876_v49 = vld [vmem:[%s12287_s6 + $0xca8] sm:$0xff] }
0x19f2   :  { %5529 = vmatpush.msra.mxu3 %v643_v17  ;;  %5453 = vmatpush.msrb.mxu0 %v906_v51  ;;  %v499_v17 = vld [vmem:[%s12287_s6 + $0xe0] sm:$0xff]  ;;  %v481_v60 = vld [vmem:[%s12287_s6 + $0x50] sm:$0xff] }
0x19f3   :  { %5480 = vmatpush.msrb.mxu1 %v960_v29  ;;  %5512 = vmatpush.msrb.mxu2 %v529_v14  ;;  %v835_v51 = vld [vmem:[%s12287_s6 + $0xb60] sm:$0xff]  ;;  %v870_v14 = vld [vmem:[%s12287_s6 + $0xc78] sm:$0xff]  ;;  %v757_v55 = vld [vmem:[%s12287_s6 + $0x8f0] sm:$0xff] }
0x19f4   :  { %5530 = vmatpush.msra.mxu3 %v637_v23  ;;  %5454 = vmatpush.msrb.mxu0 %v900_v59  ;;  %v607_v29 = vld [vmem:[%s12287_s6 + $0x440] sm:$0xff]  ;;  %v493_v23 = vld [vmem:[%s12287_s6 + $0xb0] sm:$0xff]  ;;  %v5003_v59 = vpop.f32.mrf.mxu0 }
0x19f5   :  { %5481 = vmatpush.msrb.mxu1 %v954_v40  ;;  %5513 = vmatpush.msrb.mxu2 %v523_v25  ;;  %v829_v40 = vld [vmem:[%s12287_s6 + $0xb30] sm:$0xff] }
0x19f6   :  { %5531 = vmatpush.msra.mxu3 %v631_v12  ;;  %5455 = vmatpush.msrb.mxu0 %v894_v58  ;;  %v601_v25 = vld [vmem:[%s12287_s6 + $0x410] sm:$0xff]  ;;  %v5004_v12 = vadd.f32 %v5003_v59, %v4984_v18  ;;  %v864_v58 = vld [vmem:[%s12287_s6 + $0xc48] sm:$0xff] }
0x19f7   :  { %5482 = vmatmul.f32.vlgmr.msrb.gmra.mxu1 %v10845_v6  ;;  %5514 = vmatpush.msrb.mxu2 %v517_v35  ;;  %v487_v35 = vld [vmem:[%s12287_s6 + $0x80] sm:$0xff]  ;;  %v745_v59 = vld [vmem:[%s12287_s6 + $0x890] sm:$0xff] }
0x19f8   :  { %5566 = vmatpush.msra.mxu1 %v853_v2  ;;  %5532 = vmatpush.msra.mxu3 %v625_v0  ;;  %v5023_v2 = vpop.f32.mrf.mxu1  ;;  %v823_v0 = vld [vmem:[%s12287_s6 + $0xb00] sm:$0xff] }
0x19f9   :  { %5456 = vmatpush.msrb.mxu0 %v888_v30  ;;  %5515 = vmatpush.msrb.mxu2 %v511_v4  ;;  %v595_v30 = vld [vmem:[%s12287_s6 + $0x3e0] sm:$0xff]  ;;  %v858_v4 = vld [vmem:[%s12287_s6 + $0xc18] sm:$0xff] }
0x19fa   :  { %5567 = vmatpush.msra.mxu1 %v847_v63  ;;  %5533 = vmatpush.msra.mxu3 %v619_v32  ;;  %v817_v63 = vld [vmem:[%s12287_s6 + $0xad0] sm:$0xff]  ;;  %v5043_v32 = vpop.f32.mrf.mxu2 }
0x19fb   :  { %5457 = vmatpush.msrb.mxu0 %v882_v62  ;;  %5516 = vmatpush.msrb.mxu2 %v505_v16  ;;  %v5024_v62 = vadd.f32 %v5023_v2, %v5004_v12  ;;  %v589_v16 = vld [vmem:[%s12287_s6 + $0x3b0] sm:$0xff]  ;;  %v943_v12 = vld [vmem:[%s12287_s6 + $0xec0] sm:$0xff] }
0x19fc   :  { %5568 = vmatpush.msra.mxu1 %v841_v5  ;;  %5534 = vmatpush.msra.mxu3 %v613_v41  ;;  %v811_v5 = vld [vmem:[%s12287_s6 + $0xaa0] sm:$0xff]  ;;  %v793_v2 = vld [vmem:[%s12287_s6 + $0xa10] sm:$0xff] }
0x19fd   :  { %5458 = vmatpush.msrb.mxu0 %v876_v49  ;;  %5517 = vmatpush.msrb.mxu2 %v499_v17  ;;  %v475_v41 = vld [vmem:[%s12287_s6 + $0x20] sm:$0xff]  ;;  %v5044_v18 = vadd.f32 %v5043_v32, %v5024_v62 }
0x19fe   :  { %5569 = vmatpush.msra.mxu1 %v835_v51  ;;  %5535 = vmatpush.msra.mxu3 %v607_v29  ;;  %v583_v49 = vld [vmem:[%s12287_s6 + $0x380] sm:$0xff]  ;;  %v805_v51 = vld [vmem:[%s12287_s6 + $0xa70] sm:$0xff] }
0x19ff   :  { %5459 = vmatpush.msrb.mxu0 %v870_v14  ;;  %5518 = vmatpush.msrb.mxu2 %v493_v23  ;;  %v751_v17 = vld [vmem:[%s12287_s6 + $0x8c0] sm:$0xff]  ;;  %v949_v29 = vld [vmem:[%s12287_s6 + $0xef0] sm:$0xff]  ;;  %v5063_v23 = vpop.f32.mrf.mxu3 }
0x1a00   :  { %5570 = vmatpush.msra.mxu1 %v829_v40  ;;  %5536 = vmatpush.msra.mxu3 %v601_v25  ;;  %v577_v14 = vld [vmem:[%s12287_s6 + $0x350] sm:$0xff]  ;;  %v799_v40 = vld [vmem:[%s12287_s6 + $0xa40] sm:$0xff]  ;;  %v5064_v25 = vadd.f32 %v5063_v23, %v5044_v18 }
0x1a01   :  { %5460 = vmatpush.msrb.mxu0 %v864_v58  ;;  %5519 = vmatpush.msrb.mxu2 %v487_v35  ;;  %v571_v58 = vld [vmem:[%s12287_s6 + $0x320] sm:$0xff]  ;;  %v1033_v18 = vld [vmem:[%s12287_s6 + $0x1190] sm:$0xff] }
0x1a02   :  { %5571 = vmatpush.msra.mxu1 %v823_v0  ;;  %5537 = vmatpush.msra.mxu3 %v595_v30  ;;  %v739_v35 = vld [vmem:[%s12287_s6 + $0x860] sm:$0xff]  ;;  %v937_v0 = vld [vmem:[%s12287_s6 + $0xe90] sm:$0xff]  ;;  %v5083_v30 = vpop.f32.mrf.mxu0 }
0x1a03   :  { %5461 = vmatpush.msrb.mxu0 %v858_v4  ;;  %5520 = vmatpush.msrb.mxu2 %v481_v60  ;;  %v1045_v4 = vld [vmem:[%s12287_s6 + $0x11f0] sm:$0xff]  ;;  %v787_v32 = vld [vmem:[%s12287_s6 + $0x9e0] sm:$0xff] }
0x1a04   :  { %5572 = vmatpush.msra.mxu1 %v817_v63  ;;  %5462 = vmatmul.f32.vlgmr.msrb.gmra.mxu0 %v10860_v1  ;;  %v733_v60 = vld [vmem:[%s12287_s6 + $0x830] sm:$0xff]  ;;  %v5084_v63 = vadd.f32 %v5083_v30, %v5064_v25  ;;  %v931_v62 = vld [vmem:[%s12287_s6 + $0xe60] sm:$0xff] }
0x1a05   :  { %5538 = vmatpush.msra.mxu3 %v589_v16  ;;  %5546 = vmatpush.msra.mxu0 %v757_v55  ;;  %v1039_v16 = vld [vmem:[%s12287_s6 + $0x11c0] sm:$0xff]  ;;  %v769_v23 = vld [vmem:[%s12287_s6 + $0x950] sm:$0xff] }
0x1a06   :  { %5573 = vmatpush.msra.mxu1 %v811_v5  ;;  %5521 = vmatpush.msrb.mxu2 %v475_v41  ;;  %v727_v55 = vld [vmem:[%s12287_s6 + $0x800] sm:$0xff]  ;;  %v781_v5 = vld [vmem:[%s12287_s6 + $0x9b0] sm:$0xff] }
0x1a07   :  { %5539 = vmatpush.msra.mxu3 %v583_v49  ;;  %5547 = vmatpush.msra.mxu0 %v751_v17  ;;  %v925_v41 = vld [vmem:[%s12287_s6 + $0xe30] sm:$0xff]  ;;  %v775_v17 = vld [vmem:[%s12287_s6 + $0x980] sm:$0xff] }
0x1a08   :  { %5522 = vmatmul.f32.vlgmr.msrb.gmra.mxu2 %v10630_v56  ;;  %5574 = vmatpush.msra.mxu1 %v805_v51  ;;  %v721_v49 = vld [vmem:[%s12287_s6 + $0x7d0] sm:$0xff]  ;;  %v919_v51 = vld [vmem:[%s12287_s6 + $0xe00] sm:$0xff] }
0x1a09   :  { %5586 = vmatpush.msra.mxu2 %v949_v29  ;;  %5540 = vmatpush.msra.mxu3 %v577_v14  ;;  %v1027_v29 = vld [vmem:[%s12287_s6 + $0x1160] sm:$0xff]  ;;  %v709_v25 = vld [vmem:[%s12287_s6 + $0x770] sm:$0xff] }
0x1a0a   :  { %5548 = vmatpush.msra.mxu0 %v745_v59  ;;  %5575 = vmatpush.msra.mxu1 %v799_v40  ;;  %v715_v14 = vld [vmem:[%s12287_s6 + $0x7a0] sm:$0xff]  ;;  %v913_v59 = vld [vmem:[%s12287_s6 + $0xdd0] sm:$0xff] }
0x1a0b   :  { %5587 = vmatpush.msra.mxu2 %v943_v12  ;;  %5541 = vmatpush.msra.mxu3 %v571_v58  ;;  %v1021_v40 = vld [vmem:[%s12287_s6 + $0x1130] sm:$0xff]  ;;  %v763_v12 = vld [vmem:[%s12287_s6 + $0x920] sm:$0xff] }
0x1a0c   :  { %5549 = vmatpush.msra.mxu0 %v739_v35  ;;  %5542 = vmatmul.f32.vlgmr.msra.gmra.mxu3 %v10806_v31  ;;  %v907_v58 = vld [vmem:[%s12287_s6 + $0xda0] sm:$0xff]  ;;  %v901_v30 = vld [vmem:[%s12287_s6 + $0xd70] sm:$0xff] }
0x1a0d   :  { %5576 = vmatpush.msra.mxu1 %v793_v2  ;;  %5588 = vmatpush.msra.mxu2 %v937_v0  ;;  %v1015_v35 = vld [vmem:[%s12287_s6 + $0x1100] sm:$0xff]  ;;  %v566_v0 = vld [vmem:[%s12287_s6 + $0x2f8] sm:$0xff] }
0x1a0e   :  { %5606 = vmatpush.msrb.mxu3 %v1045_v4  ;;  %5550 = vmatpush.msra.mxu0 %v733_v60  ;;  %v703_v2 = vld [vmem:[%s12287_s6 + $0x740] sm:$0xff]  ;;  %v1009_v4 = vld [vmem:[%s12287_s6 + $0x10d0] sm:$0xff] }
0x1a0f   :  { %5577 = vmatpush.msra.mxu1 %v787_v32  ;;  %5589 = vmatpush.msra.mxu2 %v931_v62  ;;  %v697_v60 = vld [vmem:[%s12287_s6 + $0x710] sm:$0xff]  ;;  %v895_v32 = vld [vmem:[%s12287_s6 + $0xd40] sm:$0xff] }
0x1a10   :  { %5607 = vmatpush.msrb.mxu3 %v1039_v16  ;;  %5792 = vrot.lane.b32.xlu1 %v5084_v63, %s8573_s8  ;;  %v560_v63 = vld [vmem:[%s12287_s6 + $0x2c8] sm:$0xff]  ;;  %v1003_v62 = vld [vmem:[%s12287_s6 + $0x10a0] sm:$0xff] }
0x1a11   :  { %5551 = vmatpush.msra.mxu0 %v727_v55  ;;  %5578 = vmatpush.msra.mxu1 %v781_v5  ;;  %v691_v16 = vld [vmem:[%s12287_s6 + $0x6e0] sm:$0xff]  ;;  %v554_v55 = vld [vmem:[%s12287_s6 + $0x298] sm:$0xff]  ;;  %v889_v5 = vld [vmem:[%s12287_s6 + $0xd10] sm:$0xff] }
0x1a12   :  { %5590 = vmatpush.msra.mxu2 %v925_v41  ;;  %5608 = vmatpush.msrb.mxu3 %v1033_v18  ;;  %v997_v41 = vld [vmem:[%s12287_s6 + $0x1070] sm:$0xff] }
0x1a13   :  { %5552 = vmatpush.msra.mxu0 %v721_v49  ;;  %5579 = vmatpush.msra.mxu1 %v775_v17  ;;  %v685_v18 = vld [vmem:[%s12287_s6 + $0x6b0] sm:$0xff]  ;;  %v548_v49 = vld [vmem:[%s12287_s6 + $0x268] sm:$0xff]  ;;  %v883_v17 = vld [vmem:[%s12287_s6 + $0xce0] sm:$0xff] }
0x1a14   :  { %5591 = vmatpush.msra.mxu2 %v919_v51  ;;  %5609 = vmatpush.msrb.mxu3 %v1027_v29  ;;  %v991_v51 = vld [vmem:[%s12287_s6 + $0x1040] sm:$0xff] }
0x1a15   :  { %5553 = vmatpush.msra.mxu0 %v715_v14  ;;  %5580 = vmatpush.msra.mxu1 %v769_v23  ;;  %v679_v29 = vld [vmem:[%s12287_s6 + $0x680] sm:$0xff]  ;;  %v542_v14 = vld [vmem:[%s12287_s6 + $0x238] sm:$0xff]  ;;  %v877_v23 = vld [vmem:[%s12287_s6 + $0xcb0] sm:$0xff] }
0x1a16   :  { %5592 = vmatpush.msra.mxu2 %v913_v59  ;;  %5610 = vmatpush.msrb.mxu3 %v1021_v40  ;;  %v985_v59 = vld [vmem:[%s12287_s6 + $0x1010] sm:$0xff] }
0x1a17   :  { %5554 = vmatpush.msra.mxu0 %v709_v25  ;;  %5581 = vmatpush.msra.mxu1 %v763_v12  ;;  %v673_v40 = vld [vmem:[%s12287_s6 + $0x650] sm:$0xff]  ;;  %v536_v25 = vld [vmem:[%s12287_s6 + $0x208] sm:$0xff]  ;;  %v871_v12 = vld [vmem:[%s12287_s6 + $0xc80] sm:$0xff] }
0x1a18   :  { %5593 = vmatpush.msra.mxu2 %v907_v58  ;;  %5611 = vmatpush.msrb.mxu3 %v1015_v35  ;;  %v979_v58 = vld [vmem:[%s12287_s6 + $0xfe0] sm:$0xff] }
0x1a19   :  { %5555 = vmatpush.msra.mxu0 %v703_v2  ;;  %5582 = vmatmul.f32.vlgmr.msra.gmra.mxu1 %v10821_v10  ;;  %v667_v35 = vld [vmem:[%s12287_s6 + $0x620] sm:$0xff]  ;;  %v530_v2 = vld [vmem:[%s12287_s6 + $0x1d8] sm:$0xff] }
0x1a1a   :  { %5646 = vmatpush.msrb.mxu1 %v566_v0  ;;  %5594 = vmatpush.msra.mxu2 %v901_v30  ;;  %v865_v0 = vld [vmem:[%s12287_s6 + $0xc50] sm:$0xff] }
0x1a1b   :  { %5612 = vmatpush.msrb.mxu3 %v1009_v4  ;;  %5556 = vmatpush.msra.mxu0 %v697_v60  ;;  %v973_v30 = vld [vmem:[%s12287_s6 + $0xfb0] sm:$0xff]  ;;  %v524_v60 = vld [vmem:[%s12287_s6 + $0x1a8] sm:$0xff] }
0x1a1c   :  { %5647 = vmatpush.msrb.mxu1 %v560_v63  ;;  %5595 = vmatpush.msra.mxu2 %v895_v32  ;;  %v1069_v4 = vld [vmem:[%s12287_s6 + $0x12b0] sm:$0xff]  ;;  %v859_v63 = vld [vmem:[%s12287_s6 + $0xc20] sm:$0xff] }
0x1a1d   :  { %5613 = vmatpush.msrb.mxu3 %v1003_v62  ;;  %5557 = vmatpush.msra.mxu0 %v691_v16  ;;  %v967_v32 = vld [vmem:[%s12287_s6 + $0xf80] sm:$0xff]  ;;  %v11274_v16 = vpop.f32.mrf.mxu2 }
0x1a1e   :  { %5648 = vmatpush.msrb.mxu1 %v554_v55  ;;  %5596 = vmatpush.msra.mxu2 %v889_v5  ;;  %v1063_v62 = vld [vmem:[%s12287_s6 + $0x1280] sm:$0xff]  ;;  %v518_v55 = vld [vmem:[%s12287_s6 + $0x178] sm:$0xff] }
0x1a1f   :  { %5614 = vmatpush.msrb.mxu3 %v997_v41  ;;  %5558 = vmatpush.msra.mxu0 %v685_v18  ;;  %v758_v5 = vld [vmem:[%s12287_s6 + $0x8f8] sm:$0xff]  ;;  %v961_v41 = vld [vmem:[%s12287_s6 + $0xf50] sm:$0xff] }
0x1a20   :  { %5649 = vmatpush.msrb.mxu1 %v548_v49  ;;  %5597 = vmatpush.msra.mxu2 %v883_v17  ;;  %v1057_v18 = vld [vmem:[%s12287_s6 + $0x1250] sm:$0xff]  ;;  %v512_v49 = vld [vmem:[%s12287_s6 + $0x148] sm:$0xff] }
0x1a21   :  { %5615 = vmatpush.msrb.mxu3 %v991_v51  ;;  %5559 = vmatpush.msra.mxu0 %v679_v29  ;;  %v752_v17 = vld [vmem:[%s12287_s6 + $0x8c8] sm:$0xff]  ;;  %v955_v51 = vld [vmem:[%s12287_s6 + $0xf20] sm:$0xff] }
0x1a22   :  { %5650 = vmatpush.msrb.mxu1 %v542_v14  ;;  %5598 = vmatpush.msra.mxu2 %v877_v23  ;;  %v1051_v29 = vld [vmem:[%s12287_s6 + $0x1220] sm:$0xff]  ;;  %v506_v14 = vld [vmem:[%s12287_s6 + $0x118] sm:$0xff] }
0x1a23   :  { %5616 = vmatpush.msrb.mxu3 %v985_v59  ;;  %5560 = vmatpush.msra.mxu0 %v673_v40  ;;  %v662_v23 = vld [vmem:[%s12287_s6 + $0x5f8] sm:$0xff]  ;;  %v11288_v40 = vpop.f32.mrf.mxu1 }
0x1a24   :  { %5651 = vmatpush.msrb.mxu1 %v536_v25  ;;  %5599 = vmatpush.msra.mxu2 %v871_v12  ;;  %v746_v59 = vld [vmem:[%s12287_s6 + $0x898] sm:$0xff]  ;;  %v500_v12 = vld [vmem:[%s12287_s6 + $0xe8] sm:$0xff] }
0x1a25   :  { %5617 = vmatpush.msrb.mxu3 %v979_v58  ;;  %5561 = vmatpush.msra.mxu0 %v667_v35  ;;  %v854_v25 = vld [vmem:[%s12287_s6 + $0xbf8] sm:$0xff]  ;;  %v656_v58 = vld [vmem:[%s12287_s6 + $0x5c8] sm:$0xff]  ;;  %v11294_v35 = vpop.f32.mrf.mxu0 }
0x1a26   :  { %5652 = vmatpush.msrb.mxu1 %v530_v2  ;;  %5562 = vmatmul.f32.vlgmr.msra.gmra.mxu0 %v10803_v38  ;;  %v740_v2 = vld [vmem:[%s12287_s6 + $0x868] sm:$0xff] }
0x1a27   :  { %5600 = vmatpush.msra.mxu2 %v865_v0  ;;  %5618 = vmatpush.msrb.mxu3 %v973_v30  ;;  %v848_v0 = vld [vmem:[%s12287_s6 + $0xbc8] sm:$0xff]  ;;  %v494_v30 = vld [vmem:[%s12287_s6 + $0xb8] sm:$0xff] }
0x1a28   :  { %5638 = vmatpush.msrb.mxu0 %v1069_v4  ;;  %5653 = vmatpush.msrb.mxu1 %v524_v60  ;;  %v650_v4 = vld [vmem:[%s12287_s6 + $0x598] sm:$0xff]  ;;  %v11302_v60 = vpop.f32.mrf.mxu2 }
0x1a29   :  { %5601 = vmatpush.msra.mxu2 %v859_v63  ;;  %5619 = vmatpush.msrb.mxu3 %v967_v32  ;;  %v734_v63 = vld [vmem:[%s12287_s6 + $0x838] sm:$0xff] }
0x1a2a   :  { %5639 = vmatpush.msrb.mxu0 %v1063_v62  ;;  %5602 = vmatmul.f32.vlgmr.msra.gmra.mxu2 %v10860_v1  ;;  %v842_v32 = vld [vmem:[%s12287_s6 + $0xb98] sm:$0xff]  ;;  %v11306_v62 = vpop.f32.mrf.mxu3 }
0x1a2b   :  { %5654 = vmatpush.msrb.mxu1 %v518_v55  ;;  %5686 = vmatpush.msrb.mxu2 %v758_v5  ;;  %v488_v55 = vld [vmem:[%s12287_s6 + $0x88] sm:$0xff] }
0x1a2c   :  { %5620 = vmatpush.msrb.mxu3 %v961_v41  ;;  %5640 = vmatpush.msrb.mxu0 %v1057_v18  ;;  %v644_v5 = vld [vmem:[%s12287_s6 + $0x568] sm:$0xff] }
0x1a2d   :  { %5655 = vmatpush.msrb.mxu1 %v512_v49  ;;  %5687 = vmatpush.msrb.mxu2 %v752_v17  ;;  %v728_v41 = vld [vmem:[%s12287_s6 + $0x808] sm:$0xff]  ;;  %v482_v49 = vld [vmem:[%s12287_s6 + $0x58] sm:$0xff] }
0x1a2e   :  { %5621 = vmatpush.msrb.mxu3 %v955_v51  ;;  %5641 = vmatpush.msrb.mxu0 %v1051_v29  ;;  %v836_v18 = vld [vmem:[%s12287_s6 + $0xb68] sm:$0xff]  ;;  %v638_v17 = vld [vmem:[%s12287_s6 + $0x538] sm:$0xff]  ;;  %v11314_v51 = vpop.f32.mrf.mxu1 }
0x1a2f   :  { %5622 = vmatmul.f32.vlgmr.msrb.gmra.mxu3 %v10845_v6  ;;  %5656 = vmatpush.msrb.mxu1 %v506_v14  ;;  %v722_v29 = vld [vmem:[%s12287_s6 + $0x7d8] sm:$0xff] }
0x1a30   :  { %5666 = vmatpush.msra.mxu0 %v662_v23  ;;  %5688 = vmatpush.msrb.mxu2 %v746_v59  ;;  %v830_v14 = vld [vmem:[%s12287_s6 + $0xb38] sm:$0xff]  ;;  %v476_v23 = vld [vmem:[%s12287_s6 + $0x28] sm:$0xff] }
0x1a31   :  { %5706 = vmatpush.msra.mxu3 %v854_v25  ;;  %7064 = vmatmul.msk.f32.vlgmr.msrb.gmra.mxu0 %vm3461_vm9, %v10823_v13  ;;  %v632_v59 = vld [vmem:[%s12287_s6 + $0x508] sm:$0xff]  ;;  %v11320_v25 = vpop.f32.mrf.mxu0 }
0x1a32   :  { %5657 = vmatpush.msrb.mxu1 %v500_v12  ;;  %5667 = vmatpush.msra.mxu0 %v656_v58  ;;  %v716_v12 = vld [vmem:[%s12287_s6 + $0x7a8] sm:$0xff] }
0x1a33   :  { %5689 = vmatpush.msrb.mxu2 %v740_v2  ;;  %5707 = vmatpush.msra.mxu3 %v848_v0  ;;  %v824_v58 = vld [vmem:[%s12287_s6 + $0xb08] sm:$0xff]  ;;  %v626_v2 = vld [vmem:[%s12287_s6 + $0x4d8] sm:$0xff]  ;;  %v5263_v0 = vpop.f32.mrf.mxu2 }
0x1a34   :  { %5658 = vmatpush.msrb.mxu1 %v494_v30  ;;  %5668 = vmatpush.msra.mxu0 %v650_v4  ;;  %v950_v30 = vld [vmem:[%s12287_s6 + $0xef8] sm:$0xff] }
0x1a35   :  { %5690 = vmatpush.msrb.mxu2 %v734_v63  ;;  %5708 = vmatpush.msra.mxu3 %v842_v32  ;;  %v710_v4 = vld [vmem:[%s12287_s6 + $0x778] sm:$0xff]  ;;  %v5243_v63 = vpop.f32.mrf.mxu3 }
0x1a36   :  { %5659 = vmatpush.msrb.mxu1 %v488_v55  ;;  %5669 = vmatpush.msra.mxu0 %v644_v5  ;;  %v818_v32 = vld [vmem:[%s12287_s6 + $0xad8] sm:$0xff]  ;;  %v620_v55 = vld [vmem:[%s12287_s6 + $0x4a8] sm:$0xff] }
0x1a37   :  { %5691 = vmatpush.msrb.mxu2 %v728_v41  ;;  %5709 = vmatpush.msra.mxu3 %v836_v18  ;;  %v944_v5 = vld [vmem:[%s12287_s6 + $0xec8] sm:$0xff]  ;;  %v5264_v18 = vadd.f32 %v5263_v0, %v5243_v63  ;;  %v926_v63 = vld [vmem:[%s12287_s6 + $0xe38] sm:$0xff] }
0x1a38   :  { %5660 = vmatpush.msrb.mxu1 %v482_v49  ;;  %5670 = vmatpush.msra.mxu0 %v638_v17  ;;  %v704_v41 = vld [vmem:[%s12287_s6 + $0x748] sm:$0xff]  ;;  %v614_v17 = vld [vmem:[%s12287_s6 + $0x478] sm:$0xff] }
0x1a39   :  { %5692 = vmatpush.msrb.mxu2 %v722_v29  ;;  %5710 = vmatpush.msra.mxu3 %v830_v14  ;;  %v812_v49 = vld [vmem:[%s12287_s6 + $0xaa8] sm:$0xff]  ;;  %v5283_v29 = vpop.f32.mrf.mxu1  ;;  %v938_v14 = vld [vmem:[%s12287_s6 + $0xe98] sm:$0xff] }
0x1a3a   :  { %5661 = vmatpush.msrb.mxu1 %v476_v23  ;;  %5671 = vmatpush.msra.mxu0 %v632_v59  ;;  %v698_v23 = vld [vmem:[%s12287_s6 + $0x718] sm:$0xff] }
0x1a3b   :  { %5693 = vmatpush.msrb.mxu2 %v716_v12  ;;  %5711 = vmatpush.msra.mxu3 %v824_v58  ;;  %v806_v59 = vld [vmem:[%s12287_s6 + $0xa78] sm:$0xff]  ;;  %v608_v12 = vld [vmem:[%s12287_s6 + $0x448] sm:$0xff] }
0x1a3c   :  { %5662 = vmatmul.f32.vlgmr.msrb.gmra.mxu1 %v10630_v56  ;;  %5672 = vmatpush.msra.mxu0 %v626_v2  ;;  %v5124_v56 = vadd.f32 %v11294_v35, %v11288_v40  ;;  %v932_v58 = vld [vmem:[%s12287_s6 + $0xe68] sm:$0xff]  ;;  %v5303_v0 = vpop.f32.mrf.mxu0  ;;  %v602_v35 = vld [vmem:[%s12287_s6 + $0x418] sm:$0xff] }
0x1a3d   :  { %5726 = vmatpush.msra.mxu1 %v950_v30  ;;  %5694 = vmatpush.msrb.mxu2 %v710_v4  ;;  %v692_v2 = vld [vmem:[%s12287_s6 + $0x6e8] sm:$0xff]  ;;  %v5284_v4 = vadd.f32 %v5283_v29, %v5264_v18 }
0x1a3e   :  { %5712 = vmatpush.msra.mxu3 %v818_v32  ;;  %5673 = vmatpush.msra.mxu0 %v620_v55  ;;  %v5144_v30 = vadd.f32 %v11274_v16, %v5124_v56  ;;  %v800_v40 = vld [vmem:[%s12287_s6 + $0xa48] sm:$0xff]  ;;  %v686_v32 = vld [vmem:[%s12287_s6 + $0x6b8] sm:$0xff] }
0x1a3f   :  { %5727 = vmatpush.msra.mxu1 %v944_v5  ;;  %5695 = vmatpush.msrb.mxu2 %v704_v41  ;;  %v794_v55 = vld [vmem:[%s12287_s6 + $0xa18] sm:$0xff]  ;;  %v596_v5 = vld [vmem:[%s12287_s6 + $0x3e8] sm:$0xff]  ;;  %v5304_v16 = vadd.f32 %v5303_v0, %v5284_v4 }
0x1a40   :  { %5713 = vmatpush.msra.mxu3 %v812_v49  ;;  %5674 = vmatpush.msra.mxu0 %v614_v17  ;;  %v920_v18 = vld [vmem:[%s12287_s6 + $0xe08] sm:$0xff]  ;;  %v5164_v17 = vadd.f32 %v11306_v62, %v5144_v30  ;;  %v914_v56 = vld [vmem:[%s12287_s6 + $0xdd8] sm:$0xff] }
0x1a41   :  { %5728 = vmatpush.msra.mxu1 %v938_v14  ;;  %5696 = vmatpush.msrb.mxu2 %v698_v23  ;;  %v680_v49 = vld [vmem:[%s12287_s6 + $0x688] sm:$0xff]  ;;  %v590_v14 = vld [vmem:[%s12287_s6 + $0x3b8] sm:$0xff] }
0x1a42   :  { %5714 = vmatpush.msra.mxu3 %v806_v59  ;;  %5675 = vmatpush.msra.mxu0 %v608_v12  ;;  %v788_v29 = vld [vmem:[%s12287_s6 + $0x9e8] sm:$0xff]  ;;  %v674_v59 = vld [vmem:[%s12287_s6 + $0x658] sm:$0xff]  ;;  %v5184_v30 = vadd.f32 %v11314_v51, %v5164_v17 }
0x1a43   :  { %5729 = vmatpush.msra.mxu1 %v932_v58  ;;  %5697 = vmatpush.msrb.mxu2 %v692_v2  ;;  %v5323_v41 = vpop.f32.mrf.mxu3  ;;  %v782_v12 = vld [vmem:[%s12287_s6 + $0x9b8] sm:$0xff]  ;;  %v584_v58 = vld [vmem:[%s12287_s6 + $0x388] sm:$0xff] }
0x1a44   :  { %5715 = vmatpush.msra.mxu3 %v800_v40  ;;  %5676 = vmatpush.msra.mxu0 %v602_v35  ;;  %v5324_v23 = vadd.f32 %v5323_v41, %v5304_v16  ;;  %v908_v62 = vld [vmem:[%s12287_s6 + $0xda8] sm:$0xff]  ;;  %v902_v35 = vld [vmem:[%s12287_s6 + $0xd78] sm:$0xff]  ;;  %v5363_v16 = vpop.f32.mrf.mxu1 }
0x1a45   :  { %5730 = vmatpush.msra.mxu1 %v926_v63  ;;  %5698 = vmatpush.msrb.mxu2 %v686_v32  ;;  %v668_v0 = vld [vmem:[%s12287_s6 + $0x628] sm:$0xff]  ;;  %v1070_v63 = vld [vmem:[%s12287_s6 + $0x12b8] sm:$0xff]  ;;  %v5204_v32 = vadd.f32 %v11320_v25, %v5184_v30  ;;  %v8119_v25 = vunpack.i.h.bf16 %v10875_v57 }
0x1a46   :  { %5716 = vmatpush.msra.mxu3 %v794_v55  ;;  %5677 = vmatpush.msra.mxu0 %v596_v5  ;;  %v776_v4 = vld [vmem:[%s12287_s6 + $0x988] sm:$0xff]  ;;  %v578_v55 = vld [vmem:[%s12287_s6 + $0x358] sm:$0xff] }
0x1a47   :  { %5731 = vmatpush.msra.mxu1 %v920_v18  ;;  %5699 = vmatpush.msrb.mxu2 %v680_v49  ;;  %v5343_v2 = vpop.f32.mrf.mxu2  ;;  %v770_v5 = vld [vmem:[%s12287_s6 + $0x958] sm:$0xff]  ;;  %v896_v51 = vld [vmem:[%s12287_s6 + $0xd48] sm:$0xff] }
0x1a48   :  { %5717 = vmatpush.msra.mxu3 %v788_v29  ;;  %5678 = vmatpush.msra.mxu0 %v590_v14  ;;  %v5344_v40 = vadd.f32 %v5343_v2, %v5324_v23  ;;  %v1064_v41 = vld [vmem:[%s12287_s6 + $0x1288] sm:$0xff]  ;;  %v8118_v29 = vunpack.i.l.bf16 %v10875_v57  ;;  %v5224_v14 = vadd.f32 %v11302_v60, %v5204_v32  ;;  %v1046_v23 = vld [vmem:[%s12287_s6 + $0x11f8] sm:$0xff] }
0x1a49   :  { %5732 = vmatpush.msra.mxu1 %v914_v56  ;;  %5700 = vmatpush.msrb.mxu2 %v674_v59  ;;  %v572_v18 = vld [vmem:[%s12287_s6 + $0x328] sm:$0xff]  ;;  %v1058_v56 = vld [vmem:[%s12287_s6 + $0x1258] sm:$0xff]  ;;  %v8139_v59 = vunpack.i.h.bf16 %v10918_v26 }
0x1a4a   :  { %5718 = vmatpush.msra.mxu3 %v782_v12  ;;  %5679 = vmatpush.msra.mxu0 %v584_v58  ;;  %v764_v49 = vld [vmem:[%s12287_s6 + $0x928] sm:$0xff]  ;;  %v5364_v17 = vadd.f32 %v5363_v16, %v5344_v40  ;;  %v8138_v12 = vunpack.i.l.bf16 %v10918_v26  ;;  %v6104_v2 = vsel %vm12296_vm5, %v8118_v29, %v8119_v25  ;;  %v866_v40 = vld [vmem:[%s12287_s6 + $0xc58] sm:$0xff] }
0x1a4b   :  { %5733 = vmatpush.msra.mxu1 %v908_v62  ;;  %5701 = vmatpush.msrb.mxu2 %v668_v0  ;;  %v884_v57 = vld [vmem:[%s12287_s6 + $0xce8] sm:$0xff]  ;;  %v878_v0 = vld [vmem:[%s12287_s6 + $0xcb8] sm:$0xff] }
0x1a4c   :  { %5719 = vmatpush.msra.mxu3 %v776_v4  ;;  %5702 = vmatmul.f32.vlgmr.msrb.gmra.mxu2 %v10803_v38  ;;  %v890_v38 = vld [vmem:[%s12287_s6 + $0xd18] sm:$0xff]  ;;  %v1040_v60 = vld [vmem:[%s12287_s6 + $0x11c8] sm:$0xff]  ;;  %v8185_v58 = vpack.i.bf16 %v5364_v17, %v5224_v14 }
0x1a4d   :  { %5734 = vmatpush.msra.mxu1 %v902_v35  ;;  %5778 = vmatpush.msra.mxu2 %v1070_v63  ;;  %v1052_v62 = vld [vmem:[%s12287_s6 + $0x1228] sm:$0xff]  ;;  %v1022_v35 = vld [vmem:[%s12287_s6 + $0x1138] sm:$0xff] }
0x1a4e   :  { %5680 = vmatpush.msra.mxu0 %v578_v55  ;;  %5720 = vmatpush.msra.mxu3 %v770_v5  ;;  %v872_v30 = vld [vmem:[%s12287_s6 + $0xc88] sm:$0xff]  ;;  %v8153_v55 = vunpack.i.l.bf16 %v10866_v46  ;;  %v1010_v5 = vld [vmem:[%s12287_s6 + $0x10d8] sm:$0xff] }
0x1a4f   :  { %5735 = vmatpush.msra.mxu1 %v896_v51  ;;  %5779 = vmatpush.msra.mxu2 %v1064_v41  ;;  %v1028_v4 = vld [vmem:[%s12287_s6 + $0x1168] sm:$0xff]  ;;  %v998_v51 = vld [vmem:[%s12287_s6 + $0x1078] sm:$0xff] }
0x1a50   :  { %5681 = vmatpush.msra.mxu0 %v572_v18  ;;  %5721 = vmatpush.msra.mxu3 %v764_v49  ;;  %v860_v63 = vld [vmem:[%s12287_s6 + $0xc28] sm:$0xff]  ;;  %v986_v18 = vld [vmem:[%s12287_s6 + $0x1018] sm:$0xff] }
0x1a51   :  { %5682 = vmatmul.f32.vlgmr.msra.gmra.mxu0 %v10806_v31  ;;  %5722 = vmatmul.f32.vlgmr.msra.gmra.mxu3 %v10821_v10  ;;  %v1034_v31 = vld [vmem:[%s12287_s6 + $0x1198] sm:$0xff]  ;;  %v6150_v10 = vsel %vm12297_vm8, %v8138_v12, %v8139_v59  ;;  %v1016_v32 = vld [vmem:[%s12287_s6 + $0x1108] sm:$0xff] }
0x1a52   :  { %5736 = vmatpush.msra.mxu1 %v890_v38  ;;  %5746 = vmatpush.msrb.mxu0 %v1046_v23  ;;  %v1004_v16 = vld [vmem:[%s12287_s6 + $0x10a8] sm:$0xff]  ;;  %v974_v17 = vld [vmem:[%s12287_s6 + $0xfb8] sm:$0xff] }
0x1a53   :  { %5780 = vmatpush.msra.mxu2 %v1058_v56  ;;  %6175 = vmatpush.msrb.mxu3 %v6104_v2  ;;  %v992_v41 = vld [vmem:[%s12287_s6 + $0x1048] sm:$0xff]  ;;  %v5403_v56 = vpop.f32.mrf.mxu1 }
0x1a54   :  { %5737 = vmatpush.msra.mxu1 %v884_v57  ;;  %5747 = vmatpush.msrb.mxu0 %v1040_v60  ;;  %v980_v49 = vld [vmem:[%s12287_s6 + $0xfe8] sm:$0xff] }
0x1a55   :  { %5781 = vmatpush.msra.mxu2 %v1052_v62  ;;  %8186 = vrot.lane.b32.xlu2 %v8185_v58, %s8573_s8  ;;  %v968_v29 = vld [vmem:[%s12287_s6 + $0xf88] sm:$0xff] }
0x1a56   :  { %5738 = vmatpush.msra.mxu1 %v878_v0  ;;  %5748 = vmatpush.msrb.mxu0 %v1034_v31  ;;  %v956_v14 = vld [vmem:[%s12287_s6 + $0xf28] sm:$0xff] }
0x1a57   :  { %6209 = vmatpush.msrb.mxu2 %v6150_v10 }
0x1a58   :  { %7065 = vmatmul.msk.f32.vlgmr.msra.gmra.mxu2 %vm3461_vm9, %v10823_v13  ;;  %5739 = vmatpush.msra.mxu1 %v872_v30  ;;  %vm12298_vm9 = vmmov %vm12296_vm5  ;;  %vm12308_vm5 = vcmask 752640  }
0x1a59   :  { %5749 = vmatpush.msrb.mxu0 %v1028_v4  ;;  %v6105_v13 = vsel %vm12298_vm9, %v8119_v25, %v8153_v55  ;;  %v12202_v25 = vunpack.i.h.bf16 %v10866_v46  ;;  %vm12309_vm8 = vmmov %vm12308_vm5 }
0x1a5a   :  { %5740 = vmatpush.msra.mxu1 %v866_v40  ;;  %vm12310_vm9 = vmmov %vm12306_vm12 }
0x1a5b   :  { %5750 = vmatpush.msrb.mxu0 %v1022_v35  ;;  %v6106_v38 = vsel %vm12299_vm2, %v8153_v55, %v12202_v25  ;;  %vm12311_vm2 = vmmov %vm12310_vm9 }
0x1a5c   :  { %5741 = vmatpush.msra.mxu1 %v860_v63  ;;  %v11421_v63 = vpop.permute.xlu2 %8176 }
0x1a5d   :  { %5751 = vmatpush.msrb.mxu0 %v1016_v32  ;;  %5742 = vmatmul.f32.vlgmr.msra.gmra.mxu1 %v10860_v1  ;;  %v962_v1 = vld [vmem:[%s12287_s6 + $0xf58] sm:$0xff] }
0x1a5e   :  { %6215 = vmatpush.msrb.mxu1 %v6105_v13  ;;  %v5383_v23 = vpop.f32.mrf.mxu0 }
0x1a5f   :  { %5752 = vmatpush.msrb.mxu0 %v1010_v5  ;;  %v5404_v57 = vadd.f32 %v5403_v56, %v5383_v23 }
0x1a61   :  { %5753 = vmatpush.msrb.mxu0 %v1004_v16 }
0x1a63   :  { %5754 = vmatpush.msrb.mxu0 %v998_v51 }
0x1a65   :  { %5755 = vmatpush.msrb.mxu0 %v992_v41  ;;  %v5423_v12 = vpop.f32.mrf.mxu3 }
0x1a66   :  { %v5424_v60 = vadd.f32 %v5423_v12, %v5404_v57 }
0x1a67   :  { %5756 = vmatpush.msrb.mxu0 %v986_v18 }
0x1a69   :  { %5757 = vmatpush.msrb.mxu0 %v980_v49  ;;  %v5443_v58 = vpop.f32.mrf.mxu2 }
0x1a6a   :  { %v5444_v2 = vadd.f32 %v5443_v58, %v5424_v60 }
0x1a6b   :  { %5758 = vmatpush.msrb.mxu0 %v974_v17 }
0x1a6d   :  { %5759 = vmatpush.msrb.mxu0 %v968_v29 }
0x1a6f   :  { %5760 = vmatpush.msrb.mxu0 %v962_v1 }
0x1a70   :  { %v5503_v30 = vpop.f32.mrf.mxu3 }
0x1a71   :  { %5761 = vmatpush.msrb.mxu0 %v956_v14 }
0x1a72   :  { %5762 = vmatmul.f32.vlgmr.msrb.gmra.mxu0 %v10845_v6  ;;  %v11419_v6 = vpop.permute.xlu1 %8146 }
0x1a73   :  { %6255 = vmatpush.msra.mxu0 %v6106_v38 }
0x1a74   :  { %v5483_v31 = vpop.f32.mrf.mxu1 }
0x1a7a   :  { %v11423_v32 = vpop.permute.xlu1 %8161 }
0x1a7b   :  { %v8163_v25 = vunpack.i.l.bf16 %v11423_v32 }
0x1a81   :  { %v5463_v62 = vpop.f32.mrf.mxu0 }
0x1a82   :  { %v5464_v0 = vadd.f32 %v5463_v62, %v5444_v2  ;;  %v11425_v41 = vpop.permute.xlu1 %5792 }
0x1a83   :  { %v5815_v1 = vsel %vm12300_vm14, 0.0, %v11425_v41  ;;  %vm12312_vm14 = vmmov %vm12311_vm2 }
0x1a84   :  { %v5484_v10 = vadd.f32 %v5483_v31, %v5464_v0 }
0x1a86   :  { %v5504_v4 = vadd.f32 %v5503_v30, %v5484_v10 }
0x1a88   :  { %5798 = vrot.lane.b32.xlu0 %v5504_v4, %s8573_s8 }
0x1a8b   :  { %v5523_v40 = vpop.f32.mrf.mxu2 }
0x1a8f   :  { %v5543_v35 = vpop.f32.mrf.mxu3 }
0x1a90   :  { %v5544_v5 = vadd.f32 %v5543_v35, %v5523_v40 }
0x1a96   :  { %v5583_v16 = vpop.f32.mrf.mxu1 }
0x1aa3   :  { %v5563_v55 = vpop.f32.mrf.mxu0 }
0x1aa4   :  { %v5564_v13 = vadd.f32 %v5563_v55, %v5544_v5 }
0x1aa6   :  { %v5584_v18 = vadd.f32 %v5583_v16, %v5564_v13 }
0x1aad   :  { %v5603_v51 = vpop.f32.mrf.mxu2 }
0x1aae   :  { %v5604_v29 = vadd.f32 %v5603_v51, %v5584_v18  ;;  %v5643_v12 = vpop.f32.mrf.mxu0  ;;  %v11446_v51 = vpop.permute.xlu0 %8181 }
0x1aaf   :  { %v8187_v49 = vpop.permute.xlu2 %8186 }
0x1ab0   :  { %v8188_v17 = vunpack.i.l.bf16 %v8187_v49  ;;  %v8189_v60 = vunpack.i.h.bf16 %v8187_v49 }
0x1ab2   :  { %v5623_v14 = vpop.f32.mrf.mxu3  ;;  %v11431_v38 = vsel %vm12301_vm4, %v11425_v41, %v8188_v17  ;;  %v11441_v58 = vsel %vm12302_vm6, %v8188_v17, %v8189_v60  ;;  %vm12313_vm6 = vcmask 220160  }
0x1ab3   :  { %v5624_v23 = vadd.f32 %v5623_v14, %v5604_v29  ;;  %v8195_v56 = vpack.i.bf16 %v11431_v38, %v5815_v1  ;;  %v8230_v2 = vpack.i.bf16 %v11441_v58, %v9559_v37 }
0x1ab5   :  { %v5644_v57 = vadd.f32 %v5643_v12, %v5624_v23  ;;  %8196 = vrot.lane.b32.xlu0 %v8195_v56, %s8569_s18 }
0x1ab7   :  { %5800 = vrot.lane.b32.xlu1 %v5644_v57, %s8573_s8 }
0x1ab9   :  { %v5663_v62 = vpop.f32.mrf.mxu1 }
0x1abd   :  { %8211 = vrot.lane.b32.xlu0 %v8195_v56, %s8570_s22 }
0x1abf   :  { %8191 = vrot.lane.b32.xlu1 %v8195_v56, %s8571_s23 }
0x1ac5   :  { %8221 = vrot.lane.b32.xlu0 %v8195_v56, %s8564_s21 }
0x1ac7   :  { %8226 = vrot.lane.b32.xlu1 %v8195_v56, %s8565_s29 }
0x1acd   :  { %8231 = vrot.lane.b32.xlu0 %v8230_v2, %s8570_s22 }
0x1ace   :  { %v5683_v0 = vpop.f32.mrf.mxu0 }
0x1acf   :  { %v5684_v31 = vadd.f32 %v5683_v0, %v5663_v62  ;;  %v5703_v10 = vpop.f32.mrf.mxu2  ;;  %v11482_v62 = vld [vmem:[%s12304_s28 + $0x8] sm:$0xff]  ;;  %v8123_v0 = vunpack.i.l.bf16 %v10840_v45 }
0x1ad1   :  { %v5704_v4 = vadd.f32 %v5703_v10, %v5684_v31 }
0x1ad4   :  { %v5723_v30 = vpop.f32.mrf.mxu3 }
0x1ad5   :  { %v5724_v35 = vadd.f32 %v5723_v30, %v5704_v4 }
0x1ada   :  { %v5743_v40 = vpop.f32.mrf.mxu1 }
0x1adb   :  { %v5744_v55 = vadd.f32 %v5743_v40, %v5724_v35  ;;  %v5783_v16 = vpop.f32.mrf.mxu2 }
0x1aef   :  { %v5763_v5 = vpop.f32.mrf.mxu0 }
0x1af0   :  { %v5764_v13 = vadd.f32 %v5763_v5, %v5744_v55  ;;  %v8129_v5 = vunpack.i.h.bf16 %v10881_v15 }
0x1af2   :  { %v5784_v18 = vadd.f32 %v5783_v16, %v5764_v13  ;;  %v8128_v13 = vunpack.i.l.bf16 %v10881_v15  ;;  %v6058_v16 = vsel %vm12308_vm5, %v8123_v0, %v8124_v11  ;;  %vm12319_vm5 = vcmask 744448  }
0x1af4   :  { %5802 = vrot.lane.b32.xlu2 %v5784_v18, %s8573_s8 }
0x1afa   :  { %v5799_v49 = vpop.permute.xlu0 %5798 }
0x1afb   :  { %v11450_v17 = vsel %vm12303_vm10, %v8189_v60, %v5799_v49  ;;  %vm12314_vm10 = vcmask 891904  }
0x1afc   :  { %8201 = vrot.lane.b32.xlu2 %v8195_v56, %s8568_s16  ;;  %v11455_v29 = vpack.i.bf16 %v11450_v17, %v11441_v58 }
0x1afe   :  { %8246 = vrot.lane.b32.xlu0 %v11455_v29, %s8568_s16  ;;  %8236 = vrot.lane.b32.xlu1 %v11455_v29, %s8571_s23 }
0x1b04   :  { %8206 = vrot.lane.b32.xlu2 %v8195_v56, %s8567_s5 }
0x1b06   :  { %8256 = vrot.lane.b32.xlu0 %v11455_v29, %s8566_s15  ;;  %8251 = vrot.lane.b32.xlu1 %v11455_v29, %s8567_s5 }
0x1b0c   :  { %8216 = vrot.lane.b32.xlu2 %v8195_v56, %s8566_s15 }
0x1b14   :  { %8241 = vrot.lane.b32.xlu2 %v11455_v29, %s8569_s18 }
0x1b27   :  { %v11469_v1 = vpop.permute.xlu0 %8196 }
0x1b28   :  { %v8199_v40 = vunpack.i.h.bf16 %v11469_v1  ;;  %v8198_v35 = vunpack.i.l.bf16 %v11469_v1 }
0x1b29   :  { %v5801_v14 = vpop.permute.xlu1 %5800 }
0x1b2a   :  { %v11472_v23 = vsel %vm12305_vm11, %v5799_v49, %v5801_v14  ;;  %v6053_v49 = vsel %vm12309_vm8, %v8198_v35, %v8199_v40  ;;  %vm12315_vm11 = vmmov %vm12314_vm10 }
0x1b2b   :  { %v8270_v12 = vpack.i.bf16 %v11472_v23, %v9578_v36  ;;  %v8280_v4 = vpack.i.bf16 %v11472_v23, %v11450_v17  ;;  %vm12320_vm8 = vmmov %vm12319_vm5 }
0x1b2d   :  { %8271 = vrot.lane.b32.xlu1 %v8270_v12, %s8568_s16  ;;  %8266 = vrot.lane.b32.xlu0 %v8270_v12, %s8569_s18 }
0x1b2e   :  { %8261 = vrot.lane.b32.xlu2 %v8270_v12, %s8571_s23 }
0x1b2f   :  { %v8212_v57 = vpop.permute.xlu0 %8211 }
0x1b30   :  { %v8214_v56 = vunpack.i.h.bf16 %v8212_v57  ;;  %v8213_v60 = vunpack.i.l.bf16 %v8212_v57  ;;  %v6012_v57 = vsel %vm1194_vm7, %v8128_v13, %v8129_v5  ;;  %v8133_v13 = vunpack.i.l.bf16 %v10900_v3 }
0x1b31   :  { %v11479_v2 = vpop.permute.xlu1 %8191 }
0x1b32   :  { %v8194_v31 = vunpack.i.h.bf16 %v11479_v2  ;;  %v8193_v10 = vunpack.i.l.bf16 %v11479_v2  ;;  %v6145_v30 = vsel %vm12306_vm12, %v8213_v60, %v8214_v56  ;;  %vm12316_vm12 = vcmask 900096  }
0x1b33   :  { %6210 = vmatpush.msrb.mxu2 %v6145_v30  ;;  %v8164_v2 = vunpack.i.h.bf16 %v11423_v32 }
0x1b34   :  { %v6099_v55 = vsel %vm12307_vm15, %v8193_v10, %v8194_v31  ;;  %7070 = vmatmul.msk.f32.vlgmr.msrb.gmra.mxu2 %vm2885_vm3, %v11482_v62  ;;  %v8178_v10 = vunpack.i.l.bf16 %v11421_v63  ;;  %vm12318_vm15 = vmmov %vm12316_vm12 }
0x1b35   :  { %8281 = vrot.lane.b32.xlu1 %v8280_v4, %s8570_s22  ;;  %6176 = vmatpush.msrb.mxu3 %v6099_v55  ;;  %v6014_v1 = vsel %vm1194_vm7, %v8163_v25, %v8164_v2 }
0x1b36   :  { %8276 = vrot.lane.b32.xlu2 %v8270_v12, %s8567_s5 }
0x1b37   :  { %6177 = vmatpush.msrb.mxu3 %v6058_v16  ;;  %v11504_v18 = vpop.permute.xlu0 %8221 }
0x1b39   :  { %6178 = vmatpush.msrb.mxu3 %v6053_v49 }
0x1b3b   :  { %6179 = vmatpush.msrb.mxu3 %v6012_v57 }
0x1b3e   :  { %8286 = vrot.lane.b32.xlu2 %v8270_v12, %s8566_s15 }
0x1b3f   :  { %v11513_v60 = vpop.permute.xlu0 %8231 }
0x1b40   :  { %v8234_v45 = vunpack.i.h.bf16 %v11513_v60  ;;  %v8233_v11 = vunpack.i.l.bf16 %v11513_v60 }
0x1b42   :  { %v6151_v0 = vsel %vm12310_vm9, %v8139_v59, %v8233_v11  ;;  %v6146_v30 = vsel %vm12311_vm2, %v8214_v56, %v8234_v45  ;;  %v6152_v4 = vsel %vm12312_vm14, %v8233_v11, %v8178_v10  ;;  %v8143_v11 = vunpack.i.l.bf16 %v10952_v27 }
0x1b43   :  { %6249 = vmatpush.msra.mxu2 %v6151_v0  ;;  %v12200_v27 = vunpack.i.h.bf16 %v11504_v18  ;;  %vm12321_vm9 = vcmask 752640  }
0x1b44   :  { %v5920_v3 = vsel %vm12316_vm12, %v8143_v11, %v8144_v19  ;;  %v8223_v19 = vunpack.i.l.bf16 %v11504_v18  ;;  %vm12322_vm14 = vmmov %vm12321_vm9 }
0x1b45   :  { %6250 = vmatpush.msra.mxu2 %v6146_v30 }
0x1b46   :  { %7071 = vmatmul.msk.f32.vlgmr.msra.gmra.mxu2 %vm2885_vm3, %v11482_v62 }
0x1b47   :  { %6289 = vmatpush.msrb.mxu2 %v6152_v4  ;;  %v8149_v4 = vunpack.i.h.bf16 %v11419_v6 }
0x1b4e   :  { %v5803_v35 = vpop.permute.xlu2 %5802 }
0x1b4f   :  { %v11530_v26 = vsel %vm12301_vm4, %v5801_v14, %v5803_v35  ;;  %v8148_v35 = vunpack.i.l.bf16 %v11419_v6  ;;  %vm12323_vm4 = vmmov %vm12321_vm9 }
0x1b50   :  { %v5816_v59 = vsel %vm12313_vm6, %v11530_v26, 0.0  ;;  %vm12324_vm6 = vmmov %vm12314_vm10 }
0x1b51   :  { %v8315_v55 = vpack.i.bf16 %v5816_v59, %v9591_v22  ;;  %v5966_v22 = vsel %vm12314_vm10, %v8133_v13, %v8134_v48  ;;  %vm12325_vm10 = vmmov %vm12324_vm6 }
0x1b53   :  { %8316 = vrot.lane.b32.xlu1 %v8315_v55, %s8568_s16  ;;  %8301 = vrot.lane.b32.xlu0 %v8315_v55, %s8569_s18 }
0x1b54   :  { %8291 = vrot.lane.b32.xlu2 %v8315_v55, %s8571_s23 }
0x1b56   :  { %v11538_v56 = vpop.permute.xlu2 %8201 }
0x1b57   :  { %v8204_v16 = vunpack.i.h.bf16 %v11538_v56  ;;  %v8203_v14 = vunpack.i.l.bf16 %v11538_v56 }
0x1b59   :  { %v6007_v49 = vsel %vm1194_vm7, %v8203_v14, %v8204_v16 }
0x1b5a   :  { %6180 = vmatpush.msrb.mxu3 %v6007_v49  ;;  %v11574_v49 = vpop.permute.xlu1 %8226 }
0x1b5b   :  { %8321 = vrot.lane.b32.xlu1 %v8315_v55, %s8567_s5  ;;  %8306 = vrot.lane.b32.xlu0 %v8270_v12, %s8564_s21  ;;  %v12201_v11 = vunpack.i.h.bf16 %v11574_v49 }
0x1b5c   :  { %8296 = vrot.lane.b32.xlu2 %v11455_v29, %s8564_s21  ;;  %6181 = vmatpush.msrb.mxu3 %v5966_v22  ;;  %v5874_v22 = vsel %vm1122_vm1, %v8148_v35, %v8149_v4 }
0x1b5e   :  { %v11553_v57 = vpop.permute.xlu2 %8206 }
0x1b5f   :  { %v8209_v0 = vunpack.i.h.bf16 %v11553_v57  ;;  %v8208_v30 = vunpack.i.l.bf16 %v11553_v57 }
0x1b61   :  { %v5961_v12 = vsel %vm12315_vm11, %v8208_v30, %v8209_v0  ;;  %v8228_v30 = vunpack.i.l.bf16 %v11574_v49  ;;  %vm12326_vm11 = vmmov %vm12324_vm6 }
0x1b62   :  { %6182 = vmatpush.msrb.mxu3 %v5961_v12  ;;  %v5869_v12 = vsel %vm1122_vm1, %v8223_v19, %v12200_v27 }
0x1b63   :  { %8326 = vrot.lane.b32.xlu1 %v8315_v55, %s8566_s15  ;;  %8311 = vrot.lane.b32.xlu0 %v11455_v29, %s8565_s29  ;;  %v5834_v35 = vsel %vm1098_vm0, %v8228_v30, %v12201_v11 }
0x1b64   :  { %8331 = vrot.lane.b32.xlu2 %v8315_v55, %s8570_s22  ;;  %6183 = vmatpush.msrb.mxu3 %v5920_v3 }
0x1b66   :  { %v11568_v48 = vpop.permute.xlu2 %8216 }
0x1b67   :  { %v8219_v13 = vunpack.i.h.bf16 %v11568_v48  ;;  %v8218_v14 = vunpack.i.l.bf16 %v11568_v48 }
0x1b69   :  { %v5915_v29 = vsel %vm12318_vm15, %v8218_v14, %v8219_v13  ;;  %vm12327_vm15 = vmmov %vm12316_vm12 }
0x1b6a   :  { %6184 = vmatpush.msrb.mxu3 %v5915_v29 }
0x1b6b   :  { %8336 = vrot.lane.b32.xlu1 %v8315_v55, %s8564_s21  ;;  %5832 = vrot.lane.b32.xlu0 %v5816_v59, %s8565_s29  ;;  %v5819_v59 = vld [vmem:[%s12317_s13] sm:$0xff] }
0x1b6c   :  { %5830 = vrot.lane.b32.xlu2 %v11472_v23, %s8565_s29  ;;  %6185 = vmatpush.msrb.mxu3 %v5874_v22  ;;  %v8159_v22 = vunpack.i.h.bf16 %v10931_v20 }
0x1b6e   :  { %6186 = vmatpush.msrb.mxu3 %v5869_v12  ;;  %v11593_v55 = vpop.permute.xlu2 %8241  ;;  %v8179_v12 = vunpack.i.h.bf16 %v11421_v63 }
0x1b6f   :  { %v8244_v11 = vunpack.i.h.bf16 %v11593_v55 }
0x1b70   :  { %6187 = vmatpush.msrb.mxu3 %v9605_v53  ;;  %v11597_v3 = vpop.permute.xlu1 %8236  ;;  %v11605_v19 = vpop.permute.xlu0 %8246  ;;  %v8243_v53 = vunpack.i.l.bf16 %v11593_v55 }
0x1b71   :  { %v8239_v14 = vunpack.i.h.bf16 %v11597_v3  ;;  %v8238_v29 = vunpack.i.l.bf16 %v11597_v3 }
0x1b72   :  { %6188 = vmatpush.msrb.mxu3 %v5834_v35  ;;  %v11620_v35 = vld [vmem:[%s12304_s28] sm:$0xff] }
0x1b73   :  { %6169 = vperm.xlu1 %7257, %v5819_v59   ;;  %v6100_v27 = vsel %vm12319_vm5, %v8194_v31, %v8238_v29  ;;  %v6101_v30 = vsel %vm12320_vm8, %v8238_v29, %v8239_v14  ;;  %v6153_v31 = vsel %vm12311_vm2, %v8178_v10, %v8179_v12  ;;  %v6013_v10 = vsel %vm1194_vm7, %v8129_v5, %v8163_v25  ;;  %vm12328_vm5 = vmmov %vm12316_vm12 }
0x1b74   :  { %7067 = vmatpush.msk.msrb.mxu3 %vm9252_vm13, %v9556_v54  ;;  %6216 = vmatpush.msrb.mxu1 %v6100_v27  ;;  %v6060_v54 = vsel %vm12321_vm9, %v8158_v21, %v8159_v22  ;;  %v8248_v27 = vunpack.i.l.bf16 %v11605_v19  ;;  %v6055_v21 = vsel %vm12323_vm4, %v8243_v53, %v8244_v11  ;;  %v8169_v29 = vunpack.i.h.bf16 %v10892_v61  ;;  %vm12329_vm8 = vmmov %vm12311_vm2 }
0x1b75   :  { %6256 = vmatpush.msra.mxu0 %v6101_v30  ;;  %vm12330_vm9 = vmmov %vm12311_vm2  ;;  %vm12332_vm2 = vcmask 744448  }
0x1b76   :  { %7069 = vmatpush.msk.msrb.mxu3 %vm9252_vm13, %v11425_v41  ;;  %6217 = vmatpush.msrb.mxu1 %v10946_v44  ;;  %v6054_v44 = vsel %vm12322_vm14, %v8199_v40, %v8243_v53  ;;  %v8249_v41 = vunpack.i.h.bf16 %v11605_v19  ;;  %v6008_v30 = vsel %vm1194_vm7, %v8204_v16, %v8248_v27  ;;  %v5968_v25 = vsel %vm12324_vm6, %v8168_v42, %v8169_v29  ;;  %vm12333_vm14 = vmmov %vm12332_vm2 }
0x1b77   :  { %6191 = vmatmul.f32.vlgmr.msrb.gmra.mxu3 %v11620_v35  ;;  %6257 = vmatpush.msra.mxu0 %v6060_v54  ;;  %v8174_v54 = vunpack.i.h.bf16 %v10960_v33  ;;  %vm12334_vm6 = vmmov %vm12323_vm4 }
0x1b78   :  { %6329 = vmatpush.msra.mxu3 %v6153_v31  ;;  %v11644_v59 = vpop.permute.xlu1 %8251  ;;  %6218 = vmatpush.msrb.mxu1 %v6054_v44  ;;  %v11660_v53 = vpop.permute.xlu0 %8256  ;;  %v6009_v5 = vsel %vm1194_vm7, %v8248_v27, %v8249_v41  ;;  %v8183_v27 = vunpack.i.l.bf16 %v11446_v51  ;;  %v8184_v44 = vunpack.i.h.bf16 %v11446_v51 }
0x1b79   :  { %6258 = vmatpush.msra.mxu0 %v6055_v21  ;;  %v8253_v40 = vunpack.i.l.bf16 %v11644_v59  ;;  %v8254_v15 = vunpack.i.h.bf16 %v11644_v59  ;;  %v8258_v56 = vunpack.i.l.bf16 %v11660_v53  ;;  %v8259_v31 = vunpack.i.h.bf16 %v11660_v53 }
0x1b7a   :  { %6219 = vmatpush.msrb.mxu1 %v6013_v10  ;;  %v5922_v42 = vsel %vm12316_vm12, %v8173_v52, %v8174_v54  ;;  %v5876_v52 = vsel %vm1122_vm1, %v8183_v27, %v8184_v44  ;;  %vm12337_vm12 = vmmov %vm12328_vm5 }
0x1b7b   :  { %6259 = vmatpush.msra.mxu0 %v6014_v1  ;;  %v5962_v16 = vsel %vm12325_vm10, %v8209_v0, %v8253_v40  ;;  %v5916_v57 = vsel %vm12327_vm15, %v8219_v13, %v8258_v56  ;;  %v5917_v0 = vsel %vm12328_vm5, %v8258_v56, %v8259_v31  ;;  %vm12338_vm15 = vmmov %vm12328_vm5 }
0x1b7c   :  { %6220 = vmatpush.msrb.mxu1 %v6008_v30  ;;  %vm12339_vm5 = vmmov %vm12329_vm8 }
0x1b7d   :  { %6260 = vmatpush.msra.mxu0 %v6009_v5 }
0x1b7e   :  { %6221 = vmatpush.msrb.mxu1 %v10916_v7  ;;  %v5963_v7 = vsel %vm12326_vm11, %v8253_v40, %v8254_v15  ;;  %vm12336_vm11 = vmmov %vm12325_vm10 }
0x1b7f   :  { %6261 = vmatpush.msra.mxu0 %v5968_v25 }
0x1b80   :  { %6222 = vmatpush.msrb.mxu1 %v5962_v16 }
0x1b81   :  { %6262 = vmatpush.msra.mxu0 %v5963_v7  ;;  %v12331_v7 = vunpack.i.h.bf16 %v10866_v46 }
0x1b82   :  { %6223 = vmatpush.msrb.mxu1 %v10975_v47  ;;  %v5875_v47 = vsel %vm1122_vm1, %v8149_v4, %v8183_v27 }
0x1b83   :  { %6263 = vmatpush.msra.mxu0 %v5922_v42 }
0x1b84   :  { %6224 = vmatpush.msrb.mxu1 %v5916_v57 }
0x1b85   :  { %6264 = vmatpush.msra.mxu0 %v5917_v0 }
0x1b86   :  { %6225 = vmatpush.msrb.mxu1 %v5875_v47 }
0x1b87   :  { %6265 = vmatpush.msra.mxu0 %v5876_v52 }
0x1b88   :  { %v11701_v21 = vpop.permute.xlu2 %8261 }
0x1b89   :  { %v8263_v1 = vunpack.i.l.bf16 %v11701_v21  ;;  %v8264_v5 = vunpack.i.h.bf16 %v11701_v21 }
0x1b8b   :  { %v6107_v27 = vsel %vm12332_vm2, %v12331_v7, %v8263_v1 }
0x1b90   :  { %v11703_v48 = vpop.permute.xlu2 %8276 }
0x1b91   :  { %v8279_v55 = vunpack.i.h.bf16 %v11703_v48 }
0x1b93   :  { %v5964_v61 = vsel %vm12336_vm11, %v8254_v15, %v8279_v55 }
0x1b98   :  { %v11707_v10 = vpop.permute.xlu2 %8286 }
0x1b9f   :  { %v11705_v13 = vpop.permute.xlu1 %8271  ;;  %v11710_v6 = vpop.permute.xlu0 %8266 }
0x1ba0   :  { %v8268_v16 = vunpack.i.l.bf16 %v11710_v6  ;;  %v8269_v60 = vunpack.i.h.bf16 %v11710_v6  ;;  %v8273_v46 = vunpack.i.l.bf16 %v11705_v13  ;;  %v8274_v0 = vunpack.i.h.bf16 %v11705_v13 }
0x1ba2   :  { %v6061_v57 = vsel %vm12323_vm4, %v8159_v22, %v8268_v16  ;;  %v6056_v3 = vsel %vm12334_vm6, %v8244_v11, %v8269_v60  ;;  %v6015_v20 = vsel %vm1194_vm7, %v8164_v2, %v8273_v46  ;;  %v6010_v22 = vsel %vm1194_vm7, %v8249_v41, %v8274_v0 }
0x1ba3   :  { %v8288_v2 = vunpack.i.l.bf16 %v11707_v10 }
0x1ba7   :  { %v8282_v40 = vpop.permute.xlu1 %8281 }
0x1ba8   :  { %v8284_v4 = vunpack.i.h.bf16 %v8282_v40  ;;  %v8283_v30 = vunpack.i.l.bf16 %v8282_v40  ;;  %v12335_v40 = vunpack.i.h.bf16 %v11504_v18  ;;  %v5923_v18 = vsel %vm12337_vm12, %v8174_v54, %v8288_v2 }
0x1baa   :  { %v6147_v25 = vsel %vm12329_vm8, %v8234_v45, %v8283_v30  ;;  %v6148_v56 = vsel %vm12330_vm9, %v8283_v30, %v8284_v4  ;;  %v6102_v45 = vsel %vm12333_vm14, %v8239_v14, %v8264_v5  ;;  %v8278_v14 = vunpack.i.l.bf16 %v11703_v48  ;;  %vm12340_vm8 = vmmov %vm12339_vm5 }
0x1bab   :  { %6290 = vmatpush.msrb.mxu2 %v6147_v25  ;;  %6330 = vmatpush.msra.mxu3 %v6148_v56  ;;  %v8289_v30 = vunpack.i.h.bf16 %v11707_v10  ;;  %vm12343_vm9 = vmmov %vm12332_vm2 }
0x1bac   :  { %7073 = vmatmul.msk.f32.vlgmr.msra.gmra.mxu3 %vm2885_vm3, %v11482_v62  ;;  %7072 = vmatmul.msk.f32.vlgmr.msrb.gmra.mxu2 %vm2885_vm3, %v11482_v62  ;;  %v5969_v32 = vsel %vm12325_vm10, %v8169_v29, %v8278_v14 }
0x1bad   :  { %6295 = vmatpush.msra.mxu2 %v6107_v27  ;;  %v5918_v59 = vsel %vm12338_vm15, %v8259_v31, %v8289_v30 }
0x1bae   :  { %v11733_v42 = vpop.permute.xlu2 %8291 }
0x1baf   :  { %6296 = vmatpush.msra.mxu2 %v6102_v45 }
0x1bb1   :  { %6297 = vmatpush.msra.mxu2 %v6061_v57  ;;  %v12341_v57 = vunpack.i.h.bf16 %v11574_v49 }
0x1bb3   :  { %6298 = vmatpush.msra.mxu2 %v6056_v3 }
0x1bb5   :  { %6299 = vmatpush.msra.mxu2 %v6015_v20  ;;  %v8293_v20 = vunpack.i.l.bf16 %v11733_v42 }
0x1bb6   :  { %v8297_v47 = vpop.permute.xlu2 %8296 }
0x1bb7   :  { %6300 = vmatpush.msra.mxu2 %v6010_v22  ;;  %v8299_v11 = vunpack.i.h.bf16 %v8297_v47  ;;  %v8298_v52 = vunpack.i.l.bf16 %v8297_v47 }
0x1bb9   :  { %6301 = vmatpush.msra.mxu2 %v5969_v32  ;;  %v5870_v19 = vsel %vm1122_vm1, %v12335_v40, %v8298_v52  ;;  %v5871_v41 = vsel %vm1122_vm1, %v8298_v52, %v8299_v11 }
0x1bba   :  { %6226 = vmatpush.msrb.mxu1 %v5870_v19  ;;  %6266 = vmatpush.msra.mxu0 %v5871_v41 }
0x1bbb   :  { %6302 = vmatpush.msra.mxu2 %v5964_v61 }
0x1bbc   :  { %6227 = vmatpush.msrb.mxu1 %v9599_v50  ;;  %6267 = vmatpush.msra.mxu0 %v9602_v8 }
0x1bbd   :  { %6303 = vmatpush.msra.mxu2 %v5923_v18 }
0x1bbe   :  { %v8332_v29 = vpop.permute.xlu2 %8331 }
0x1bbf   :  { %v8334_v15 = vunpack.i.h.bf16 %v8332_v29  ;;  %v8333_v25 = vunpack.i.l.bf16 %v8332_v29  ;;  %6304 = vmatpush.msra.mxu2 %v5918_v59 }
0x1bc1   :  { %v6154_v50 = vsel %vm12339_vm5, %v8179_v12, %v8333_v25  ;;  %v6149_v8 = vsel %vm12340_vm8, %v8284_v4, %v8334_v15  ;;  %vm12359_vm5 = vcmask 154624  }
0x1bc2   :  { %6369 = vmatpush.msrb.mxu3 %v6154_v50  ;;  %vm12360_vm8 = vmmov %vm12359_vm5 }
0x1bc4   :  { %6370 = vmatpush.msrb.mxu3 %v6149_v8 }
0x1bc5   :  { %v8302_v33 = vpop.permute.xlu0 %8301  ;;  %7074 = vmatmul.msk.f32.vlgmr.msrb.gmra.mxu3 %vm2885_vm3, %v11482_v62  ;;  %v8317_v54 = vpop.permute.xlu1 %8316 }
0x1bc6   :  { %6409 = vmatpush.msra.mxu3 %v8333_v25  ;;  %v11808_v45 = vpop.permute.xlu2 %5830  ;;  %v8303_v49 = vunpack.i.l.bf16 %v8302_v33 }
0x1bc8   :  { %6410 = vmatpush.msra.mxu3 %v8334_v15 }
0x1bcd   :  { %v11793_v53 = vpop.permute.xlu0 %8306  ;;  %7077 = vmatmul.msk.f32.vlgmr.msra.gmra.mxu3 %vm2885_vm3, %v11482_v62  ;;  %v8322_v62 = vpop.permute.xlu1 %8321  ;;  %vm12342_vm3 = vmmov %vm12332_vm2 }
0x1bce   :  { %v8309_v31 = vunpack.i.h.bf16 %v11793_v53  ;;  %v8308_v56 = vunpack.i.l.bf16 %v11793_v53  ;;  %vm12344_vm2 = vmmov %vm12323_vm4  ;;  %v8323_v21 = vunpack.i.l.bf16 %v8322_v62  ;;  %v8324_v22 = vunpack.i.h.bf16 %v8322_v62 }
0x1bcf   :  { %vm12345_vm14 = vmmov %vm12344_vm2 }
0x1bd0   :  { %v5877_v63 = vsel %vm1122_vm1, %v8184_v44, %v8308_v56  ;;  %v5872_v12 = vsel %vm1122_vm1, %v8299_v11, %v8309_v31  ;;  %vm12346_vm4 = vmmov %vm12325_vm10 }
0x1bd1   :  { %6305 = vmatpush.msra.mxu2 %v5877_v63  ;;  %v5970_v6 = vsel %vm12346_vm4, %v8278_v14, %v8323_v21  ;;  %vm12347_vm6 = vmmov %vm12346_vm4  ;;  %v12355_v63 = vld [vmem:[#allocation36_spill] sm:$0xff] }
0x1bd2   :  { %vm12348_vm10 = vmmov %vm12337_vm12  ;;  %vm12351_vm12 = vcmask 220160  }
0x1bd3   :  { %6306 = vmatpush.msra.mxu2 %v5872_v12  ;;  %vm12349_vm11 = vmmov %vm12348_vm10 }
0x1bd4   :  { %vm12352_vm15 = vmmov %vm12351_vm12 }
0x1bd5   :  { %v8312_v4 = vpop.permute.xlu0 %8311  ;;  %6307 = vmatpush.msra.mxu2 %v9596_v39  ;;  %v8294_v39 = vunpack.i.h.bf16 %v11733_v42  ;;  %v8319_v42 = vunpack.i.h.bf16 %v8317_v54  ;;  %vm12365_vm4 = vmmov %vm12351_vm12 }
0x1bd6   :  { %v8314_v7 = vunpack.i.h.bf16 %v8312_v4  ;;  %v8313_v27 = vunpack.i.l.bf16 %v8312_v4 }
0x1bd8   :  { %v5835_v51 = vsel %vm1098_vm0, %v12341_v57, %v8313_v27  ;;  %v5836_v44 = vsel %vm1098_vm0, %v8313_v27, %v8314_v7  ;;  %v5837_v3 = vsel %vm1098_vm0, %v8314_v7, %v11808_v45 }
0x1bd9   :  { %6228 = vmatpush.msrb.mxu1 %v5835_v51  ;;  %6268 = vmatpush.msra.mxu0 %v5836_v44 }
0x1bda   :  { %6308 = vmatpush.msra.mxu2 %v5837_v3 }
0x1bdb   :  { %6229 = vmatpush.msrb.mxu1 %v9563_v43  ;;  %6269 = vmatpush.msra.mxu0 %v9559_v37  ;;  %v6108_v37 = vsel %vm12342_vm3, %v8263_v1, %v8293_v20  ;;  %v8304_v43 = vunpack.i.h.bf16 %v8302_v33  ;;  %vm12361_vm3 = vmmov %vm12359_vm5 }
0x1bdc   :  { %6309 = vmatpush.msra.mxu2 %v9575_v34  ;;  %v6103_v34 = vsel %vm12343_vm9, %v8264_v5, %v8294_v39  ;;  %vm12362_vm9 = vmmov %vm12361_vm3 }
0x1bdd   :  { %6230 = vmatpush.msrb.mxu1 %v11431_v38  ;;  %6270 = vmatpush.msra.mxu0 %v11441_v58  ;;  %v8327_v38 = vpop.permute.xlu1 %8326  ;;  %v8318_v58 = vunpack.i.l.bf16 %v8317_v54  ;;  %v6057_v1 = vsel %vm12345_vm14, %v8269_v60, %v8304_v43  ;;  %v5833_v32 = vpop.permute.xlu0 %5832 }
0x1bde   :  { %6310 = vmatpush.msra.mxu2 %v11450_v17  ;;  %6231 = vmatmul.f32.vlgmr.msrb.gmra.mxu1 %v11620_v35  ;;  %v6062_v17 = vsel %vm12344_vm2, %v8268_v16, %v8303_v49  ;;  %v6011_v16 = vsel %vm1194_vm7, %v8274_v0, %v8319_v42  ;;  %v8328_v47 = vunpack.i.l.bf16 %v8327_v38  ;;  %v8329_v11 = vunpack.i.h.bf16 %v8327_v38  ;;  %v12357_v38 = vld [vmem:[#allocation38_spill] sm:$0xff]  ;;  %vm12363_vm2 = vmmov %vm12361_vm3 }
0x1bdf   :  { %6271 = vmatmul.f32.vlgmr.msra.gmra.mxu0 %v11620_v35  ;;  %6311 = vmatmul.f32.vlgmr.msra.gmra.mxu2 %v11620_v35  ;;  %v6016_v5 = vsel %vm1194_vm7, %v8273_v46, %v8318_v58  ;;  %v5965_v46 = vsel %vm12347_vm6, %v8279_v55, %v8324_v22  ;;  %v5838_v10 = vsel %vm1098_vm0, %v11808_v45, %v5833_v32  ;;  %v12356_v45 = vld [vmem:[#allocation39_spill] sm:$0xff]  ;;  %vm12364_vm14 = vmmov %vm12363_vm2  ;;  %vm12366_vm6 = vcmask 736256  }
0x1be0   :  { %6335 = vmatpush.msra.mxu1 %v6108_v37  ;;  %6375 = vmatpush.msrb.mxu0 %v8293_v20  ;;  %v5924_v0 = vsel %vm12348_vm10, %v8288_v2, %v8328_v47  ;;  %v5919_v14 = vsel %vm12349_vm11, %v8289_v30, %v8329_v11  ;;  %v6212_v2 = vpop.f32.mrf.mxu2  ;;  %v12350_v30 = vld [vmem:[#allocation40_spill] sm:$0xff]  ;;  %vm12367_vm10 = vmmov %vm12366_vm6 }
0x1be1   :  { %vm12368_vm11 = vmmov %vm12366_vm6 }
0x1be2   :  { %6336 = vmatpush.msra.mxu1 %v6103_v34  ;;  %6376 = vmatpush.msrb.mxu0 %v8294_v39 }
0x1be4   :  { %6337 = vmatpush.msra.mxu1 %v6062_v17  ;;  %6377 = vmatpush.msrb.mxu0 %v8303_v49  ;;  %v12358_v17 = vld [vmem:[#allocation37_spill] sm:$0xff] }
0x1be5   :  { %v8337_v60 = vpop.permute.xlu1 %8336 }
0x1be6   :  { %6338 = vmatpush.msra.mxu1 %v6057_v1  ;;  %6378 = vmatpush.msrb.mxu0 %v8304_v43  ;;  %v8338_v13 = vunpack.i.l.bf16 %v8337_v60  ;;  %v8339_v52 = vunpack.i.h.bf16 %v8337_v60 }
0x1be8   :  { %6339 = vmatpush.msra.mxu1 %v6016_v5  ;;  %6379 = vmatpush.msrb.mxu0 %v8318_v58  ;;  %v5878_v48 = vsel %vm1122_vm1, %v8308_v56, %v8338_v13  ;;  %v5873_v55 = vsel %vm1122_vm1, %v8309_v31, %v8339_v52  ;;  %v6252_v29 = vpop.f32.mrf.mxu2 }
0x1bea   :  { %6340 = vmatpush.msra.mxu1 %v6011_v16  ;;  %6380 = vmatpush.msrb.mxu0 %v8319_v42 }
0x1bec   :  { %6341 = vmatpush.msra.mxu1 %v5970_v6  ;;  %6381 = vmatpush.msrb.mxu0 %v8323_v21 }
0x1bed   :  { %v6170_v40 = vpop.permute.xlu1 %6169 }
0x1bee   :  { %6342 = vmatpush.msra.mxu1 %v5965_v46  ;;  %6382 = vmatpush.msrb.mxu0 %v8324_v22 }
0x1bf0   :  { %6343 = vmatpush.msra.mxu1 %v5924_v0  ;;  %6383 = vmatpush.msrb.mxu0 %v8328_v47 }
0x1bf2   :  { %6344 = vmatpush.msra.mxu1 %v5919_v14  ;;  %6384 = vmatpush.msrb.mxu0 %v8329_v11 }
0x1bf4   :  { %6345 = vmatpush.msra.mxu1 %v5878_v48  ;;  %6385 = vmatpush.msrb.mxu0 %v8338_v13 }
0x1bf6   :  { %6346 = vmatpush.msra.mxu1 %v5873_v55  ;;  %6386 = vmatpush.msrb.mxu0 %v8339_v52 }
0x1bf8   :  { %6347 = vmatpush.msra.mxu1 %v9628_v9  ;;  %6387 = vmatpush.msrb.mxu0 %v9620_v28  ;;  %v12353_v9 = vld [vmem:[#allocation34_spill] sm:$0xff] }
0x1bfa   :  { %6348 = vmatpush.msra.mxu1 %v5838_v10  ;;  %6388 = vmatpush.msrb.mxu0 %v5833_v32  ;;  %v6192_v19 = vpop.f32.mrf.mxu3  ;;  %v6459_v10 = vld [vmem:[%s8791_s17] sm:$0xff]  ;;  %s12382_s17 = sld [smem:[#allocation33_spill]] }
0x1bfb   :  { %v6193_v41 = vadd.f32 %v6192_v19, %v6170_v40 }
0x1bfc   :  { %6349 = vmatpush.msra.mxu1 %v9578_v36  ;;  %7075 = vmatpush.msk.msrb.mxu0 %vm12351_vm12, %v12350_v30  ;;  %vm12369_vm12 = vcmask 744448  }
0x1bfd   :  { %v6213_v61 = vadd.f32 %v6212_v2, %v6193_v41 }
0x1bfe   :  { %6350 = vmatpush.msra.mxu1 %v11472_v23  ;;  %7076 = vmatpush.msk.msrb.mxu0 %vm12352_vm15, %v11530_v26  ;;  %v12354_v26 = vld [vmem:[#allocation35_spill] sm:$0xff]  ;;  %vm12370_vm15 = vcmask 752640  }
0x1bff   :  { %v6415_v28 = vmax.f32 %v6213_v61, 0.0  ;;  %6351 = vmatmul.f32.vlgmr.msra.gmra.mxu1 %v11620_v35  ;;  %6391 = vmatmul.f32.vlgmr.msrb.gmra.mxu0 %v11620_v35 }
0x1c01   :  { %v6421_v18 = vmul.f32 %v6415_v28, %v12353_v9 }
0x1c03   :  { %6433 = vrot.lane.b32.xlu2 %v6421_v18, %s8573_s8 }
0x1c2f   :  { %v6292_v36 = vpop.f32.mrf.mxu2  ;;  %v6332_v56 = vpop.f32.mrf.mxu3 }
0x1c48   :  { %v6372_v57 = vpop.f32.mrf.mxu3 }
0x1c50   :  { %v6412_v51 = vpop.f32.mrf.mxu3 }
0x1c5b   :  { %v6232_v59 = vpop.f32.mrf.mxu1 }
0x1c5c   :  { %v6233_v15 = vadd.f32 %v6232_v59, %v6170_v40  ;;  %v6272_v25 = vpop.f32.mrf.mxu0 }
0x1c5d   :  { %v6273_v50 = vadd.f32 %v6272_v25, %v6170_v40  ;;  %v11886_v22 = vpop.permute.xlu2 %6433 }
0x1c5e   :  { %v6253_v8 = vadd.f32 %v6252_v29, %v6233_v15  ;;  %v6456_v46 = vsel %vm12362_vm9, 0.0, %v11886_v22  ;;  %vm12374_vm9 = vcmask 900096  }
0x1c5f   :  { %v6293_v23 = vadd.f32 %v6292_v36, %v6273_v50 }
0x1c60   :  { %v6416_v33 = vmax.f32 %v6253_v8, 0.0 }
0x1c61   :  { %v6417_v53 = vmax.f32 %v6293_v23, 0.0 }
0x1c62   :  { %v6422_v54 = vmul.f32 %v6416_v33, %v12354_v26  ;;  %v6312_v31 = vpop.f32.mrf.mxu2 }
0x1c63   :  { %v6423_v35 = vmul.f32 %v6417_v53, %v12355_v63  ;;  %v6313_v12 = vadd.f32 %v6312_v31, %v6170_v40 }
0x1c65   :  { %v8340_v4 = vpack.i.bf16 %v6423_v35, %v6422_v54  ;;  %v6333_v7 = vadd.f32 %v6332_v56, %v6313_v12 }
0x1c67   :  { %8341 = vrot.lane.b32.xlu0 %v8340_v4, %s8573_s8  ;;  %v6418_v27 = vmax.f32 %v6333_v7, 0.0 }
0x1c69   :  { %v6424_v62 = vmul.f32 %v6418_v27, %v12356_v45 }
0x1c6f   :  { %6439 = vrot.lane.b32.xlu0 %v6424_v62, %s8573_s8 }
0x1c7c   :  { %v6352_v44 = vpop.f32.mrf.mxu1  ;;  %v6392_v3 = vpop.f32.mrf.mxu0 }
0x1c7d   :  { %v6353_v20 = vadd.f32 %v6352_v44, %v6170_v40  ;;  %v6393_v39 = vadd.f32 %v6392_v3, %v6170_v40 }
0x1c7f   :  { %v6373_v49 = vadd.f32 %v6372_v57, %v6353_v20  ;;  %v6413_v37 = vadd.f32 %v6412_v51, %v6393_v39 }
0x1c81   :  { %v6419_v43 = vmax.f32 %v6373_v49, 0.0  ;;  %v6420_v34 = vmax.f32 %v6413_v37, 0.0 }
0x1c83   :  { %v6425_v58 = vmul.f32 %v6419_v43, %v12357_v38  ;;  %v6426_v42 = vmul.f32 %v6420_v34, %v12358_v17 }
0x1c85   :  { %6441 = vrot.lane.b32.xlu1 %v6425_v58, %s8573_s8  ;;  %6443 = vrot.lane.b32.xlu2 %v6426_v42, %s8573_s8 }
0x1cd9   :  { %v8342_v1 = vpop.permute.xlu0 %8341 }
0x1cda   :  { %v8344_v21 = vunpack.i.h.bf16 %v8342_v1  ;;  %v8343_v5 = vunpack.i.l.bf16 %v8342_v1 }
0x1cdc   :  { %v11890_v16 = vsel %vm12359_vm5, %v11886_v22, %v8343_v5  ;;  %v11893_v47 = vsel %vm12360_vm8, %v8343_v5, %v8344_v21  ;;  %vm12371_vm5 = vmmov %vm12366_vm6  ;;  %vm12372_vm8 = vcmask 891904  }
0x1cdd   :  { %v8355_v6 = vpack.i.bf16 %v11893_v47, %v11890_v16 }
0x1cdf   :  { %8356 = vrot.lane.b32.xlu2 %v8355_v6, %s8569_s18  ;;  %8351 = vrot.lane.b32.xlu0 %v8355_v6, %s8571_s23  ;;  %v6444_v0 = vpop.permute.xlu2 %6443 }
0x1ce0   :  { %8346 = vrot.lane.b32.xlu1 %v8355_v6, %s8570_s22 }
0x1ce1   :  { %v6440_v60 = vpop.permute.xlu0 %6439 }
0x1ce2   :  { %v11901_v11 = vsel %vm12361_vm3, %v8344_v21, %v6440_v60  ;;  %vm12373_vm3 = vmmov %vm12369_vm12 }
0x1ce3   :  { %v8380_v13 = vpack.i.bf16 %v11901_v11, %v6456_v46 }
0x1ce7   :  { %8381 = vrot.lane.b32.xlu2 %v8380_v13, %s8570_s22  ;;  %8366 = vrot.lane.b32.xlu0 %v8355_v6, %s8567_s5 }
0x1ce8   :  { %8361 = vrot.lane.b32.xlu1 %v8355_v6, %s8568_s16 }
0x1cef   :  { %8401 = vrot.lane.b32.xlu2 %v8380_v13, %s8568_s16  ;;  %8371 = vrot.lane.b32.xlu0 %v8355_v6, %s8566_s15 }
0x1cf0   :  { %8386 = vrot.lane.b32.xlu1 %v8380_v13, %s8571_s23 }
0x1cf7   :  { %v6442_v52 = vpop.permute.xlu1 %6441  ;;  %8376 = vrot.lane.b32.xlu0 %v8355_v6, %s8564_s21 }
0x1cf8   :  { %v11914_v14 = vsel %vm12363_vm2, %v6440_v60, %v6442_v52  ;;  %v11917_v48 = vsel %vm12364_vm14, %v6442_v52, %v6444_v0  ;;  %8406 = vrot.lane.b32.xlu1 %v8380_v13, %s8567_s5  ;;  %vm12375_vm2 = vmmov %vm12373_vm3 }
0x1cf9   :  { %v6457_v55 = vsel %vm12365_vm4, %v11917_v48, 0.0  ;;  %vm12376_vm14 = vmmov %vm12375_vm2 }
0x1cfa   :  { %v8425_v32 = vpack.i.bf16 %v6457_v55, %v11914_v14  ;;  %vm12377_vm4 = vmmov %vm12370_vm15 }
0x1cfc   :  { %8426 = vrot.lane.b32.xlu2 %v8425_v32, %s8570_s22 }
0x1cff   :  { %8391 = vrot.lane.b32.xlu0 %v8380_v13, %s8569_s18 }
0x1d00   :  { %8411 = vrot.lane.b32.xlu1 %v8380_v13, %s8566_s15 }
0x1d04   :  { %8431 = vrot.lane.b32.xlu2 %v8425_v32, %s8571_s23 }
0x1d07   :  { %8396 = vrot.lane.b32.xlu0 %v8355_v6, %s8565_s29 }
0x1d08   :  { %8416 = vrot.lane.b32.xlu1 %v8380_v13, %s8564_s21 }
0x1d0c   :  { %8436 = vrot.lane.b32.xlu2 %v8425_v32, %s8569_s18 }
0x1d0f   :  { %8446 = vrot.lane.b32.xlu0 %v8425_v32, %s8567_s5 }
0x1d10   :  { %8421 = vrot.lane.b32.xlu1 %v8380_v13, %s8565_s29 }
0x1d14   :  { %8441 = vrot.lane.b32.xlu2 %v8425_v32, %s8568_s16 }
0x1d17   :  { %8461 = vrot.lane.b32.xlu0 %v8425_v32, %s8565_s29 }
0x1d18   :  { %8451 = vrot.lane.b32.xlu1 %v8425_v32, %s8566_s15 }
0x1d1c   :  { %8456 = vrot.lane.b32.xlu2 %v8425_v32, %s8564_s21 }
0x1d20   :  { %6648 = vperm.xlu1 %7257, %v6459_v10  }
0x1d39   :  { %v11937_v2 = vpop.permute.xlu2 %8356 }
0x1d3a   :  { %v8359_v15 = vunpack.i.h.bf16 %v11937_v2  ;;  %v8358_v25 = vunpack.i.l.bf16 %v11937_v2 }
0x1d3c   :  { %v6590_v35 = vsel %vm12370_vm15, %v8358_v25, %v8359_v15  ;;  %vm12383_vm15 = vmmov %vm12374_vm9 }
0x1d41   :  { %v11939_v40 = vpop.permute.xlu2 %8381 }
0x1d42   :  { %v8384_v30 = vunpack.i.h.bf16 %v11939_v40  ;;  %v8383_v61 = vunpack.i.l.bf16 %v11939_v40 }
0x1d49   :  { %v11941_v19 = vpop.permute.xlu2 %8401 }
0x1d51   :  { %v8352_v41 = vpop.permute.xlu0 %8351 }
0x1d52   :  { %v8347_v28 = vpop.permute.xlu1 %8346  ;;  %v8354_v18 = vunpack.i.h.bf16 %v8352_v41  ;;  %v8353_v29 = vunpack.i.l.bf16 %v8352_v41 }
0x1d53   :  { %v8349_v36 = vunpack.i.h.bf16 %v8347_v28  ;;  %v8348_v59 = vunpack.i.l.bf16 %v8347_v28 }
0x1d54   :  { %v6613_v31 = vsel %vm12369_vm12, %v8353_v29, %v8354_v18  ;;  %vm12381_vm12 = vmmov %vm12372_vm8 }
0x1d55   :  { %v6636_v50 = vsel %vm12366_vm6, %v8348_v59, %v8349_v36  ;;  %v6635_v8 = vsel %vm12367_vm10, %v8383_v61, %v8348_v59  ;;  %v6637_v23 = vsel %vm12368_vm11, %v8349_v36, %v8384_v30  ;;  %vm12378_vm6 = vmmov %vm12377_vm4 }
0x1d56   :  { %6681 = vmatpush.msrb.mxu2 %v6636_v50  ;;  %v11952_v33 = vpop.permute.xlu2 %8426  ;;  %6661 = vmatpush.msrb.mxu3 %v6635_v8  ;;  %vm12379_vm10 = vmmov %vm12377_vm4 }
0x1d57   :  { %v8429_v53 = vunpack.i.h.bf16 %v11952_v33  ;;  %v8428_v54 = vunpack.i.l.bf16 %v11952_v33  ;;  %6701 = vmatpush.msrb.mxu1 %v6637_v23  ;;  %v8404_v23 = vunpack.i.h.bf16 %v11941_v19  ;;  %vm12380_vm11 = vmmov %vm12372_vm8 }
0x1d58   :  { %6682 = vmatpush.msrb.mxu2 %v6613_v31  ;;  %v8403_v31 = vunpack.i.l.bf16 %v11941_v19 }
0x1d59   :  { %v11957_v56 = vpop.permute.xlu0 %8366  ;;  %v6639_v12 = vsel %vm12371_vm5, %v8428_v54, %v8429_v53  ;;  %vm12384_vm5 = vmmov %vm12374_vm9 }
0x1d5a   :  { %v8362_v4 = vpop.permute.xlu1 %8361  ;;  %6683 = vmatpush.msrb.mxu2 %v6590_v35  ;;  %6741 = vmatpush.msra.mxu0 %v6639_v12  ;;  %v8369_v7 = vunpack.i.h.bf16 %v11957_v56  ;;  %v8368_v27 = vunpack.i.l.bf16 %v11957_v56 }
0x1d5b   :  { %v8364_v62 = vunpack.i.h.bf16 %v8362_v4  ;;  %v8363_v57 = vunpack.i.l.bf16 %v8362_v4 }
0x1d5c   :  { %v6544_v39 = vsel %vm12372_vm8, %v8368_v27, %v8369_v7  ;;  %vm12385_vm8 = vcmask 588800  }
0x1d5d   :  { %v6567_v51 = vsel %vm1194_vm7, %v8363_v57, %v8364_v62 }
0x1d5e   :  { %v11972_v44 = vpop.permute.xlu2 %8431  ;;  %6684 = vmatpush.msrb.mxu2 %v6567_v51 }
0x1d5f   :  { %v8434_v3 = vunpack.i.h.bf16 %v11972_v44  ;;  %v8433_v20 = vunpack.i.l.bf16 %v11972_v44 }
0x1d60   :  { %6685 = vmatpush.msrb.mxu2 %v6544_v39 }
0x1d61   :  { %v8372_v49 = vpop.permute.xlu0 %8371  ;;  %v6616_v37 = vsel %vm12373_vm3, %v8433_v20, %v8434_v3  ;;  %vm12386_vm3 = vmmov %vm12380_vm11 }
0x1d62   :  { %v8374_v43 = vunpack.i.h.bf16 %v8372_v49  ;;  %v8373_v34 = vunpack.i.l.bf16 %v8372_v49  ;;  %v11982_v58 = vpop.permute.xlu1 %8386  ;;  %6742 = vmatpush.msra.mxu0 %v6616_v37  ;;  %v6566_v49 = vsel %vm1194_vm7, %v8403_v31, %v8363_v57  ;;  %v6568_v37 = vsel %vm1194_vm7, %v8364_v62, %v8404_v23 }
0x1d63   :  { %v8389_v42 = vunpack.i.h.bf16 %v11982_v58  ;;  %v8388_v1 = vunpack.i.l.bf16 %v11982_v58 }
0x1d64   :  { %v6521_v21 = vsel %vm12374_vm9, %v8373_v34, %v8374_v43  ;;  %vm12387_vm9 = vmmov %vm12385_vm8 }
0x1d65   :  { %v6612_v5 = vsel %vm12375_vm2, %v8388_v1, %v8353_v29  ;;  %6686 = vmatpush.msrb.mxu2 %v6521_v21  ;;  %v6614_v6 = vsel %vm12376_vm14, %v8354_v18, %v8389_v42  ;;  %vm12388_vm2 = vmmov %vm12385_vm8  ;;  %vm12389_vm14 = vcmask 736256  }
0x1d66   :  { %v11991_v60 = vpop.permute.xlu2 %8436  ;;  %6662 = vmatpush.msrb.mxu3 %v6612_v5  ;;  %6702 = vmatpush.msrb.mxu1 %v6614_v6 }
0x1d67   :  { %v8439_v46 = vunpack.i.h.bf16 %v11991_v60  ;;  %v8438_v13 = vunpack.i.l.bf16 %v11991_v60 }
0x1d69   :  { %v8377_v0 = vpop.permute.xlu0 %8376  ;;  %v6593_v52 = vsel %vm12377_vm4, %v8438_v13, %v8439_v46 }
0x1d6a   :  { %v8379_v55 = vunpack.i.h.bf16 %v8377_v0  ;;  %v8378_v32 = vunpack.i.l.bf16 %v8377_v0  ;;  %v12000_v10 = vpop.permute.xlu1 %8406  ;;  %6743 = vmatpush.msra.mxu0 %v6593_v52 }
0x1d6b   :  { %v8409_v56 = vunpack.i.h.bf16 %v12000_v10  ;;  %v8408_v35 = vunpack.i.l.bf16 %v12000_v10 }
0x1d6c   :  { %v6498_v41 = vsel %vm1122_vm1, %v8378_v32, %v8379_v55 }
0x1d6d   :  { %6687 = vmatpush.msrb.mxu2 %v6498_v41  ;;  %v6545_v2 = vsel %vm12381_vm12, %v8369_v7, %v8409_v56  ;;  %vm12395_vm12 = vmmov %vm12388_vm2 }
0x1d6e   :  { %v12003_v61 = vpop.permute.xlu2 %8441 }
0x1d6f   :  { %v8444_v28 = vunpack.i.h.bf16 %v12003_v61  ;;  %v8443_v18 = vunpack.i.l.bf16 %v12003_v61 }
0x1d71   :  { %v12007_v29 = vpop.permute.xlu0 %8391  ;;  %v6570_v36 = vsel %vm1194_vm7, %v8443_v18, %v8444_v28 }
0x1d72   :  { %v8394_v59 = vunpack.i.h.bf16 %v12007_v29  ;;  %v8393_v50 = vunpack.i.l.bf16 %v12007_v29  ;;  %v12014_v8 = vpop.permute.xlu1 %8411  ;;  %6744 = vmatpush.msra.mxu0 %v6570_v36 }
0x1d73   :  { %v8414_v51 = vunpack.i.h.bf16 %v12014_v8  ;;  %v8413_v39 = vunpack.i.l.bf16 %v12014_v8 }
0x1d74   :  { %v6589_v12 = vsel %vm12378_vm6, %v8393_v50, %v8358_v25  ;;  %v6591_v4 = vsel %vm12379_vm10, %v8359_v15, %v8394_v59  ;;  %v6543_v25 = vsel %vm12380_vm11, %v8408_v35, %v8368_v27  ;;  %v6592_v40 = vsel %vm12377_vm4, %v8394_v59, %v8438_v13  ;;  %vm12391_vm6 = vmmov %vm12384_vm5 }
0x1d75   :  { %6663 = vmatpush.msrb.mxu3 %v6589_v12  ;;  %6703 = vmatpush.msrb.mxu1 %v6591_v4  ;;  %v6520_v57 = vsel %vm12383_vm15, %v8413_v39, %v8373_v34  ;;  %v6522_v62 = vsel %vm12384_vm5, %v8374_v43, %v8414_v51  ;;  %v12052_v34 = vld [vmem:[%s12382_s17] sm:$0xff]  ;;  %vm12392_vm10 = vmmov %vm12386_vm3 }
0x1d76   :  { %vm12393_vm11 = vmmov %vm12384_vm5 }
0x1d77   :  { %6664 = vmatpush.msrb.mxu3 %v6566_v49  ;;  %6704 = vmatpush.msrb.mxu1 %v6568_v37  ;;  %vm12396_vm15 = vmmov %vm12388_vm2 }
0x1d78   :  { %vm12397_vm5 = vmmov %vm12388_vm2 }
0x1d79   :  { %v8397_v15 = vpop.permute.xlu0 %8396  ;;  %6665 = vmatpush.msrb.mxu3 %v6543_v25  ;;  %6705 = vmatpush.msrb.mxu1 %v6545_v2 }
0x1d7a   :  { %v8399_v1 = vunpack.i.h.bf16 %v8397_v15  ;;  %v8398_v21 = vunpack.i.l.bf16 %v8397_v15  ;;  %v12038_v5 = vpop.permute.xlu1 %8416 }
0x1d7b   :  { %v8419_v27 = vunpack.i.h.bf16 %v12038_v5  ;;  %v8418_v6 = vunpack.i.l.bf16 %v12038_v5  ;;  %6666 = vmatpush.msrb.mxu3 %v6520_v57  ;;  %6706 = vmatpush.msrb.mxu1 %v6522_v62 }
0x1d7c   :  { %v6475_v7 = vsel %vm1098_vm0, %v8398_v21, %v8399_v1 }
0x1d7d   :  { %v6497_v0 = vsel %vm1122_vm1, %v8418_v6, %v8378_v32  ;;  %6688 = vmatpush.msrb.mxu2 %v6475_v7  ;;  %v6499_v52 = vsel %vm1122_vm1, %v8379_v55, %v8419_v27 }
0x1d7e   :  { %6667 = vmatpush.msrb.mxu3 %v6497_v0  ;;  %6707 = vmatpush.msrb.mxu1 %v6499_v52 }
0x1d7f   :  { %6689 = vmatpush.msrb.mxu2 %v11890_v16 }
0x1d80   :  { %7081 = vmatmul.msk.f32.vlgmr.msrb.gmra.mxu2 %vm12385_vm8, %v12052_v34  ;;  %vm6830_vm8 = vcmask 1047704  }
0x1d81   :  { %6761 = vmatpush.msra.mxu2 %v8429_v53  ;;  %v8447_v43 = vpop.permute.xlu0 %8446  ;;  %v8457_v53 = vpop.permute.xlu2 %8456 }
0x1d82   :  { %v8422_v41 = vpop.permute.xlu1 %8421  ;;  %v8449_v32 = vunpack.i.h.bf16 %v8447_v43  ;;  %v8448_v36 = vunpack.i.l.bf16 %v8447_v43 }
0x1d83   :  { %v8424_v50 = vunpack.i.h.bf16 %v8422_v41  ;;  %v8423_v31 = vunpack.i.l.bf16 %v8422_v41  ;;  %6762 = vmatpush.msra.mxu2 %v8434_v3  ;;  %v6638_v3 = vsel %vm12389_vm14, %v8384_v30, %v8428_v54  ;;  %v6569_v54 = vsel %vm1194_vm7, %v8404_v23, %v8443_v18 }
0x1d84   :  { %v6547_v55 = vsel %vm12386_vm3, %v8448_v36, %v8449_v32  ;;  %vm12394_vm7 = vcmask 220160  }
0x1d85   :  { %6763 = vmatpush.msra.mxu2 %v8439_v46  ;;  %v6474_v16 = vsel %vm1098_vm0, %v8423_v31, %v8398_v21  ;;  %v6476_v35 = vsel %vm1098_vm0, %v8399_v1, %v8424_v50  ;;  %6745 = vmatpush.msra.mxu0 %v6547_v55  ;;  %v6817_v21 = vld [vmem:[%s8796_s25] sm:$0xff] }
0x1d86   :  { %6668 = vmatpush.msrb.mxu3 %v6474_v16  ;;  %6708 = vmatpush.msrb.mxu1 %v6476_v35 }
0x1d87   :  { %6764 = vmatpush.msra.mxu2 %v8444_v28 }
0x1d88   :  { %7079 = vmatpush.msk.msrb.mxu3 %vm9252_vm13, %v11886_v22  ;;  %6709 = vmatpush.msrb.mxu1 %v11893_v47  ;;  %vm12390_vm13 = vcmask 744448   ;;  %v8459_v22 = vunpack.i.h.bf16 %v8457_v53  ;;  %v8458_v47 = vunpack.i.l.bf16 %v8457_v53 }
0x1d89   :  { %7080 = vmatmul.msk.f32.vlgmr.msrb.gmra.mxu3 %vm12387_vm9, %v12052_v34  ;;  %7082 = vmatmul.msk.f32.vlgmr.msrb.gmra.mxu1 %vm12388_vm2, %v12052_v34  ;;  %v8462_v28 = vpop.permute.xlu0 %8461  ;;  %v6615_v24 = vsel %vm12390_vm13, %v8389_v42, %v8433_v20  ;;  %v6546_v20 = vsel %vm12392_vm10, %v8409_v56, %v8448_v36  ;;  %vm12401_vm9 = vmmov %vm12394_vm7  ;;  %vm6896_vm10 = vcmask 1044483  }
0x1d8a   :  { %6721 = vmatpush.msra.mxu3 %v6638_v3  ;;  %6765 = vmatpush.msra.mxu2 %v8449_v32  ;;  %v8452_v46 = vpop.permute.xlu1 %8451  ;;  %v8464_v33 = vunpack.i.h.bf16 %v8462_v28  ;;  %v8463_v39 = vunpack.i.l.bf16 %v8462_v28  ;;  %v6501_v44 = vsel %vm1122_vm1, %v8458_v47, %v8459_v22  ;;  %v6500_v42 = vsel %vm1122_vm1, %v8419_v27, %v8458_v47  ;;  %v6818_v27 = vld [vmem:[#allocation2] sm:$0x1]  ;;  %vm12402_vm2 = vmmov %vm12394_vm7 }
0x1d8b   :  { %v8454_v12 = vunpack.i.h.bf16 %v8452_v46  ;;  %v8453_v4 = vunpack.i.l.bf16 %v8452_v46 }
0x1d8c   :  { %6722 = vmatpush.msra.mxu3 %v6615_v24  ;;  %v6478_v58 = vsel %vm1098_vm0, %v8463_v39, %v8464_v33  ;;  %v6477_v60 = vsel %vm1098_vm0, %v8424_v50, %v8463_v39  ;;  %vm12398_vm0 = vcmask 154624  }
0x1d8d   :  { %6766 = vmatpush.msra.mxu2 %v8454_v12  ;;  %v6524_v30 = vsel %vm12391_vm6, %v8453_v4, %v8454_v12  ;;  %v6523_v19 = vsel %vm12393_vm11, %v8414_v51, %v8453_v4  ;;  %vm12399_vm1 = vmmov %vm12398_vm0  ;;  %vm6894_vm6 = vcmask 1043459   ;;  %vm12406_vm11 = vcmask 1040384  }
0x1d8e   :  { %6723 = vmatpush.msra.mxu3 %v6592_v40  ;;  %6746 = vmatpush.msra.mxu0 %v6524_v30  ;;  %vm12400_vm3 = vmmov %vm12398_vm0 }
0x1d8f   :  { %6767 = vmatpush.msra.mxu2 %v8459_v22  ;;  %vm12403_vm14 = vmmov %vm12398_vm0 }
0x1d90   :  { %6724 = vmatpush.msra.mxu3 %v6569_v54  ;;  %6747 = vmatpush.msra.mxu0 %v6501_v44  ;;  %vm12404_vm13 = vmmov %vm12398_vm0 }
0x1d91   :  { %6768 = vmatpush.msra.mxu2 %v8464_v33  ;;  %vm12405_vm4 = vmmov %vm12398_vm0 }
0x1d92   :  { %6725 = vmatpush.msra.mxu3 %v6546_v20  ;;  %6748 = vmatpush.msra.mxu0 %v6478_v58 }
0x1d93   :  { %7085 = vmatpush.msk.msra.mxu2 %vm12394_vm7, %v11917_v48  ;;  %vm12407_vm7 = vcmask 1041408  }
0x1d94   :  { %6726 = vmatpush.msra.mxu3 %v6523_v19  ;;  %6749 = vmatpush.msra.mxu0 %v11914_v14  ;;  %v6649_v14 = vpop.permute.xlu1 %6648 }
0x1d95   :  { %7086 = vmatmul.msk.f32.vlgmr.msra.gmra.mxu2 %vm12395_vm12, %v12052_v34  ;;  %7084 = vmatmul.msk.f32.vlgmr.msra.gmra.mxu0 %vm12396_vm15, %v12052_v34  ;;  %vm12408_vm12 = vcmask 1042432  }
0x1d96   :  { %6727 = vmatpush.msra.mxu3 %v6500_v42 }
0x1d98   :  { %6728 = vmatpush.msra.mxu3 %v6477_v60 }
0x1d9a   :  { %6729 = vmatpush.msra.mxu3 %v11901_v11 }
0x1d9b   :  { %7083 = vmatmul.msk.f32.vlgmr.msra.gmra.mxu3 %vm12397_vm5, %v12052_v34  ;;  %vm12409_vm5 = vcmask 891904  }
0x1e03   :  { %v6691_v48 = vpop.f32.mrf.mxu2 }
0x1e04   :  { %v6692_v13 = vadd.f32 %v6691_v48, %v6649_v14 }
0x1e06   :  { %v6775_v10 = vmax.f32 %v6692_v13, 0.0 }
0x1e08   :  { %v6781_v61 = vmul.f32 %v6775_v10, %v12354_v26  ;;  %v6711_v26 = vpop.f32.mrf.mxu1 }
0x1e09   :  { %v6712_v2 = vadd.f32 %v6711_v26, %v6649_v14 }
0x1e0a   :  { %6794 = vrot.lane.b32.xlu2 %v6781_v61, %s8573_s8 }
0x1e0c   :  { %v6671_v18 = vpop.f32.mrf.mxu3 }
0x1e0d   :  { %v6672_v29 = vadd.f32 %v6671_v18, %v6649_v14 }
0x1e0f   :  { %v6774_v59 = vmax.f32 %v6672_v29, 0.0 }
0x1e11   :  { %v6780_v8 = vmul.f32 %v6774_v59, %v12353_v9  ;;  %v6776_v9 = vmax.f32 %v6712_v2, 0.0 }
0x1e12   :  { %v6751_v23 = vpop.f32.mrf.mxu0 }
0x1e13   :  { %v6752_v56 = vadd.f32 %v6751_v23, %v6649_v14  ;;  %6792 = vrot.lane.b32.xlu1 %v6780_v8, %s8573_s8 }
0x1e15   :  { %v6778_v11 = vmax.f32 %v6752_v56, 0.0 }
0x1e17   :  { %v6784_v51 = vmul.f32 %v6778_v11, %v12357_v38  ;;  %v6782_v38 = vmul.f32 %v6776_v9, %v12355_v63 }
0x1e18   :  { %v6771_v49 = vpop.f32.mrf.mxu2 }
0x1e19   :  { %v6772_v37 = vadd.f32 %v6771_v49, %v6649_v14  ;;  %6800 = vrot.lane.b32.xlu2 %v6784_v51, %s8573_s8 }
0x1e1b   :  { %v6779_v25 = vmax.f32 %v6772_v37, 0.0 }
0x1e1d   :  { %v6785_v15 = vmul.f32 %v6779_v25, %v12358_v17 }
0x1e1e   :  { %v6731_v1 = vpop.f32.mrf.mxu3 }
0x1e1f   :  { %v6732_v5 = vadd.f32 %v6731_v1, %v6649_v14  ;;  %6802 = vrot.lane.b32.xlu0 %v6785_v15, %s8573_s8 }
0x1e21   :  { %v6777_v57 = vmax.f32 %v6732_v5, 0.0  ;;  %6821 = vperm.xlu2 %7363, %v6817_v21  }
0x1e23   :  { %v6783_v62 = vmul.f32 %v6777_v57, %v12356_v45 }
0x1e25   :  { %6798 = vrot.lane.b32.xlu1 %v6783_v62, %s8573_s8 }
0x1e27   :  { %6796 = vrot.lane.b32.xlu0 %v6782_v38, %s8573_s8 }
0x1e2f   :  { %6871 = vperm.xlu0 %7469, %v6818_v27  }
0x1e64   :  { %v6795_v6 = vpop.permute.xlu2 %6794 }
0x1e73   :  { %v6801_v17 = vpop.permute.xlu2 %6800 }
0x1e7b   :  { %v6822_v52 = vpop.permute.xlu2 %6821 }
0x1e85   :  { %v6793_v7 = vpop.permute.xlu1 %6792 }
0x1e86   :  { %v6804_v0 = vsel %vm12398_vm0, %v6793_v7, %v6795_v6  ;;  %v6815_v34 = vsel %vm12399_vm1, 0.0, %v6793_v7 }
0x1e87   :  { %v6825_v43 = vmul.f32 %v6822_v52, %v6804_v0  ;;  %v6824_v41 = vmul.f32 %v6822_v52, %v6815_v34 }
0x1e89   :  { %v6838_v45 = vrot.slane %v6825_v43, 4  ;;  %v6831_v32 = vsel %vm6830_vm8, %v6824_v41, 0.0 }
0x1e8a   :  { %v6832_v55 = vrot.slane %v6831_v32, 4 }
0x1e8b   :  { %v6839_v36 = vadd.f32 %v6838_v45, %v6825_v43 }
0x1e8c   :  { %v6833_v28 = vadd.f32 %v6832_v55, %v6831_v32 }
0x1e8d   :  { %v6840_v35 = vrot.slane %v6839_v36, 2 }
0x1e8e   :  { %v6834_v20 = vrot.slane %v6833_v28, 2 }
0x1e8f   :  { %v6841_v4 = vadd.f32 %v6840_v35, %v6839_v36 }
0x1e90   :  { %v6835_v61 = vadd.f32 %v6834_v20, %v6833_v28 }
0x1e91   :  { %v6803_v63 = vpop.permute.xlu0 %6802  ;;  %v6842_v14 = vrot.slane %v6841_v4, 1 }
0x1e92   :  { %v6808_v50 = vsel %vm12400_vm3, %v6801_v17, %v6803_v63  ;;  %v6836_v26 = vrot.slane %v6835_v61, 1 }
0x1e93   :  { %v6816_v31 = vsel %vm12401_vm9, %v6808_v50, 0.0  ;;  %v6843_v56 = vadd.f32 %v6842_v14, %v6841_v4  ;;  %v6904_v50 = vlaneseq }
0x1e94   :  { %v6829_v16 = vmul.f32 %v6822_v52, %v6816_v31  ;;  %v6837_v62 = vadd.f32 %v6836_v26, %v6835_v61 }
0x1e95   :  { %vm6906_vm15 = vcmp.lt.s32.totalorder %v6904_v50, 648 }
0x1e96   :  { %v6862_v53 = vsel %vm12402_vm2, %v6829_v16, 0.0 }
0x1e97   :  { %v6863_v3 = vrot.slane %v6862_v53, 4  ;;  %v6799_v46 = vpop.permute.xlu1 %6798 }
0x1e98   :  { %v6807_v24 = vsel %vm12403_vm14, %v6799_v46, %v6801_v17 }
0x1e99   :  { %v6864_v22 = vadd.f32 %v6863_v3, %v6862_v53  ;;  %v6828_v47 = vmul.f32 %v6822_v52, %v6807_v24  ;;  %v6797_v12 = vpop.permute.xlu0 %6796 }
0x1e9a   :  { %v6805_v33 = vsel %vm12404_vm13, %v6795_v6, %v6797_v12  ;;  %v6806_v39 = vsel %vm12405_vm4, %v6797_v12, %v6799_v46 }
0x1e9b   :  { %v6865_v40 = vrot.slane %v6864_v22, 2  ;;  %v6856_v30 = vrot.slane %v6828_v47, 4  ;;  %v6826_v54 = vmul.f32 %v6822_v52, %v6805_v33  ;;  %v6827_v44 = vmul.f32 %v6822_v52, %v6806_v39 }
0x1e9d   :  { %v6866_v58 = vadd.f32 %v6865_v40, %v6864_v22  ;;  %v6857_v19 = vadd.f32 %v6856_v30, %v6828_v47  ;;  %v6844_v42 = vrot.slane %v6826_v54, 4  ;;  %v6850_v60 = vrot.slane %v6827_v44, 4 }
0x1e9f   :  { %v6858_v48 = vrot.slane %v6857_v19, 2  ;;  %v6845_v13 = vadd.f32 %v6844_v42, %v6826_v54  ;;  %v6851_v10 = vadd.f32 %v6850_v60, %v6827_v44  ;;  %v6867_v18 = vrot.slane %v6866_v58, 1 }
0x1ea1   :  { %v6859_v29 = vadd.f32 %v6858_v48, %v6857_v19  ;;  %v6846_v59 = vrot.slane %v6845_v13, 2  ;;  %v6852_v8 = vrot.slane %v6851_v10, 2  ;;  %v6872_v23 = vpop.permute.xlu0 %6871  ;;  %v6868_v25 = vadd.f32 %v6867_v18, %v6866_v58 }
0x1ea2   :  { %v6874_v11 = vperm.slane %v6872_v23, 0 }
0x1ea3   :  { %v6860_v51 = vrot.slane %v6859_v29, 1  ;;  %v6847_v49 = vadd.f32 %v6846_v59, %v6845_v13  ;;  %v6853_v37 = vadd.f32 %v6852_v8, %v6851_v10 }
0x1ea4   :  { %v6876_v2 = vadd.f32 %v6874_v11, %v6843_v56  ;;  %v6880_v38 = vadd.f32 %v6874_v11, %v6868_v25  ;;  %v6875_v7 = vadd.f32 %v6874_v11, %v6837_v62 }
0x1ea5   :  { %v6861_v15 = vadd.f32 %v6860_v51, %v6859_v29  ;;  %v6848_v1 = vrot.slane %v6847_v49, 1  ;;  %v6854_v21 = vrot.slane %v6853_v37, 1 }
0x1ea6   :  { %v6887_v27 = vrot.slane %v6876_v2, 7  ;;  %v6891_v43 = vrot.slane %v6880_v38, 3 }
0x1ea7   :  { %v6849_v5 = vadd.f32 %v6848_v1, %v6847_v49  ;;  %v6855_v9 = vadd.f32 %v6854_v21, %v6853_v37  ;;  %v6879_v57 = vadd.f32 %v6874_v11, %v6861_v15 }
0x1ea8   :  { %v6892_v41 = vsel %vm12406_vm11, %v6875_v7, %v6887_v27 }
0x1ea9   :  { %v6877_v6 = vadd.f32 %v6874_v11, %v6849_v5  ;;  %v6878_v17 = vadd.f32 %v6874_v11, %v6855_v9  ;;  %v6890_v34 = vrot.slane %v6879_v57, 4 }
0x1eab   :  { %v6888_v0 = vrot.slane %v6877_v6, 6  ;;  %v6889_v52 = vrot.slane %v6878_v17, 5 }
0x1ead   :  { %v6893_v45 = vsel %vm12407_vm7, %v6892_v41, %v6888_v0  ;;  %v6895_v32 = vsel %vm6894_vm6, %v6889_v52, %v6890_v34 }
0x1eae   :  { %v6897_v63 = vsel %vm6896_vm10, %v6895_v32, %v6891_v43 }
0x1eaf   :  { %v6898_v36 = vsel %vm12408_vm12, %v6893_v45, %v6897_v63 }
0x1eb0   :  { %6899 = vrot.lane.b32.xlu1 %v6898_v36, %s8567_s5 }
0x1f22   :  { %v6900_v31 = vpop.permute.xlu1 %6899 }
0x1f23   :  { %v6901_v55 = vrot.slane %v6900_v31, 1 }
0x1f25   :  { %v6902_v16 = vsel %vm12409_vm5, %v6900_v31, %v6901_v55 }
0x1f26   :  { %6908 = vst.msk [vmem:[%s8804_s3] sm:$0x3f] %vm6906_vm15, %v6902_v16 }
0x1f27   :  { %6913 = vsyncpa [#allocation4], 1 }
0x1f28   :  { %6914 = vsyncpa [#allocation6], 1 }

</bundles_post_ra>
